<compile_context>
chip_gen: v5e
topology: v5e:2x2
jax: 0.10.0
libtpu: 0.0.40
codegen_flags: <defaults>
</compile_context>

<pallas_src>
import numpy as np

import jax
import jax.numpy as jnp
from jax import lax
from jax.experimental import pallas as pl
from jax.experimental.pallas import tpu as pltpu


# ---------------------------------------------------------------------------
# Architecture: (cout, cin, kh, kw, stride, pad) per conv, as in the PyTorch
# module.  ReLU follows every conv; MaxPool2d(2) follows cnn2, cnn4, cnn5.
# ---------------------------------------------------------------------------
_CONV_DEFS = [
    (16,   1, 4, 4, 2, 2),   # cnn1
    (32,  16, 4, 4, 1, 2),   # cnn2   (+ maxpool1)
    (64,  32, 3, 3, 2, 2),   # cnn3
    (128, 64, 3, 3, 1, 1),   # cnn4   (+ maxpool2)
    (256, 128, 2, 2, 1, 1),  # cnn5   (+ maxpool3)
    (64, 256, 1, 1, 1, 0),   # cnn6
]

_POOL_LEGS = ((0, 0), (0, 1), (1, 0), (1, 1))


# ---------------------------------------------------------------------------
# Per-image static 0/1 selector construction (numpy, at setup time).
# Activation layout inside the kernel: (rows, C) with channels on lanes.
# ---------------------------------------------------------------------------
def _grid_rowmajor(H, W):
    """Row index for each valid spatial position, standard row-major order."""
    return {(h, w): h * W + w for h in range(H) for w in range(W)}


def _pool_feed_rows(Hp, Wp, mq_pad):
    """Output-row list for a conv whose output feeds MaxPool2d(2).

    Rows are ordered leg-major: 4 blocks (one per 2x2 pool leg), each block
    holds the pooled positions (hp, wp) row-major and is padded to mq_pad rows
    (pad rows get an all-zero selector row).  Pooling then = max of 4 aligned
    row blocks."""
    rows = []
    for leg, (di, dj) in enumerate(_POOL_LEGS):
        for hp in range(Hp):
            for wp in range(Wp):
                rows.append((leg * mq_pad + hp * Wp + wp, 2 * hp + di, 2 * wp + dj))
    return rows, 4 * mq_pad


def _stacked_selector(in_index, Mi, out_rows, Mo, kh, kw, stride, pad):
    """(kh*kw*Mo, Mi) 0/1 matrix: row kk*Mo+m selects the input row feeding
    output row m at kernel tap kk (zero row for padding / out-of-bounds)."""
    S = np.zeros((kh * kw * Mo, Mi), np.float32)
    for ki in range(kh):
        for kj in range(kw):
            kk = ki * kw + kj
            for m, ho, wo in out_rows:
                hi, wi = ho * stride + ki - pad, wo * stride + kj - pad
                if (hi, wi) in in_index:
                    S[kk * Mo + m, in_index[(hi, wi)]] = 1.0
    return S


# ---------------------------------------------------------------------------
# Parameters (PyTorch layouts / default-style init) and one-time packing.
# ---------------------------------------------------------------------------
def _uniform_init(key, shape, fan_in):
    bound = 1.0 / float(fan_in) ** 0.5
    return jax.random.uniform(key, shape, jnp.float32, -bound, bound)


def init_params(seed=0):
    key = jax.random.PRNGKey(seed)
    keys = jax.random.split(key, 14)
    params = {}
    for i, (cout, cin, kh, kw, _, _) in enumerate(_CONV_DEFS):
        fan_in = cin * kh * kw
        params[f"w{i+1}"] = _uniform_init(keys[2 * i], (cout, cin, kh, kw), fan_in)
        params[f"b{i+1}"] = _uniform_init(keys[2 * i + 1], (cout,), fan_in)
    params["fc_w"] = _uniform_init(keys[12], (10, 64), 64)   # PyTorch Linear: (out, in)
    params["fc_b"] = _uniform_init(keys[13], (10,), 64)
    return params


def prepare_constants(params):
    """Precompute per-image bf16 selectors / weights and f32 biases (O(1) in B)."""
    bf16, f32 = jnp.bfloat16, jnp.float32
    c = {}

    # cnn1: host-side per-image im2col -> weight packed (Cin*kh*kw, Cout),
    # rows ordered (ci, ki, kj) to match the patch-matrix columns.
    cout1, cin1, kh1, kw1, _, _ = _CONV_DEFS[0]
    c["w1"] = params["w1"].transpose(1, 2, 3, 0).reshape(cin1 * kh1 * kw1, cout1).astype(bf16)
    c["b1"] = params["b1"].reshape(1, cout1).astype(f32)

    def pack_conv(idx):
        cout, cin, kh, kw, _, _ = _CONV_DEFS[idx - 1]
        c[f"w{idx}"] = (params[f"w{idx}"].transpose(2, 3, 1, 0)
                        .reshape(kh * kw, cin, cout).astype(bf16))
        c[f"b{idx}"] = params[f"b{idx}"].reshape(1, cout).astype(f32)

    # cnn2: 9x9 -> 10x10, pooled to 5x5 (leg blocks padded 25 -> 32 rows).
    out_rows, mo = _pool_feed_rows(5, 5, 32)
    c["s2"] = jnp.asarray(_stacked_selector(_grid_rowmajor(9, 9), 81, out_rows, mo, 4, 4, 1, 2), bf16)
    pack_conv(2)

    # cnn3: pooled 5x5 (32 rows, 25 real) -> 4x4 standard row-major (16 rows).
    out_rows = [(h * 4 + w, h, w) for h in range(4) for w in range(4)]
    c["s3"] = jnp.asarray(_stacked_selector(_grid_rowmajor(5, 5), 32, out_rows, 16, 3, 3, 2, 2), bf16)
    pack_conv(3)

    # cnn4: 4x4 -> 4x4, pooled to 2x2 (leg blocks padded 4 -> 8 rows).
    out_rows, mo = _pool_feed_rows(2, 2, 8)
    c["s4"] = jnp.asarray(_stacked_selector(_grid_rowmajor(4, 4), 16, out_rows, mo, 3, 3, 1, 1), bf16)
    pack_conv(4)

    # cnn5: pooled 2x2 (8 rows, 4 real) -> 3x3, pooled to 1x1 (leg blocks padded to 8).
    out_rows, mo = _pool_feed_rows(1, 1, 8)
    c["s5"] = jnp.asarray(_stacked_selector(_grid_rowmajor(2, 2), 8, out_rows, mo, 2, 2, 1, 1), bf16)
    pack_conv(5)

    # cnn6 is a 1x1 conv on 1x1 spatial -> plain (256, 64) matmul.
    c["w6"] = params["w6"].reshape(64, 256).T.astype(bf16)
    c["b6"] = params["b6"].reshape(1, 64).astype(f32)

    # fc: lane-pad the output to 128 so the kernel's store is lane-dense.
    fcw = jnp.zeros((64, 128), f32).at[:, :10].set(params["fc_w"].T)
    fcb = jnp.zeros((1, 128), f32).at[:, :10].set(params["fc_b"])
    c["fc_w"] = fcw.astype(bf16)
    c["fc_b"] = fcb
    return c


# ---------------------------------------------------------------------------
# The fused per-image Pallas kernel (grid = batch).
# ---------------------------------------------------------------------------
def _tree_sum(xs):
    while len(xs) > 1:
        nxt = [xs[i] + xs[i + 1] for i in range(0, len(xs) - 1, 2)]
        if len(xs) % 2:
            nxt.append(xs[-1])
        xs = nxt
    return xs[0]


def _conv_block(act, s_ref, w_ref, b_ref):
    """act: (Mi, Cin) bf16.  One stacked gather matmul builds all kh*kw shifted
    copies; per-tap (Cin, Cout) weights hit aligned row-blocks of the result and
    are tree-summed in f32.  Returns relu(conv + bias) in f32, (Mo, Cout)."""
    f32, bf16 = jnp.float32, jnp.bfloat16
    kk_total = w_ref.shape[0]
    mo = s_ref.shape[0] // kk_total
    gv = jnp.dot(s_ref[...], act, preferred_element_type=f32).astype(bf16)  # exact
    parts = [jnp.dot(gv[kk * mo:(kk + 1) * mo, :], w_ref[kk], preferred_element_type=f32)
             for kk in range(kk_total)]
    acc = _tree_sum(parts)
    return jnp.maximum(acc + b_ref[...], 0.0)


def _pool_block(a):
    """MaxPool2d(2) on leg-major conv output: max of 4 aligned row blocks (VPU)."""
    mq = a.shape[0] // 4
    return jnp.maximum(jnp.maximum(a[0:mq], a[mq:2 * mq]),
                       jnp.maximum(a[2 * mq:3 * mq], a[3 * mq:4 * mq]))


def _cnn_fused_kernel(p1, w1, b1,
                      s2, w2, b2,
                      s3, w3, b3,
                      s4, w4, b4,
                      s5, w5, b5,
                      w6, b6, fcw, fcb,
                      out_ref):
    f32, bf16 = jnp.float32, jnp.bfloat16

    # cnn1 (+ drop1 identity) + relu1: patches pre-gathered host-side.
    a = jnp.dot(p1[0], w1[...], preferred_element_type=f32)
    a = jnp.maximum(a + b1[...], 0.0).astype(bf16)                 # (81, 16)
    # cnn2 + relu2 + maxpool1
    a = _pool_block(_conv_block(a, s2, w2, b2)).astype(bf16)       # (32, 32)  (25 real)
    # cnn3 (+ drop2 identity) + relu3
    a = _conv_block(a, s3, w3, b3).astype(bf16)                    # (16, 64)
    # cnn4 + relu4 + maxpool2
    a = _pool_block(_conv_block(a, s4, w4, b4)).astype(bf16)       # (8, 128)  (4 real)
    # (drop3 identity) + cnn5 + relu5 + maxpool3
    a = _pool_block(_conv_block(a, s5, w5, b5)).astype(bf16)       # (8, 256)  (1 real)
    # cnn6 (1x1 conv) + relu6  (row-wise matmul: only row 0 is meaningful)
    a = jnp.dot(a, w6[...], preferred_element_type=f32)
    a = jnp.maximum(a + b6[...], 0.0).astype(bf16)                 # (8, 64)
    # flatten (1x1 spatial) + fc1 (lane-padded to 128 columns)
    logits = jnp.dot(a, fcw[...], preferred_element_type=f32) + fcb[...]   # (8, 128)
    out_ref[0] = logits[0:1, :]


# ---------------------------------------------------------------------------
# Host wrapper.
# ---------------------------------------------------------------------------
def _im2col_first(x, kh, kw, stride, pad):
    """Per-image im2col of the raw network input for cnn1 only -> (B, Ho*Wo, Cin*kh*kw)."""
    B, Cin, H, W = x.shape
    xp = jnp.pad(x, ((0, 0), (0, 0), (pad, pad), (pad, pad)))
    Ho = (H + 2 * pad - kh) // stride + 1
    Wo = (W + 2 * pad - kw) // stride + 1
    cols = []
    for ki in range(kh):
        for kj in range(kw):
            cols.append(xp[:, :, ki:ki + stride * Ho:stride, kj:kj + stride * Wo:stride])
    p = jnp.stack(cols, axis=-1)                       # (B, Cin, Ho, Wo, kh*kw)
    return p.transpose(0, 2, 3, 1, 4).reshape(B, Ho * Wo, Cin * kh * kw)


def _cost_estimate(consts, batch):
    macs = 81 * consts["w1"].shape[0] * consts["w1"].shape[1]          # cnn1
    for i in (2, 3, 4, 5):
        s, w = consts[f"s{i}"], consts[f"w{i}"]
        _, cin, cout = w.shape
        rows, mi = s.shape                                             # rows = kh*kw*Mo
        macs += rows * mi * cin                                        # stacked gather matmul
        macs += rows * cin * cout                                      # per-tap weight matmuls
    macs += 8 * 256 * 64                                               # cnn6
    macs += 8 * 64 * 128                                               # fc (lane padded)
    const_bytes = sum(int(np.prod(v.shape)) * v.dtype.itemsize for v in consts.values())
    io_bytes = batch * (81 * 16 * 2 + 128 * 4)
    return pl.CostEstimate(flops=2 * macs * batch, transcendentals=0,
                           bytes_accessed=const_bytes + io_bytes)


_CONST_NAMES = ["w1", "b1", "s2", "w2", "b2", "s3", "w3", "b3",
                "s4", "w4", "b4", "s5", "w5", "b5", "w6", "b6", "fc_w", "fc_b"]


def cnn_model_forward(consts, x):
    B = x.shape[0]
    _, _, kh, kw, s, p = _CONV_DEFS[0]
    patches = _im2col_first(x, kh, kw, s, p).astype(jnp.bfloat16)      # (B, 81, 16)
    const_args = [consts[n] for n in _CONST_NAMES]

    def const_spec(arr):
        zeros = (0,) * arr.ndim
        return pl.BlockSpec(arr.shape, lambda b, _z=zeros: _z)         # VMEM-resident across steps

    in_specs = ([pl.BlockSpec((1, 81, 16), lambda b: (b, 0, 0))] +
                [const_spec(a) for a in const_args])
    out_spec = pl.BlockSpec((1, 1, 128), lambda b: (b, 0, 0))

    out = pl.pallas_call(
        _cnn_fused_kernel,
        out_shape=jax.ShapeDtypeStruct((B, 1, 128), jnp.float32),
        grid=(B,),
        in_specs=in_specs,
        out_specs=out_spec,
        compiler_params=pltpu.CompilerParams(
            dimension_semantics=("parallel",),          # megacore batch split on v7x
            vmem_limit_bytes=32 * 1024 * 1024),
        cost_estimate=_cost_estimate(consts, B),
    )(patches, *const_args)
    return out.reshape(B, 128)[:, :10]


# ---------------------------------------------------------------------------
# Pure-JAX reference (f32) for a loose-tolerance correctness check.
# ---------------------------------------------------------------------------
def _reference_forward(params, x):
    def conv(h, w, b, stride, pad):
        out = lax.conv_general_dilated(
            h, w, window_strides=(stride, stride),
            padding=((pad, pad), (pad, pad)),
            dimension_numbers=("NCHW", "OIHW", "NCHW"))
        return out + b.reshape(1, -1, 1, 1)

    def maxpool(h):
        return lax.reduce_window(h, -jnp.inf, lax.max, (1, 1, 2, 2), (1, 1, 2, 2), "VALID")

    a = jax.nn.relu(conv(x, params["w1"], params["b1"], 2, 2))
    a = maxpool(jax.nn.relu(conv(a, params["w2"], params["b2"], 1, 2)))
    a = jax.nn.relu(conv(a, params["w3"], params["b3"], 2, 2))
    a = maxpool(jax.nn.relu(conv(a, params["w4"], params["b4"], 1, 1)))
    a = maxpool(jax.nn.relu(conv(a, params["w5"], params["b5"], 1, 1)))
    a = jax.nn.relu(conv(a, params["w6"], params["b6"], 1, 0))
    a = a.reshape(a.shape[0], -1)
    return a @ params["fc_w"].T + params["fc_b"]


# TODO(synk): Dropout layers are treated as inference-mode identity (no RNG mask).

if __name__ == "__main__":
    B, H, W = 2, 16, 16   # 16x16x1 input reduces to 1x1x64 before Linear(64, 10)
    params = init_params(seed=0)
    consts = prepare_constants(params)
    x = jax.random.normal(jax.random.PRNGKey(0), (B, 1, H, W), dtype=jnp.float32)

    fwd = jax.jit(cnn_model_forward)
    out = jax.block_until_ready(fwd(consts, x))
    assert out.shape == (B, 10), out.shape

    ref = jax.block_until_ready(jax.jit(_reference_forward)(params, x))
    err = float(jnp.max(jnp.abs(out - ref)))
    assert err < 5e-2, f"max|out-ref| = {err}"   # bf16 activations/weights vs f32 reference
    print("KERNEL_OK")
</pallas_src>

<mosaic_0001>
module attributes {stable_mosaic.version = 11 : i64} {
  func.func @_cnn_fused_kernel(%arg0: i32, %arg1: memref<1x81x16xbf16, #tpu.memory_space<vmem>>, %arg2: memref<16x16xbf16, #tpu.memory_space<vmem>>, %arg3: memref<1x16xf32, #tpu.memory_space<vmem>>, %arg4: memref<2048x81xbf16, #tpu.memory_space<vmem>>, %arg5: memref<16x16x32xbf16, #tpu.memory_space<vmem>>, %arg6: memref<1x32xf32, #tpu.memory_space<vmem>>, %arg7: memref<144x32xbf16, #tpu.memory_space<vmem>>, %arg8: memref<9x32x64xbf16, #tpu.memory_space<vmem>>, %arg9: memref<1x64xf32, #tpu.memory_space<vmem>>, %arg10: memref<288x16xbf16, #tpu.memory_space<vmem>>, %arg11: memref<9x64x128xbf16, #tpu.memory_space<vmem>>, %arg12: memref<1x128xf32, #tpu.memory_space<vmem>>, %arg13: memref<128x8xbf16, #tpu.memory_space<vmem>>, %arg14: memref<4x128x256xbf16, #tpu.memory_space<vmem>>, %arg15: memref<1x256xf32, #tpu.memory_space<vmem>>, %arg16: memref<256x64xbf16, #tpu.memory_space<vmem>>, %arg17: memref<1x64xf32, #tpu.memory_space<vmem>>, %arg18: memref<64x128xbf16, #tpu.memory_space<vmem>>, %arg19: memref<1x128xf32, #tpu.memory_space<vmem>>, %arg20: memref<1x1x128xf32, #tpu.memory_space<vmem>>) attributes {dimension_semantics = [#tpu.dimension_semantics<parallel>], iteration_bounds = array<i64: 2>, scalar_prefetch = 0 : i64, scratch_operands = 0 : i64, tpu.core_type = #tpu.core_type<tc>, window_params = [{transform_indices = @transform_0, window_bounds = array<i64: 1, 81, 16>}, {pipeline_mode = #tpu.pipeline_mode<synchronous>, transform_indices = @transform_1, window_bounds = array<i64: 16, 16>}, {pipeline_mode = #tpu.pipeline_mode<synchronous>, transform_indices = @transform_2, window_bounds = array<i64: 1, 16>}, {pipeline_mode = #tpu.pipeline_mode<synchronous>, transform_indices = @transform_3, window_bounds = array<i64: 2048, 81>}, {pipeline_mode = #tpu.pipeline_mode<synchronous>, transform_indices = @transform_4, window_bounds = array<i64: 16, 16, 32>}, {pipeline_mode = #tpu.pipeline_mode<synchronous>, transform_indices = @transform_5, window_bounds = array<i64: 1, 32>}, {pipeline_mode = #tpu.pipeline_mode<synchronous>, transform_indices = @transform_6, window_bounds = array<i64: 144, 32>}, {pipeline_mode = #tpu.pipeline_mode<synchronous>, transform_indices = @transform_7, window_bounds = array<i64: 9, 32, 64>}, {pipeline_mode = #tpu.pipeline_mode<synchronous>, transform_indices = @transform_8, window_bounds = array<i64: 1, 64>}, {pipeline_mode = #tpu.pipeline_mode<synchronous>, transform_indices = @transform_9, window_bounds = array<i64: 288, 16>}, {pipeline_mode = #tpu.pipeline_mode<synchronous>, transform_indices = @transform_10, window_bounds = array<i64: 9, 64, 128>}, {pipeline_mode = #tpu.pipeline_mode<synchronous>, transform_indices = @transform_11, window_bounds = array<i64: 1, 128>}, {pipeline_mode = #tpu.pipeline_mode<synchronous>, transform_indices = @transform_12, window_bounds = array<i64: 128, 8>}, {pipeline_mode = #tpu.pipeline_mode<synchronous>, transform_indices = @transform_13, window_bounds = array<i64: 4, 128, 256>}, {pipeline_mode = #tpu.pipeline_mode<synchronous>, transform_indices = @transform_14, window_bounds = array<i64: 1, 256>}, {pipeline_mode = #tpu.pipeline_mode<synchronous>, transform_indices = @transform_15, window_bounds = array<i64: 256, 64>}, {pipeline_mode = #tpu.pipeline_mode<synchronous>, transform_indices = @transform_16, window_bounds = array<i64: 1, 64>}, {pipeline_mode = #tpu.pipeline_mode<synchronous>, transform_indices = @transform_17, window_bounds = array<i64: 64, 128>}, {pipeline_mode = #tpu.pipeline_mode<synchronous>, transform_indices = @transform_18, window_bounds = array<i64: 1, 128>}, {transform_indices = @transform_19, window_bounds = array<i64: 1, 1, 128>}]} {
    %c0 = arith.constant 0 : index
    %c0_0 = arith.constant 0 : index
    %c0_1 = arith.constant 0 : index
    %0 = vector.load %arg1[%c0, %c0_0, %c0_1] : memref<1x81x16xbf16, #tpu.memory_space<vmem>>, vector<1x81x16xbf16>
    %1 = vector.shape_cast %0 : vector<1x81x16xbf16> to vector<81x16xbf16>
    %c0_2 = arith.constant 0 : index
    %c0_3 = arith.constant 0 : index
    %2 = vector.load %arg2[%c0_2, %c0_3] : memref<16x16xbf16, #tpu.memory_space<vmem>>, vector<16x16xbf16>
    %cst = arith.constant dense<0.000000e+00> : vector<81x16xf32>
    %3 = tpu.matmul %1, %2, %cst {dimension_numbers = #tpu.dot_dimension_numbers<[1], [0], [0], [1], [0, 0, 1, 1], [], []>} : vector<81x16xbf16>, vector<16x16xbf16>, vector<81x16xf32> -> vector<81x16xf32>
    %c0_4 = arith.constant 0 : index
    %c0_5 = arith.constant 0 : index
    %4 = vector.load %arg3[%c0_4, %c0_5] : memref<1x16xf32, #tpu.memory_space<vmem>>, vector<1x16xf32>
    %5 = vector.broadcast %4 : vector<1x16xf32> to vector<81x16xf32>
    %6 = arith.addf %3, %5 : vector<81x16xf32>
    %cst_6 = arith.constant 0.000000e+00 : f32
    %7 = vector.broadcast %cst_6 : f32 to vector<81x16xf32>
    %8 = arith.maximumf %6, %7 : vector<81x16xf32>
    %9 = arith.truncf %8 : vector<81x16xf32> to vector<81x16xbf16>
    %c0_7 = arith.constant 0 : index
    %c0_8 = arith.constant 0 : index
    %10 = vector.load %arg4[%c0_7, %c0_8] : memref<2048x81xbf16, #tpu.memory_space<vmem>>, vector<2048x81xbf16>
    %cst_9 = arith.constant dense<0.000000e+00> : vector<2048x16xf32>
    %11 = tpu.matmul %10, %9, %cst_9 {dimension_numbers = #tpu.dot_dimension_numbers<[1], [0], [0], [1], [0, 0, 1, 1], [], []>} : vector<2048x81xbf16>, vector<81x16xbf16>, vector<2048x16xf32> -> vector<2048x16xf32>
    %12 = arith.truncf %11 : vector<2048x16xf32> to vector<2048x16xbf16>
    %13 = vector.extract_strided_slice %12 {offsets = [0, 0], sizes = [128, 16], strides = [1, 1]} : vector<2048x16xbf16> to vector<128x16xbf16>
    %c0_10 = arith.constant 0 : index
    %c0_11 = arith.constant 0 : index
    %c0_12 = arith.constant 0 : index
    %14 = vector.load %arg5[%c0_10, %c0_11, %c0_12] : memref<16x16x32xbf16, #tpu.memory_space<vmem>>, vector<1x16x32xbf16>
    %15 = vector.shape_cast %14 : vector<1x16x32xbf16> to vector<16x32xbf16>
    %cst_13 = arith.constant dense<0.000000e+00> : vector<128x32xf32>
    %16 = tpu.matmul %13, %15, %cst_13 {dimension_numbers = #tpu.dot_dimension_numbers<[1], [0], [0], [1], [0, 0, 1, 1], [], []>} : vector<128x16xbf16>, vector<16x32xbf16>, vector<128x32xf32> -> vector<128x32xf32>
    %17 = vector.extract_strided_slice %12 {offsets = [128, 0], sizes = [128, 16], strides = [1, 1]} : vector<2048x16xbf16> to vector<128x16xbf16>
    %c1 = arith.constant 1 : index
    %c0_14 = arith.constant 0 : index
    %c0_15 = arith.constant 0 : index
    %18 = vector.load %arg5[%c1, %c0_14, %c0_15] : memref<16x16x32xbf16, #tpu.memory_space<vmem>>, vector<1x16x32xbf16>
    %19 = vector.shape_cast %18 : vector<1x16x32xbf16> to vector<16x32xbf16>
    %cst_16 = arith.constant dense<0.000000e+00> : vector<128x32xf32>
    %20 = tpu.matmul %17, %19, %cst_16 {dimension_numbers = #tpu.dot_dimension_numbers<[1], [0], [0], [1], [0, 0, 1, 1], [], []>} : vector<128x16xbf16>, vector<16x32xbf16>, vector<128x32xf32> -> vector<128x32xf32>
    %21 = vector.extract_strided_slice %12 {offsets = [256, 0], sizes = [128, 16], strides = [1, 1]} : vector<2048x16xbf16> to vector<128x16xbf16>
    %c2 = arith.constant 2 : index
    %c0_17 = arith.constant 0 : index
    %c0_18 = arith.constant 0 : index
    %22 = vector.load %arg5[%c2, %c0_17, %c0_18] : memref<16x16x32xbf16, #tpu.memory_space<vmem>>, vector<1x16x32xbf16>
    %23 = vector.shape_cast %22 : vector<1x16x32xbf16> to vector<16x32xbf16>
    %cst_19 = arith.constant dense<0.000000e+00> : vector<128x32xf32>
    %24 = tpu.matmul %21, %23, %cst_19 {dimension_numbers = #tpu.dot_dimension_numbers<[1], [0], [0], [1], [0, 0, 1, 1], [], []>} : vector<128x16xbf16>, vector<16x32xbf16>, vector<128x32xf32> -> vector<128x32xf32>
    %25 = vector.extract_strided_slice %12 {offsets = [384, 0], sizes = [128, 16], strides = [1, 1]} : vector<2048x16xbf16> to vector<128x16xbf16>
    %c3 = arith.constant 3 : index
    %c0_20 = arith.constant 0 : index
    %c0_21 = arith.constant 0 : index
    %26 = vector.load %arg5[%c3, %c0_20, %c0_21] : memref<16x16x32xbf16, #tpu.memory_space<vmem>>, vector<1x16x32xbf16>
    %27 = vector.shape_cast %26 : vector<1x16x32xbf16> to vector<16x32xbf16>
    %cst_22 = arith.constant dense<0.000000e+00> : vector<128x32xf32>
    %28 = tpu.matmul %25, %27, %cst_22 {dimension_numbers = #tpu.dot_dimension_numbers<[1], [0], [0], [1], [0, 0, 1, 1], [], []>} : vector<128x16xbf16>, vector<16x32xbf16>, vector<128x32xf32> -> vector<128x32xf32>
    %29 = vector.extract_strided_slice %12 {offsets = [512, 0], sizes = [128, 16], strides = [1, 1]} : vector<2048x16xbf16> to vector<128x16xbf16>
    %c4 = arith.constant 4 : index
    %c0_23 = arith.constant 0 : index
    %c0_24 = arith.constant 0 : index
    %30 = vector.load %arg5[%c4, %c0_23, %c0_24] : memref<16x16x32xbf16, #tpu.memory_space<vmem>>, vector<1x16x32xbf16>
    %31 = vector.shape_cast %30 : vector<1x16x32xbf16> to vector<16x32xbf16>
    %cst_25 = arith.constant dense<0.000000e+00> : vector<128x32xf32>
    %32 = tpu.matmul %29, %31, %cst_25 {dimension_numbers = #tpu.dot_dimension_numbers<[1], [0], [0], [1], [0, 0, 1, 1], [], []>} : vector<128x16xbf16>, vector<16x32xbf16>, vector<128x32xf32> -> vector<128x32xf32>
    %33 = vector.extract_strided_slice %12 {offsets = [640, 0], sizes = [128, 16], strides = [1, 1]} : vector<2048x16xbf16> to vector<128x16xbf16>
    %c5 = arith.constant 5 : index
    %c0_26 = arith.constant 0 : index
    %c0_27 = arith.constant 0 : index
    %34 = vector.load %arg5[%c5, %c0_26, %c0_27] : memref<16x16x32xbf16, #tpu.memory_space<vmem>>, vector<1x16x32xbf16>
    %35 = vector.shape_cast %34 : vector<1x16x32xbf16> to vector<16x32xbf16>
    %cst_28 = arith.constant dense<0.000000e+00> : vector<128x32xf32>
    %36 = tpu.matmul %33, %35, %cst_28 {dimension_numbers = #tpu.dot_dimension_numbers<[1], [0], [0], [1], [0, 0, 1, 1], [], []>} : vector<128x16xbf16>, vector<16x32xbf16>, vector<128x32xf32> -> vector<128x32xf32>
    %37 = vector.extract_strided_slice %12 {offsets = [768, 0], sizes = [128, 16], strides = [1, 1]} : vector<2048x16xbf16> to vector<128x16xbf16>
    %c6 = arith.constant 6 : index
    %c0_29 = arith.constant 0 : index
    %c0_30 = arith.constant 0 : index
    %38 = vector.load %arg5[%c6, %c0_29, %c0_30] : memref<16x16x32xbf16, #tpu.memory_space<vmem>>, vector<1x16x32xbf16>
    %39 = vector.shape_cast %38 : vector<1x16x32xbf16> to vector<16x32xbf16>
    %cst_31 = arith.constant dense<0.000000e+00> : vector<128x32xf32>
    %40 = tpu.matmul %37, %39, %cst_31 {dimension_numbers = #tpu.dot_dimension_numbers<[1], [0], [0], [1], [0, 0, 1, 1], [], []>} : vector<128x16xbf16>, vector<16x32xbf16>, vector<128x32xf32> -> vector<128x32xf32>
    %41 = vector.extract_strided_slice %12 {offsets = [896, 0], sizes = [128, 16], strides = [1, 1]} : vector<2048x16xbf16> to vector<128x16xbf16>
    %c7 = arith.constant 7 : index
    %c0_32 = arith.constant 0 : index
    %c0_33 = arith.constant 0 : index
    %42 = vector.load %arg5[%c7, %c0_32, %c0_33] : memref<16x16x32xbf16, #tpu.memory_space<vmem>>, vector<1x16x32xbf16>
    %43 = vector.shape_cast %42 : vector<1x16x32xbf16> to vector<16x32xbf16>
    %cst_34 = arith.constant dense<0.000000e+00> : vector<128x32xf32>
    %44 = tpu.matmul %41, %43, %cst_34 {dimension_numbers = #tpu.dot_dimension_numbers<[1], [0], [0], [1], [0, 0, 1, 1], [], []>} : vector<128x16xbf16>, vector<16x32xbf16>, vector<128x32xf32> -> vector<128x32xf32>
    %45 = vector.extract_strided_slice %12 {offsets = [1024, 0], sizes = [128, 16], strides = [1, 1]} : vector<2048x16xbf16> to vector<128x16xbf16>
    %c8 = arith.constant 8 : index
    %c0_35 = arith.constant 0 : index
    %c0_36 = arith.constant 0 : index
    %46 = vector.load %arg5[%c8, %c0_35, %c0_36] : memref<16x16x32xbf16, #tpu.memory_space<vmem>>, vector<1x16x32xbf16>
    %47 = vector.shape_cast %46 : vector<1x16x32xbf16> to vector<16x32xbf16>
    %cst_37 = arith.constant dense<0.000000e+00> : vector<128x32xf32>
    %48 = tpu.matmul %45, %47, %cst_37 {dimension_numbers = #tpu.dot_dimension_numbers<[1], [0], [0], [1], [0, 0, 1, 1], [], []>} : vector<128x16xbf16>, vector<16x32xbf16>, vector<128x32xf32> -> vector<128x32xf32>
    %49 = vector.extract_strided_slice %12 {offsets = [1152, 0], sizes = [128, 16], strides = [1, 1]} : vector<2048x16xbf16> to vector<128x16xbf16>
    %c9 = arith.constant 9 : index
    %c0_38 = arith.constant 0 : index
    %c0_39 = arith.constant 0 : index
    %50 = vector.load %arg5[%c9, %c0_38, %c0_39] : memref<16x16x32xbf16, #tpu.memory_space<vmem>>, vector<1x16x32xbf16>
    %51 = vector.shape_cast %50 : vector<1x16x32xbf16> to vector<16x32xbf16>
    %cst_40 = arith.constant dense<0.000000e+00> : vector<128x32xf32>
    %52 = tpu.matmul %49, %51, %cst_40 {dimension_numbers = #tpu.dot_dimension_numbers<[1], [0], [0], [1], [0, 0, 1, 1], [], []>} : vector<128x16xbf16>, vector<16x32xbf16>, vector<128x32xf32> -> vector<128x32xf32>
    %53 = vector.extract_strided_slice %12 {offsets = [1280, 0], sizes = [128, 16], strides = [1, 1]} : vector<2048x16xbf16> to vector<128x16xbf16>
    %c10 = arith.constant 10 : index
    %c0_41 = arith.constant 0 : index
    %c0_42 = arith.constant 0 : index
    %54 = vector.load %arg5[%c10, %c0_41, %c0_42] : memref<16x16x32xbf16, #tpu.memory_space<vmem>>, vector<1x16x32xbf16>
    %55 = vector.shape_cast %54 : vector<1x16x32xbf16> to vector<16x32xbf16>
    %cst_43 = arith.constant dense<0.000000e+00> : vector<128x32xf32>
    %56 = tpu.matmul %53, %55, %cst_43 {dimension_numbers = #tpu.dot_dimension_numbers<[1], [0], [0], [1], [0, 0, 1, 1], [], []>} : vector<128x16xbf16>, vector<16x32xbf16>, vector<128x32xf32> -> vector<128x32xf32>
    %57 = vector.extract_strided_slice %12 {offsets = [1408, 0], sizes = [128, 16], strides = [1, 1]} : vector<2048x16xbf16> to vector<128x16xbf16>
    %c11 = arith.constant 11 : index
    %c0_44 = arith.constant 0 : index
    %c0_45 = arith.constant 0 : index
    %58 = vector.load %arg5[%c11, %c0_44, %c0_45] : memref<16x16x32xbf16, #tpu.memory_space<vmem>>, vector<1x16x32xbf16>
    %59 = vector.shape_cast %58 : vector<1x16x32xbf16> to vector<16x32xbf16>
    %cst_46 = arith.constant dense<0.000000e+00> : vector<128x32xf32>
    %60 = tpu.matmul %57, %59, %cst_46 {dimension_numbers = #tpu.dot_dimension_numbers<[1], [0], [0], [1], [0, 0, 1, 1], [], []>} : vector<128x16xbf16>, vector<16x32xbf16>, vector<128x32xf32> -> vector<128x32xf32>
    %61 = vector.extract_strided_slice %12 {offsets = [1536, 0], sizes = [128, 16], strides = [1, 1]} : vector<2048x16xbf16> to vector<128x16xbf16>
    %c12 = arith.constant 12 : index
    %c0_47 = arith.constant 0 : index
    %c0_48 = arith.constant 0 : index
    %62 = vector.load %arg5[%c12, %c0_47, %c0_48] : memref<16x16x32xbf16, #tpu.memory_space<vmem>>, vector<1x16x32xbf16>
    %63 = vector.shape_cast %62 : vector<1x16x32xbf16> to vector<16x32xbf16>
    %cst_49 = arith.constant dense<0.000000e+00> : vector<128x32xf32>
    %64 = tpu.matmul %61, %63, %cst_49 {dimension_numbers = #tpu.dot_dimension_numbers<[1], [0], [0], [1], [0, 0, 1, 1], [], []>} : vector<128x16xbf16>, vector<16x32xbf16>, vector<128x32xf32> -> vector<128x32xf32>
    %65 = vector.extract_strided_slice %12 {offsets = [1664, 0], sizes = [128, 16], strides = [1, 1]} : vector<2048x16xbf16> to vector<128x16xbf16>
    %c13 = arith.constant 13 : index
    %c0_50 = arith.constant 0 : index
    %c0_51 = arith.constant 0 : index
    %66 = vector.load %arg5[%c13, %c0_50, %c0_51] : memref<16x16x32xbf16, #tpu.memory_space<vmem>>, vector<1x16x32xbf16>
    %67 = vector.shape_cast %66 : vector<1x16x32xbf16> to vector<16x32xbf16>
    %cst_52 = arith.constant dense<0.000000e+00> : vector<128x32xf32>
    %68 = tpu.matmul %65, %67, %cst_52 {dimension_numbers = #tpu.dot_dimension_numbers<[1], [0], [0], [1], [0, 0, 1, 1], [], []>} : vector<128x16xbf16>, vector<16x32xbf16>, vector<128x32xf32> -> vector<128x32xf32>
    %69 = vector.extract_strided_slice %12 {offsets = [1792, 0], sizes = [128, 16], strides = [1, 1]} : vector<2048x16xbf16> to vector<128x16xbf16>
    %c14 = arith.constant 14 : index
    %c0_53 = arith.constant 0 : index
    %c0_54 = arith.constant 0 : index
    %70 = vector.load %arg5[%c14, %c0_53, %c0_54] : memref<16x16x32xbf16, #tpu.memory_space<vmem>>, vector<1x16x32xbf16>
    %71 = vector.shape_cast %70 : vector<1x16x32xbf16> to vector<16x32xbf16>
    %cst_55 = arith.constant dense<0.000000e+00> : vector<128x32xf32>
    %72 = tpu.matmul %69, %71, %cst_55 {dimension_numbers = #tpu.dot_dimension_numbers<[1], [0], [0], [1], [0, 0, 1, 1], [], []>} : vector<128x16xbf16>, vector<16x32xbf16>, vector<128x32xf32> -> vector<128x32xf32>
    %73 = vector.extract_strided_slice %12 {offsets = [1920, 0], sizes = [128, 16], strides = [1, 1]} : vector<2048x16xbf16> to vector<128x16xbf16>
    %c15 = arith.constant 15 : index
    %c0_56 = arith.constant 0 : index
    %c0_57 = arith.constant 0 : index
    %74 = vector.load %arg5[%c15, %c0_56, %c0_57] : memref<16x16x32xbf16, #tpu.memory_space<vmem>>, vector<1x16x32xbf16>
    %75 = vector.shape_cast %74 : vector<1x16x32xbf16> to vector<16x32xbf16>
    %cst_58 = arith.constant dense<0.000000e+00> : vector<128x32xf32>
    %76 = tpu.matmul %73, %75, %cst_58 {dimension_numbers = #tpu.dot_dimension_numbers<[1], [0], [0], [1], [0, 0, 1, 1], [], []>} : vector<128x16xbf16>, vector<16x32xbf16>, vector<128x32xf32> -> vector<128x32xf32>
    %77 = arith.addf %16, %20 : vector<128x32xf32>
    %78 = arith.addf %24, %28 : vector<128x32xf32>
    %79 = arith.addf %32, %36 : vector<128x32xf32>
    %80 = arith.addf %40, %44 : vector<128x32xf32>
    %81 = arith.addf %48, %52 : vector<128x32xf32>
    %82 = arith.addf %56, %60 : vector<128x32xf32>
    %83 = arith.addf %64, %68 : vector<128x32xf32>
    %84 = arith.addf %72, %76 : vector<128x32xf32>
    %85 = arith.addf %77, %78 : vector<128x32xf32>
    %86 = arith.addf %79, %80 : vector<128x32xf32>
    %87 = arith.addf %81, %82 : vector<128x32xf32>
    %88 = arith.addf %83, %84 : vector<128x32xf32>
    %89 = arith.addf %85, %86 : vector<128x32xf32>
    %90 = arith.addf %87, %88 : vector<128x32xf32>
    %91 = arith.addf %89, %90 : vector<128x32xf32>
    %c0_59 = arith.constant 0 : index
    %c0_60 = arith.constant 0 : index
    %92 = vector.load %arg6[%c0_59, %c0_60] : memref<1x32xf32, #tpu.memory_space<vmem>>, vector<1x32xf32>
    %93 = vector.broadcast %92 : vector<1x32xf32> to vector<128x32xf32>
    %94 = arith.addf %91, %93 : vector<128x32xf32>
    %cst_61 = arith.constant 0.000000e+00 : f32
    %95 = vector.broadcast %cst_61 : f32 to vector<128x32xf32>
    %96 = arith.maximumf %94, %95 : vector<128x32xf32>
    %97 = vector.extract_strided_slice %96 {offsets = [0, 0], sizes = [32, 32], strides = [1, 1]} : vector<128x32xf32> to vector<32x32xf32>
    %98 = vector.extract_strided_slice %96 {offsets = [32, 0], sizes = [32, 32], strides = [1, 1]} : vector<128x32xf32> to vector<32x32xf32>
    %99 = arith.maximumf %97, %98 : vector<32x32xf32>
    %100 = vector.extract_strided_slice %96 {offsets = [64, 0], sizes = [32, 32], strides = [1, 1]} : vector<128x32xf32> to vector<32x32xf32>
    %101 = vector.extract_strided_slice %96 {offsets = [96, 0], sizes = [32, 32], strides = [1, 1]} : vector<128x32xf32> to vector<32x32xf32>
    %102 = arith.maximumf %100, %101 : vector<32x32xf32>
    %103 = arith.maximumf %99, %102 : vector<32x32xf32>
    %104 = arith.truncf %103 : vector<32x32xf32> to vector<32x32xbf16>
    %c0_62 = arith.constant 0 : index
    %c0_63 = arith.constant 0 : index
    %105 = vector.load %arg7[%c0_62, %c0_63] : memref<144x32xbf16, #tpu.memory_space<vmem>>, vector<144x32xbf16>
    %cst_64 = arith.constant dense<0.000000e+00> : vector<144x32xf32>
    %106 = tpu.matmul %105, %104, %cst_64 {dimension_numbers = #tpu.dot_dimension_numbers<[1], [0], [0], [1], [0, 0, 1, 1], [], []>} : vector<144x32xbf16>, vector<32x32xbf16>, vector<144x32xf32> -> vector<144x32xf32>
    %107 = arith.truncf %106 : vector<144x32xf32> to vector<144x32xbf16>
    %108 = vector.extract_strided_slice %107 {offsets = [0, 0], sizes = [16, 32], strides = [1, 1]} : vector<144x32xbf16> to vector<16x32xbf16>
    %c0_65 = arith.constant 0 : index
    %c0_66 = arith.constant 0 : index
    %c0_67 = arith.constant 0 : index
    %109 = vector.load %arg8[%c0_65, %c0_66, %c0_67] : memref<9x32x64xbf16, #tpu.memory_space<vmem>>, vector<1x32x64xbf16>
    %110 = vector.shape_cast %109 : vector<1x32x64xbf16> to vector<32x64xbf16>
    %cst_68 = arith.constant dense<0.000000e+00> : vector<16x64xf32>
    %111 = tpu.matmul %108, %110, %cst_68 {dimension_numbers = #tpu.dot_dimension_numbers<[1], [0], [0], [1], [0, 0, 1, 1], [], []>} : vector<16x32xbf16>, vector<32x64xbf16>, vector<16x64xf32> -> vector<16x64xf32>
    %112 = vector.extract_strided_slice %107 {offsets = [16, 0], sizes = [16, 32], strides = [1, 1]} : vector<144x32xbf16> to vector<16x32xbf16>
    %c1_69 = arith.constant 1 : index
    %c0_70 = arith.constant 0 : index
    %c0_71 = arith.constant 0 : index
    %113 = vector.load %arg8[%c1_69, %c0_70, %c0_71] : memref<9x32x64xbf16, #tpu.memory_space<vmem>>, vector<1x32x64xbf16>
    %114 = vector.shape_cast %113 : vector<1x32x64xbf16> to vector<32x64xbf16>
    %cst_72 = arith.constant dense<0.000000e+00> : vector<16x64xf32>
    %115 = tpu.matmul %112, %114, %cst_72 {dimension_numbers = #tpu.dot_dimension_numbers<[1], [0], [0], [1], [0, 0, 1, 1], [], []>} : vector<16x32xbf16>, vector<32x64xbf16>, vector<16x64xf32> -> vector<16x64xf32>
    %116 = vector.extract_strided_slice %107 {offsets = [32, 0], sizes = [16, 32], strides = [1, 1]} : vector<144x32xbf16> to vector<16x32xbf16>
    %c2_73 = arith.constant 2 : index
    %c0_74 = arith.constant 0 : index
    %c0_75 = arith.constant 0 : index
    %117 = vector.load %arg8[%c2_73, %c0_74, %c0_75] : memref<9x32x64xbf16, #tpu.memory_space<vmem>>, vector<1x32x64xbf16>
    %118 = vector.shape_cast %117 : vector<1x32x64xbf16> to vector<32x64xbf16>
    %cst_76 = arith.constant dense<0.000000e+00> : vector<16x64xf32>
    %119 = tpu.matmul %116, %118, %cst_76 {dimension_numbers = #tpu.dot_dimension_numbers<[1], [0], [0], [1], [0, 0, 1, 1], [], []>} : vector<16x32xbf16>, vector<32x64xbf16>, vector<16x64xf32> -> vector<16x64xf32>
    %120 = vector.extract_strided_slice %107 {offsets = [48, 0], sizes = [16, 32], strides = [1, 1]} : vector<144x32xbf16> to vector<16x32xbf16>
    %c3_77 = arith.constant 3 : index
    %c0_78 = arith.constant 0 : index
    %c0_79 = arith.constant 0 : index
    %121 = vector.load %arg8[%c3_77, %c0_78, %c0_79] : memref<9x32x64xbf16, #tpu.memory_space<vmem>>, vector<1x32x64xbf16>
    %122 = vector.shape_cast %121 : vector<1x32x64xbf16> to vector<32x64xbf16>
    %cst_80 = arith.constant dense<0.000000e+00> : vector<16x64xf32>
    %123 = tpu.matmul %120, %122, %cst_80 {dimension_numbers = #tpu.dot_dimension_numbers<[1], [0], [0], [1], [0, 0, 1, 1], [], []>} : vector<16x32xbf16>, vector<32x64xbf16>, vector<16x64xf32> -> vector<16x64xf32>
    %124 = vector.extract_strided_slice %107 {offsets = [64, 0], sizes = [16, 32], strides = [1, 1]} : vector<144x32xbf16> to vector<16x32xbf16>
    %c4_81 = arith.constant 4 : index
    %c0_82 = arith.constant 0 : index
    %c0_83 = arith.constant 0 : index
    %125 = vector.load %arg8[%c4_81, %c0_82, %c0_83] : memref<9x32x64xbf16, #tpu.memory_space<vmem>>, vector<1x32x64xbf16>
    %126 = vector.shape_cast %125 : vector<1x32x64xbf16> to vector<32x64xbf16>
    %cst_84 = arith.constant dense<0.000000e+00> : vector<16x64xf32>
    %127 = tpu.matmul %124, %126, %cst_84 {dimension_numbers = #tpu.dot_dimension_numbers<[1], [0], [0], [1], [0, 0, 1, 1], [], []>} : vector<16x32xbf16>, vector<32x64xbf16>, vector<16x64xf32> -> vector<16x64xf32>
    %128 = vector.extract_strided_slice %107 {offsets = [80, 0], sizes = [16, 32], strides = [1, 1]} : vector<144x32xbf16> to vector<16x32xbf16>
    %c5_85 = arith.constant 5 : index
    %c0_86 = arith.constant 0 : index
    %c0_87 = arith.constant 0 : index
    %129 = vector.load %arg8[%c5_85, %c0_86, %c0_87] : memref<9x32x64xbf16, #tpu.memory_space<vmem>>, vector<1x32x64xbf16>
    %130 = vector.shape_cast %129 : vector<1x32x64xbf16> to vector<32x64xbf16>
    %cst_88 = arith.constant dense<0.000000e+00> : vector<16x64xf32>
    %131 = tpu.matmul %128, %130, %cst_88 {dimension_numbers = #tpu.dot_dimension_numbers<[1], [0], [0], [1], [0, 0, 1, 1], [], []>} : vector<16x32xbf16>, vector<32x64xbf16>, vector<16x64xf32> -> vector<16x64xf32>
    %132 = vector.extract_strided_slice %107 {offsets = [96, 0], sizes = [16, 32], strides = [1, 1]} : vector<144x32xbf16> to vector<16x32xbf16>
    %c6_89 = arith.constant 6 : index
    %c0_90 = arith.constant 0 : index
    %c0_91 = arith.constant 0 : index
    %133 = vector.load %arg8[%c6_89, %c0_90, %c0_91] : memref<9x32x64xbf16, #tpu.memory_space<vmem>>, vector<1x32x64xbf16>
    %134 = vector.shape_cast %133 : vector<1x32x64xbf16> to vector<32x64xbf16>
    %cst_92 = arith.constant dense<0.000000e+00> : vector<16x64xf32>
    %135 = tpu.matmul %132, %134, %cst_92 {dimension_numbers = #tpu.dot_dimension_numbers<[1], [0], [0], [1], [0, 0, 1, 1], [], []>} : vector<16x32xbf16>, vector<32x64xbf16>, vector<16x64xf32> -> vector<16x64xf32>
    %136 = vector.extract_strided_slice %107 {offsets = [112, 0], sizes = [16, 32], strides = [1, 1]} : vector<144x32xbf16> to vector<16x32xbf16>
    %c7_93 = arith.constant 7 : index
    %c0_94 = arith.constant 0 : index
    %c0_95 = arith.constant 0 : index
    %137 = vector.load %arg8[%c7_93, %c0_94, %c0_95] : memref<9x32x64xbf16, #tpu.memory_space<vmem>>, vector<1x32x64xbf16>
    %138 = vector.shape_cast %137 : vector<1x32x64xbf16> to vector<32x64xbf16>
    %cst_96 = arith.constant dense<0.000000e+00> : vector<16x64xf32>
    %139 = tpu.matmul %136, %138, %cst_96 {dimension_numbers = #tpu.dot_dimension_numbers<[1], [0], [0], [1], [0, 0, 1, 1], [], []>} : vector<16x32xbf16>, vector<32x64xbf16>, vector<16x64xf32> -> vector<16x64xf32>
    %140 = vector.extract_strided_slice %107 {offsets = [128, 0], sizes = [16, 32], strides = [1, 1]} : vector<144x32xbf16> to vector<16x32xbf16>
    %c8_97 = arith.constant 8 : index
    %c0_98 = arith.constant 0 : index
    %c0_99 = arith.constant 0 : index
    %141 = vector.load %arg8[%c8_97, %c0_98, %c0_99] : memref<9x32x64xbf16, #tpu.memory_space<vmem>>, vector<1x32x64xbf16>
    %142 = vector.shape_cast %141 : vector<1x32x64xbf16> to vector<32x64xbf16>
    %cst_100 = arith.constant dense<0.000000e+00> : vector<16x64xf32>
    %143 = tpu.matmul %140, %142, %cst_100 {dimension_numbers = #tpu.dot_dimension_numbers<[1], [0], [0], [1], [0, 0, 1, 1], [], []>} : vector<16x32xbf16>, vector<32x64xbf16>, vector<16x64xf32> -> vector<16x64xf32>
    %144 = arith.addf %111, %115 : vector<16x64xf32>
    %145 = arith.addf %119, %123 : vector<16x64xf32>
    %146 = arith.addf %127, %131 : vector<16x64xf32>
    %147 = arith.addf %135, %139 : vector<16x64xf32>
    %148 = arith.addf %144, %145 : vector<16x64xf32>
    %149 = arith.addf %146, %147 : vector<16x64xf32>
    %150 = arith.addf %148, %149 : vector<16x64xf32>
    %151 = arith.addf %150, %143 : vector<16x64xf32>
    %c0_101 = arith.constant 0 : index
    %c0_102 = arith.constant 0 : index
    %152 = vector.load %arg9[%c0_101, %c0_102] : memref<1x64xf32, #tpu.memory_space<vmem>>, vector<1x64xf32>
    %153 = vector.broadcast %152 : vector<1x64xf32> to vector<16x64xf32>
    %154 = arith.addf %151, %153 : vector<16x64xf32>
    %cst_103 = arith.constant 0.000000e+00 : f32
    %155 = vector.broadcast %cst_103 : f32 to vector<16x64xf32>
    %156 = arith.maximumf %154, %155 : vector<16x64xf32>
    %157 = arith.truncf %156 : vector<16x64xf32> to vector<16x64xbf16>
    %c0_104 = arith.constant 0 : index
    %c0_105 = arith.constant 0 : index
    %158 = vector.load %arg10[%c0_104, %c0_105] : memref<288x16xbf16, #tpu.memory_space<vmem>>, vector<288x16xbf16>
    %cst_106 = arith.constant dense<0.000000e+00> : vector<288x64xf32>
    %159 = tpu.matmul %158, %157, %cst_106 {dimension_numbers = #tpu.dot_dimension_numbers<[1], [0], [0], [1], [0, 0, 1, 1], [], []>} : vector<288x16xbf16>, vector<16x64xbf16>, vector<288x64xf32> -> vector<288x64xf32>
    %160 = arith.truncf %159 : vector<288x64xf32> to vector<288x64xbf16>
    %161 = vector.extract_strided_slice %160 {offsets = [0, 0], sizes = [32, 64], strides = [1, 1]} : vector<288x64xbf16> to vector<32x64xbf16>
    %c0_107 = arith.constant 0 : index
    %c0_108 = arith.constant 0 : index
    %c0_109 = arith.constant 0 : index
    %162 = vector.load %arg11[%c0_107, %c0_108, %c0_109] : memref<9x64x128xbf16, #tpu.memory_space<vmem>>, vector<1x64x128xbf16>
    %163 = vector.shape_cast %162 : vector<1x64x128xbf16> to vector<64x128xbf16>
    %cst_110 = arith.constant dense<0.000000e+00> : vector<32x128xf32>
    %164 = tpu.matmul %161, %163, %cst_110 {dimension_numbers = #tpu.dot_dimension_numbers<[1], [0], [0], [1], [0, 0, 1, 1], [], []>} : vector<32x64xbf16>, vector<64x128xbf16>, vector<32x128xf32> -> vector<32x128xf32>
    %165 = vector.extract_strided_slice %160 {offsets = [32, 0], sizes = [32, 64], strides = [1, 1]} : vector<288x64xbf16> to vector<32x64xbf16>
    %c1_111 = arith.constant 1 : index
    %c0_112 = arith.constant 0 : index
    %c0_113 = arith.constant 0 : index
    %166 = vector.load %arg11[%c1_111, %c0_112, %c0_113] : memref<9x64x128xbf16, #tpu.memory_space<vmem>>, vector<1x64x128xbf16>
    %167 = vector.shape_cast %166 : vector<1x64x128xbf16> to vector<64x128xbf16>
    %cst_114 = arith.constant dense<0.000000e+00> : vector<32x128xf32>
    %168 = tpu.matmul %165, %167, %cst_114 {dimension_numbers = #tpu.dot_dimension_numbers<[1], [0], [0], [1], [0, 0, 1, 1], [], []>} : vector<32x64xbf16>, vector<64x128xbf16>, vector<32x128xf32> -> vector<32x128xf32>
    %169 = vector.extract_strided_slice %160 {offsets = [64, 0], sizes = [32, 64], strides = [1, 1]} : vector<288x64xbf16> to vector<32x64xbf16>
    %c2_115 = arith.constant 2 : index
    %c0_116 = arith.constant 0 : index
    %c0_117 = arith.constant 0 : index
    %170 = vector.load %arg11[%c2_115, %c0_116, %c0_117] : memref<9x64x128xbf16, #tpu.memory_space<vmem>>, vector<1x64x128xbf16>
    %171 = vector.shape_cast %170 : vector<1x64x128xbf16> to vector<64x128xbf16>
    %cst_118 = arith.constant dense<0.000000e+00> : vector<32x128xf32>
    %172 = tpu.matmul %169, %171, %cst_118 {dimension_numbers = #tpu.dot_dimension_numbers<[1], [0], [0], [1], [0, 0, 1, 1], [], []>} : vector<32x64xbf16>, vector<64x128xbf16>, vector<32x128xf32> -> vector<32x128xf32>
    %173 = vector.extract_strided_slice %160 {offsets = [96, 0], sizes = [32, 64], strides = [1, 1]} : vector<288x64xbf16> to vector<32x64xbf16>
    %c3_119 = arith.constant 3 : index
    %c0_120 = arith.constant 0 : index
    %c0_121 = arith.constant 0 : index
    %174 = vector.load %arg11[%c3_119, %c0_120, %c0_121] : memref<9x64x128xbf16, #tpu.memory_space<vmem>>, vector<1x64x128xbf16>
    %175 = vector.shape_cast %174 : vector<1x64x128xbf16> to vector<64x128xbf16>
    %cst_122 = arith.constant dense<0.000000e+00> : vector<32x128xf32>
    %176 = tpu.matmul %173, %175, %cst_122 {dimension_numbers = #tpu.dot_dimension_numbers<[1], [0], [0], [1], [0, 0, 1, 1], [], []>} : vector<32x64xbf16>, vector<64x128xbf16>, vector<32x128xf32> -> vector<32x128xf32>
    %177 = vector.extract_strided_slice %160 {offsets = [128, 0], sizes = [32, 64], strides = [1, 1]} : vector<288x64xbf16> to vector<32x64xbf16>
    %c4_123 = arith.constant 4 : index
    %c0_124 = arith.constant 0 : index
    %c0_125 = arith.constant 0 : index
    %178 = vector.load %arg11[%c4_123, %c0_124, %c0_125] : memref<9x64x128xbf16, #tpu.memory_space<vmem>>, vector<1x64x128xbf16>
    %179 = vector.shape_cast %178 : vector<1x64x128xbf16> to vector<64x128xbf16>
    %cst_126 = arith.constant dense<0.000000e+00> : vector<32x128xf32>
    %180 = tpu.matmul %177, %179, %cst_126 {dimension_numbers = #tpu.dot_dimension_numbers<[1], [0], [0], [1], [0, 0, 1, 1], [], []>} : vector<32x64xbf16>, vector<64x128xbf16>, vector<32x128xf32> -> vector<32x128xf32>
    %181 = vector.extract_strided_slice %160 {offsets = [160, 0], sizes = [32, 64], strides = [1, 1]} : vector<288x64xbf16> to vector<32x64xbf16>
    %c5_127 = arith.constant 5 : index
    %c0_128 = arith.constant 0 : index
    %c0_129 = arith.constant 0 : index
    %182 = vector.load %arg11[%c5_127, %c0_128, %c0_129] : memref<9x64x128xbf16, #tpu.memory_space<vmem>>, vector<1x64x128xbf16>
    %183 = vector.shape_cast %182 : vector<1x64x128xbf16> to vector<64x128xbf16>
    %cst_130 = arith.constant dense<0.000000e+00> : vector<32x128xf32>
    %184 = tpu.matmul %181, %183, %cst_130 {dimension_numbers = #tpu.dot_dimension_numbers<[1], [0], [0], [1], [0, 0, 1, 1], [], []>} : vector<32x64xbf16>, vector<64x128xbf16>, vector<32x128xf32> -> vector<32x128xf32>
    %185 = vector.extract_strided_slice %160 {offsets = [192, 0], sizes = [32, 64], strides = [1, 1]} : vector<288x64xbf16> to vector<32x64xbf16>
    %c6_131 = arith.constant 6 : index
    %c0_132 = arith.constant 0 : index
    %c0_133 = arith.constant 0 : index
    %186 = vector.load %arg11[%c6_131, %c0_132, %c0_133] : memref<9x64x128xbf16, #tpu.memory_space<vmem>>, vector<1x64x128xbf16>
    %187 = vector.shape_cast %186 : vector<1x64x128xbf16> to vector<64x128xbf16>
    %cst_134 = arith.constant dense<0.000000e+00> : vector<32x128xf32>
    %188 = tpu.matmul %185, %187, %cst_134 {dimension_numbers = #tpu.dot_dimension_numbers<[1], [0], [0], [1], [0, 0, 1, 1], [], []>} : vector<32x64xbf16>, vector<64x128xbf16>, vector<32x128xf32> -> vector<32x128xf32>
    %189 = vector.extract_strided_slice %160 {offsets = [224, 0], sizes = [32, 64], strides = [1, 1]} : vector<288x64xbf16> to vector<32x64xbf16>
    %c7_135 = arith.constant 7 : index
    %c0_136 = arith.constant 0 : index
    %c0_137 = arith.constant 0 : index
    %190 = vector.load %arg11[%c7_135, %c0_136, %c0_137] : memref<9x64x128xbf16, #tpu.memory_space<vmem>>, vector<1x64x128xbf16>
    %191 = vector.shape_cast %190 : vector<1x64x128xbf16> to vector<64x128xbf16>
    %cst_138 = arith.constant dense<0.000000e+00> : vector<32x128xf32>
    %192 = tpu.matmul %189, %191, %cst_138 {dimension_numbers = #tpu.dot_dimension_numbers<[1], [0], [0], [1], [0, 0, 1, 1], [], []>} : vector<32x64xbf16>, vector<64x128xbf16>, vector<32x128xf32> -> vector<32x128xf32>
    %193 = vector.extract_strided_slice %160 {offsets = [256, 0], sizes = [32, 64], strides = [1, 1]} : vector<288x64xbf16> to vector<32x64xbf16>
    %c8_139 = arith.constant 8 : index
    %c0_140 = arith.constant 0 : index
    %c0_141 = arith.constant 0 : index
    %194 = vector.load %arg11[%c8_139, %c0_140, %c0_141] : memref<9x64x128xbf16, #tpu.memory_space<vmem>>, vector<1x64x128xbf16>
    %195 = vector.shape_cast %194 : vector<1x64x128xbf16> to vector<64x128xbf16>
    %cst_142 = arith.constant dense<0.000000e+00> : vector<32x128xf32>
    %196 = tpu.matmul %193, %195, %cst_142 {dimension_numbers = #tpu.dot_dimension_numbers<[1], [0], [0], [1], [0, 0, 1, 1], [], []>} : vector<32x64xbf16>, vector<64x128xbf16>, vector<32x128xf32> -> vector<32x128xf32>
    %197 = arith.addf %164, %168 : vector<32x128xf32>
    %198 = arith.addf %172, %176 : vector<32x128xf32>
    %199 = arith.addf %180, %184 : vector<32x128xf32>
    %200 = arith.addf %188, %192 : vector<32x128xf32>
    %201 = arith.addf %197, %198 : vector<32x128xf32>
    %202 = arith.addf %199, %200 : vector<32x128xf32>
    %203 = arith.addf %201, %202 : vector<32x128xf32>
    %204 = arith.addf %203, %196 : vector<32x128xf32>
    %c0_143 = arith.constant 0 : index
    %c0_144 = arith.constant 0 : index
    %205 = vector.load %arg12[%c0_143, %c0_144] : memref<1x128xf32, #tpu.memory_space<vmem>>, vector<1x128xf32>
    %206 = vector.broadcast %205 : vector<1x128xf32> to vector<32x128xf32>
    %207 = arith.addf %204, %206 : vector<32x128xf32>
    %cst_145 = arith.constant 0.000000e+00 : f32
    %208 = vector.broadcast %cst_145 : f32 to vector<32x128xf32>
    %209 = arith.maximumf %207, %208 : vector<32x128xf32>
    %210 = vector.extract_strided_slice %209 {offsets = [0, 0], sizes = [8, 128], strides = [1, 1]} : vector<32x128xf32> to vector<8x128xf32>
    %211 = vector.extract_strided_slice %209 {offsets = [8, 0], sizes = [8, 128], strides = [1, 1]} : vector<32x128xf32> to vector<8x128xf32>
    %212 = arith.maximumf %210, %211 : vector<8x128xf32>
    %213 = vector.extract_strided_slice %209 {offsets = [16, 0], sizes = [8, 128], strides = [1, 1]} : vector<32x128xf32> to vector<8x128xf32>
    %214 = vector.extract_strided_slice %209 {offsets = [24, 0], sizes = [8, 128], strides = [1, 1]} : vector<32x128xf32> to vector<8x128xf32>
    %215 = arith.maximumf %213, %214 : vector<8x128xf32>
    %216 = arith.maximumf %212, %215 : vector<8x128xf32>
    %217 = arith.truncf %216 : vector<8x128xf32> to vector<8x128xbf16>
    %c0_146 = arith.constant 0 : index
    %c0_147 = arith.constant 0 : index
    %218 = vector.load %arg13[%c0_146, %c0_147] : memref<128x8xbf16, #tpu.memory_space<vmem>>, vector<128x8xbf16>
    %cst_148 = arith.constant dense<0.000000e+00> : vector<128x128xf32>
    %219 = tpu.matmul %218, %217, %cst_148 {dimension_numbers = #tpu.dot_dimension_numbers<[1], [0], [0], [1], [0, 0, 1, 1], [], []>} : vector<128x8xbf16>, vector<8x128xbf16>, vector<128x128xf32> -> vector<128x128xf32>
    %220 = arith.truncf %219 : vector<128x128xf32> to vector<128x128xbf16>
    %221 = vector.extract_strided_slice %220 {offsets = [0, 0], sizes = [32, 128], strides = [1, 1]} : vector<128x128xbf16> to vector<32x128xbf16>
    %c0_149 = arith.constant 0 : index
    %c0_150 = arith.constant 0 : index
    %c0_151 = arith.constant 0 : index
    %222 = vector.load %arg14[%c0_149, %c0_150, %c0_151] : memref<4x128x256xbf16, #tpu.memory_space<vmem>>, vector<1x128x256xbf16>
    %223 = vector.shape_cast %222 : vector<1x128x256xbf16> to vector<128x256xbf16>
    %cst_152 = arith.constant dense<0.000000e+00> : vector<32x256xf32>
    %224 = tpu.matmul %221, %223, %cst_152 {dimension_numbers = #tpu.dot_dimension_numbers<[1], [0], [0], [1], [0, 0, 1, 1], [], []>} : vector<32x128xbf16>, vector<128x256xbf16>, vector<32x256xf32> -> vector<32x256xf32>
    %225 = vector.extract_strided_slice %220 {offsets = [32, 0], sizes = [32, 128], strides = [1, 1]} : vector<128x128xbf16> to vector<32x128xbf16>
    %c1_153 = arith.constant 1 : index
    %c0_154 = arith.constant 0 : index
    %c0_155 = arith.constant 0 : index
    %226 = vector.load %arg14[%c1_153, %c0_154, %c0_155] : memref<4x128x256xbf16, #tpu.memory_space<vmem>>, vector<1x128x256xbf16>
    %227 = vector.shape_cast %226 : vector<1x128x256xbf16> to vector<128x256xbf16>
    %cst_156 = arith.constant dense<0.000000e+00> : vector<32x256xf32>
    %228 = tpu.matmul %225, %227, %cst_156 {dimension_numbers = #tpu.dot_dimension_numbers<[1], [0], [0], [1], [0, 0, 1, 1], [], []>} : vector<32x128xbf16>, vector<128x256xbf16>, vector<32x256xf32> -> vector<32x256xf32>
    %229 = vector.extract_strided_slice %220 {offsets = [64, 0], sizes = [32, 128], strides = [1, 1]} : vector<128x128xbf16> to vector<32x128xbf16>
    %c2_157 = arith.constant 2 : index
    %c0_158 = arith.constant 0 : index
    %c0_159 = arith.constant 0 : index
    %230 = vector.load %arg14[%c2_157, %c0_158, %c0_159] : memref<4x128x256xbf16, #tpu.memory_space<vmem>>, vector<1x128x256xbf16>
    %231 = vector.shape_cast %230 : vector<1x128x256xbf16> to vector<128x256xbf16>
    %cst_160 = arith.constant dense<0.000000e+00> : vector<32x256xf32>
    %232 = tpu.matmul %229, %231, %cst_160 {dimension_numbers = #tpu.dot_dimension_numbers<[1], [0], [0], [1], [0, 0, 1, 1], [], []>} : vector<32x128xbf16>, vector<128x256xbf16>, vector<32x256xf32> -> vector<32x256xf32>
    %233 = vector.extract_strided_slice %220 {offsets = [96, 0], sizes = [32, 128], strides = [1, 1]} : vector<128x128xbf16> to vector<32x128xbf16>
    %c3_161 = arith.constant 3 : index
    %c0_162 = arith.constant 0 : index
    %c0_163 = arith.constant 0 : index
    %234 = vector.load %arg14[%c3_161, %c0_162, %c0_163] : memref<4x128x256xbf16, #tpu.memory_space<vmem>>, vector<1x128x256xbf16>
    %235 = vector.shape_cast %234 : vector<1x128x256xbf16> to vector<128x256xbf16>
    %cst_164 = arith.constant dense<0.000000e+00> : vector<32x256xf32>
    %236 = tpu.matmul %233, %235, %cst_164 {dimension_numbers = #tpu.dot_dimension_numbers<[1], [0], [0], [1], [0, 0, 1, 1], [], []>} : vector<32x128xbf16>, vector<128x256xbf16>, vector<32x256xf32> -> vector<32x256xf32>
    %237 = arith.addf %224, %228 : vector<32x256xf32>
    %238 = arith.addf %232, %236 : vector<32x256xf32>
    %239 = arith.addf %237, %238 : vector<32x256xf32>
    %c0_165 = arith.constant 0 : index
    %c0_166 = arith.constant 0 : index
    %240 = vector.load %arg15[%c0_165, %c0_166] : memref<1x256xf32, #tpu.memory_space<vmem>>, vector<1x256xf32>
    %241 = vector.broadcast %240 : vector<1x256xf32> to vector<32x256xf32>
    %242 = arith.addf %239, %241 : vector<32x256xf32>
    %cst_167 = arith.constant 0.000000e+00 : f32
    %243 = vector.broadcast %cst_167 : f32 to vector<32x256xf32>
    %244 = arith.maximumf %242, %243 : vector<32x256xf32>
    %245 = vector.extract_strided_slice %244 {offsets = [0, 0], sizes = [8, 256], strides = [1, 1]} : vector<32x256xf32> to vector<8x256xf32>
    %246 = vector.extract_strided_slice %244 {offsets = [8, 0], sizes = [8, 256], strides = [1, 1]} : vector<32x256xf32> to vector<8x256xf32>
    %247 = arith.maximumf %245, %246 : vector<8x256xf32>
    %248 = vector.extract_strided_slice %244 {offsets = [16, 0], sizes = [8, 256], strides = [1, 1]} : vector<32x256xf32> to vector<8x256xf32>
    %249 = vector.extract_strided_slice %244 {offsets = [24, 0], sizes = [8, 256], strides = [1, 1]} : vector<32x256xf32> to vector<8x256xf32>
    %250 = arith.maximumf %248, %249 : vector<8x256xf32>
    %251 = arith.maximumf %247, %250 : vector<8x256xf32>
    %252 = arith.truncf %251 : vector<8x256xf32> to vector<8x256xbf16>
    %c0_168 = arith.constant 0 : index
    %c0_169 = arith.constant 0 : index
    %253 = vector.load %arg16[%c0_168, %c0_169] : memref<256x64xbf16, #tpu.memory_space<vmem>>, vector<256x64xbf16>
    %cst_170 = arith.constant dense<0.000000e+00> : vector<8x64xf32>
    %254 = tpu.matmul %252, %253, %cst_170 {dimension_numbers = #tpu.dot_dimension_numbers<[1], [0], [0], [1], [0, 0, 1, 1], [], []>} : vector<8x256xbf16>, vector<256x64xbf16>, vector<8x64xf32> -> vector<8x64xf32>
    %c0_171 = arith.constant 0 : index
    %c0_172 = arith.constant 0 : index
    %255 = vector.load %arg17[%c0_171, %c0_172] : memref<1x64xf32, #tpu.memory_space<vmem>>, vector<1x64xf32>
    %256 = vector.broadcast %255 : vector<1x64xf32> to vector<8x64xf32>
    %257 = arith.addf %254, %256 : vector<8x64xf32>
    %cst_173 = arith.constant 0.000000e+00 : f32
    %258 = vector.broadcast %cst_173 : f32 to vector<8x64xf32>
    %259 = arith.maximumf %257, %258 : vector<8x64xf32>
    %260 = arith.truncf %259 : vector<8x64xf32> to vector<8x64xbf16>
    %c0_174 = arith.constant 0 : index
    %c0_175 = arith.constant 0 : index
    %261 = vector.load %arg18[%c0_174, %c0_175] : memref<64x128xbf16, #tpu.memory_space<vmem>>, vector<64x128xbf16>
    %cst_176 = arith.constant dense<0.000000e+00> : vector<8x128xf32>
    %262 = tpu.matmul %260, %261, %cst_176 {dimension_numbers = #tpu.dot_dimension_numbers<[1], [0], [0], [1], [0, 0, 1, 1], [], []>} : vector<8x64xbf16>, vector<64x128xbf16>, vector<8x128xf32> -> vector<8x128xf32>
    %c0_177 = arith.constant 0 : index
    %c0_178 = arith.constant 0 : index
    %263 = vector.load %arg19[%c0_177, %c0_178] : memref<1x128xf32, #tpu.memory_space<vmem>>, vector<1x128xf32>
    %264 = vector.broadcast %263 : vector<1x128xf32> to vector<8x128xf32>
    %265 = arith.addf %262, %264 : vector<8x128xf32>
    %266 = vector.extract_strided_slice %265 {offsets = [0, 0], sizes = [1, 128], strides = [1, 1]} : vector<8x128xf32> to vector<1x128xf32>
    %c0_179 = arith.constant 0 : index
    %c0_180 = arith.constant 0 : index
    %c0_181 = arith.constant 0 : index
    %267 = vector.load %arg20[%c0_179, %c0_180, %c0_181] : memref<1x1x128xf32, #tpu.memory_space<vmem>>, vector<1x1x128xf32>
    %268 = vector.shape_cast %267 : vector<1x1x128xf32> to vector<1x128xf32>
    %269 = vector.shape_cast %266 : vector<1x128xf32> to vector<1x1x128xf32>
    tpu.vector_store %arg20[%c0_179, %c0_180, %c0_181], %269 {strides = array<i32>} : memref<1x1x128xf32, #tpu.memory_space<vmem>>, vector<1x1x128xf32>,
    return
  }
  func.func @transform_0(%arg0: i32) -> (i32, i32, i32) {
    %c0_i32 = arith.constant 0 : i32
    %c0_i32_0 = arith.constant 0 : i32
    %c0_i32_1 = arith.constant 0 : i32
    return %arg0, %c0_i32, %c0_i32_0 : i32, i32, i32
  }
  func.func @transform_1(%arg0: i32) -> (i32, i32) {
    %c0_i32 = arith.constant 0 : i32
    %c0_i32_0 = arith.constant 0 : i32
    %c0_i32_1 = arith.constant 0 : i32
    return %c0_i32, %c0_i32_0 : i32, i32
  }
  func.func @transform_2(%arg0: i32) -> (i32, i32) {
    %c0_i32 = arith.constant 0 : i32
    %c0_i32_0 = arith.constant 0 : i32
    %c0_i32_1 = arith.constant 0 : i32
    return %c0_i32, %c0_i32_0 : i32, i32
  }
  func.func @transform_3(%arg0: i32) -> (i32, i32) {
    %c0_i32 = arith.constant 0 : i32
    %c0_i32_0 = arith.constant 0 : i32
    %c0_i32_1 = arith.constant 0 : i32
    return %c0_i32, %c0_i32_0 : i32, i32
  }
  func.func @transform_4(%arg0: i32) -> (i32, i32, i32) {
    %c0_i32 = arith.constant 0 : i32
    %c0_i32_0 = arith.constant 0 : i32
    %c0_i32_1 = arith.constant 0 : i32
    %c0_i32_2 = arith.constant 0 : i32
    return %c0_i32, %c0_i32_0, %c0_i32_1 : i32, i32, i32
  }
  func.func @transform_5(%arg0: i32) -> (i32, i32) {
    %c0_i32 = arith.constant 0 : i32
    %c0_i32_0 = arith.constant 0 : i32
    %c0_i32_1 = arith.constant 0 : i32
    return %c0_i32, %c0_i32_0 : i32, i32
  }
  func.func @transform_6(%arg0: i32) -> (i32, i32) {
    %c0_i32 = arith.constant 0 : i32
    %c0_i32_0 = arith.constant 0 : i32
    %c0_i32_1 = arith.constant 0 : i32
    return %c0_i32, %c0_i32_0 : i32, i32
  }
  func.func @transform_7(%arg0: i32) -> (i32, i32, i32) {
    %c0_i32 = arith.constant 0 : i32
    %c0_i32_0 = arith.constant 0 : i32
    %c0_i32_1 = arith.constant 0 : i32
    %c0_i32_2 = arith.constant 0 : i32
    return %c0_i32, %c0_i32_0, %c0_i32_1 : i32, i32, i32
  }
  func.func @transform_8(%arg0: i32) -> (i32, i32) {
    %c0_i32 = arith.constant 0 : i32
    %c0_i32_0 = arith.constant 0 : i32
    %c0_i32_1 = arith.constant 0 : i32
    return %c0_i32, %c0_i32_0 : i32, i32
  }
  func.func @transform_9(%arg0: i32) -> (i32, i32) {
    %c0_i32 = arith.constant 0 : i32
    %c0_i32_0 = arith.constant 0 : i32
    %c0_i32_1 = arith.constant 0 : i32
    return %c0_i32, %c0_i32_0 : i32, i32
  }
  func.func @transform_10(%arg0: i32) -> (i32, i32, i32) {
    %c0_i32 = arith.constant 0 : i32
    %c0_i32_0 = arith.constant 0 : i32
    %c0_i32_1 = arith.constant 0 : i32
    %c0_i32_2 = arith.constant 0 : i32
    return %c0_i32, %c0_i32_0, %c0_i32_1 : i32, i32, i32
  }
  func.func @transform_11(%arg0: i32) -> (i32, i32) {
    %c0_i32 = arith.constant 0 : i32
    %c0_i32_0 = arith.constant 0 : i32
    %c0_i32_1 = arith.constant 0 : i32
    return %c0_i32, %c0_i32_0 : i32, i32
  }
  func.func @transform_12(%arg0: i32) -> (i32, i32) {
    %c0_i32 = arith.constant 0 : i32
    %c0_i32_0 = arith.constant 0 : i32
    %c0_i32_1 = arith.constant 0 : i32
    return %c0_i32, %c0_i32_0 : i32, i32
  }
  func.func @transform_13(%arg0: i32) -> (i32, i32, i32) {
    %c0_i32 = arith.constant 0 : i32
    %c0_i32_0 = arith.constant 0 : i32
    %c0_i32_1 = arith.constant 0 : i32
    %c0_i32_2 = arith.constant 0 : i32
    return %c0_i32, %c0_i32_0, %c0_i32_1 : i32, i32, i32
  }
  func.func @transform_14(%arg0: i32) -> (i32, i32) {
    %c0_i32 = arith.constant 0 : i32
    %c0_i32_0 = arith.constant 0 : i32
    %c0_i32_1 = arith.constant 0 : i32
    return %c0_i32, %c0_i32_0 : i32, i32
  }
  func.func @transform_15(%arg0: i32) -> (i32, i32) {
    %c0_i32 = arith.constant 0 : i32
    %c0_i32_0 = arith.constant 0 : i32
    %c0_i32_1 = arith.constant 0 : i32
    return %c0_i32, %c0_i32_0 : i32, i32
  }
  func.func @transform_16(%arg0: i32) -> (i32, i32) {
    %c0_i32 = arith.constant 0 : i32
    %c0_i32_0 = arith.constant 0 : i32
    %c0_i32_1 = arith.constant 0 : i32
    return %c0_i32, %c0_i32_0 : i32, i32
  }
  func.func @transform_17(%arg0: i32) -> (i32, i32) {
    %c0_i32 = arith.constant 0 : i32
    %c0_i32_0 = arith.constant 0 : i32
    %c0_i32_1 = arith.constant 0 : i32
    return %c0_i32, %c0_i32_0 : i32, i32
  }
  func.func @transform_18(%arg0: i32) -> (i32, i32) {
    %c0_i32 = arith.constant 0 : i32
    %c0_i32_0 = arith.constant 0 : i32
    %c0_i32_1 = arith.constant 0 : i32
    return %c0_i32, %c0_i32_0 : i32, i32
  }
  func.func @transform_19(%arg0: i32) -> (i32, i32, i32) {
    %c0_i32 = arith.constant 0 : i32
    %c0_i32_0 = arith.constant 0 : i32
    %c0_i32_1 = arith.constant 0 : i32
    return %arg0, %c0_i32, %c0_i32_0 : i32, i32, i32
  }
}

</mosaic_0001>

<bundles_post_ra>
// kernel: cnn_model_forward.1
= control target key start
LH: loop header
LB: loop body
LE: loop exit
PB: predicated region body
PF: predicated region fallthrough
CT: control target
= control target key end

     0   :  { %s13008_s0 = inlined_call_operand.vmem [shape: bf16[2,81,16], index: 0, kind: input, shape index: {}]   ;;  %s13009_s1 = inlined_call_operand.vmem [shape: bf16[16,16], index: 1, kind: input, shape index: {}]   ;;  %s13010_s2 = inlined_call_operand.vmem [shape: f32[1,16], index: 2, kind: input, shape index: {}]   ;;  %s13011_s3 = inlined_call_operand.vmem [shape: bf16[2048,81], index: 3, kind: input, shape index: {}]   ;;  %s13012_s4 = inlined_call_operand.vmem [shape: bf16[16,16,32], index: 4, kind: input, shape index: {}]   ;;  %s13013_s5 = inlined_call_operand.vmem [shape: f32[1,32], index: 5, kind: input, shape index: {}]   ;;  %s13014_s6 = inlined_call_operand.vmem [shape: bf16[144,32], index: 6, kind: input, shape index: {}]   ;;  %s13015_s7 = inlined_call_operand.vmem [shape: bf16[9,32,64], index: 7, kind: input, shape index: {}]   ;;  %s13016_s8 = inlined_call_operand.vmem [shape: f32[1,64], index: 8, kind: input, shape index: {}]   ;;  %s13017_s9 = inlined_call_operand.vmem [shape: bf16[288,16], index: 9, kind: input, shape index: {}]   ;;  %s13018_s10 = inlined_call_operand.vmem [shape: bf16[9,64,128], index: 10, kind: input, shape index: {}]   ;;  %s13019_s11 = inlined_call_operand.vmem [shape: f32[1,128], index: 11, kind: input, shape index: {}]   ;;  %s13020_s12 = inlined_call_operand.vmem [shape: bf16[128,8], index: 12, kind: input, shape index: {}]   ;;  %s13021_s13 = inlined_call_operand.vmem [shape: bf16[4,128,256], index: 13, kind: input, shape index: {}]   ;;  %s13022_s14 = inlined_call_operand.vmem [shape: f32[1,256], index: 14, kind: input, shape index: {}]   ;;  %s13023_s15 = inlined_call_operand.vmem [shape: bf16[256,64], index: 15, kind: input, shape index: {}]   ;;  %s13024_s16 = inlined_call_operand.vmem [shape: f32[1,64], index: 16, kind: input, shape index: {}]   ;;  %s13025_s17 = inlined_call_operand.vmem [shape: bf16[64,128], index: 17, kind: input, shape index: {}]   ;;  %s13026_s18 = inlined_call_operand.vmem [shape: f32[1,128], index: 18, kind: input, shape index: {}]   ;;  %s13027_s19 = inlined_call_operand.hbm [shape: f32[2,1,128], index: 19, kind: output, shape index: {}]  }
   0x1   :  { %13103 = sst [smem:[#allocation146_spill]] %s13008_s0 }
   0x2   :  { %13104 = sst [smem:[#allocation147_spill]] %s13009_s1 }
   0x3   :  { %13105 = sst [smem:[#allocation148_spill]] %s13010_s2 }
   0x4   :  { %13106 = sst [smem:[#allocation149_spill]] %s13011_s3 }
   0x5   :  { %13107 = sst [smem:[#allocation150_spill]] %s13012_s4 }
   0x6   :  { %13108 = sst [smem:[#allocation151_spill]] %s13013_s5 }
   0x7   :  { %13109 = sst [smem:[#allocation152_spill]] %s13014_s6 }
   0x8   :  { %13110 = sst [smem:[#allocation153_spill]] %s13015_s7 }
   0x9   :  { %24 = vsyncpa [#allocation3], 0 }
   0xa   :  { %26 = vsyncpa [#allocation3 + $0x1], 0  ;;  %s9922_s0 = smov 0   ;;  %s9924_s30 = smov 0  }
   0xb   :  { %s9926_s20 = smov 0   ;;  %s9928_s21 = smov 0  }
   0xc LB: > { %13111 = sst [smem:[#allocation5_spill]] %s9815_s20  ;;  %s9943_s1 = sadd.s32 4294967295, %s9819_s21   ;;  %s9819_s21 = sphi %s9928_s21, %s13598_s21   ;;  %s9815_s20 = sphi %s9926_s20, %s13600_s20   ;;  %s9811_s30 = sphi %s9924_s30, %s13602_s30   ;;  %s9807_s0 = sphi %s9922_s0, %s13601_s0  }
   0xd   : > { %s7576_s22 = sadd.s32 4294967294, %s9819_s21   ;;  %s9947_s2 = sadd.s32 1, %s9819_s21  }
   0xe   : > { %13112 = sst [smem:[#allocation6_spill]] %s9947_s2  ;;  %s443_s23 = sadd.s32 1, %s9815_s20 }
   0xf   : > { %s440_s24 = ssub.s32 %s9819_s21, %s9947_s2  ;;  %p453_p0 = scmp.ne.s32.totalorder %s9815_s20, %s9811_s30 }
  0x10   : > { %p441_p1 = scmp.eq.s32.totalorder %s440_s24, 0  ;;  %p454_p2 = scmp.eq.s32.totalorder %s9943_s1, 1 }
  0x11   : > { %p459_p3 = scmp.ne.s32.totalorder %s9811_s30, %s9807_s0  ;;  %p460_p4 = scmp.eq.s32.totalorder %s7576_s22, 1 }
  0x12   : > { %s9958_s25 = scalar_select %p441_p1, %s9815_s20, %s443_s23  }
  0x13   : > { %p9960_p5 = por %p454_p2, %p453_p0  ;;  %p9964_p6 = por %p460_p4, %p459_p3 }
  0x14   : > { %13113 = sst [smem:[#allocation7_spill]] %s9958_s25  ;;  %p7579_p7 = scmp.ge.s32.totalorder %s9819_s21, 1 }
  0x15   : > { %p540_p8 = scmp.lt.s32.totalorder %s9819_s21, 3 }
  0x17   : > { %p541_p9 = pnand %p7579_p7, %p540_p8 }
  0x19   : > { %544 = sbr.rel (%p541_p9) target bundleno = 4049 (0xfd1), region = 96 }
  0x1e   : > { %s13116_s29 = sld [smem:[#allocation147_spill]]  ;;  %p595_p10 = scmp.lt.s32.totalorder %s9943_s1, 1  ;;  %vm652_vm0 = vcmask 130048   ;;  %vm2007_vm1 = vcmask 1040384   ;;  %v9821_v22 = vmov 0   ;;  %vm1622_vm2 = vcmask 662528  }
  0x1f   : > { %s13117_s20 = sld [smem:[#allocation146_spill]]  ;;  %v2009_v23 = vsel %vm2007_vm1, 65535, %v9821_v22  ;;  %vm5094_vm3 = vcmask 261120   ;;  %vm5927_vm4 = vcmask 523264   ;;  %vm6601_vm5 = vcmask 1043456   ;;  %s9777_s25 = scalar_lea.hbm %s13027_s19, 2 }
  0x20   : > { %s596_s22 = scalar_select %p595_p10, %s9943_s1, 1  ;;  %vm6576_vm6 = vcmask 64512  }
  0x21   : > { %s13118_s27 = sld [smem:[#allocation148_spill]] }
  0x22   : > { %s9710_s23 = smul.u32 44, %s596_s22  ;;  %s13132_s4 = sld [smem:[#allocation150_spill]] }
  0x23   : > { %s13528_s5 = sld [smem:[#allocation151_spill]] }
  0x24   : > { %v9379_v0 = vld [vmem:[%s13116_s29] sm:$0xff]  ;;  %s13119_s29 = sld [smem:[#allocation149_spill]] }
  0x25   : > { %9697 = vmatpush.bf16.msra.mxu2 %v9379_v0  ;;  %678 = vmatpush.bf16.msra.mxu0 %v9379_v0  ;;  %s599_s2 = scalar_lea.vmem %s13117_s20, %s9710_s23  ;;  %s13596_s6 = sld [smem:[#allocation152_spill]] }
  0x26   : > { %v9375_v1 = vld [vmem:[%s599_s2 + $0x8] sm:$0xff]  ;;  %v9376_v2 = vld [vmem:[%s599_s2 + $0x10] sm:$0xff]  ;;  %v9377_v3 = vld [vmem:[%s599_s2 + $0x18] sm:$0xff]  ;;  %s13597_s7 = sld [smem:[#allocation153_spill]] }
  0x27   : > { %v9374_v4 = vld [vmem:[%s599_s2] sm:$0xff]  ;;  %v611_v6 = vld [vmem:[%s599_s2 + $0x28] sm:$0x1] }
  0x28   : > { %7606 = vmatmul.msk.bf16.vlgmr.msra.gmra.mxu2 %vm652_vm0, %v9375_v1  ;;  %7605 = vmatmul.msk.bf16.vlgmr.msra.gmra.mxu0 %vm652_vm0, %v9374_v4  ;;  %v9378_v5 = vld [vmem:[%s599_s2 + $0x20] sm:$0xff]  ;;  %v639_v7 = vunpack.c.l.b16 %v611_v6 }
  0x29   : > { %v9751_v17 = vld [vmem:[%s13118_s27] ss:$0 sm:$0xff]  ;;  %s7517_s27 = scalar_lea.hbm %s13027_s19, %s9943_s1 }
  0x2a   : > { %v645_v8 = vpack.c.b16 %v639_v7, %v639_v7  ;;  %v9380_v53 = vld [vmem:[%s13119_s29] sm:$0xff]  ;;  %v9381_v55 = vld [vmem:[%s13119_s29 + $0x8] sm:$0xff]  ;;  %v9382_v57 = vld [vmem:[%s13119_s29 + $0x10] sm:$0xff]  ;;  %s7521_s23 = sshll.u32 %s7517_s27, 4  ;;  %s7522_s23 = int_to_ptr.hbm [resolvable:$true] %s7521_s23 }
  0x2b   : > { %v9476_v54 = vld [vmem:[%s13119_s29 + $0x300] sm:$0xff]  ;;  %v9477_v56 = vld [vmem:[%s13119_s29 + $0x308] sm:$0xff]  ;;  %v9478_v58 = vld [vmem:[%s13119_s29 + $0x310] sm:$0xff] }
  0x2c   : > { %v9383_v59 = vld [vmem:[%s13119_s29 + $0x18] sm:$0xff]  ;;  %v9384_v61 = vld [vmem:[%s13119_s29 + $0x20] sm:$0xff]  ;;  %v9466_v63 = vld [vmem:[%s13119_s29 + $0x2b0] sm:$0xff] }
  0x2d   : > { %v9479_v60 = vld [vmem:[%s13119_s29 + $0x318] sm:$0xff]  ;;  %v9480_v62 = vld [vmem:[%s13119_s29 + $0x320] sm:$0xff]  ;;  %v9385_v0 = vld [vmem:[%s13119_s29 + $0x28] sm:$0xff] }
  0x2e   : > { %v9481_v1 = vld [vmem:[%s13119_s29 + $0x328] sm:$0xff]  ;;  %v9482_v4 = vld [vmem:[%s13119_s29 + $0x330] sm:$0xff]  ;;  %v9387_v6 = vld [vmem:[%s13119_s29 + $0x38] sm:$0xff] }
  0x2f   : > { %v9483_v7 = vld [vmem:[%s13119_s29 + $0x338] sm:$0xff] }
  0x38   : > { %7607 = vmatmul.msk.bf16.gmra.mxu2 %vm652_vm0, %v9376_v2  ;;  %v9467_v2 = vld [vmem:[%s13119_s29 + $0x2b8] sm:$0xff] }
  0x48   : > { %7608 = vmatmul.msk.bf16.gmra.mxu2 %vm652_vm0, %v9377_v3  ;;  %v9386_v3 = vld [vmem:[%s13119_s29 + $0x30] sm:$0xff] }
  0x58   : > { %7609 = vmatmul.msk.bf16.gmra.mxu2 %vm652_vm0, %v9378_v5  ;;  %v9468_v5 = vld [vmem:[%s13119_s29 + $0x2c0] sm:$0xff] }
  0x68   : > { %7610 = vmatmul.msk.bf16.gmra.mxu2 %vm652_vm0, %v645_v8  ;;  %v9469_v8 = vld [vmem:[%s13119_s29 + $0x2c8] sm:$0xff] }
  0xa5   : > { %v680_v26 = vpop.f32.mrf.mxu0 }
  0xa6   : > { %v681_v45 = vadd.f32 %v9751_v17, %v680_v26  ;;  %v9485_v26 = vld [vmem:[%s13119_s29 + $0x348] sm:$0xff] }
  0xa8   : > { %v709_v49 = vmax.f32 %v681_v45, 0.0 }
  0xab   : > { %v685_v9 = vpop.f32.mrf.mxu2 }
  0xac   : > { %v686_v42 = vadd.f32 %v9751_v17, %v685_v9  ;;  %v9388_v9 = vld [vmem:[%s13119_s29 + $0x40] sm:$0xff] }
  0xad   : > { %v682_v41 = vpop.f32.mrf.mxu0 }
  0xae   : > { %v683_v46 = vadd.f32 %v9751_v17, %v682_v41  ;;  %v711_v48 = vmax.f32 %v686_v42, 0.0 }
  0xb0   : > { %v710_v50 = vmax.f32 %v683_v46, 0.0 }
  0xb2   : > { %v720_v52 = vpack.c.bf16 %v710_v50, %v709_v49 }
  0xb3   : > { %v687_v10 = vpop.f32.mrf.mxu2 }
  0xb4   : > { %v688_v38 = vadd.f32 %v9751_v17, %v687_v10 }
  0xb6   : > { %v712_v44 = vmax.f32 %v688_v38, 0.0  ;;  %v9390_v38 = vld [vmem:[%s13119_s29 + $0x50] sm:$0xff] }
  0xb8   : > { %v721_v51 = vpack.c.bf16 %v712_v44, %v711_v48 }
  0xbb   : > { %v690_v11 = vpop.f32.mrf.mxu2 }
  0xbc   : > { %v691_v36 = vadd.f32 %v9751_v17, %v690_v11  ;;  %v9484_v11 = vld [vmem:[%s13119_s29 + $0x340] sm:$0xff] }
  0xbe   : > { %v713_v43 = vmax.f32 %v691_v36, 0.0 }
  0xc3   : > { %v692_v12 = vpop.f32.mrf.mxu2 }
  0xc4   : > { %v693_v33 = vadd.f32 %v9751_v17, %v692_v12 }
  0xc6   : > { %v714_v39 = vmax.f32 %v693_v33, 0.0 }
  0xc8   : > { %v722_v47 = vpack.c.bf16 %v714_v39, %v713_v43  ;;  %v9486_v43 = vld [vmem:[%s13119_s29 + $0x350] sm:$0xff] }
  0xcb   : > { %v695_v13 = vpop.f32.mrf.mxu2 }
  0xcc   : > { %v696_v31 = vadd.f32 %v9751_v17, %v695_v13 }
  0xce   : > { %v715_v37 = vmax.f32 %v696_v31, 0.0 }
  0xd3   : > { %v697_v14 = vpop.f32.mrf.mxu2 }
  0xd4   : > { %v698_v27 = vadd.f32 %v9751_v17, %v697_v14 }
  0xd6   : > { %v716_v34 = vmax.f32 %v698_v27, 0.0 }
  0xd8   : > { %v723_v40 = vpack.c.bf16 %v716_v34, %v715_v37  ;;  %v9471_v37 = vld [vmem:[%s13119_s29 + $0x2d8] sm:$0xff] }
  0xdb   : > { %v700_v15 = vpop.f32.mrf.mxu2 }
  0xdc   : > { %v701_v24 = vadd.f32 %v9751_v17, %v700_v15 }
  0xde   : > { %v717_v32 = vmax.f32 %v701_v24, 0.0 }
  0xe3   : > { %v702_v16 = vpop.f32.mrf.mxu2 }
  0xe4   : > { %v703_v20 = vadd.f32 %v9751_v17, %v702_v16 }
  0xe6   : > { %v718_v28 = vmax.f32 %v703_v20, 0.0  ;;  %v9470_v20 = vld [vmem:[%s13119_s29 + $0x2d0] sm:$0xff] }
  0xe8   : > { %v724_v35 = vpack.c.bf16 %v718_v28, %v717_v32 }
  0xeb   : > { %v705_v18 = vpop.f32.mrf.mxu2 }
  0xec   : > { %v706_v19 = vadd.f32 %v9751_v17, %v705_v18 }
  0xee   : > { %v719_v21 = vmax.f32 %v706_v19, 0.0 }
  0xf0   : > { %v725_v25 = vpack.c.bf16 %v719_v21, %v719_v21  ;;  %v9389_v21 = vld [vmem:[%s13119_s29 + $0x48] sm:$0xff] }
  0xf2   : > { %v2011_v29 = vand.u32 %v2009_v23, %v725_v25 }
  0xf3   : > { %v707_v30 = vpop.f32.mrf.mxu2 }
  0xf4   : > { %2015 = vmatpush.bf16.msra.mxu1 %v2011_v29  ;;  %9698 = vmatpush.bf16.msrb.mxu2 %v2011_v29 }
  0xf5   : > { %9699 = vmatpush.bf16.msra.mxu3 %v2011_v29 }
  0xf8   : > { %2016 = vmatpush.bf16.msra.mxu1 %v724_v35  ;;  %9700 = vmatpush.bf16.msrb.mxu2 %v724_v35 }
  0xf9   : > { %9701 = vmatpush.bf16.msra.mxu3 %v724_v35 }
  0xfc   : > { %2017 = vmatpush.bf16.msra.mxu1 %v723_v40  ;;  %9702 = vmatpush.bf16.msrb.mxu2 %v723_v40 }
  0xfd   : > { %9703 = vmatpush.bf16.msra.mxu3 %v723_v40 }
 0x100   : > { %2018 = vmatpush.bf16.msra.mxu1 %v722_v47  ;;  %9704 = vmatpush.bf16.msrb.mxu2 %v722_v47 }
 0x101   : > { %9705 = vmatpush.bf16.msra.mxu3 %v722_v47 }
 0x104   : > { %2019 = vmatpush.bf16.msra.mxu1 %v721_v51  ;;  %9706 = vmatpush.bf16.msrb.mxu2 %v721_v51 }
 0x105   : > { %9707 = vmatpush.bf16.msra.mxu3 %v721_v51 }
 0x108   : > { %2020 = vmatpush.bf16.msra.mxu1 %v720_v52  ;;  %9708 = vmatpush.bf16.msrb.mxu2 %v720_v52 }
 0x109   : > { %9709 = vmatpush.bf16.msra.mxu3 %v720_v52 }
 0x10b   : > { %8123 = vmatmul.msk.bf16.vlgmr.msra.gmra.mxu1 %vm1622_vm2, %v9380_v53  ;;  %8209 = vmatmul.msk.bf16.vlgmr.msrb.gmra.mxu2 %vm1622_vm2, %v9466_v63 }
 0x10c   : > { %8219 = vmatmul.msk.bf16.vlgmr.msra.gmra.mxu3 %vm1622_vm2, %v9476_v54  ;;  %v9472_v54 = vld [vmem:[%s13119_s29 + $0x2e0] sm:$0xff] }
 0x11b   : > { %8124 = vmatmul.msk.bf16.gmra.mxu1 %vm1622_vm2, %v9381_v55  ;;  %8210 = vmatmul.msk.bf16.gmra.mxu2 %vm1622_vm2, %v9467_v2  ;;  %v9391_v55 = vld [vmem:[%s13119_s29 + $0x58] sm:$0xff] }
 0x11c   : > { %8220 = vmatmul.msk.bf16.gmra.mxu3 %vm1622_vm2, %v9477_v56 }
 0x12b   : > { %8125 = vmatmul.msk.bf16.gmra.mxu1 %vm1622_vm2, %v9382_v57  ;;  %8211 = vmatmul.msk.bf16.gmra.mxu2 %vm1622_vm2, %v9468_v5 }
 0x12c   : > { %8221 = vmatmul.msk.bf16.gmra.mxu3 %vm1622_vm2, %v9478_v58 }
 0x13b   : > { %8126 = vmatmul.msk.bf16.gmra.mxu1 %vm1622_vm2, %v9383_v59  ;;  %8212 = vmatmul.msk.bf16.gmra.mxu2 %vm1622_vm2, %v9469_v8  ;;  %v9392_v8 = vld [vmem:[%s13119_s29 + $0x60] sm:$0xff] }
 0x13c   : > { %8222 = vmatmul.msk.bf16.gmra.mxu3 %vm1622_vm2, %v9479_v60  ;;  %v9487_v60 = vld [vmem:[%s13119_s29 + $0x358] sm:$0xff] }
 0x14b   : > { %8127 = vmatmul.msk.bf16.gmra.mxu1 %vm1622_vm2, %v9384_v61  ;;  %8213 = vmatmul.msk.bf16.gmra.mxu2 %vm1622_vm2, %v9470_v20 }
 0x14c   : > { %8223 = vmatmul.msk.bf16.gmra.mxu3 %vm1622_vm2, %v9480_v62 }
 0x15b   : > { %8128 = vmatmul.msk.bf16.gmra.mxu1 %vm1622_vm2, %v9385_v0  ;;  %8214 = vmatmul.msk.bf16.gmra.mxu2 %vm1622_vm2, %v9471_v37 }
 0x15c   : > { %8224 = vmatmul.msk.bf16.gmra.mxu3 %vm1622_vm2, %v9481_v1 }
 0x16b   : > { %8129 = vmatmul.msk.bf16.gmra.mxu1 %vm1622_vm2, %v9386_v3  ;;  %8215 = vmatmul.msk.bf16.gmra.mxu2 %vm1622_vm2, %v9472_v54 }
 0x16c   : > { %8225 = vmatmul.msk.bf16.gmra.mxu3 %vm1622_vm2, %v9482_v4 }
 0x17b   : > { %8130 = vmatmul.msk.bf16.gmra.mxu1 %vm1622_vm2, %v9387_v6 }
 0x17c   : > { %8226 = vmatmul.msk.bf16.gmra.mxu3 %vm1622_vm2, %v9483_v7  ;;  %v9473_v7 = vld [vmem:[%s13119_s29 + $0x2e8] sm:$0xff] }
 0x17d   : > { %8216 = vmatmul.msk.bf16.gmra.mxu2 %vm1622_vm2, %v9473_v7 }
 0x188   : > { %v2022_v10 = vpop.f32.mrf.mxu1 }
 0x189   : > { %v2662_v12 = vpack.c.bf16 %v2022_v10, %v2022_v10 }
 0x18b   : > { %8131 = vmatmul.msk.bf16.gmra.mxu1 %vm1622_vm2, %v9388_v9  ;;  %v10075_v16 = vunpack.c.l.b16 %v2662_v12 }
 0x18c   : > { %8227 = vmatmul.msk.bf16.gmra.mxu3 %vm1622_vm2, %v9484_v11 }
 0x18f   : > { %v2502_v13 = vpop.f32.mrf.mxu3 }
 0x190   : > { %v2024_v14 = vpop.f32.mrf.mxu1  ;;  %v2854_v18 = vpack.c.bf16 %v2502_v13, %v2502_v13  ;;  %v9488_v13 = vld [vmem:[%s13119_s29 + $0x360] sm:$0xff] }
 0x191   : > { %v2663_v15 = vpack.c.bf16 %v2024_v14, %v2024_v14 }
 0x192   : > { %v10088_v24 = vunpack.c.l.b16 %v2854_v18 }
 0x193   : > { %v10077_v17 = vunpack.c.l.b16 %v2663_v15 }
 0x194   : > { %13120 = vst [vmem:[#allocation8_spill] sm:$0xff] %v10088_v24 }
 0x197   : > { %v2504_v22 = vpop.f32.mrf.mxu3 }
 0x198   : > { %v2027_v23 = vpop.f32.mrf.mxu1  ;;  %v2855_v25 = vpack.c.bf16 %v2504_v22, %v2504_v22 }
 0x199   : > { %v2664_v29 = vpack.c.bf16 %v2027_v23, %v2027_v23 }
 0x19a   : > { %v10093_v27 = vunpack.c.l.b16 %v2855_v25 }
 0x19b   : > { %8132 = vmatmul.msk.bf16.gmra.mxu1 %vm1622_vm2, %v9389_v21  ;;  %v10099_v33 = vunpack.c.l.b16 %v2664_v29 }
 0x19c   : > { %13121 = vst [vmem:[#allocation9_spill] sm:$0xff] %v10093_v27  ;;  %8228 = vmatmul.msk.bf16.gmra.mxu3 %vm1622_vm2, %v9485_v26 }
 0x19f   : > { %v2507_v30 = vpop.f32.mrf.mxu3 }
 0x1a0   : > { %v2029_v31 = vpop.f32.mrf.mxu1  ;;  %v2856_v35 = vpack.c.bf16 %v2507_v30, %v2507_v30  ;;  %v9474_v30 = vld [vmem:[%s13119_s29 + $0x2f0] sm:$0xff] }
 0x1a1   : > { %v2665_v32 = vpack.c.bf16 %v2029_v31, %v2029_v31  ;;  %v9393_v31 = vld [vmem:[%s13119_s29 + $0x68] sm:$0xff]  ;;  %8217 = vmatmul.msk.bf16.gmra.mxu2 %vm1622_vm2, %v9474_v30 }
 0x1a2   : > { %v10112_v41 = vunpack.c.l.b16 %v2856_v35 }
 0x1a3   : > { %v10101_v34 = vunpack.c.l.b16 %v2665_v32 }
 0x1a4   : > { %13122 = vst [vmem:[#allocation10_spill] sm:$0xff] %v10112_v41 }
 0x1a7   : > { %v2509_v39 = vpop.f32.mrf.mxu3 }
 0x1a8   : > { %v2032_v40 = vpop.f32.mrf.mxu1  ;;  %v2857_v42 = vpack.c.bf16 %v2509_v39, %v2509_v39  ;;  %v9489_v39 = vld [vmem:[%s13119_s29 + $0x368] sm:$0xff] }
 0x1a9   : > { %v2666_v46 = vpack.c.bf16 %v2032_v40, %v2032_v40 }
 0x1aa   : > { %v10117_v44 = vunpack.c.l.b16 %v2857_v42 }
 0x1ab   : > { %8133 = vmatmul.msk.bf16.gmra.mxu1 %vm1622_vm2, %v9390_v38  ;;  %v10123_v50 = vunpack.c.l.b16 %v2666_v46 }
 0x1ac   : > { %13123 = vst [vmem:[#allocation11_spill] sm:$0xff] %v10117_v44  ;;  %8229 = vmatmul.msk.bf16.gmra.mxu3 %vm1622_vm2, %v9486_v43 }
 0x1af   : > { %v2512_v47 = vpop.f32.mrf.mxu3 }
 0x1b0   : > { %v2034_v48 = vpop.f32.mrf.mxu1  ;;  %v2858_v52 = vpack.c.bf16 %v2512_v47, %v2512_v47 }
 0x1b1   : > { %v2667_v49 = vpack.c.bf16 %v2034_v48, %v2034_v48 }
 0x1b2   : > { %v10136_v58 = vunpack.c.l.b16 %v2858_v52 }
 0x1b3   : > { %v10125_v51 = vunpack.c.l.b16 %v2667_v49 }
 0x1b4   : > { %13124 = vst [vmem:[#allocation12_spill] sm:$0xff] %v10136_v58 }
 0x1b7   : > { %v2514_v56 = vpop.f32.mrf.mxu3 }
 0x1b8   : > { %v2037_v57 = vpop.f32.mrf.mxu1  ;;  %v2859_v59 = vpack.c.bf16 %v2514_v56, %v2514_v56  ;;  %v9475_v56 = vld [vmem:[%s13119_s29 + $0x2f8] sm:$0xff] }
 0x1b9   : > { %v2668_v63 = vpack.c.bf16 %v2037_v57, %v2037_v57  ;;  %v9394_v57 = vld [vmem:[%s13119_s29 + $0x70] sm:$0xff]  ;;  %8218 = vmatmul.msk.bf16.gmra.mxu2 %vm1622_vm2, %v9475_v56 }
 0x1ba   : > { %v10141_v61 = vunpack.c.l.b16 %v2859_v59 }
 0x1bb   : > { %8134 = vmatmul.msk.bf16.gmra.mxu1 %vm1622_vm2, %v9391_v55  ;;  %v10147_v3 = vunpack.c.l.b16 %v2668_v63 }
 0x1bc   : > { %13125 = vst [vmem:[#allocation13_spill] sm:$0xff] %v10141_v61  ;;  %8230 = vmatmul.msk.bf16.gmra.mxu3 %vm1622_vm2, %v9487_v60 }
 0x1bf   : > { %v2517_v0 = vpop.f32.mrf.mxu3 }
 0x1c0   : > { %v2039_v1 = vpop.f32.mrf.mxu1  ;;  %v2860_v5 = vpack.c.bf16 %v2517_v0, %v2517_v0 }
 0x1c1   : > { %v2669_v2 = vpack.c.bf16 %v2039_v1, %v2039_v1  ;;  %v9490_v1 = vld [vmem:[%s13119_s29 + $0x370] sm:$0xff] }
 0x1c2   : > { %v10160_v11 = vunpack.c.l.b16 %v2860_v5 }
 0x1c3   : > { %v10149_v4 = vunpack.c.l.b16 %v2669_v2 }
 0x1c4   : > { %13126 = vst [vmem:[#allocation14_spill] sm:$0xff] %v10160_v11 }
 0x1c7   : > { %v2519_v9 = vpop.f32.mrf.mxu3 }
 0x1c8   : > { %v2042_v10 = vpop.f32.mrf.mxu1  ;;  %v2861_v12 = vpack.c.bf16 %v2519_v9, %v2519_v9 }
 0x1c9   : > { %v2670_v18 = vpack.c.bf16 %v2042_v10, %v2042_v10 }
 0x1ca   : > { %v10165_v14 = vunpack.c.l.b16 %v2861_v12 }
 0x1cb   : > { %8135 = vmatmul.msk.bf16.gmra.mxu1 %vm1622_vm2, %v9392_v8  ;;  %v10171_v23 = vunpack.c.l.b16 %v2670_v18  ;;  %v9509_v18 = vld [vmem:[%s13132_s4 + $0x8] sm:$0xff] }
 0x1cc   : > { %13127 = vst [vmem:[#allocation15_spill] sm:$0xff] %v10165_v14  ;;  %8231 = vmatmul.msk.bf16.gmra.mxu3 %vm1622_vm2, %v9488_v13  ;;  %3000 = vmatpush.bf16.msra.mxu2 %v9509_v18 }
 0x1cf   : > { %v2522_v20 = vpop.f32.mrf.mxu3 }
 0x1d0   : > { %v2044_v21 = vpop.f32.mrf.mxu1  ;;  %v2862_v26 = vpack.c.bf16 %v2522_v20, %v2522_v20 }
 0x1d1   : > { %v2671_v22 = vpack.c.bf16 %v2044_v21, %v2044_v21 }
 0x1d2   : > { %v10184_v37 = vunpack.c.l.b16 %v2862_v26 }
 0x1d3   : > { %v10173_v25 = vunpack.c.l.b16 %v2671_v22  ;;  %v9395_v22 = vld [vmem:[%s13119_s29 + $0x78] sm:$0xff] }
 0x1d4   : > { %13128 = vst [vmem:[#allocation16_spill] sm:$0xff] %v10184_v37 }
 0x1d7   : > { %v2524_v32 = vpop.f32.mrf.mxu3 }
 0x1d8   : > { %v2047_v35 = vpop.f32.mrf.mxu1  ;;  %v2863_v38 = vpack.c.bf16 %v2524_v32, %v2524_v32 }
 0x1d9   : > { %v2672_v43 = vpack.c.bf16 %v2047_v35, %v2047_v35  ;;  %v9491_v35 = vld [vmem:[%s13119_s29 + $0x378] sm:$0xff] }
 0x1da   : > { %v10189_v40 = vunpack.c.l.b16 %v2863_v38 }
 0x1db   : > { %8136 = vmatmul.msk.bf16.gmra.mxu1 %vm1622_vm2, %v9393_v31  ;;  %v10195_v49 = vunpack.c.l.b16 %v2672_v43 }
 0x1dc   : > { %13129 = vst [vmem:[#allocation17_spill] sm:$0xff] %v10189_v40  ;;  %8232 = vmatmul.msk.bf16.gmra.mxu3 %vm1622_vm2, %v9489_v39 }
 0x1df   : > { %v2527_v46 = vpop.f32.mrf.mxu3 }
 0x1e0   : > { %v2049_v47 = vpop.f32.mrf.mxu1  ;;  %v2864_v54 = vpack.c.bf16 %v2527_v46, %v2527_v46 }
 0x1e1   : > { %v2673_v48 = vpack.c.bf16 %v2049_v47, %v2049_v47 }
 0x1e2   : > { %v10208_v63 = vunpack.c.l.b16 %v2864_v54 }
 0x1e3   : > { %v10197_v52 = vunpack.c.l.b16 %v2673_v48 }
 0x1e4   : > { %13130 = vst [vmem:[#allocation18_spill] sm:$0xff] %v10208_v63 }
 0x1e7   : > { %v2529_v59 = vpop.f32.mrf.mxu3 }
 0x1e8   : > { %v2052_v60 = vpop.f32.mrf.mxu1  ;;  %v2865_v0 = vpack.c.bf16 %v2529_v59, %v2529_v59 }
 0x1e9   : > { %v2674_v7 = vpack.c.bf16 %v2052_v60, %v2052_v60  ;;  %v9396_v60 = vld [vmem:[%s13119_s29 + $0x80] sm:$0xff] }
 0x1ea   : > { %v10213_v2 = vunpack.c.l.b16 %v2865_v0 }
 0x1eb   : > { %8137 = vmatmul.msk.bf16.gmra.mxu1 %vm1622_vm2, %v9394_v57  ;;  %v10219_v12 = vunpack.c.l.b16 %v2674_v7 }
 0x1ec   : > { %13131 = vst [vmem:[#allocation19_spill] sm:$0xff] %v10213_v2  ;;  %8233 = vmatmul.msk.bf16.gmra.mxu3 %vm1622_vm2, %v9490_v1 }
 0x1ef   : > { %v2532_v8 = vpop.f32.mrf.mxu3 }
 0x1f0   : > { %v2054_v9 = vpop.f32.mrf.mxu1  ;;  %v2866_v20 = vpack.c.bf16 %v2532_v8, %v2532_v8 }
 0x1f1   : > { %v2675_v10 = vpack.c.bf16 %v2054_v9, %v2054_v9  ;;  %v9492_v9 = vld [vmem:[%s13119_s29 + $0x380] sm:$0xff] }
 0x1f2   : > { %v10231_v31 = vunpack.c.l.b16 %v2866_v20 }
 0x1f3   : > { %v10221_v13 = vunpack.c.l.b16 %v2675_v10 }
 0x1f4   : > { %13133 = vst [vmem:[#allocation20_spill] sm:$0xff] %v10231_v31 }
 0x1f7   : > { %v2534_v26 = vpop.f32.mrf.mxu3 }
 0x1f8   : > { %v2057_v30 = vpop.f32.mrf.mxu1  ;;  %v2867_v32 = vpack.c.bf16 %v2534_v26, %v2534_v26 }
 0x1f9   : > { %v2676_v43 = vpack.c.bf16 %v2057_v30, %v2057_v30 }
 0x1fa   : > { %v10236_v38 = vunpack.c.l.b16 %v2867_v32 }
 0x1fb   : > { %8138 = vmatmul.msk.bf16.gmra.mxu1 %vm1622_vm2, %v9395_v22  ;;  %v10242_v54 = vunpack.c.l.b16 %v2676_v43 }
 0x1fc   : > { %13134 = vst [vmem:[#allocation21_spill] sm:$0xff] %v10236_v38  ;;  %8234 = vmatmul.msk.bf16.gmra.mxu3 %vm1622_vm2, %v9491_v35 }
 0x1ff   : > { %v2537_v46 = vpop.f32.mrf.mxu3 }
 0x200   : > { %v2059_v47 = vpop.f32.mrf.mxu1  ;;  %v2868_v57 = vpack.c.bf16 %v2537_v46, %v2537_v46 }
 0x201   : > { %v2677_v48 = vpack.c.bf16 %v2059_v47, %v2059_v47  ;;  %v9397_v47 = vld [vmem:[%s13119_s29 + $0x88] sm:$0xff] }
 0x202   : > { %v10251_v7 = vunpack.c.l.b16 %v2868_v57 }
 0x203   : > { %v10244_v56 = vunpack.c.l.b16 %v2677_v48 }
 0x204   : > { %13135 = vst [vmem:[#allocation22_spill] sm:$0xff] %v10251_v7 }
 0x207   : > { %v2539_v0 = vpop.f32.mrf.mxu3 }
 0x208   : > { %v2062_v1 = vpop.f32.mrf.mxu1  ;;  %v2869_v8 = vpack.c.bf16 %v2539_v0, %v2539_v0 }
 0x209   : > { %v2678_v20 = vpack.c.bf16 %v2062_v1, %v2062_v1  ;;  %v9493_v1 = vld [vmem:[%s13119_s29 + $0x388] sm:$0xff] }
 0x20a   : > { %v10256_v10 = vunpack.c.l.b16 %v2869_v8  ;;  %v10271_v8 = vpop.f32.mrf.mxu2 }
 0x20b   : > { %8139 = vmatmul.msk.bf16.gmra.mxu1 %vm1622_vm2, %v9396_v60  ;;  %v2939_v32 = vunpack.c.l.b16 %v2678_v20  ;;  %13137 = vst [vmem:[#allocation24_spill] sm:$0xff] %v10271_v8 }
 0x20c   : > { %13136 = vst [vmem:[#allocation23_spill] sm:$0xff] %v10256_v10  ;;  %8235 = vmatmul.msk.bf16.gmra.mxu3 %vm1622_vm2, %v9492_v9 }
 0x20f   : > { %v2542_v22 = vpop.f32.mrf.mxu3 }
 0x210   : > { %v2064_v26 = vpop.f32.mrf.mxu1  ;;  %v2870_v43 = vpack.c.bf16 %v2542_v22, %v2542_v22 }
 0x211   : > { %v2679_v30 = vpack.c.bf16 %v2064_v26, %v2064_v26 }
 0x212   : > { %v10266_v60 = vunpack.c.l.b16 %v2870_v43 }
 0x213   : > { %v2940_v35 = vunpack.c.l.b16 %v2679_v30 }
 0x215   : > { %v2955_v46 = vpack.c.b16 %v2940_v35, %v2939_v32  ;;  %v10279_v35 = vpop.f32.mrf.mxu2 }
 0x216   : > { %13138 = vst [vmem:[#allocation25_spill] sm:$0xff] %v10279_v35 }
 0x217   : > { %8257 = vmatmul.msk.bf16.vlgmr.msra.gmra.mxu2 %vm652_vm0, %v2955_v46  ;;  %v2544_v48 = vpop.f32.mrf.mxu3 }
 0x218   : > { %v2067_v57 = vpop.f32.mrf.mxu1  ;;  %v2871_v0 = vpack.c.bf16 %v2544_v48, %v2544_v48 }
 0x219   : > { %v2680_v22 = vpack.c.bf16 %v2067_v57, %v2067_v57 }
 0x21a   : > { %v10273_v9 = vunpack.c.l.b16 %v2871_v0 }
 0x21b   : > { %8140 = vmatmul.msk.bf16.gmra.mxu1 %vm1622_vm2, %v9397_v47  ;;  %v2941_v43 = vunpack.c.l.b16 %v2680_v22  ;;  %v9398_v47 = vld [vmem:[%s13119_s29 + $0x90] sm:$0xff] }
 0x21c   : > { %8236 = vmatmul.msk.bf16.gmra.mxu3 %vm1622_vm2, %v9493_v1  ;;  %v9494_v1 = vld [vmem:[%s13119_s29 + $0x390] sm:$0xff] }
 0x21d   : > { %v10296_v22 = vpop.f32.mrf.mxu2 }
 0x21e   : > { %13139 = vst [vmem:[#allocation26_spill] sm:$0xff] %v10296_v22 }
 0x21f   : > { %v2547_v26 = vpop.f32.mrf.mxu3 }
 0x220   : > { %v2069_v30 = vpop.f32.mrf.mxu1  ;;  %v2872_v48 = vpack.c.bf16 %v2547_v26, %v2547_v26 }
 0x221   : > { %v2681_v32 = vpack.c.bf16 %v2069_v30, %v2069_v30 }
 0x222   : > { %v10285_v5 = vunpack.c.l.b16 %v2872_v48 }
 0x223   : > { %v2942_v46 = vunpack.c.l.b16 %v2681_v32 }
 0x225   : > { %v2956_v18 = vpack.c.b16 %v2942_v46, %v2941_v43  ;;  %v10298_v62 = vpop.f32.mrf.mxu2 }
 0x226   : > { %13140 = vst [vmem:[#allocation27_spill] sm:$0xff] %v10298_v62 }
 0x227   : > { %8258 = vmatmul.msk.bf16.gmra.mxu2 %vm652_vm0, %v2956_v18  ;;  %v2549_v0 = vpop.f32.mrf.mxu3 }
 0x228   : > { %v2072_v39 = vpop.f32.mrf.mxu1  ;;  %v2873_v57 = vpack.c.bf16 %v2549_v0, %v2549_v0 }
 0x229   : > { %v2682_v26 = vpack.c.bf16 %v2072_v39, %v2072_v39 }
 0x22a   : > { %v10290_v30 = vunpack.c.l.b16 %v2873_v57 }
 0x22b   : > { %8141 = vmatmul.msk.bf16.gmra.mxu1 %vm1622_vm2, %v9398_v47  ;;  %v2943_v48 = vunpack.c.l.b16 %v2682_v26  ;;  %v9399_v47 = vld [vmem:[%s13119_s29 + $0x98] sm:$0xff] }
 0x22c   : > { %8237 = vmatmul.msk.bf16.gmra.mxu3 %vm1622_vm2, %v9494_v1  ;;  %v9495_v26 = vld [vmem:[%s13119_s29 + $0x398] sm:$0xff] }
 0x22f   : > { %v2552_v32 = vpop.f32.mrf.mxu3 }
 0x230   : > { %v2074_v43 = vpop.f32.mrf.mxu1  ;;  %v2874_v42 = vpack.c.bf16 %v2552_v32, %v2552_v32 }
 0x231   : > { %v2683_v46 = vpack.c.bf16 %v2074_v43, %v2074_v43 }
 0x232   : > { %v10304_v45 = vunpack.c.l.b16 %v2874_v42 }
 0x233   : > { %v2944_v0 = vunpack.c.l.b16 %v2683_v46 }
 0x235   : > { %v2957_v15 = vpack.c.b16 %v2944_v0, %v2943_v48  ;;  %v10315_v0 = vpop.f32.mrf.mxu2 }
 0x237   : > { %8259 = vmatmul.msk.bf16.gmra.mxu2 %vm652_vm0, %v2957_v15  ;;  %v2554_v57 = vpop.f32.mrf.mxu3 }
 0x238   : > { %v2077_v1 = vpop.f32.mrf.mxu1  ;;  %v2875_v39 = vpack.c.bf16 %v2554_v57, %v2554_v57 }
 0x239   : > { %v2684_v32 = vpack.c.bf16 %v2077_v1, %v2077_v1 }
 0x23a   : > { %v10309_v43 = vunpack.c.l.b16 %v2875_v39 }
 0x23b   : > { %8142 = vmatmul.msk.bf16.gmra.mxu1 %vm1622_vm2, %v9399_v47  ;;  %v2945_v57 = vunpack.c.l.b16 %v2684_v32  ;;  %v9400_v47 = vld [vmem:[%s13119_s29 + $0xa0] sm:$0xff] }
 0x23c   : > { %8238 = vmatmul.msk.bf16.gmra.mxu3 %vm1622_vm2, %v9495_v26  ;;  %v9496_v26 = vld [vmem:[%s13119_s29 + $0x3a0] sm:$0xff] }
 0x23d   : > { %v10328_v32 = vpop.f32.mrf.mxu2 }
 0x23f   : > { %v2557_v46 = vpop.f32.mrf.mxu3 }
 0x240   : > { %v2079_v48 = vpop.f32.mrf.mxu1  ;;  %v2876_v18 = vpack.c.bf16 %v2557_v46, %v2557_v46 }
 0x241   : > { %v2685_v42 = vpack.c.bf16 %v2079_v48, %v2079_v48 }
 0x242   : > { %v10321_v59 = vunpack.c.l.b16 %v2876_v18 }
 0x243   : > { %v2946_v28 = vunpack.c.l.b16 %v2685_v42 }
 0x245   : > { %v2958_v20 = vpack.c.b16 %v2946_v28, %v2945_v57  ;;  %v10334_v55 = vpop.f32.mrf.mxu2 }
 0x247   : > { %8260 = vmatmul.msk.bf16.gmra.mxu2 %vm652_vm0, %v2958_v20  ;;  %v2559_v39 = vpop.f32.mrf.mxu3 }
 0x248   : > { %v2082_v15 = vpop.f32.mrf.mxu1  ;;  %v2877_v1 = vpack.c.bf16 %v2559_v39, %v2559_v39 }
 0x249   : > { %v2686_v20 = vpack.c.bf16 %v2082_v15, %v2082_v15 }
 0x24a   : > { %v10326_v48 = vunpack.c.l.b16 %v2877_v1 }
 0x24b   : > { %8143 = vmatmul.msk.bf16.gmra.mxu1 %vm1622_vm2, %v9400_v47  ;;  %v2947_v57 = vunpack.c.l.b16 %v2686_v20  ;;  %v9401_v47 = vld [vmem:[%s13119_s29 + $0xa8] sm:$0xff] }
 0x24c   : > { %8239 = vmatmul.msk.bf16.gmra.mxu3 %vm1622_vm2, %v9496_v26  ;;  %v9497_v26 = vld [vmem:[%s13119_s29 + $0x3a8] sm:$0xff] }
 0x24f   : > { %v2562_v46 = vpop.f32.mrf.mxu3 }
 0x250   : > { %v2084_v18 = vpop.f32.mrf.mxu1  ;;  %v2878_v21 = vpack.c.bf16 %v2562_v46, %v2562_v46 }
 0x251   : > { %v2687_v42 = vpack.c.bf16 %v2084_v18, %v2084_v18  ;;  %v10351_v18 = vpop.f32.mrf.mxu2 }
 0x252   : > { %v10340_v6 = vunpack.c.l.b16 %v2878_v21 }
 0x253   : > { %v2948_v39 = vunpack.c.l.b16 %v2687_v42 }
 0x255   : > { %v2959_v1 = vpack.c.b16 %v2948_v39, %v2947_v57 }
 0x257   : > { %8261 = vmatmul.msk.bf16.gmra.mxu2 %vm652_vm0, %v2959_v1  ;;  %v2564_v29 = vpop.f32.mrf.mxu3 }
 0x258   : > { %v2087_v28 = vpop.f32.mrf.mxu1  ;;  %v2879_v15 = vpack.c.bf16 %v2564_v29, %v2564_v29 }
 0x259   : > { %v2688_v42 = vpack.c.bf16 %v2087_v28, %v2087_v28  ;;  %v9498_v28 = vld [vmem:[%s13119_s29 + $0x3b0] sm:$0xff] }
 0x25a   : > { %v10345_v20 = vunpack.c.l.b16 %v2879_v15 }
 0x25b   : > { %8144 = vmatmul.msk.bf16.gmra.mxu1 %vm1622_vm2, %v9401_v47  ;;  %v2949_v29 = vunpack.c.l.b16 %v2688_v42  ;;  %v9402_v47 = vld [vmem:[%s13119_s29 + $0xb0] sm:$0xff] }
 0x25c   : > { %8240 = vmatmul.msk.bf16.gmra.mxu3 %vm1622_vm2, %v9497_v26 }
 0x25f   : > { %v2567_v57 = vpop.f32.mrf.mxu3 }
 0x260   : > { %v2089_v21 = vpop.f32.mrf.mxu1  ;;  %v2880_v53 = vpack.c.bf16 %v2567_v57, %v2567_v57 }
 0x261   : > { %v2689_v39 = vpack.c.bf16 %v2089_v21, %v2089_v21  ;;  %v10362_v21 = vpop.f32.mrf.mxu2 }
 0x262   : > { %v10357_v19 = vunpack.c.l.b16 %v2880_v53 }
 0x263   : > { %v2950_v1 = vunpack.c.l.b16 %v2689_v39 }
 0x265   : > { %v2960_v36 = vpack.c.b16 %v2950_v1, %v2949_v29 }
 0x267   : > { %8262 = vmatmul.msk.bf16.gmra.mxu2 %vm652_vm0, %v2960_v36  ;;  %v2569_v15 = vpop.f32.mrf.mxu3 }
 0x268   : > { %v2092_v46 = vpop.f32.mrf.mxu1  ;;  %v2881_v26 = vpack.c.bf16 %v2569_v15, %v2569_v15 }
 0x269   : > { %v2690_v57 = vpack.c.bf16 %v2092_v46, %v2092_v46  ;;  %v10370_v1 = vpop.f32.mrf.mxu2 }
 0x26a   : > { %v10364_v42 = vunpack.c.l.b16 %v2881_v26 }
 0x26b   : > { %8145 = vmatmul.msk.bf16.gmra.mxu1 %vm1622_vm2, %v9402_v47  ;;  %v2951_v15 = vunpack.c.l.b16 %v2690_v57  ;;  %v9403_v47 = vld [vmem:[%s13119_s29 + $0xb8] sm:$0xff] }
 0x26c   : > { %8241 = vmatmul.msk.bf16.gmra.mxu3 %vm1622_vm2, %v9498_v28  ;;  %v9499_v28 = vld [vmem:[%s13119_s29 + $0x3b8] sm:$0xff] }
 0x26f   : > { %v2572_v39 = vpop.f32.mrf.mxu3 }
 0x270   : > { %v2094_v53 = vpop.f32.mrf.mxu1  ;;  %v2882_v22 = vpack.c.bf16 %v2572_v39, %v2572_v39 }
 0x271   : > { %v2691_v29 = vpack.c.bf16 %v2094_v53, %v2094_v53 }
 0x272   : > { %v10376_v8 = vunpack.c.l.b16 %v2882_v22 }
 0x273   : > { %v2952_v62 = vunpack.c.l.b16 %v2691_v29 }
 0x275   : > { %v2961_v35 = vpack.c.b16 %v2952_v62, %v2951_v15 }
 0x277   : > { %8263 = vmatmul.msk.bf16.gmra.mxu2 %vm652_vm0, %v2961_v35  ;;  %v2574_v26 = vpop.f32.mrf.mxu3  ;;  %v10387_v35 = vpop.f32.mrf.mxu2 }
 0x278   : > { %v2097_v36 = vpop.f32.mrf.mxu1  ;;  %v2883_v46 = vpack.c.bf16 %v2574_v26, %v2574_v26 }
 0x279   : > { %v2692_v57 = vpack.c.bf16 %v2097_v36, %v2097_v36 }
 0x27a   : > { %v10381_v53 = vunpack.c.l.b16 %v2883_v46 }
 0x27b   : > { %8146 = vmatmul.msk.bf16.gmra.mxu1 %vm1622_vm2, %v9403_v47  ;;  %v2953_v15 = vunpack.c.l.b16 %v2692_v57  ;;  %v9404_v47 = vld [vmem:[%s13119_s29 + $0xc0] sm:$0xff] }
 0x27c   : > { %8242 = vmatmul.msk.bf16.gmra.mxu3 %vm1622_vm2, %v9499_v28  ;;  %v9500_v57 = vld [vmem:[%s13119_s29 + $0x3c0] sm:$0xff] }
 0x27f   : > { %v2577_v39 = vpop.f32.mrf.mxu3  ;;  %v10389_v31 = vpop.f32.mrf.mxu2 }
 0x280   : > { %v2099_v22 = vpop.f32.mrf.mxu1  ;;  %v2884_v7 = vpack.c.bf16 %v2577_v39, %v2577_v39 }
 0x281   : > { %v2693_v29 = vpack.c.bf16 %v2099_v22, %v2099_v22 }
 0x282   : > { %v10395_v62 = vunpack.c.l.b16 %v2884_v7 }
 0x283   : > { %v2954_v26 = vunpack.c.l.b16 %v2693_v29 }
 0x285   : > { %v2962_v10 = vpack.c.b16 %v2954_v26, %v2953_v15 }
 0x287   : > { %8264 = vmatmul.msk.bf16.gmra.mxu2 %vm652_vm0, %v2962_v10  ;;  %v2579_v46 = vpop.f32.mrf.mxu3 }
 0x288   : > { %v2102_v28 = vpop.f32.mrf.mxu1  ;;  %v2885_v36 = vpack.c.bf16 %v2579_v46, %v2579_v46 }
 0x289   : > { %v2694_v39 = vpack.c.bf16 %v2102_v28, %v2102_v28 }
 0x28a   : > { %v10400_v22 = vunpack.c.l.b16 %v2885_v36 }
 0x28b   : > { %8147 = vmatmul.msk.bf16.gmra.mxu1 %vm1622_vm2, %v9404_v47  ;;  %v10406_v7 = vunpack.c.l.b16 %v2694_v39  ;;  %v9405_v47 = vld [vmem:[%s13119_s29 + $0xc8] sm:$0xff] }
 0x28c   : > { %8243 = vmatmul.msk.bf16.gmra.mxu3 %vm1622_vm2, %v9500_v57  ;;  %v9501_v57 = vld [vmem:[%s13119_s29 + $0x3c8] sm:$0xff] }
 0x28d   : > { %13141 = vst [vmem:[#allocation28_spill] sm:$0xff] %v10406_v7 }
 0x28f   : > { %v2582_v29 = vpop.f32.mrf.mxu3 }
 0x290   : > { %v2104_v15 = vpop.f32.mrf.mxu1  ;;  %v2886_v38 = vpack.c.bf16 %v2582_v29, %v2582_v29 }
 0x291   : > { %v2695_v26 = vpack.c.bf16 %v2104_v15, %v2104_v15 }
 0x292   : > { %v10415_v2 = vunpack.c.l.b16 %v2886_v38 }
 0x293   : > { %v10408_v46 = vunpack.c.l.b16 %v2695_v26 }
 0x294   : > { %13142 = vst [vmem:[#allocation29_spill] sm:$0xff] %v10415_v2 }
 0x297   : > { %v2584_v63 = vpop.f32.mrf.mxu3 }
 0x298   : > { %v2107_v10 = vpop.f32.mrf.mxu1  ;;  %v2887_v28 = vpack.c.bf16 %v2584_v63, %v2584_v63 }
 0x299   : > { %v2696_v15 = vpack.c.bf16 %v2107_v10, %v2107_v10 }
 0x29a   : > { %v10420_v39 = vunpack.c.l.b16 %v2887_v28 }
 0x29b   : > { %8148 = vmatmul.msk.bf16.gmra.mxu1 %vm1622_vm2, %v9405_v47  ;;  %v10426_v38 = vunpack.c.l.b16 %v2696_v15  ;;  %v9406_v47 = vld [vmem:[%s13119_s29 + $0xd0] sm:$0xff] }
 0x29c   : > { %13143 = vst [vmem:[#allocation30_spill] sm:$0xff] %v10420_v39  ;;  %8244 = vmatmul.msk.bf16.gmra.mxu3 %vm1622_vm2, %v9501_v57 }
 0x29d   : > { %13144 = vst [vmem:[#allocation31_spill] sm:$0xff] %v10426_v38 }
 0x29f   : > { %v2587_v26 = vpop.f32.mrf.mxu3 }
 0x2a0   : > { %v2109_v36 = vpop.f32.mrf.mxu1  ;;  %v2888_v40 = vpack.c.bf16 %v2587_v26, %v2587_v26 }
 0x2a1   : > { %v2697_v37 = vpack.c.bf16 %v2109_v36, %v2109_v36  ;;  %v9502_v36 = vld [vmem:[%s13119_s29 + $0x3d0] sm:$0xff] }
 0x2a2   : > { %v10435_v2 = vunpack.c.l.b16 %v2888_v40 }
 0x2a3   : > { %v10428_v63 = vunpack.c.l.b16 %v2697_v37 }
 0x2a4   : > { %13146 = vst [vmem:[#allocation33_spill] sm:$0xff] %v10435_v2 }
 0x2a5   : > { %13145 = vst [vmem:[#allocation32_spill] sm:$0xff] %v10428_v63 }
 0x2a7   : > { %v2589_v11 = vpop.f32.mrf.mxu3 }
 0x2a8   : > { %v2112_v29 = vpop.f32.mrf.mxu1  ;;  %v2889_v10 = vpack.c.bf16 %v2589_v11, %v2589_v11 }
 0x2a9   : > { %v2698_v15 = vpack.c.bf16 %v2112_v29, %v2112_v29 }
 0x2aa   : > { %v10440_v57 = vunpack.c.l.b16 %v2889_v10 }
 0x2ab   : > { %8149 = vmatmul.msk.bf16.gmra.mxu1 %vm1622_vm2, %v9406_v47  ;;  %v10446_v40 = vunpack.c.l.b16 %v2698_v15  ;;  %v9407_v47 = vld [vmem:[%s13119_s29 + $0xd8] sm:$0xff] }
 0x2ac   : > { %13147 = vst [vmem:[#allocation34_spill] sm:$0xff] %v10440_v57  ;;  %8245 = vmatmul.msk.bf16.gmra.mxu3 %vm1622_vm2, %v9502_v36 }
 0x2ad   : > { %13148 = vst [vmem:[#allocation35_spill] sm:$0xff] %v10446_v40 }
 0x2af   : > { %v2592_v26 = vpop.f32.mrf.mxu3 }
 0x2b0   : > { %v2114_v28 = vpop.f32.mrf.mxu1  ;;  %v2890_v14 = vpack.c.bf16 %v2592_v26, %v2592_v26 }
 0x2b1   : > { %v2699_v39 = vpack.c.bf16 %v2114_v28, %v2114_v28  ;;  %v9503_v28 = vld [vmem:[%s13119_s29 + $0x3d8] sm:$0xff] }
 0x2b2   : > { %v10455_v2 = vunpack.c.l.b16 %v2890_v14 }
 0x2b3   : > { %v10448_v11 = vunpack.c.l.b16 %v2699_v39 }
 0x2b4   : > { %13150 = vst [vmem:[#allocation37_spill] sm:$0xff] %v10455_v2 }
 0x2b5   : > { %13149 = vst [vmem:[#allocation36_spill] sm:$0xff] %v10448_v11 }
 0x2b7   : > { %v2594_v58 = vpop.f32.mrf.mxu3 }
 0x2b8   : > { %v2117_v37 = vpop.f32.mrf.mxu1  ;;  %v2891_v29 = vpack.c.bf16 %v2594_v58, %v2594_v58 }
 0x2b9   : > { %v2700_v15 = vpack.c.bf16 %v2117_v37, %v2117_v37 }
 0x2ba   : > { %v10460_v36 = vunpack.c.l.b16 %v2891_v29 }
 0x2bb   : > { %8150 = vmatmul.msk.bf16.gmra.mxu1 %vm1622_vm2, %v9407_v47  ;;  %v10466_v14 = vunpack.c.l.b16 %v2700_v15  ;;  %v9408_v47 = vld [vmem:[%s13119_s29 + $0xe0] sm:$0xff] }
 0x2bc   : > { %13151 = vst [vmem:[#allocation38_spill] sm:$0xff] %v10460_v36  ;;  %8246 = vmatmul.msk.bf16.gmra.mxu3 %vm1622_vm2, %v9503_v28 }
 0x2bd   : > { %13152 = vst [vmem:[#allocation39_spill] sm:$0xff] %v10466_v14 }
 0x2bf   : > { %v2597_v26 = vpop.f32.mrf.mxu3 }
 0x2c0   : > { %v2119_v10 = vpop.f32.mrf.mxu1  ;;  %v2892_v61 = vpack.c.bf16 %v2597_v26, %v2597_v26 }
 0x2c1   : > { %v2701_v57 = vpack.c.bf16 %v2119_v10, %v2119_v10  ;;  %v9504_v10 = vld [vmem:[%s13119_s29 + $0x3e0] sm:$0xff] }
 0x2c2   : > { %v10475_v2 = vunpack.c.l.b16 %v2892_v61 }
 0x2c3   : > { %v10468_v58 = vunpack.c.l.b16 %v2701_v57 }
 0x2c4   : > { %13154 = vst [vmem:[#allocation41_spill] sm:$0xff] %v10475_v2 }
 0x2c5   : > { %13153 = vst [vmem:[#allocation40_spill] sm:$0xff] %v10468_v58 }
 0x2c7   : > { %v2599_v40 = vpop.f32.mrf.mxu3 }
 0x2c8   : > { %v2122_v39 = vpop.f32.mrf.mxu1  ;;  %v2893_v37 = vpack.c.bf16 %v2599_v40, %v2599_v40 }
 0x2c9   : > { %v2702_v15 = vpack.c.bf16 %v2122_v39, %v2122_v39 }
 0x2ca   : > { %v10480_v28 = vunpack.c.l.b16 %v2893_v37 }
 0x2cb   : > { %8151 = vmatmul.msk.bf16.gmra.mxu1 %vm1622_vm2, %v9408_v47  ;;  %v10486_v61 = vunpack.c.l.b16 %v2702_v15  ;;  %v9409_v47 = vld [vmem:[%s13119_s29 + $0xe8] sm:$0xff] }
 0x2cc   : > { %13155 = vst [vmem:[#allocation42_spill] sm:$0xff] %v10480_v28  ;;  %8247 = vmatmul.msk.bf16.gmra.mxu3 %vm1622_vm2, %v9504_v10 }
 0x2cd   : > { %13156 = vst [vmem:[#allocation43_spill] sm:$0xff] %v10486_v61 }
 0x2cf   : > { %v2602_v26 = vpop.f32.mrf.mxu3 }
 0x2d0   : > { %v2124_v29 = vpop.f32.mrf.mxu1  ;;  %v2894_v14 = vpack.c.bf16 %v2602_v26, %v2602_v26 }
 0x2d1   : > { %v2703_v36 = vpack.c.bf16 %v2124_v29, %v2124_v29  ;;  %v9505_v29 = vld [vmem:[%s13119_s29 + $0x3e8] sm:$0xff] }
 0x2d2   : > { %v10495_v2 = vunpack.c.l.b16 %v2894_v14 }
 0x2d3   : > { %v10488_v40 = vunpack.c.l.b16 %v2703_v36 }
 0x2d4   : > { %13158 = vst [vmem:[#allocation45_spill] sm:$0xff] %v10495_v2 }
 0x2d5   : > { %13157 = vst [vmem:[#allocation44_spill] sm:$0xff] %v10488_v40 }
 0x2d7   : > { %v2604_v58 = vpop.f32.mrf.mxu3 }
 0x2d8   : > { %v2127_v57 = vpop.f32.mrf.mxu1  ;;  %v2895_v39 = vpack.c.bf16 %v2604_v58, %v2604_v58 }
 0x2d9   : > { %v2704_v15 = vpack.c.bf16 %v2127_v57, %v2127_v57 }
 0x2da   : > { %v10500_v10 = vunpack.c.l.b16 %v2895_v39 }
 0x2db   : > { %8152 = vmatmul.msk.bf16.gmra.mxu1 %vm1622_vm2, %v9409_v47  ;;  %v10506_v14 = vunpack.c.l.b16 %v2704_v15  ;;  %v9410_v47 = vld [vmem:[%s13119_s29 + $0xf0] sm:$0xff] }
 0x2dc   : > { %13159 = vst [vmem:[#allocation46_spill] sm:$0xff] %v10500_v10  ;;  %8248 = vmatmul.msk.bf16.gmra.mxu3 %vm1622_vm2, %v9505_v29 }
 0x2dd   : > { %13160 = vst [vmem:[#allocation47_spill] sm:$0xff] %v10506_v14 }
 0x2df   : > { %v2607_v26 = vpop.f32.mrf.mxu3 }
 0x2e0   : > { %v2129_v37 = vpop.f32.mrf.mxu1  ;;  %v2896_v61 = vpack.c.bf16 %v2607_v26, %v2607_v26 }
 0x2e1   : > { %v2705_v28 = vpack.c.bf16 %v2129_v37, %v2129_v37  ;;  %v9506_v37 = vld [vmem:[%s13119_s29 + $0x3f0] sm:$0xff] }
 0x2e2   : > { %v10515_v2 = vunpack.c.l.b16 %v2896_v61 }
 0x2e3   : > { %v10508_v58 = vunpack.c.l.b16 %v2705_v28 }
 0x2e4   : > { %13162 = vst [vmem:[#allocation49_spill] sm:$0xff] %v10515_v2 }
 0x2e5   : > { %13161 = vst [vmem:[#allocation48_spill] sm:$0xff] %v10508_v58 }
 0x2e7   : > { %v2609_v40 = vpop.f32.mrf.mxu3 }
 0x2e8   : > { %v2132_v36 = vpop.f32.mrf.mxu1  ;;  %v2897_v57 = vpack.c.bf16 %v2609_v40, %v2609_v40 }
 0x2e9   : > { %v2706_v15 = vpack.c.bf16 %v2132_v36, %v2132_v36  ;;  %v9411_v36 = vld [vmem:[%s13119_s29 + $0xf8] sm:$0xff] }
 0x2ea   : > { %v10520_v29 = vunpack.c.l.b16 %v2897_v57  ;;  %v9511_v57 = vld [vmem:[%s13132_s4 + $0x18] sm:$0xff] }
 0x2eb   : > { %8153 = vmatmul.msk.bf16.gmra.mxu1 %vm1622_vm2, %v9410_v47  ;;  %v10526_v61 = vunpack.c.l.b16 %v2706_v15  ;;  %3125 = vmatpush.bf16.msrb.mxu3 %v9511_v57 }
 0x2ec   : > { %13163 = vst [vmem:[#allocation50_spill] sm:$0xff] %v10520_v29  ;;  %8249 = vmatmul.msk.bf16.gmra.mxu3 %vm1622_vm2, %v9506_v37 }
 0x2ed   : > { %13164 = vst [vmem:[#allocation51_spill] sm:$0xff] %v10526_v61 }
 0x2ef   : > { %v2612_v26 = vpop.f32.mrf.mxu3 }
 0x2f0   : > { %v2134_v39 = vpop.f32.mrf.mxu1  ;;  %v2898_v14 = vpack.c.bf16 %v2612_v26, %v2612_v26 }
 0x2f1   : > { %v2707_v10 = vpack.c.bf16 %v2134_v39, %v2134_v39 }
 0x2f2   : > { %v10538_v39 = vunpack.c.l.b16 %v2898_v14 }
 0x2f3   : > { %v10528_v40 = vunpack.c.l.b16 %v2707_v10  ;;  %v9507_v10 = vld [vmem:[%s13119_s29 + $0x3f8] sm:$0xff] }
 0x2f4   : > { %13166 = vst [vmem:[#allocation53_spill] sm:$0xff] %v10538_v39 }
 0x2f5   : > { %13165 = vst [vmem:[#allocation52_spill] sm:$0xff] %v10528_v40 }
 0x2f7   : > { %v2614_v37 = vpop.f32.mrf.mxu3 }
 0x2f8   : > { %v2137_v28 = vpop.f32.mrf.mxu1  ;;  %v2899_v15 = vpack.c.bf16 %v2614_v37, %v2614_v37 }
 0x2f9   : > { %v2708_v57 = vpack.c.bf16 %v2137_v28, %v2137_v28 }
 0x2fa   : > { %v10543_v2 = vunpack.c.l.b16 %v2899_v15 }
 0x2fb   : > { %8154 = vmatmul.msk.bf16.gmra.mxu1 %vm1622_vm2, %v9411_v36  ;;  %v10549_v14 = vunpack.c.l.b16 %v2708_v57  ;;  %v9412_v36 = vld [vmem:[%s13119_s29 + $0x100] sm:$0xff] }
 0x2fc   : > { %13167 = vst [vmem:[#allocation54_spill] sm:$0xff] %v10543_v2  ;;  %8250 = vmatmul.msk.bf16.gmra.mxu3 %vm1622_vm2, %v9507_v10 }
 0x2fd   : > { %13168 = vst [vmem:[#allocation55_spill] sm:$0xff] %v10549_v14 }
 0x2ff   : > { %v2617_v47 = vpop.f32.mrf.mxu3 }
 0x300   : > { %v2139_v29 = vpop.f32.mrf.mxu1  ;;  %v2900_v40 = vpack.c.bf16 %v2617_v47, %v2617_v47 }
 0x301   : > { %v2709_v61 = vpack.c.bf16 %v2139_v29, %v2139_v29 }
 0x302   : > { %v10558_v39 = vunpack.c.l.b16 %v2900_v40 }
 0x303   : > { %v10551_v37 = vunpack.c.l.b16 %v2709_v61 }
 0x304   : > { %13170 = vst [vmem:[#allocation57_spill] sm:$0xff] %v10558_v39 }
 0x305   : > { %13169 = vst [vmem:[#allocation56_spill] sm:$0xff] %v10551_v37 }
 0x307   : > { %v2619_v58 = vpop.f32.mrf.mxu3 }
 0x308   : > { %v2142_v26 = vpop.f32.mrf.mxu1  ;;  %v2901_v28 = vpack.c.bf16 %v2619_v58, %v2619_v58  ;;  %v9413_v58 = vld [vmem:[%s13119_s29 + $0x108] sm:$0xff] }
 0x309   : > { %v2710_v61 = vpack.c.bf16 %v2142_v26, %v2142_v26 }
 0x30a   : > { %v10560_v10 = vunpack.c.l.b16 %v2901_v28 }
 0x30b   : > { %8155 = vmatmul.msk.bf16.gmra.mxu1 %vm1622_vm2, %v9412_v36  ;;  %v3064_v2 = vunpack.c.l.b16 %v2710_v61 }
 0x30c   : > { %13171 = vst [vmem:[#allocation58_spill] sm:$0xff] %v10560_v10 }
 0x30f   : > { %v2622_v47 = vpop.f32.mrf.mxu3 }
 0x310   : > { %v2144_v57 = vpop.f32.mrf.mxu1  ;;  %v2902_v37 = vpack.c.bf16 %v2622_v47, %v2622_v47 }
 0x311   : > { %v2711_v15 = vpack.c.bf16 %v2144_v57, %v2144_v57 }
 0x312   : > { %v10569_v36 = vunpack.c.l.b16 %v2902_v37 }
 0x313   : > { %v3065_v14 = vunpack.c.l.b16 %v2711_v15 }
 0x314   : > { %13172 = vst [vmem:[#allocation59_spill] sm:$0xff] %v10569_v36 }
 0x315   : > { %v3080_v11 = vpack.c.b16 %v3065_v14, %v3064_v2 }
 0x317   : > { %8273 = vmatmul.msk.bf16.vlgmr.msrb.gmra.mxu3 %vm652_vm0, %v3080_v11  ;;  %v2624_v40 = vpop.f32.mrf.mxu3 }
 0x318   : > { %v2147_v28 = vpop.f32.mrf.mxu1  ;;  %v2903_v41 = vpack.c.bf16 %v2624_v40, %v2624_v40 }
 0x319   : > { %v2712_v15 = vpack.c.bf16 %v2147_v28, %v2147_v28 }
 0x31a   : > { %v10571_v29 = vunpack.c.l.b16 %v2903_v41  ;;  %v9414_v41 = vld [vmem:[%s13119_s29 + $0x110] sm:$0xff] }
 0x31b   : > { %8156 = vmatmul.msk.bf16.gmra.mxu1 %vm1622_vm2, %v9413_v58  ;;  %v3066_v61 = vunpack.c.l.b16 %v2712_v15 }
 0x31c   : > { %13173 = vst [vmem:[#allocation60_spill] sm:$0xff] %v10571_v29 }
 0x31f   : > { %v2627_v2 = vpop.f32.mrf.mxu3 }
 0x320   : > { %v2149_v14 = vpop.f32.mrf.mxu1  ;;  %v2904_v57 = vpack.c.bf16 %v2627_v2, %v2627_v2 }
 0x321   : > { %v2713_v11 = vpack.c.bf16 %v2149_v14, %v2149_v14 }
 0x322   : > { %v10580_v58 = vunpack.c.l.b16 %v2904_v57 }
 0x323   : > { %v3067_v47 = vunpack.c.l.b16 %v2713_v11 }
 0x324   : > { %13174 = vst [vmem:[#allocation61_spill] sm:$0xff] %v10580_v58 }
 0x325   : > { %v3081_v39 = vpack.c.b16 %v3067_v47, %v3066_v61 }
 0x327   : > { %8274 = vmatmul.msk.bf16.gmra.mxu3 %vm652_vm0, %v3081_v39  ;;  %v2629_v37 = vpop.f32.mrf.mxu3 }
 0x328   : > { %v2152_v40 = vpop.f32.mrf.mxu1  ;;  %v2905_v10 = vpack.c.bf16 %v2629_v37, %v2629_v37 }
 0x329   : > { %v2714_v15 = vpack.c.bf16 %v2152_v40, %v2152_v40 }
 0x32a   : > { %v10582_v26 = vunpack.c.l.b16 %v2905_v10  ;;  %v9415_v10 = vld [vmem:[%s13119_s29 + $0x118] sm:$0xff] }
 0x32b   : > { %8157 = vmatmul.msk.bf16.gmra.mxu1 %vm1622_vm2, %v9414_v41  ;;  %v3068_v11 = vunpack.c.l.b16 %v2714_v15 }
 0x32c   : > { %13175 = vst [vmem:[#allocation62_spill] sm:$0xff] %v10582_v26 }
 0x32f   : > { %v2632_v2 = vpop.f32.mrf.mxu3 }
 0x330   : > { %v2154_v14 = vpop.f32.mrf.mxu1  ;;  %v2906_v47 = vpack.c.bf16 %v2632_v2, %v2632_v2 }
 0x331   : > { %v2715_v39 = vpack.c.bf16 %v2154_v14, %v2154_v14 }
 0x332   : > { %v10591_v41 = vunpack.c.l.b16 %v2906_v47 }
 0x333   : > { %v3069_v61 = vunpack.c.l.b16 %v2715_v39 }
 0x334   : > { %13176 = vst [vmem:[#allocation63_spill] sm:$0xff] %v10591_v41 }
 0x335   : > { %v3082_v36 = vpack.c.b16 %v3069_v61, %v3068_v11 }
 0x337   : > { %8275 = vmatmul.msk.bf16.gmra.mxu3 %vm652_vm0, %v3082_v36  ;;  %v2634_v57 = vpop.f32.mrf.mxu3 }
 0x338   : > { %v2157_v37 = vpop.f32.mrf.mxu1  ;;  %v2907_v29 = vpack.c.bf16 %v2634_v57, %v2634_v57 }
 0x339   : > { %v2716_v15 = vpack.c.bf16 %v2157_v37, %v2157_v37 }
 0x33a   : > { %v10593_v28 = vunpack.c.l.b16 %v2907_v29  ;;  %v9416_v29 = vld [vmem:[%s13119_s29 + $0x120] sm:$0xff] }
 0x33b   : > { %8158 = vmatmul.msk.bf16.gmra.mxu1 %vm1622_vm2, %v9415_v10  ;;  %v3070_v39 = vunpack.c.l.b16 %v2716_v15 }
 0x33c   : > { %13177 = vst [vmem:[#allocation64_spill] sm:$0xff] %v10593_v28 }
 0x33f   : > { %v2637_v2 = vpop.f32.mrf.mxu3 }
 0x340   : > { %v2159_v14 = vpop.f32.mrf.mxu1  ;;  %v2908_v61 = vpack.c.bf16 %v2637_v2, %v2637_v2 }
 0x341   : > { %v2717_v36 = vpack.c.bf16 %v2159_v14, %v2159_v14 }
 0x342   : > { %v10602_v10 = vunpack.c.l.b16 %v2908_v61 }
 0x343   : > { %v3071_v11 = vunpack.c.l.b16 %v2717_v36 }
 0x344   : > { %13178 = vst [vmem:[#allocation65_spill] sm:$0xff] %v10602_v10 }
 0x345   : > { %v3083_v58 = vpack.c.b16 %v3071_v11, %v3070_v39  ;;  %v9417_v11 = vld [vmem:[%s13119_s29 + $0x128] sm:$0xff] }
 0x347   : > { %8276 = vmatmul.msk.bf16.gmra.mxu3 %vm652_vm0, %v3083_v58  ;;  %v2639_v47 = vpop.f32.mrf.mxu3 }
 0x348   : > { %v2162_v57 = vpop.f32.mrf.mxu1  ;;  %v2909_v26 = vpack.c.bf16 %v2639_v47, %v2639_v47 }
 0x349   : > { %v2718_v15 = vpack.c.bf16 %v2162_v57, %v2162_v57 }
 0x34a   : > { %v10604_v40 = vunpack.c.l.b16 %v2909_v26 }
 0x34b   : > { %8159 = vmatmul.msk.bf16.gmra.mxu1 %vm1622_vm2, %v9416_v29  ;;  %v3072_v58 = vunpack.c.l.b16 %v2718_v15  ;;  %v9418_v15 = vld [vmem:[%s13119_s29 + $0x130] sm:$0xff] }
 0x34c   : > { %13179 = vst [vmem:[#allocation66_spill] sm:$0xff] %v10604_v40 }
 0x350   : > { %v2164_v2 = vpop.f32.mrf.mxu1 }
 0x351   : > { %v2719_v14 = vpack.c.bf16 %v2164_v2, %v2164_v2 }
 0x353   : > { %v3073_v36 = vunpack.c.l.b16 %v2719_v14 }
 0x355   : > { %v3084_v39 = vpack.c.b16 %v3073_v36, %v3072_v58 }
 0x357   : > { %8277 = vmatmul.msk.bf16.gmra.mxu3 %vm652_vm0, %v3084_v39 }
 0x358   : > { %v2167_v61 = vpop.f32.mrf.mxu1 }
 0x359   : > { %v2720_v26 = vpack.c.bf16 %v2167_v61, %v2167_v61 }
 0x35b   : > { %8160 = vmatmul.msk.bf16.gmra.mxu1 %vm1622_vm2, %v9417_v11  ;;  %v3074_v41 = vunpack.c.l.b16 %v2720_v26 }
 0x360   : > { %v2169_v29 = vpop.f32.mrf.mxu1 }
 0x361   : > { %v2721_v47 = vpack.c.bf16 %v2169_v29, %v2169_v29 }
 0x363   : > { %v3075_v37 = vunpack.c.l.b16 %v2721_v47 }
 0x365   : > { %v3085_v57 = vpack.c.b16 %v3075_v37, %v3074_v41  ;;  %v9419_v41 = vld [vmem:[%s13119_s29 + $0x138] sm:$0xff] }
 0x367   : > { %8278 = vmatmul.msk.bf16.gmra.mxu3 %vm652_vm0, %v3085_v57 }
 0x368   : > { %v2172_v2 = vpop.f32.mrf.mxu1 }
 0x369   : > { %v2722_v14 = vpack.c.bf16 %v2172_v2, %v2172_v2 }
 0x36b   : > { %8161 = vmatmul.msk.bf16.gmra.mxu1 %vm1622_vm2, %v9418_v15  ;;  %v3076_v39 = vunpack.c.l.b16 %v2722_v14  ;;  %v9420_v14 = vld [vmem:[%s13119_s29 + $0x140] sm:$0xff] }
 0x370   : > { %v2174_v58 = vpop.f32.mrf.mxu1 }
 0x371   : > { %v2723_v36 = vpack.c.bf16 %v2174_v58, %v2174_v58 }
 0x373   : > { %v3077_v11 = vunpack.c.l.b16 %v2723_v36 }
 0x375   : > { %v3086_v61 = vpack.c.b16 %v3077_v11, %v3076_v39 }
 0x377   : > { %8279 = vmatmul.msk.bf16.gmra.mxu3 %vm652_vm0, %v3086_v61 }
 0x378   : > { %v2177_v37 = vpop.f32.mrf.mxu1 }
 0x379   : > { %v2724_v26 = vpack.c.bf16 %v2177_v37, %v2177_v37 }
 0x37b   : > { %8162 = vmatmul.msk.bf16.gmra.mxu1 %vm1622_vm2, %v9419_v41  ;;  %v3078_v57 = vunpack.c.l.b16 %v2724_v26  ;;  %v9421_v26 = vld [vmem:[%s13119_s29 + $0x148] sm:$0xff] }
 0x380   : > { %v2179_v29 = vpop.f32.mrf.mxu1 }
 0x381   : > { %v2725_v47 = vpack.c.bf16 %v2179_v29, %v2179_v29 }
 0x383   : > { %v3079_v15 = vunpack.c.l.b16 %v2725_v47 }
 0x385   : > { %v3087_v2 = vpack.c.b16 %v3079_v15, %v3078_v57 }
 0x387   : > { %8280 = vmatmul.msk.bf16.gmra.mxu3 %vm652_vm0, %v3087_v2 }
 0x388   : > { %v2182_v58 = vpop.f32.mrf.mxu1 }
 0x389   : > { %v2726_v36 = vpack.c.bf16 %v2182_v58, %v2182_v58 }
 0x38b   : > { %8163 = vmatmul.msk.bf16.gmra.mxu1 %vm1622_vm2, %v9420_v14  ;;  %v10629_v61 = vunpack.c.l.b16 %v2726_v36  ;;  %v9422_v36 = vld [vmem:[%s13119_s29 + $0x150] sm:$0xff] }
 0x38d   : > { %13180 = vst [vmem:[#allocation67_spill] sm:$0xff] %v10629_v61 }
 0x390   : > { %v2184_v39 = vpop.f32.mrf.mxu1 }
 0x391   : > { %v2727_v11 = vpack.c.bf16 %v2184_v39, %v2184_v39 }
 0x393   : > { %v10631_v41 = vunpack.c.l.b16 %v2727_v11 }
 0x395   : > { %13181 = vst [vmem:[#allocation68_spill] sm:$0xff] %v10631_v41 }
 0x398   : > { %v2187_v29 = vpop.f32.mrf.mxu1 }
 0x399   : > { %v2728_v47 = vpack.c.bf16 %v2187_v29, %v2187_v29 }
 0x39b   : > { %8164 = vmatmul.msk.bf16.gmra.mxu1 %vm1622_vm2, %v9421_v26  ;;  %v10639_v2 = vunpack.c.l.b16 %v2728_v47 }
 0x39d   : > { %13182 = vst [vmem:[#allocation69_spill] sm:$0xff] %v10639_v2 }
 0x3a0   : > { %v2189_v57 = vpop.f32.mrf.mxu1 }
 0x3a1   : > { %v2729_v15 = vpack.c.bf16 %v2189_v57, %v2189_v57 }
 0x3a3   : > { %v10641_v14 = vunpack.c.l.b16 %v2729_v15  ;;  %v9423_v15 = vld [vmem:[%s13119_s29 + $0x158] sm:$0xff] }
 0x3a5   : > { %13183 = vst [vmem:[#allocation70_spill] sm:$0xff] %v10641_v14 }
 0x3a8   : > { %v2192_v39 = vpop.f32.mrf.mxu1 }
 0x3a9   : > { %v2730_v11 = vpack.c.bf16 %v2192_v39, %v2192_v39 }
 0x3ab   : > { %8165 = vmatmul.msk.bf16.gmra.mxu1 %vm1622_vm2, %v9422_v36  ;;  %v10649_v29 = vunpack.c.l.b16 %v2730_v11 }
 0x3ad   : > { %13184 = vst [vmem:[#allocation71_spill] sm:$0xff] %v10649_v29 }
 0x3b0   : > { %v2194_v37 = vpop.f32.mrf.mxu1 }
 0x3b1   : > { %v2731_v26 = vpack.c.bf16 %v2194_v37, %v2194_v37 }
 0x3b3   : > { %v10651_v57 = vunpack.c.l.b16 %v2731_v26  ;;  %v9424_v26 = vld [vmem:[%s13119_s29 + $0x160] sm:$0xff] }
 0x3b5   : > { %13185 = vst [vmem:[#allocation72_spill] sm:$0xff] %v10651_v57 }
 0x3b8   : > { %v2197_v58 = vpop.f32.mrf.mxu1 }
 0x3b9   : > { %v2732_v2 = vpack.c.bf16 %v2197_v58, %v2197_v58 }
 0x3bb   : > { %8166 = vmatmul.msk.bf16.gmra.mxu1 %vm1622_vm2, %v9423_v15  ;;  %v10659_v39 = vunpack.c.l.b16 %v2732_v2 }
 0x3bd   : > { %13186 = vst [vmem:[#allocation73_spill] sm:$0xff] %v10659_v39 }
 0x3c0   : > { %v2199_v14 = vpop.f32.mrf.mxu1 }
 0x3c1   : > { %v2733_v36 = vpack.c.bf16 %v2199_v14, %v2199_v14 }
 0x3c3   : > { %v10661_v37 = vunpack.c.l.b16 %v2733_v36  ;;  %v9425_v36 = vld [vmem:[%s13119_s29 + $0x168] sm:$0xff] }
 0x3c5   : > { %13187 = vst [vmem:[#allocation74_spill] sm:$0xff] %v10661_v37 }
 0x3c8   : > { %v2202_v47 = vpop.f32.mrf.mxu1 }
 0x3c9   : > { %v2734_v29 = vpack.c.bf16 %v2202_v47, %v2202_v47 }
 0x3cb   : > { %8167 = vmatmul.msk.bf16.gmra.mxu1 %vm1622_vm2, %v9424_v26  ;;  %v10669_v58 = vunpack.c.l.b16 %v2734_v29  ;;  %v9427_v29 = vld [vmem:[%s13119_s29 + $0x178] sm:$0xff] }
 0x3cd   : > { %13188 = vst [vmem:[#allocation75_spill] sm:$0xff] %v10669_v58 }
 0x3d0   : > { %v2204_v57 = vpop.f32.mrf.mxu1 }
 0x3d1   : > { %v2735_v15 = vpack.c.bf16 %v2204_v57, %v2204_v57 }
 0x3d3   : > { %v10671_v14 = vunpack.c.l.b16 %v2735_v15  ;;  %v9426_v15 = vld [vmem:[%s13119_s29 + $0x170] sm:$0xff] }
 0x3d5   : > { %13189 = vst [vmem:[#allocation76_spill] sm:$0xff] %v10671_v14 }
 0x3d8   : > { %v2207_v11 = vpop.f32.mrf.mxu1 }
 0x3d9   : > { %v2736_v39 = vpack.c.bf16 %v2207_v11, %v2207_v11 }
 0x3db   : > { %8168 = vmatmul.msk.bf16.gmra.mxu1 %vm1622_vm2, %v9425_v36  ;;  %v10679_v47 = vunpack.c.l.b16 %v2736_v39  ;;  %v9513_v39 = vld [vmem:[%s13132_s4 + $0x28] sm:$0xff] }
 0x3dc   : > { %3250 = vmatpush.bf16.msrb.mxu0 %v9513_v39  ;;  %v9428_v39 = vld [vmem:[%s13119_s29 + $0x180] sm:$0xff] }
 0x3dd   : > { %13190 = vst [vmem:[#allocation77_spill] sm:$0xff] %v10679_v47 }
 0x3e0   : > { %v2209_v37 = vpop.f32.mrf.mxu1 }
 0x3e1   : > { %v2737_v26 = vpack.c.bf16 %v2209_v37, %v2209_v37 }
 0x3e3   : > { %v10681_v57 = vunpack.c.l.b16 %v2737_v26 }
 0x3e5   : > { %13191 = vst [vmem:[#allocation78_spill] sm:$0xff] %v10681_v57 }
 0x3e8   : > { %v2212_v2 = vpop.f32.mrf.mxu1 }
 0x3e9   : > { %v2738_v58 = vpack.c.bf16 %v2212_v2, %v2212_v2 }
 0x3eb   : > { %8169 = vmatmul.msk.bf16.gmra.mxu1 %vm1622_vm2, %v9426_v15  ;;  %v10689_v11 = vunpack.c.l.b16 %v2738_v58 }
 0x3ed   : > { %13192 = vst [vmem:[#allocation79_spill] sm:$0xff] %v10689_v11 }
 0x3f0   : > { %v2214_v14 = vpop.f32.mrf.mxu1 }
 0x3f1   : > { %v2739_v36 = vpack.c.bf16 %v2214_v14, %v2214_v14 }
 0x3f3   : > { %v10691_v37 = vunpack.c.l.b16 %v2739_v36 }
 0x3f5   : > { %13193 = vst [vmem:[#allocation80_spill] sm:$0xff] %v10691_v37 }
 0x3f8   : > { %v2217_v15 = vpop.f32.mrf.mxu1 }
 0x3f9   : > { %v2740_v14 = vpack.c.bf16 %v2217_v15, %v2217_v15 }
 0x3fb   : > { %8170 = vmatmul.msk.bf16.gmra.mxu1 %vm1622_vm2, %v9427_v29  ;;  %v10702_v36 = vunpack.c.l.b16 %v2740_v14  ;;  %v9429_v14 = vld [vmem:[%s13119_s29 + $0x188] sm:$0xff] }
 0x3fd   : > { %13194 = vst [vmem:[#allocation81_spill] sm:$0xff] %v10702_v36 }
 0x400   : > { %v2219_v58 = vpop.f32.mrf.mxu1 }
 0x401   : > { %v2741_v2 = vpack.c.bf16 %v2219_v58, %v2219_v58 }
 0x403   : > { %v10704_v47 = vunpack.c.l.b16 %v2741_v2 }
 0x405   : > { %13195 = vst [vmem:[#allocation82_spill] sm:$0xff] %v10704_v47 }
 0x408   : > { %v2222_v26 = vpop.f32.mrf.mxu1 }
 0x409   : > { %v2742_v11 = vpack.c.bf16 %v2222_v26, %v2222_v26 }
 0x40b   : > { %8171 = vmatmul.msk.bf16.gmra.mxu1 %vm1622_vm2, %v9428_v39  ;;  %v3189_v15 = vunpack.c.l.b16 %v2742_v11 }
 0x410   : > { %v2224_v37 = vpop.f32.mrf.mxu1 }
 0x411   : > { %v2743_v29 = vpack.c.bf16 %v2224_v37, %v2224_v37 }
 0x413   : > { %v3190_v61 = vunpack.c.l.b16 %v2743_v29 }
 0x415   : > { %v3205_v58 = vpack.c.b16 %v3190_v61, %v3189_v15  ;;  %v9430_v61 = vld [vmem:[%s13119_s29 + $0x190] sm:$0xff] }
 0x417   : > { %8289 = vmatmul.msk.bf16.vlgmr.msrb.gmra.mxu0 %vm652_vm0, %v3205_v58 }
 0x418   : > { %v2227_v2 = vpop.f32.mrf.mxu1 }
 0x419   : > { %v2744_v57 = vpack.c.bf16 %v2227_v2, %v2227_v2 }
 0x41b   : > { %8172 = vmatmul.msk.bf16.gmra.mxu1 %vm1622_vm2, %v9429_v14  ;;  %v3191_v41 = vunpack.c.l.b16 %v2744_v57 }
 0x420   : > { %v2229_v36 = vpop.f32.mrf.mxu1 }
 0x421   : > { %v2745_v47 = vpack.c.bf16 %v2229_v36, %v2229_v36 }
 0x423   : > { %v3192_v39 = vunpack.c.l.b16 %v2745_v47 }
 0x425   : > { %v3206_v26 = vpack.c.b16 %v3192_v39, %v3191_v41  ;;  %v9431_v41 = vld [vmem:[%s13119_s29 + $0x198] sm:$0xff] }
 0x427   : > { %8290 = vmatmul.msk.bf16.gmra.mxu0 %vm652_vm0, %v3206_v26 }
 0x428   : > { %v2232_v11 = vpop.f32.mrf.mxu1 }
 0x429   : > { %v2746_v37 = vpack.c.bf16 %v2232_v11, %v2232_v11 }
 0x42b   : > { %8173 = vmatmul.msk.bf16.gmra.mxu1 %vm1622_vm2, %v9430_v61  ;;  %v3193_v58 = vunpack.c.l.b16 %v2746_v37  ;;  %v9432_v37 = vld [vmem:[%s13119_s29 + $0x1a0] sm:$0xff] }
 0x430   : > { %v2234_v29 = vpop.f32.mrf.mxu1 }
 0x431   : > { %v2747_v15 = vpack.c.bf16 %v2234_v29, %v2234_v29 }
 0x433   : > { %v3194_v14 = vunpack.c.l.b16 %v2747_v15 }
 0x435   : > { %v3207_v2 = vpack.c.b16 %v3194_v14, %v3193_v58 }
 0x437   : > { %8291 = vmatmul.msk.bf16.gmra.mxu0 %vm652_vm0, %v3207_v2 }
 0x438   : > { %v2237_v47 = vpop.f32.mrf.mxu1 }
 0x439   : > { %v2748_v57 = vpack.c.bf16 %v2237_v47, %v2237_v47 }
 0x43b   : > { %8174 = vmatmul.msk.bf16.gmra.mxu1 %vm1622_vm2, %v9431_v41  ;;  %v3195_v26 = vunpack.c.l.b16 %v2748_v57  ;;  %v9433_v57 = vld [vmem:[%s13119_s29 + $0x1a8] sm:$0xff] }
 0x440   : > { %v2239_v36 = vpop.f32.mrf.mxu1 }
 0x441   : > { %v2749_v39 = vpack.c.bf16 %v2239_v36, %v2239_v36 }
 0x443   : > { %v3196_v61 = vunpack.c.l.b16 %v2749_v39 }
 0x445   : > { %v3208_v11 = vpack.c.b16 %v3196_v61, %v3195_v26 }
 0x447   : > { %8292 = vmatmul.msk.bf16.gmra.mxu0 %vm652_vm0, %v3208_v11 }
 0x448   : > { %v2242_v29 = vpop.f32.mrf.mxu1 }
 0x449   : > { %v2750_v15 = vpack.c.bf16 %v2242_v29, %v2242_v29 }
 0x44b   : > { %8175 = vmatmul.msk.bf16.gmra.mxu1 %vm1622_vm2, %v9432_v37  ;;  %v3197_v2 = vunpack.c.l.b16 %v2750_v15  ;;  %v9434_v15 = vld [vmem:[%s13119_s29 + $0x1b0] sm:$0xff] }
 0x450   : > { %v2244_v58 = vpop.f32.mrf.mxu1 }
 0x451   : > { %v2751_v14 = vpack.c.bf16 %v2244_v58, %v2244_v58 }
 0x453   : > { %v3198_v41 = vunpack.c.l.b16 %v2751_v14 }
 0x455   : > { %v3209_v47 = vpack.c.b16 %v3198_v41, %v3197_v2 }
 0x457   : > { %8293 = vmatmul.msk.bf16.gmra.mxu0 %vm652_vm0, %v3209_v47 }
 0x458   : > { %v2247_v36 = vpop.f32.mrf.mxu1 }
 0x459   : > { %v2752_v39 = vpack.c.bf16 %v2247_v36, %v2247_v36  ;;  %v9519_v36 = vld [vmem:[%s13132_s4 + $0x58] sm:$0xff] }
 0x45a   : > { %3625 = vmatpush.bf16.msra.mxu0 %v9519_v36 }
 0x45b   : > { %8176 = vmatmul.msk.bf16.gmra.mxu1 %vm1622_vm2, %v9433_v57  ;;  %v3199_v11 = vunpack.c.l.b16 %v2752_v39 }
 0x460   : > { %v2249_v26 = vpop.f32.mrf.mxu1 }
 0x461   : > { %v2753_v61 = vpack.c.bf16 %v2249_v26, %v2249_v26  ;;  %v9435_v26 = vld [vmem:[%s13119_s29 + $0x1b8] sm:$0xff] }
 0x463   : > { %v3200_v37 = vunpack.c.l.b16 %v2753_v61 }
 0x465   : > { %v3210_v29 = vpack.c.b16 %v3200_v37, %v3199_v11 }
 0x467   : > { %8294 = vmatmul.msk.bf16.gmra.mxu0 %vm652_vm0, %v3210_v29 }
 0x468   : > { %v2252_v58 = vpop.f32.mrf.mxu1 }
 0x469   : > { %v2754_v14 = vpack.c.bf16 %v2252_v58, %v2252_v58 }
 0x46b   : > { %8177 = vmatmul.msk.bf16.gmra.mxu1 %vm1622_vm2, %v9434_v15  ;;  %v3201_v47 = vunpack.c.l.b16 %v2754_v14 }
 0x470   : > { %v2254_v2 = vpop.f32.mrf.mxu1 }
 0x471   : > { %v2755_v41 = vpack.c.bf16 %v2254_v2, %v2254_v2  ;;  %v9436_v2 = vld [vmem:[%s13119_s29 + $0x1c0] sm:$0xff] }
 0x473   : > { %v3202_v57 = vunpack.c.l.b16 %v2755_v41 }
 0x475   : > { %v3211_v39 = vpack.c.b16 %v3202_v57, %v3201_v47  ;;  %v2838_v47 = vpack.c.bf16 %v10315_v0, %v10315_v0  ;;  %v2839_v57 = vpack.c.bf16 %v10328_v32, %v10328_v32  ;;  %v9437_v32 = vld [vmem:[%s13119_s29 + $0x1c8] sm:$0xff] }
 0x477   : > { %8295 = vmatmul.msk.bf16.gmra.mxu0 %vm652_vm0, %v3211_v39  ;;  %v3564_v36 = vunpack.c.l.b16 %v2838_v47  ;;  %v3565_v39 = vunpack.c.l.b16 %v2839_v57 }
 0x478   : > { %v2257_v61 = vpop.f32.mrf.mxu1 }
 0x479   : > { %v2756_v11 = vpack.c.bf16 %v2257_v61, %v2257_v61 }
 0x47b   : > { %8178 = vmatmul.msk.bf16.gmra.mxu1 %vm1622_vm2, %v9435_v26  ;;  %v3203_v15 = vunpack.c.l.b16 %v2756_v11 }
 0x480   : > { %v2259_v37 = vpop.f32.mrf.mxu1 }
 0x481   : > { %v2757_v29 = vpack.c.bf16 %v2259_v37, %v2259_v37  ;;  %v3580_v37 = vpack.c.b16 %v3565_v39, %v3564_v36 }
 0x483   : > { %v3204_v58 = vunpack.c.l.b16 %v2757_v29 }
 0x485   : > { %v3212_v14 = vpack.c.b16 %v3204_v58, %v3203_v15 }
 0x487   : > { %8296 = vmatmul.msk.bf16.gmra.mxu0 %vm652_vm0, %v3212_v14 }
 0x488   : > { %v2262_v41 = vpop.f32.mrf.mxu1 }
 0x489   : > { %v2758_v26 = vpack.c.bf16 %v2262_v41, %v2262_v41  ;;  %v2841_v41 = vpack.c.bf16 %v10351_v18, %v10351_v18  ;;  %v9438_v18 = vld [vmem:[%s13119_s29 + $0x1d0] sm:$0xff] }
 0x48b   : > { %8179 = vmatmul.msk.bf16.gmra.mxu1 %vm1622_vm2, %v9436_v2  ;;  %v10759_v29 = vunpack.c.l.b16 %v2758_v26  ;;  %v2840_v2 = vpack.c.bf16 %v10334_v55, %v10334_v55  ;;  %v3567_v36 = vunpack.c.l.b16 %v2841_v41  ;;  %v2482_v41 = vpop.f32.mrf.mxu2 }
 0x48d   : > { %v3566_v57 = vunpack.c.l.b16 %v2840_v2  ;;  %v2843_v2 = vpack.c.bf16 %v10370_v1, %v10370_v1 }
 0x48f   : > { %v3581_v0 = vpack.c.b16 %v3567_v36, %v3566_v57 }
 0x490   : > { %v2264_v61 = vpop.f32.mrf.mxu1 }
 0x491   : > { %v2759_v11 = vpack.c.bf16 %v2264_v61, %v2264_v61 }
 0x493   : > { %v10761_v15 = vunpack.c.l.b16 %v2759_v11  ;;  %v2484_v1 = vpop.f32.mrf.mxu2 }
 0x494   : > { %v10763_v58 = vpop.f32.mrf.mxu0 }
 0x495   : > { %13196 = vst [vmem:[#allocation83_spill] sm:$0xff] %v10763_v58 }
 0x497   : > { %8337 = vmatmul.msk.bf16.vlgmr.msra.gmra.mxu0 %vm652_vm0, %v3580_v37 }
 0x498   : > { %v2267_v14 = vpop.f32.mrf.mxu1 }
 0x499   : > { %v2760_v39 = vpack.c.bf16 %v2267_v14, %v2267_v14  ;;  %v2842_v14 = vpack.c.bf16 %v10362_v21, %v10362_v21 }
 0x49b   : > { %8180 = vmatmul.msk.bf16.gmra.mxu1 %vm1622_vm2, %v9437_v32  ;;  %v10778_v11 = vunpack.c.l.b16 %v2760_v39  ;;  %v3568_v36 = vunpack.c.l.b16 %v2842_v14  ;;  %v3569_v39 = vunpack.c.l.b16 %v2843_v2  ;;  %v2844_v14 = vpack.c.bf16 %v10387_v35, %v10387_v35  ;;  %v9440_v35 = vld [vmem:[%s13119_s29 + $0x1e0] sm:$0xff] }
 0x49c   : > { %v10776_v47 = vpop.f32.mrf.mxu0  ;;  %v2845_v2 = vpack.c.bf16 %v10389_v31, %v10389_v31 }
 0x49d   : > { %13197 = vst [vmem:[#allocation84_spill] sm:$0xff] %v10776_v47  ;;  %v3582_v47 = vpack.c.b16 %v3569_v39, %v3568_v36  ;;  %v3570_v39 = vunpack.c.l.b16 %v2844_v14  ;;  %v2846_v14 = vpack.c.bf16 %v2482_v41, %v2482_v41 }
 0x4a0   : > { %v2269_v26 = vpop.f32.mrf.mxu1 }
 0x4a1   : > { %v2761_v61 = vpack.c.bf16 %v2269_v26, %v2269_v26 }
 0x4a3   : > { %v10780_v37 = vunpack.c.l.b16 %v2761_v61 }
 0x4a4   : > { %v10782_v58 = vpop.f32.mrf.mxu0 }
 0x4a5   : > { %13198 = vst [vmem:[#allocation85_spill] sm:$0xff] %v10782_v58 }
 0x4a7   : > { %8338 = vmatmul.msk.bf16.gmra.mxu0 %vm652_vm0, %v3581_v0 }
 0x4a8   : > { %v2272_v32 = vpop.f32.mrf.mxu1 }
 0x4a9   : > { %v2762_v26 = vpack.c.bf16 %v2272_v32, %v2272_v32 }
 0x4ab   : > { %8181 = vmatmul.msk.bf16.gmra.mxu1 %vm1622_vm2, %v9438_v18  ;;  %v10797_v55 = vunpack.c.l.b16 %v2762_v26  ;;  %v9439_v18 = vld [vmem:[%s13119_s29 + $0x1d8] sm:$0xff]  ;;  %v3571_v26 = vunpack.c.l.b16 %v2845_v2  ;;  %v2847_v2 = vpack.c.bf16 %v2484_v1, %v2484_v1  ;;  %v9441_v1 = vld [vmem:[%s13119_s29 + $0x1e8] sm:$0xff] }
 0x4ac   : > { %v10795_v57 = vpop.f32.mrf.mxu0 }
 0x4ad   : > { %13199 = vst [vmem:[#allocation86_spill] sm:$0xff] %v10795_v57 }
 0x4b0   : > { %v2274_v0 = vpop.f32.mrf.mxu1 }
 0x4b1   : > { %v2763_v61 = vpack.c.bf16 %v2274_v0, %v2274_v0 }
 0x4b3   : > { %v10799_v58 = vunpack.c.l.b16 %v2763_v61  ;;  %v2487_v61 = vpop.f32.mrf.mxu2 }
 0x4b4   : > { %v10801_v10 = vpop.f32.mrf.mxu0 }
 0x4b5   : > { %13200 = vst [vmem:[#allocation87_spill] sm:$0xff] %v10801_v10  ;;  %v3583_v10 = vpack.c.b16 %v3571_v26, %v3570_v39  ;;  %v3573_v26 = vunpack.c.l.b16 %v2847_v2 }
 0x4b7   : > { %8339 = vmatmul.msk.bf16.gmra.mxu0 %vm652_vm0, %v3582_v47 }
 0x4b8   : > { %v2277_v32 = vpop.f32.mrf.mxu1 }
 0x4b9   : > { %v2764_v0 = vpack.c.bf16 %v2277_v32, %v2277_v32 }
 0x4bb   : > { %8182 = vmatmul.msk.bf16.gmra.mxu1 %vm1622_vm2, %v9439_v18  ;;  %v10816_v57 = vunpack.c.l.b16 %v2764_v0  ;;  %v2489_v32 = vpop.f32.mrf.mxu2 }
 0x4bc   : > { %v10814_v36 = vpop.f32.mrf.mxu0 }
 0x4bd   : > { %13201 = vst [vmem:[#allocation88_spill] sm:$0xff] %v10814_v36 }
 0x4c0   : > { %v2279_v47 = vpop.f32.mrf.mxu1 }
 0x4c1   : > { %v2765_v21 = vpack.c.bf16 %v2279_v47, %v2279_v47 }
 0x4c3   : > { %v10818_v40 = vunpack.c.l.b16 %v2765_v21  ;;  %v3572_v21 = vunpack.c.l.b16 %v2846_v14  ;;  %v2492_v44 = vpop.f32.mrf.mxu2  ;;  %v2849_v14 = vpack.c.bf16 %v2489_v32, %v2489_v32  ;;  %v9442_v32 = vld [vmem:[%s13119_s29 + $0x1f0] sm:$0xff] }
 0x4c4   : > { %v10820_v28 = vpop.f32.mrf.mxu0 }
 0x4c5   : > { %13202 = vst [vmem:[#allocation89_spill] sm:$0xff] %v10820_v28  ;;  %v3584_v31 = vpack.c.b16 %v3573_v26, %v3572_v21  ;;  %v3575_v26 = vunpack.c.l.b16 %v2849_v14 }
 0x4c7   : > { %8340 = vmatmul.msk.bf16.gmra.mxu0 %vm652_vm0, %v3583_v10 }
 0x4c8   : > { %v2282_v18 = vpop.f32.mrf.mxu1 }
 0x4c9   : > { %v2766_v0 = vpack.c.bf16 %v2282_v18, %v2282_v18  ;;  %v2848_v18 = vpack.c.bf16 %v2487_v61, %v2487_v61 }
 0x4cb   : > { %8183 = vmatmul.msk.bf16.gmra.mxu1 %vm1622_vm2, %v9440_v35  ;;  %v10831_v36 = vunpack.c.l.b16 %v2766_v0  ;;  %v3574_v21 = vunpack.c.l.b16 %v2848_v18  ;;  %v2850_v18 = vpack.c.bf16 %v2492_v44, %v2492_v44  ;;  %v9515_v44 = vld [vmem:[%s13132_s4 + $0x38] sm:$0xff] }
 0x4cc   : > { %v10829_v39 = vpop.f32.mrf.mxu0  ;;  %3375 = vmatpush.bf16.msrb.mxu2 %v9515_v44 }
 0x4cd   : > { %13203 = vst [vmem:[#allocation90_spill] sm:$0xff] %v10829_v39  ;;  %v3585_v41 = vpack.c.b16 %v3575_v26, %v3574_v21 }
 0x4d0   : > { %v2284_v47 = vpop.f32.mrf.mxu1 }
 0x4d1   : > { %v2767_v28 = vpack.c.bf16 %v2284_v47, %v2284_v47 }
 0x4d3   : > { %v10833_v10 = vunpack.c.l.b16 %v2767_v28  ;;  %v2494_v28 = vpop.f32.mrf.mxu2 }
 0x4d4   : > { %v10835_v38 = vpop.f32.mrf.mxu0  ;;  %v2851_v14 = vpack.c.bf16 %v2494_v28, %v2494_v28  ;;  %v9508_v28 = vld [vmem:[%s13132_s4] sm:$0xff] }
 0x4d5   : > { %13204 = vst [vmem:[#allocation91_spill] sm:$0xff] %v10835_v38  ;;  %3994 = vmatpush.bf16.msrb.mxu0 %v9508_v28 }
 0x4d6   : > { %v3577_v26 = vunpack.c.l.b16 %v2851_v14 }
 0x4d7   : > { %8341 = vmatmul.msk.bf16.gmra.mxu0 %vm652_vm0, %v3584_v31 }
 0x4d8   : > { %v2287_v35 = vpop.f32.mrf.mxu1 }
 0x4d9   : > { %v2768_v0 = vpack.c.bf16 %v2287_v35, %v2287_v35 }
 0x4db   : > { %8184 = vmatmul.msk.bf16.gmra.mxu1 %vm1622_vm2, %v9441_v1  ;;  %v10846_v39 = vunpack.c.l.b16 %v2768_v0  ;;  %v2497_v1 = vpop.f32.mrf.mxu2 }
 0x4dc   : > { %v10844_v2 = vpop.f32.mrf.mxu0  ;;  %v2852_v14 = vpack.c.bf16 %v2497_v1, %v2497_v1 }
 0x4dd   : > { %13205 = vst [vmem:[#allocation92_spill] sm:$0xff] %v10844_v2 }
 0x4e0   : > { %v2289_v47 = vpop.f32.mrf.mxu1 }
 0x4e1   : > { %v2769_v38 = vpack.c.bf16 %v2289_v47, %v2289_v47 }
 0x4e3   : > { %v10848_v31 = vunpack.c.l.b16 %v2769_v38  ;;  %v3576_v38 = vunpack.c.l.b16 %v2850_v18  ;;  %v2499_v61 = vpop.f32.mrf.mxu2 }
 0x4e4   : > { %v10850_v63 = vpop.f32.mrf.mxu0 }
 0x4e5   : > { %13206 = vst [vmem:[#allocation93_spill] sm:$0xff] %v10850_v63  ;;  %v3586_v63 = vpack.c.b16 %v3577_v26, %v3576_v38  ;;  %v2853_v38 = vpack.c.bf16 %v2499_v61, %v2499_v61 }
 0x4e7   : > { %8342 = vmatmul.msk.bf16.gmra.mxu0 %vm652_vm0, %v3585_v41 }
 0x4e8   : > { %v2292_v35 = vpop.f32.mrf.mxu1 }
 0x4e9   : > { %v2770_v0 = vpack.c.bf16 %v2292_v35, %v2292_v35 }
 0x4eb   : > { %8185 = vmatmul.msk.bf16.gmra.mxu1 %vm1622_vm2, %v9442_v32  ;;  %v10861_v41 = vunpack.c.l.b16 %v2770_v0  ;;  %v10880_v26 = vpop.f32.mrf.mxu2 }
 0x4ec   : > { %v10859_v21 = vpop.f32.mrf.mxu0 }
 0x4ed   : > { %13207 = vst [vmem:[#allocation94_spill] sm:$0xff] %v10859_v21  ;;  %v3579_v21 = vunpack.c.l.b16 %v2853_v38 }
 0x4f0   : > { %v2294_v47 = vpop.f32.mrf.mxu1 }
 0x4f1   : > { %v2771_v2 = vpack.c.bf16 %v2294_v47, %v2294_v47  ;;  %v3578_v47 = vunpack.c.l.b16 %v2852_v14 }
 0x4f3   : > { %v10863_v24 = vunpack.c.l.b16 %v2771_v2  ;;  %v9443_v2 = vld [vmem:[%s13119_s29 + $0x1f8] sm:$0xff]  ;;  %v10892_v1 = vpop.f32.mrf.mxu2 }
 0x4f4   : > { %v10871_v32 = vpop.f32.mrf.mxu0 }
 0x4f5   : > { %13208 = vst [vmem:[#allocation95_spill] sm:$0xff] %v10871_v32  ;;  %v3587_v32 = vpack.c.b16 %v3579_v21, %v3578_v47 }
 0x4f7   : > { %8343 = vmatmul.msk.bf16.gmra.mxu0 %vm652_vm0, %v3586_v63 }
 0x4f8   : > { %v2297_v18 = vpop.f32.mrf.mxu1 }
 0x4f9   : > { %v2772_v35 = vpack.c.bf16 %v2297_v18, %v2297_v18 }
 0x4fb   : > { %8186 = vmatmul.msk.bf16.gmra.mxu1 %vm1622_vm2, %v9443_v2  ;;  %v10884_v63 = vunpack.c.l.b16 %v2772_v35  ;;  %v9444_v2 = vld [vmem:[%s13119_s29 + $0x200] sm:$0xff]  ;;  %v10901_v14 = vpop.f32.mrf.mxu2 }
 0x4fc   : > { %v10882_v0 = vpop.f32.mrf.mxu0 }
 0x4fd   : > { %13209 = vst [vmem:[#allocation96_spill] sm:$0xff] %v10882_v0 }
 0x500   : > { %v2299_v44 = vpop.f32.mrf.mxu1 }
 0x501   : > { %v2773_v28 = vpack.c.bf16 %v2299_v44, %v2299_v44 }
 0x503   : > { %v10886_v27 = vunpack.c.l.b16 %v2773_v28 }
 0x504   : > { %v10888_v7 = vpop.f32.mrf.mxu0 }
 0x505   : > { %13210 = vst [vmem:[#allocation97_spill] sm:$0xff] %v10888_v7 }
 0x507   : > { %8344 = vmatmul.msk.bf16.gmra.mxu0 %vm652_vm0, %v3587_v32  ;;  %v13213_v32 = vpack.c.b16 %v10077_v17, %v10075_v16 }
 0x508   : > { %v2302_v18 = vpop.f32.mrf.mxu1 }
 0x509   : > { %v2774_v35 = vpack.c.bf16 %v2302_v18, %v2302_v18 }
 0x50b   : > { %8187 = vmatmul.msk.bf16.gmra.mxu1 %vm1622_vm2, %v9444_v2  ;;  %v3314_v44 = vunpack.c.l.b16 %v2774_v35  ;;  %v9445_v2 = vld [vmem:[%s13119_s29 + $0x208] sm:$0xff] }
 0x50c   : > { %v10899_v21 = vpop.f32.mrf.mxu0 }
 0x50d   : > { %13211 = vst [vmem:[#allocation98_spill] sm:$0xff] %v10899_v21  ;;  %v10913_v21 = vpop.f32.mrf.mxu2 }
 0x510   : > { %v2304_v38 = vpop.f32.mrf.mxu1 }
 0x511   : > { %v2775_v47 = vpack.c.bf16 %v2304_v38, %v2304_v38 }
 0x513   : > { %v3315_v28 = vunpack.c.l.b16 %v2775_v47 }
 0x514   : > { %v10903_v61 = vpop.f32.mrf.mxu0 }
 0x515   : > { %13212 = vst [vmem:[#allocation99_spill] sm:$0xff] %v10903_v61  ;;  %v3330_v0 = vpack.c.b16 %v3315_v28, %v3314_v44  ;;  %v10918_v61 = vpop.f32.mrf.mxu2 }
 0x517   : > { %8305 = vmatmul.msk.bf16.vlgmr.msrb.gmra.mxu2 %vm652_vm0, %v3330_v0  ;;  %8381 = vmatmul.msk.bf16.vlgmr.msrb.gmra.mxu0 %vm652_vm0, %v13213_v32  ;;  %v13216_v32 = vpack.c.b16 %v10101_v34, %v10099_v33  ;;  %v13219_v34 = vpack.c.b16 %v10125_v51, %v10123_v50 }
 0x518   : > { %v2307_v18 = vpop.f32.mrf.mxu1 }
 0x519   : > { %v2776_v38 = vpack.c.bf16 %v2307_v18, %v2307_v18 }
 0x51b   : > { %8188 = vmatmul.msk.bf16.gmra.mxu1 %vm1622_vm2, %v9445_v2  ;;  %v3316_v0 = vunpack.c.l.b16 %v2776_v38  ;;  %v9446_v2 = vld [vmem:[%s13119_s29 + $0x210] sm:$0xff] }
 0x51c   : > { %v10916_v35 = vpop.f32.mrf.mxu0 }
 0x51d   : > { %13214 = vst [vmem:[#allocation100_spill] sm:$0xff] %v10916_v35 }
 0x520   : > { %v2309_v47 = vpop.f32.mrf.mxu1 }
 0x521   : > { %v2777_v44 = vpack.c.bf16 %v2309_v47, %v2309_v47  ;;  %v10933_v47 = vpop.f32.mrf.mxu2 }
 0x523   : > { %v3317_v28 = vunpack.c.l.b16 %v2777_v44 }
 0x524   : > { %v10920_v16 = vpop.f32.mrf.mxu0 }
 0x525   : > { %13215 = vst [vmem:[#allocation101_spill] sm:$0xff] %v10920_v16  ;;  %v3331_v17 = vpack.c.b16 %v3317_v28, %v3316_v0 }
 0x527   : > { %8306 = vmatmul.msk.bf16.gmra.mxu2 %vm652_vm0, %v3331_v17  ;;  %8382 = vmatmul.msk.bf16.gmra.mxu0 %vm652_vm0, %v13216_v32  ;;  %v9447_v32 = vld [vmem:[%s13119_s29 + $0x218] sm:$0xff] }
 0x528   : > { %v2312_v18 = vpop.f32.mrf.mxu1 }
 0x529   : > { %v2778_v44 = vpack.c.bf16 %v2312_v18, %v2312_v18 }
 0x52b   : > { %8189 = vmatmul.msk.bf16.gmra.mxu1 %vm1622_vm2, %v9446_v2  ;;  %v3318_v17 = vunpack.c.l.b16 %v2778_v44  ;;  %v10945_v2 = vpop.f32.mrf.mxu2 }
 0x52c   : > { %v10931_v38 = vpop.f32.mrf.mxu0 }
 0x52d   : > { %13217 = vst [vmem:[#allocation102_spill] sm:$0xff] %v10931_v38 }
 0x530   : > { %v2314_v0 = vpop.f32.mrf.mxu1 }
 0x531   : > { %v2779_v28 = vpack.c.bf16 %v2314_v0, %v2314_v0 }
 0x533   : > { %v3319_v16 = vunpack.c.l.b16 %v2779_v28 }
 0x534   : > { %v10935_v35 = vpop.f32.mrf.mxu0 }
 0x535   : > { %13218 = vst [vmem:[#allocation103_spill] sm:$0xff] %v10935_v35  ;;  %v3332_v33 = vpack.c.b16 %v3319_v16, %v3318_v17  ;;  %v10950_v17 = vpop.f32.mrf.mxu2  ;;  %v13222_v35 = vpack.c.b16 %v10149_v4, %v10147_v3 }
 0x537   : > { %8307 = vmatmul.msk.bf16.gmra.mxu2 %vm652_vm0, %v3332_v33  ;;  %8383 = vmatmul.msk.bf16.gmra.mxu0 %vm652_vm0, %v13219_v34 }
 0x538   : > { %v2317_v18 = vpop.f32.mrf.mxu1 }
 0x539   : > { %v2780_v0 = vpack.c.bf16 %v2317_v18, %v2317_v18 }
 0x53b   : > { %8190 = vmatmul.msk.bf16.gmra.mxu1 %vm1622_vm2, %v9447_v32  ;;  %v3320_v33 = vunpack.c.l.b16 %v2780_v0  ;;  %v9448_v32 = vld [vmem:[%s13119_s29 + $0x220] sm:$0xff] }
 0x53c   : > { %v10948_v44 = vpop.f32.mrf.mxu0 }
 0x53d   : > { %13220 = vst [vmem:[#allocation104_spill] sm:$0xff] %v10948_v44 }
 0x540   : > { %v2319_v16 = vpop.f32.mrf.mxu1 }
 0x541   : > { %v2781_v28 = vpack.c.bf16 %v2319_v16, %v2319_v16  ;;  %v10963_v16 = vpop.f32.mrf.mxu2 }
 0x543   : > { %v3321_v50 = vunpack.c.l.b16 %v2781_v28 }
 0x544   : > { %v10952_v51 = vpop.f32.mrf.mxu0 }
 0x545   : > { %13221 = vst [vmem:[#allocation105_spill] sm:$0xff] %v10952_v51  ;;  %v3333_v34 = vpack.c.b16 %v3321_v50, %v3320_v33 }
 0x547   : > { %8308 = vmatmul.msk.bf16.gmra.mxu2 %vm652_vm0, %v3333_v34  ;;  %8384 = vmatmul.msk.bf16.gmra.mxu0 %vm652_vm0, %v13222_v35  ;;  %v13225_v35 = vpack.c.b16 %v10173_v25, %v10171_v23  ;;  %v13228_v25 = vpack.c.b16 %v10197_v52, %v10195_v49  ;;  %v9521_v49 = vld [vmem:[%s13132_s4 + $0x68] sm:$0xff]  ;;  %v9514_v52 = vld [vmem:[%s13132_s4 + $0x30] sm:$0xff] }
 0x548   : > { %v2322_v18 = vpop.f32.mrf.mxu1  ;;  %3750 = vmatpush.bf16.msra.mxu2 %v9521_v49  ;;  %4351 = vmatpush.bf16.msra.mxu0 %v9514_v52 }
 0x549   : > { %v2782_v28 = vpack.c.bf16 %v2322_v18, %v2322_v18  ;;  %v10969_v4 = vpop.f32.mrf.mxu2 }
 0x54b   : > { %8191 = vmatmul.msk.bf16.gmra.mxu1 %vm1622_vm2, %v9448_v32  ;;  %v3322_v34 = vunpack.c.l.b16 %v2782_v28  ;;  %v9449_v32 = vld [vmem:[%s13119_s29 + $0x228] sm:$0xff] }
 0x54c   : > { %v10965_v0 = vpop.f32.mrf.mxu0 }
 0x54d   : > { %13223 = vst [vmem:[#allocation106_spill] sm:$0xff] %v10965_v0 }
 0x550   : > { %v2324_v33 = vpop.f32.mrf.mxu1 }
 0x551   : > { %v2783_v50 = vpack.c.bf16 %v2324_v33, %v2324_v33 }
 0x553   : > { %v3323_v51 = vunpack.c.l.b16 %v2783_v50 }
 0x554   : > { %v10967_v44 = vpop.f32.mrf.mxu0 }
 0x555   : > { %13224 = vst [vmem:[#allocation107_spill] sm:$0xff] %v10967_v44  ;;  %v3334_v3 = vpack.c.b16 %v3323_v51, %v3322_v34  ;;  %v10982_v51 = vpop.f32.mrf.mxu2 }
 0x557   : > { %8309 = vmatmul.msk.bf16.gmra.mxu2 %vm652_vm0, %v3334_v3  ;;  %8385 = vmatmul.msk.bf16.gmra.mxu0 %vm652_vm0, %v13225_v35  ;;  %v9450_v35 = vld [vmem:[%s13119_s29 + $0x230] sm:$0xff] }
 0x558   : > { %v2327_v18 = vpop.f32.mrf.mxu1 }
 0x559   : > { %v2784_v33 = vpack.c.bf16 %v2327_v18, %v2327_v18 }
 0x55b   : > { %8192 = vmatmul.msk.bf16.gmra.mxu1 %vm1622_vm2, %v9449_v32  ;;  %v3324_v3 = vunpack.c.l.b16 %v2784_v33 }
 0x55c   : > { %v10980_v28 = vpop.f32.mrf.mxu0 }
 0x55d   : > { %13226 = vst [vmem:[#allocation108_spill] sm:$0xff] %v10980_v28  ;;  %v10994_v18 = vpop.f32.mrf.mxu2 }
 0x55e   : > { %13229 = vst [vmem:[#allocation110_spill] sm:$0xff] %v10994_v18 }
 0x560   : > { %v2329_v50 = vpop.f32.mrf.mxu1 }
 0x561   : > { %v2785_v34 = vpack.c.bf16 %v2329_v50, %v2329_v50 }
 0x563   : > { %v3325_v44 = vunpack.c.l.b16 %v2785_v34 }
 0x564   : > { %v10984_v23 = vpop.f32.mrf.mxu0 }
 0x565   : > { %v3335_v0 = vpack.c.b16 %v3325_v44, %v3324_v3  ;;  %13227 = vst [vmem:[#allocation109_spill] sm:$0xff] %v10984_v23 }
 0x567   : > { %8310 = vmatmul.msk.bf16.gmra.mxu2 %vm652_vm0, %v3335_v0  ;;  %8386 = vmatmul.msk.bf16.gmra.mxu0 %vm652_vm0, %v13228_v25  ;;  %v11005_v25 = vpop.f32.mrf.mxu2 }
 0x568   : > { %v2332_v32 = vpop.f32.mrf.mxu1  ;;  %13231 = vst [vmem:[#allocation112_spill] sm:$0xff] %v11005_v25 }
 0x569   : > { %v2786_v33 = vpack.c.bf16 %v2332_v32, %v2332_v32  ;;  %v9451_v32 = vld [vmem:[%s13119_s29 + $0x238] sm:$0xff] }
 0x56b   : > { %8193 = vmatmul.msk.bf16.gmra.mxu1 %vm1622_vm2, %v9450_v35  ;;  %v3326_v0 = vunpack.c.l.b16 %v2786_v33  ;;  %v13232_v35 = vpack.c.b16 %v10221_v13, %v10219_v12  ;;  %v13236_v13 = vpack.c.b16 %v10244_v56, %v10242_v54 }
 0x56c   : > { %v10997_v44 = vpop.f32.mrf.mxu0 }
 0x56d   : > { %13230 = vst [vmem:[#allocation111_spill] sm:$0xff] %v10997_v44 }
 0x570   : > { %v2334_v50 = vpop.f32.mrf.mxu1 }
 0x571   : > { %v2787_v34 = vpack.c.bf16 %v2334_v50, %v2334_v50 }
 0x573   : > { %v3327_v3 = vunpack.c.l.b16 %v2787_v34  ;;  %v11018_v34 = vpop.f32.mrf.mxu2 }
 0x574   : > { %v11015_v50 = vpop.f32.mrf.mxu0  ;;  %13234 = vst [vmem:[#allocation114_spill] sm:$0xff] %v11018_v34 }
 0x575   : > { %v3336_v28 = vpack.c.b16 %v3327_v3, %v3326_v0  ;;  %13233 = vst [vmem:[#allocation113_spill] sm:$0xff] %v11015_v50 }
 0x577   : > { %8311 = vmatmul.msk.bf16.gmra.mxu2 %vm652_vm0, %v3336_v28  ;;  %8387 = vmatmul.msk.bf16.gmra.mxu0 %vm652_vm0, %v13232_v35  ;;  %v9452_v35 = vld [vmem:[%s13119_s29 + $0x240] sm:$0xff] }
 0x578   : > { %v2337_v33 = vpop.f32.mrf.mxu1 }
 0x579   : > { %v2788_v0 = vpack.c.bf16 %v2337_v33, %v2337_v33 }
 0x57b   : > { %8194 = vmatmul.msk.bf16.gmra.mxu1 %vm1622_vm2, %v9451_v32  ;;  %v3328_v28 = vunpack.c.l.b16 %v2788_v0  ;;  %v11030_v32 = vpop.f32.mrf.mxu2 }
 0x57c   : > { %v11020_v44 = vpop.f32.mrf.mxu0  ;;  %13237 = vst [vmem:[#allocation116_spill] sm:$0xff] %v11030_v32 }
 0x57d   : > { %13235 = vst [vmem:[#allocation115_spill] sm:$0xff] %v11020_v44 }
 0x580   : > { %v2339_v3 = vpop.f32.mrf.mxu1 }
 0x581   : > { %v2789_v49 = vpack.c.bf16 %v2339_v3, %v2339_v3 }
 0x583   : > { %v3329_v52 = vunpack.c.l.b16 %v2789_v49 }
 0x584   : > { %v11033_v0 = vpop.f32.mrf.mxu0 }
 0x585   : > { %v3337_v12 = vpack.c.b16 %v3329_v52, %v3328_v28  ;;  %13238 = vst [vmem:[#allocation117_spill] sm:$0xff] %v11033_v0  ;;  %v11035_v52 = vpop.f32.mrf.mxu2 }
 0x586   : > { %13239 = vst [vmem:[#allocation118_spill] sm:$0xff] %v11035_v52 }
 0x587   : > { %8312 = vmatmul.msk.bf16.gmra.mxu2 %vm652_vm0, %v3337_v12  ;;  %8388 = vmatmul.msk.bf16.gmra.mxu0 %vm652_vm0, %v13236_v13  ;;  %v13240_v13 = vpack.c.b16 %v10273_v9, %v10266_v60 }
 0x588   : > { %v2342_v33 = vpop.f32.mrf.mxu1 }
 0x589   : > { %v2790_v3 = vpack.c.bf16 %v2342_v33, %v2342_v33  ;;  %v9453_v33 = vld [vmem:[%s13119_s29 + $0x248] sm:$0xff] }
 0x58b   : > { %8195 = vmatmul.msk.bf16.gmra.mxu1 %vm1622_vm2, %v9452_v35  ;;  %v11037_v12 = vunpack.c.l.b16 %v2790_v3  ;;  %v13241_v35 = vpack.c.b16 %v10761_v15, %v10759_v29 }
 0x58c   : > { %v11054_v3 = vpop.f32.mrf.mxu0 }
 0x58d   : > { %13242 = vst [vmem:[#allocation119_spill] sm:$0xff] %v11054_v3  ;;  %v13245_v3 = vpack.c.b16 %v10290_v30, %v10285_v5 }
 0x590   : > { %v2344_v49 = vpop.f32.mrf.mxu1 }
 0x591   : > { %v2791_v28 = vpack.c.bf16 %v2344_v49, %v2344_v49 }
 0x593   : > { %v11039_v54 = vunpack.c.l.b16 %v2791_v28 }
 0x597   : > { %8353 = vmatmul.msk.bf16.vlgmr.msra.gmra.mxu2 %vm652_vm0, %v13240_v13  ;;  %8417 = vmatmul.msk.bf16.vlgmr.msra.gmra.mxu0 %vm652_vm0, %v13241_v35  ;;  %v11059_v13 = vpop.f32.mrf.mxu0 }
 0x598   : > { %v2347_v49 = vpop.f32.mrf.mxu1 }
 0x599   : > { %v2792_v56 = vpack.c.bf16 %v2347_v49, %v2347_v49 }
 0x59a   : > { %v11056_v28 = vpop.f32.mrf.mxu2 }
 0x59b   : > { %13243 = vst [vmem:[#allocation120_spill] sm:$0xff] %v11056_v28  ;;  %8196 = vmatmul.msk.bf16.gmra.mxu1 %vm1622_vm2, %v9453_v33  ;;  %v11063_v29 = vunpack.c.l.b16 %v2792_v56  ;;  %v13246_v33 = vpack.c.b16 %v10780_v37, %v10778_v11  ;;  %v9454_v56 = vld [vmem:[%s13119_s29 + $0x250] sm:$0xff] }
 0x59f   : > { %v11085_v35 = vpop.f32.mrf.mxu0 }
 0x5a0   : > { %v2349_v60 = vpop.f32.mrf.mxu1 }
 0x5a1   : > { %v2793_v9 = vpack.c.bf16 %v2349_v60, %v2349_v60 }
 0x5a2   : > { %v11061_v0 = vpop.f32.mrf.mxu2 }
 0x5a3   : > { %13244 = vst [vmem:[#allocation121_spill] sm:$0xff] %v11061_v0  ;;  %v11065_v15 = vunpack.c.l.b16 %v2793_v9  ;;  %v11082_v9 = vpop.f32.mrf.mxu3 }
 0x5a7   : > { %8354 = vmatmul.msk.bf16.gmra.mxu2 %vm652_vm0, %v13245_v3  ;;  %8418 = vmatmul.msk.bf16.gmra.mxu0 %vm652_vm0, %v13246_v33  ;;  %v11097_v23 = vpop.f32.mrf.mxu0 }
 0x5a8   : > { %v2352_v49 = vpop.f32.mrf.mxu1 }
 0x5a9   : > { %v2794_v5 = vpack.c.bf16 %v2352_v49, %v2352_v49  ;;  %v13250_v49 = vpack.c.b16 %v10799_v58, %v10797_v55 }
 0x5aa   : > { %v11080_v60 = vpop.f32.mrf.mxu2 }
 0x5ab   : > { %13247 = vst [vmem:[#allocation122_spill] sm:$0xff] %v11080_v60  ;;  %8197 = vmatmul.msk.bf16.gmra.mxu1 %vm1622_vm2, %v9454_v56  ;;  %v11089_v11 = vunpack.c.l.b16 %v2794_v5  ;;  %v11093_v33 = vpop.f32.mrf.mxu3  ;;  %v13249_v56 = vpack.c.b16 %v10309_v43, %v10304_v45  ;;  %v9455_v5 = vld [vmem:[%s13119_s29 + $0x258] sm:$0xff] }
 0x5ac   : > { %v9459_v60 = vld [vmem:[%s13119_s29 + $0x278] sm:$0xff] }
 0x5af   : > { %v11115_v45 = vpop.f32.mrf.mxu0 }
 0x5b0   : > { %v2354_v30 = vpop.f32.mrf.mxu1 }
 0x5b1   : > { %v2795_v3 = vpack.c.bf16 %v2354_v30, %v2354_v30 }
 0x5b2   : > { %v11087_v44 = vpop.f32.mrf.mxu2 }
 0x5b3   : > { %13248 = vst [vmem:[#allocation123_spill] sm:$0xff] %v11087_v44  ;;  %v11091_v37 = vunpack.c.l.b16 %v2795_v3  ;;  %v11113_v50 = vpop.f32.mrf.mxu3 }
 0x5b7   : > { %8355 = vmatmul.msk.bf16.gmra.mxu2 %vm652_vm0, %v13249_v56  ;;  %8419 = vmatmul.msk.bf16.gmra.mxu0 %vm652_vm0, %v13250_v49 }
 0x5b8   : > { %v2357_v30 = vpop.f32.mrf.mxu1 }
 0x5b9   : > { %v2796_v38 = vpack.c.bf16 %v2357_v30, %v2357_v30 }
 0x5ba   : > { %v11110_v3 = vpop.f32.mrf.mxu2 }
 0x5bb   : > { %13251 = vst [vmem:[#allocation124_spill] sm:$0xff] %v11110_v3  ;;  %8198 = vmatmul.msk.bf16.gmra.mxu1 %vm1622_vm2, %v9455_v5  ;;  %v11119_v58 = vunpack.c.l.b16 %v2796_v38  ;;  %v13253_v3 = vpack.c.b16 %v10326_v48, %v10321_v59  ;;  %v13254_v5 = vpack.c.b16 %v10818_v40, %v10816_v57  ;;  %v9456_v38 = vld [vmem:[%s13119_s29 + $0x260] sm:$0xff] }
 0x5c0   : > { %v2359_v43 = vpop.f32.mrf.mxu1 }
 0x5c1   : > { %v2797_v56 = vpack.c.bf16 %v2359_v43, %v2359_v43  ;;  %v11138_v43 = vpop.f32.mrf.mxu3 }
 0x5c2   : > { %v11117_v7 = vpop.f32.mrf.mxu2 }
 0x5c3   : > { %13252 = vst [vmem:[#allocation125_spill] sm:$0xff] %v11117_v7  ;;  %v11121_v55 = vunpack.c.l.b16 %v2797_v56  ;;  %v11140_v56 = vpop.f32.mrf.mxu0 }
 0x5c7   : > { %8356 = vmatmul.msk.bf16.gmra.mxu2 %vm652_vm0, %v13253_v3  ;;  %8420 = vmatmul.msk.bf16.gmra.mxu0 %vm652_vm0, %v13254_v5  ;;  %v13258_v3 = vpack.c.b16 %v10345_v20, %v10340_v6  ;;  %v13259_v5 = vpack.c.b16 %v10833_v10, %v10831_v36  ;;  %v13264_v10 = vpack.c.b16 %v10364_v42, %v10357_v19 }
 0x5c8   : > { %v11136_v30 = vpop.f32.mrf.mxu1 }
 0x5c9   : > { %v11149_v40 = vpop.f32.mrf.mxu3 }
 0x5ca   : > { %v11142_v49 = vpop.f32.mrf.mxu2  ;;  %13257 = vst [vmem:[#allocation128_spill] sm:$0xff] %v11149_v40 }
 0x5cb   : > { %13255 = vst [vmem:[#allocation126_spill] sm:$0xff] %v11142_v49  ;;  %8199 = vmatmul.msk.bf16.gmra.mxu1 %vm1622_vm2, %v9456_v38  ;;  %v11151_v57 = vpop.f32.mrf.mxu0  ;;  %v9457_v38 = vld [vmem:[%s13119_s29 + $0x268] sm:$0xff] }
 0x5d0   : > { %v11145_v59 = vpop.f32.mrf.mxu1 }
 0x5d1   : > { %v11169_v7 = vpop.f32.mrf.mxu3 }
 0x5d2   : > { %v11147_v48 = vpop.f32.mrf.mxu2  ;;  %13261 = vst [vmem:[#allocation130_spill] sm:$0xff] %v11169_v7  ;;  %v13333_v7 = vld [vmem:[#allocation18_spill] sm:$0xff] }
 0x5d3   : > { %13256 = vst [vmem:[#allocation127_spill] sm:$0xff] %v11147_v48  ;;  %v11171_v6 = vpop.f32.mrf.mxu0 }
 0x5d7   : > { %8357 = vmatmul.msk.bf16.gmra.mxu2 %vm652_vm0, %v13258_v3  ;;  %8421 = vmatmul.msk.bf16.gmra.mxu0 %vm652_vm0, %v13259_v5  ;;  %v13265_v5 = vpack.c.b16 %v10848_v31, %v10846_v39  ;;  %v9517_v31 = vld [vmem:[%s13132_s4 + $0x48] sm:$0xff] }
 0x5d8   : > { %v11164_v49 = vpop.f32.mrf.mxu1  ;;  %3500 = vmatpush.bf16.msra.mxu3 %v9517_v31 }
 0x5d9   : > { %v11177_v36 = vpop.f32.mrf.mxu3 }
 0x5da   : > { %v11166_v48 = vpop.f32.mrf.mxu2  ;;  %13263 = vst [vmem:[#allocation132_spill] sm:$0xff] %v11177_v36 }
 0x5db   : > { %13260 = vst [vmem:[#allocation129_spill] sm:$0xff] %v11166_v48  ;;  %8200 = vmatmul.msk.bf16.gmra.mxu1 %vm1622_vm2, %v9457_v38  ;;  %v9458_v38 = vld [vmem:[%s13119_s29 + $0x270] sm:$0xff]  ;;  %v11190_v48 = vpop.f32.mrf.mxu0 }
 0x5e0   : > { %v11173_v20 = vpop.f32.mrf.mxu1 }
 0x5e1   : > { %v11199_v42 = vpop.f32.mrf.mxu3 }
 0x5e2   : > { %v11175_v3 = vpop.f32.mrf.mxu2  ;;  %13269 = vst [vmem:[#allocation136_spill] sm:$0xff] %v11199_v42 }
 0x5e3   : > { %13262 = vst [vmem:[#allocation131_spill] sm:$0xff] %v11175_v3 }
 0x5e7   : > { %8358 = vmatmul.msk.bf16.gmra.mxu2 %vm652_vm0, %v13264_v10  ;;  %8422 = vmatmul.msk.bf16.gmra.mxu0 %vm652_vm0, %v13265_v5  ;;  %v11201_v10 = vpop.f32.mrf.mxu0  ;;  %v9510_v5 = vld [vmem:[%s13132_s4 + $0x10] sm:$0xff] }
 0x5e8   : > { %v11192_v44 = vpop.f32.mrf.mxu1  ;;  %4113 = vmatpush.bf16.msrb.mxu2 %v9510_v5  ;;  %v13278_v5 = vpack.c.b16 %v10886_v27, %v10884_v63  ;;  %v13282_v27 = vld [vmem:[#allocation28_spill] sm:$0xff] }
 0x5e9   : > { %13266 = vst [vmem:[#allocation133_spill] sm:$0xff] %v11192_v44  ;;  %v11229_v31 = vpop.f32.mrf.mxu3  ;;  %v13283_v63 = vpack.c.b16 %v10408_v46, %v13282_v27 }
 0x5ea   : > { %v11194_v3 = vpop.f32.mrf.mxu2 }
 0x5eb   : > { %13267 = vst [vmem:[#allocation134_spill] sm:$0xff] %v11194_v3  ;;  %8201 = vmatmul.msk.bf16.gmra.mxu1 %vm1622_vm2, %v9458_v38  ;;  %v9520_v38 = vld [vmem:[%s13132_s4 + $0x60] sm:$0xff]  ;;  %v13271_v3 = vpack.c.b16 %v10381_v53, %v10376_v8 }
 0x5ec   : > { %4708 = vmatpush.bf16.msrb.mxu0 %v9520_v38 }
 0x5ef   : > { %v11232_v8 = vpop.f32.mrf.mxu0 }
 0x5f0   : > { %v11197_v19 = vpop.f32.mrf.mxu1 }
 0x5f1   : > { %13268 = vst [vmem:[#allocation135_spill] sm:$0xff] %v11197_v19 }
 0x5f2   : > { %v11203_v39 = vpop.f32.mrf.mxu2 }
 0x5f3   : > { %13270 = vst [vmem:[#allocation137_spill] sm:$0xff] %v11203_v39  ;;  %v13272_v39 = vpack.c.b16 %v10863_v24, %v10861_v41  ;;  %v11238_v24 = vpop.f32.mrf.mxu3 }
 0x5f7   : > { %8359 = vmatmul.msk.bf16.gmra.mxu2 %vm652_vm0, %v13271_v3  ;;  %8423 = vmatmul.msk.bf16.gmra.mxu0 %vm652_vm0, %v13272_v39  ;;  %v11240_v41 = vpop.f32.mrf.mxu0  ;;  %v13277_v39 = vpack.c.b16 %v10400_v22, %v10395_v62 }
 0x5f8   : > { %v11225_v0 = vpop.f32.mrf.mxu1 }
 0x5f9   : > { %13273 = vst [vmem:[#allocation138_spill] sm:$0xff] %v11225_v0 }
 0x5fa   : > { %v11227_v28 = vpop.f32.mrf.mxu2 }
 0x5fb   : > { %13274 = vst [vmem:[#allocation139_spill] sm:$0xff] %v11227_v28  ;;  %8202 = vmatmul.msk.bf16.gmra.mxu1 %vm1622_vm2, %v9459_v60  ;;  %v11252_v28 = vpop.f32.mrf.mxu3 }
 0x5ff   : > { %v11254_v52 = vpop.f32.mrf.mxu0 }
 0x600   : > { %v11234_v53 = vpop.f32.mrf.mxu1  ;;  %13280 = vst [vmem:[#allocation143_spill] sm:$0xff] %v11254_v52 }
 0x601   : > { %13275 = vst [vmem:[#allocation140_spill] sm:$0xff] %v11234_v53 }
 0x602   : > { %v11236_v3 = vpop.f32.mrf.mxu2 }
 0x603   : > { %13276 = vst [vmem:[#allocation141_spill] sm:$0xff] %v11236_v3  ;;  %v11267_v42 = vpop.f32.mrf.mxu3 }
 0x607   : > { %8360 = vmatmul.msk.bf16.gmra.mxu2 %vm652_vm0, %v13277_v39  ;;  %8424 = vmatmul.msk.bf16.gmra.mxu0 %vm652_vm0, %v13278_v5  ;;  %v13284_v5 = vld [vmem:[#allocation9_spill] sm:$0xff] }
 0x608   : > { %v2382_v60 = vpop.f32.mrf.mxu1 }
 0x609   : > { %v2806_v3 = vpack.c.bf16 %v2382_v60, %v2382_v60 }
 0x60a   : > { %v11250_v38 = vpop.f32.mrf.mxu2 }
 0x60b   : > { %13279 = vst [vmem:[#allocation142_spill] sm:$0xff] %v11250_v38  ;;  %v3439_v62 = vunpack.c.l.b16 %v2806_v3  ;;  %v13285_v38 = vld [vmem:[#allocation8_spill] sm:$0xff]  ;;  %v11275_v46 = vpop.f32.mrf.mxu3 }
 0x60c   : > { %v13286_v53 = vpack.c.b16 %v13284_v5, %v13285_v38  ;;  %v13292_v5 = vld [vmem:[#allocation31_spill] sm:$0xff] }
 0x610   : > { %v2384_v32 = vpop.f32.mrf.mxu1 }
 0x611   : > { %v2807_v34 = vpack.c.bf16 %v2384_v32, %v2384_v32  ;;  %v11269_v32 = vpop.f32.mrf.mxu0 }
 0x612   : > { %v11256_v0 = vpop.f32.mrf.mxu2  ;;  %13287 = vst [vmem:[#allocation28_spill] sm:$0xff] %v11269_v32 }
 0x613   : > { %13281 = vst [vmem:[#allocation144_spill] sm:$0xff] %v11256_v0  ;;  %v3440_v22 = vunpack.c.l.b16 %v2807_v34 }
 0x615   : > { %v3455_v39 = vpack.c.b16 %v3440_v22, %v3439_v62 }
 0x617   : > { %8321 = vmatmul.msk.bf16.vlgmr.msra.gmra.mxu3 %vm652_vm0, %v3455_v39  ;;  %8393 = vmatmul.msk.bf16.vlgmr.msrb.gmra.mxu2 %vm652_vm0, %v13283_v63 }
 0x618   : > { %8453 = vmatmul.msk.bf16.vlgmr.msrb.gmra.mxu0 %vm652_vm0, %v13286_v53  ;;  %v2387_v60 = vpop.f32.mrf.mxu1  ;;  %v13291_v53 = vld [vmem:[#allocation32_spill] sm:$0xff] }
 0x619   : > { %v2808_v34 = vpack.c.bf16 %v2387_v60, %v2387_v60  ;;  %v11277_v0 = vpop.f32.mrf.mxu0  ;;  %v13293_v36 = vpack.c.b16 %v13291_v53, %v13292_v5  ;;  %v13295_v60 = vld [vmem:[#allocation10_spill] sm:$0xff] }
 0x61a   : > { %v11271_v3 = vpop.f32.mrf.mxu2  ;;  %13290 = vst [vmem:[#allocation145_spill] sm:$0xff] %v11277_v0 }
 0x61b   : > { %13288 = vst [vmem:[#allocation9_spill] sm:$0xff] %v11271_v3  ;;  %v3441_v27 = vunpack.c.l.b16 %v2808_v34  ;;  %v13294_v3 = vld [vmem:[#allocation11_spill] sm:$0xff]  ;;  %v11290_v34 = vpop.f32.mrf.mxu3 }
 0x61c   : > { %v13296_v32 = vpack.c.b16 %v13294_v3, %v13295_v60  ;;  %v13301_v3 = vld [vmem:[#allocation35_spill] sm:$0xff] }
 0x620   : > { %v2389_v62 = vpop.f32.mrf.mxu1 }
 0x621   : > { %v2809_v22 = vpack.c.bf16 %v2389_v62, %v2389_v62 }
 0x622   : > { %v11273_v39 = vpop.f32.mrf.mxu2 }
 0x623   : > { %13289 = vst [vmem:[#allocation8_spill] sm:$0xff] %v11273_v39  ;;  %v3442_v63 = vunpack.c.l.b16 %v2809_v22  ;;  %v11292_v22 = vpop.f32.mrf.mxu0  ;;  %v11296_v25 = vpop.f32.mrf.mxu3 }
 0x624   : > { %13298 = vst [vmem:[#allocation31_spill] sm:$0xff] %v11292_v22  ;;  %v13304_v22 = vld [vmem:[#allocation13_spill] sm:$0xff] }
 0x625   : > { %v3456_v38 = vpack.c.b16 %v3442_v63, %v3441_v27 }
 0x627   : > { %8322 = vmatmul.msk.bf16.gmra.mxu3 %vm652_vm0, %v3456_v38  ;;  %8394 = vmatmul.msk.bf16.gmra.mxu2 %vm652_vm0, %v13293_v36 }
 0x628   : > { %8454 = vmatmul.msk.bf16.gmra.mxu0 %vm652_vm0, %v13296_v32  ;;  %v2392_v62 = vpop.f32.mrf.mxu1  ;;  %v13300_v32 = vld [vmem:[#allocation36_spill] sm:$0xff] }
 0x629   : > { %v2810_v27 = vpack.c.bf16 %v2392_v62, %v2392_v62  ;;  %v13302_v60 = vpack.c.b16 %v13300_v32, %v13301_v3  ;;  %v13305_v62 = vld [vmem:[#allocation12_spill] sm:$0xff] }
 0x62a   : > { %v11288_v39 = vpop.f32.mrf.mxu2  ;;  %v13306_v52 = vpack.c.b16 %v13304_v22, %v13305_v62  ;;  %v13310_v22 = vld [vmem:[#allocation40_spill] sm:$0xff]  ;;  %v13311_v62 = vld [vmem:[#allocation39_spill] sm:$0xff] }
 0x62b   : > { %13297 = vst [vmem:[#allocation32_spill] sm:$0xff] %v11288_v39  ;;  %v3443_v53 = vunpack.c.l.b16 %v2810_v27  ;;  %v11303_v39 = vpop.f32.mrf.mxu0 }
 0x62c   : > { %13303 = vst [vmem:[#allocation10_spill] sm:$0xff] %v11303_v39 }
 0x630   : > { %v2394_v63 = vpop.f32.mrf.mxu1 }
 0x631   : > { %v2811_v38 = vpack.c.bf16 %v2394_v63, %v2394_v63 }
 0x632   : > { %v11294_v0 = vpop.f32.mrf.mxu2 }
 0x633   : > { %13299 = vst [vmem:[#allocation11_spill] sm:$0xff] %v11294_v0  ;;  %v3444_v5 = vunpack.c.l.b16 %v2811_v38  ;;  %v11313_v0 = vpop.f32.mrf.mxu0 }
 0x634   : > { %13308 = vst [vmem:[#allocation35_spill] sm:$0xff] %v11313_v0 }
 0x635   : > { %v3457_v36 = vpack.c.b16 %v3444_v5, %v3443_v53  ;;  %v11311_v5 = vpop.f32.mrf.mxu3 }
 0x637   : > { %8323 = vmatmul.msk.bf16.gmra.mxu3 %vm652_vm0, %v3457_v36  ;;  %8395 = vmatmul.msk.bf16.gmra.mxu2 %vm652_vm0, %v13302_v60 }
 0x638   : > { %8455 = vmatmul.msk.bf16.gmra.mxu0 %vm652_vm0, %v13306_v52  ;;  %v2397_v63 = vpop.f32.mrf.mxu1  ;;  %v13312_v52 = vpack.c.b16 %v13310_v22, %v13311_v62 }
 0x639   : > { %v2812_v38 = vpack.c.bf16 %v2397_v63, %v2397_v63  ;;  %v13314_v63 = vld [vmem:[#allocation14_spill] sm:$0xff] }
 0x63a   : > { %v11309_v27 = vpop.f32.mrf.mxu2 }
 0x63b   : > { %13307 = vst [vmem:[#allocation36_spill] sm:$0xff] %v11309_v27  ;;  %v3445_v3 = vunpack.c.l.b16 %v2812_v38  ;;  %v13313_v27 = vld [vmem:[#allocation15_spill] sm:$0xff]  ;;  %v11330_v38 = vpop.f32.mrf.mxu0 }
 0x63c   : > { %v13315_v18 = vpack.c.b16 %v13313_v27, %v13314_v63  ;;  %13317 = vst [vmem:[#allocation40_spill] sm:$0xff] %v11330_v38  ;;  %v13321_v63 = vld [vmem:[#allocation43_spill] sm:$0xff]  ;;  %v13323_v38 = vld [vmem:[#allocation17_spill] sm:$0xff] }
 0x63d   : > { %v11328_v0 = vpop.f32.mrf.mxu3 }
 0x640   : > { %v2399_v53 = vpop.f32.mrf.mxu1 }
 0x641   : > { %v2813_v36 = vpack.c.bf16 %v2399_v53, %v2399_v53 }
 0x642   : > { %v11315_v32 = vpop.f32.mrf.mxu2 }
 0x643   : > { %13309 = vst [vmem:[#allocation13_spill] sm:$0xff] %v11315_v32  ;;  %v3446_v60 = vunpack.c.l.b16 %v2813_v36  ;;  %v11336_v27 = vpop.f32.mrf.mxu0 }
 0x644   : > { %13319 = vst [vmem:[#allocation15_spill] sm:$0xff] %v11336_v27 }
 0x645   : > { %v3458_v39 = vpack.c.b16 %v3446_v60, %v3445_v3 }
 0x647   : > { %8324 = vmatmul.msk.bf16.gmra.mxu3 %vm652_vm0, %v3458_v39  ;;  %8396 = vmatmul.msk.bf16.gmra.mxu2 %vm652_vm0, %v13312_v52  ;;  %v11334_v52 = vpop.f32.mrf.mxu3 }
 0x648   : > { %8456 = vmatmul.msk.bf16.gmra.mxu0 %vm652_vm0, %v13315_v18  ;;  %v2402_v53 = vpop.f32.mrf.mxu1  ;;  %v13320_v18 = vld [vmem:[#allocation44_spill] sm:$0xff] }
 0x649   : > { %v2814_v36 = vpack.c.bf16 %v2402_v53, %v2402_v53  ;;  %v13324_v53 = vld [vmem:[#allocation16_spill] sm:$0xff] }
 0x64a   : > { %v11326_v44 = vpop.f32.mrf.mxu2  ;;  %v13325_v19 = vpack.c.b16 %v13323_v38, %v13324_v53  ;;  %v13329_v38 = vld [vmem:[#allocation48_spill] sm:$0xff]  ;;  %v13330_v53 = vld [vmem:[#allocation47_spill] sm:$0xff] }
 0x64b   : > { %13316 = vst [vmem:[#allocation12_spill] sm:$0xff] %v11326_v44  ;;  %v3447_v22 = vunpack.c.l.b16 %v2814_v36  ;;  %v13322_v44 = vpack.c.b16 %v13320_v18, %v13321_v63 }
 0x650   : > { %v2404_v3 = vpop.f32.mrf.mxu1 }
 0x651   : > { %v2815_v39 = vpack.c.bf16 %v2404_v3, %v2404_v3 }
 0x652   : > { %v11332_v60 = vpop.f32.mrf.mxu2 }
 0x653   : > { %13318 = vst [vmem:[#allocation39_spill] sm:$0xff] %v11332_v60  ;;  %v3448_v62 = vunpack.c.l.b16 %v2815_v39  ;;  %v11349_v39 = vpop.f32.mrf.mxu3 }
 0x655   : > { %v3459_v32 = vpack.c.b16 %v3448_v62, %v3447_v22  ;;  %v11351_v62 = vpop.f32.mrf.mxu0 }
 0x656   : > { %13327 = vst [vmem:[#allocation44_spill] sm:$0xff] %v11351_v62 }
 0x657   : > { %8325 = vmatmul.msk.bf16.gmra.mxu3 %vm652_vm0, %v3459_v32  ;;  %8397 = vmatmul.msk.bf16.gmra.mxu2 %vm652_vm0, %v13322_v44 }
 0x658   : > { %8457 = vmatmul.msk.bf16.gmra.mxu0 %vm652_vm0, %v13325_v19  ;;  %v2407_v3 = vpop.f32.mrf.mxu1  ;;  %v13331_v19 = vpack.c.b16 %v13329_v38, %v13330_v53 }
 0x659   : > { %v2816_v22 = vpack.c.bf16 %v2407_v3, %v2407_v3 }
 0x65a   : > { %v11347_v36 = vpop.f32.mrf.mxu2 }
 0x65b   : > { %13326 = vst [vmem:[#allocation14_spill] sm:$0xff] %v11347_v36  ;;  %v3449_v18 = vunpack.c.l.b16 %v2816_v22  ;;  %v13332_v36 = vld [vmem:[#allocation19_spill] sm:$0xff]  ;;  %v11364_v62 = vpop.f32.mrf.mxu3 }
 0x65c   : > { %v13334_v40 = vpack.c.b16 %v13332_v36, %v13333_v7  ;;  %13335 = vst [vmem:[#allocation17_spill] sm:$0xff] %v11364_v62  ;;  %v9516_v7 = vld [vmem:[%s13132_s4 + $0x40] sm:$0xff] }
 0x65d   : > { %4470 = vmatpush.bf16.msra.mxu2 %v9516_v7 }
 0x660   : > { %v2409_v60 = vpop.f32.mrf.mxu1 }
 0x661   : > { %v2817_v32 = vpack.c.bf16 %v2409_v60, %v2409_v60  ;;  %v11366_v60 = vpop.f32.mrf.mxu0 }
 0x662   : > { %v11353_v27 = vpop.f32.mrf.mxu2  ;;  %13336 = vst [vmem:[#allocation16_spill] sm:$0xff] %v11366_v60 }
 0x663   : > { %13328 = vst [vmem:[#allocation43_spill] sm:$0xff] %v11353_v27  ;;  %v3450_v63 = vunpack.c.l.b16 %v2817_v32  ;;  %v9523_v32 = vld [vmem:[%s13132_s4 + $0x78] sm:$0xff]  ;;  %v11378_v53 = vpop.f32.mrf.mxu3 }
 0x664   : > { %3875 = vmatpush.bf16.msrb.mxu3 %v9523_v32  ;;  %13339 = vst [vmem:[#allocation19_spill] sm:$0xff] %v11378_v53  ;;  %v13342_v32 = vld [vmem:[#allocation51_spill] sm:$0xff] }
 0x665   : > { %v3460_v44 = vpack.c.b16 %v3450_v63, %v3449_v18 }
 0x667   : > { %8326 = vmatmul.msk.bf16.gmra.mxu3 %vm652_vm0, %v3460_v44  ;;  %8398 = vmatmul.msk.bf16.gmra.mxu2 %vm652_vm0, %v13331_v19 }
 0x668   : > { %8458 = vmatmul.msk.bf16.gmra.mxu0 %vm652_vm0, %v13334_v40  ;;  %v2412_v3 = vpop.f32.mrf.mxu1 }
 0x669   : > { %v2818_v18 = vpack.c.bf16 %v2412_v3, %v2412_v3  ;;  %v11380_v19 = vpop.f32.mrf.mxu0  ;;  %v13341_v3 = vld [vmem:[#allocation52_spill] sm:$0xff] }
 0x66a   : > { %v11368_v22 = vpop.f32.mrf.mxu2  ;;  %13340 = vst [vmem:[#allocation18_spill] sm:$0xff] %v11380_v19 }
 0x66b   : > { %13337 = vst [vmem:[#allocation48_spill] sm:$0xff] %v11368_v22  ;;  %v3451_v40 = vunpack.c.l.b16 %v2818_v18  ;;  %v13343_v22 = vpack.c.b16 %v13341_v3, %v13342_v32  ;;  %v11393_v53 = vpop.f32.mrf.mxu3 }
 0x66c   : > { %13348 = vst [vmem:[#allocation51_spill] sm:$0xff] %v11393_v53 }
 0x670   : > { %v2414_v63 = vpop.f32.mrf.mxu1 }
 0x671   : > { %v2819_v44 = vpack.c.bf16 %v2414_v63, %v2414_v63  ;;  %v13344_v63 = vld [vmem:[#allocation21_spill] sm:$0xff]  ;;  %v11395_v19 = vpop.f32.mrf.mxu0 }
 0x672   : > { %v11373_v38 = vpop.f32.mrf.mxu2  ;;  %13349 = vst [vmem:[#allocation21_spill] sm:$0xff] %v11395_v19  ;;  %v13354_v19 = vld [vmem:[#allocation23_spill] sm:$0xff] }
 0x673   : > { %13338 = vst [vmem:[#allocation47_spill] sm:$0xff] %v11373_v38  ;;  %v3452_v36 = vunpack.c.l.b16 %v2819_v44  ;;  %v13345_v38 = vld [vmem:[#allocation20_spill] sm:$0xff] }
 0x674   : > { %v13346_v60 = vpack.c.b16 %v13344_v63, %v13345_v38  ;;  %v13351_v38 = vld [vmem:[#allocation56_spill] sm:$0xff]  ;;  %v13352_v63 = vld [vmem:[#allocation55_spill] sm:$0xff] }
 0x675   : > { %v3461_v27 = vpack.c.b16 %v3452_v36, %v3451_v40 }
 0x677   : > { %8327 = vmatmul.msk.bf16.gmra.mxu3 %vm652_vm0, %v3461_v27  ;;  %8399 = vmatmul.msk.bf16.gmra.mxu2 %vm652_vm0, %v13343_v22 }
 0x678   : > { %8459 = vmatmul.msk.bf16.gmra.mxu0 %vm652_vm0, %v13346_v60  ;;  %v2417_v18 = vpop.f32.mrf.mxu1  ;;  %v13353_v60 = vpack.c.b16 %v13351_v38, %v13352_v63  ;;  %v13362_v38 = vpack.c.b16 %v11039_v54, %v11037_v12 }
 0x679   : > { %v2820_v7 = vpack.c.bf16 %v2417_v18, %v2417_v18  ;;  %v11406_v53 = vpop.f32.mrf.mxu0  ;;  %v13355_v18 = vld [vmem:[#allocation22_spill] sm:$0xff] }
 0x67a   : > { %v11391_v44 = vpop.f32.mrf.mxu2  ;;  %v13356_v62 = vpack.c.b16 %v13354_v19, %v13355_v18 }
 0x67b   : > { %13347 = vst [vmem:[#allocation52_spill] sm:$0xff] %v11391_v44  ;;  %v3453_v3 = vunpack.c.l.b16 %v2820_v7  ;;  %v11404_v44 = vpop.f32.mrf.mxu3 }
 0x680   : > { %v2419_v40 = vpop.f32.mrf.mxu1 }
 0x681   : > { %v2821_v27 = vpack.c.bf16 %v2419_v40, %v2419_v40 }
 0x682   : > { %v11397_v36 = vpop.f32.mrf.mxu2 }
 0x683   : > { %13350 = vst [vmem:[#allocation20_spill] sm:$0xff] %v11397_v36  ;;  %v3454_v32 = vunpack.c.l.b16 %v2821_v27  ;;  %v11414_v7 = vpop.f32.mrf.mxu3 }
 0x685   : > { %v3462_v22 = vpack.c.b16 %v3454_v32, %v3453_v3  ;;  %v13359_v3 = vld [vmem:[#allocation60_spill] sm:$0xff]  ;;  %v13360_v32 = vld [vmem:[#allocation59_spill] sm:$0xff] }
 0x687   : > { %8328 = vmatmul.msk.bf16.gmra.mxu3 %vm652_vm0, %v3462_v22  ;;  %8400 = vmatmul.msk.bf16.gmra.mxu2 %vm652_vm0, %v13353_v60  ;;  %v13361_v22 = vpack.c.b16 %v13359_v3, %v13360_v32  ;;  %v3999_v32 = vadd.f32 %v11085_v35, %v10892_v1  ;;  %v4002_v1 = vadd.f32 %v11097_v23, %v10901_v14 }
 0x688   : > { %8460 = vmatmul.msk.bf16.gmra.mxu0 %vm652_vm0, %v13356_v62  ;;  %v3997_v62 = vadd.f32 %v11059_v13, %v10880_v26  ;;  %v13366_v26 = vpack.c.b16 %v11065_v15, %v11063_v29  ;;  %v13370_v14 = vpack.c.b16 %v11091_v37, %v11089_v11 }
 0x68a   : > { %v11412_v40 = vpop.f32.mrf.mxu2 }
 0x68b   : > { %13357 = vst [vmem:[#allocation56_spill] sm:$0xff] %v11412_v40 }
 0x692   : > { %v11416_v27 = vpop.f32.mrf.mxu2 }
 0x693   : > { %13358 = vst [vmem:[#allocation55_spill] sm:$0xff] %v11416_v27 }
 0x697   : > { %8369 = vmatmul.msk.bf16.vlgmr.msrb.gmra.mxu3 %vm652_vm0, %v13361_v22  ;;  %8429 = vmatmul.msk.bf16.vlgmr.msra.gmra.mxu2 %vm652_vm0, %v13362_v38  ;;  %v13363_v22 = vld [vmem:[#allocation62_spill] sm:$0xff]  ;;  %v13364_v38 = vld [vmem:[#allocation61_spill] sm:$0xff] }
 0x698   : > { %v13365_v40 = vpack.c.b16 %v13363_v22, %v13364_v38  ;;  %v4009_v38 = vadd.f32 %v11151_v57, %v10933_v47  ;;  %v4012_v47 = vadd.f32 %v11171_v6, %v10945_v2 }
 0x69a   : > { %v11426_v63 = vpop.f32.mrf.mxu3  ;;  %v4115_v19 = vpop.f32.mrf.mxu2 }
 0x69b   : > { %v4116_v60 = vadd.f32 %v4115_v19, %v11229_v31 }
 0x69d   : > { %v11431_v18 = vadd.f32 %v4116_v60, %v3997_v62  ;;  %v13367_v60 = vld [vmem:[#allocation64_spill] sm:$0xff] }
 0x6a2   : > { %v11433_v27 = vpop.f32.mrf.mxu3  ;;  %v4117_v3 = vpop.f32.mrf.mxu2 }
 0x6a3   : > { %v4118_v12 = vadd.f32 %v4117_v3, %v11238_v24  ;;  %v13368_v3 = vld [vmem:[#allocation63_spill] sm:$0xff] }
 0x6a5   : > { %v11438_v54 = vadd.f32 %v4118_v12, %v3999_v32  ;;  %v13369_v32 = vpack.c.b16 %v13367_v60, %v13368_v3 }
 0x6a7   : > { %8370 = vmatmul.msk.bf16.gmra.mxu3 %vm652_vm0, %v13365_v40  ;;  %8430 = vmatmul.msk.bf16.gmra.mxu2 %vm652_vm0, %v13366_v26  ;;  %v4004_v40 = vadd.f32 %v11115_v45, %v10913_v21  ;;  %v4007_v21 = vadd.f32 %v11140_v56, %v10918_v61  ;;  %v13371_v26 = vld [vmem:[#allocation66_spill] sm:$0xff]  ;;  %v13374_v61 = vpack.c.b16 %v11121_v55, %v11119_v58 }
 0x6a8   : > { %v2798_v55 = vpack.c.bf16 %v11136_v30, %v11136_v30 }
 0x6aa   : > { %v11448_v13 = vpop.f32.mrf.mxu3  ;;  %v4120_v31 = vpop.f32.mrf.mxu2  ;;  %v4417_v6 = vunpack.c.l.b16 %v2798_v55 }
 0x6ab   : > { %v4121_v35 = vadd.f32 %v4120_v31, %v11252_v28  ;;  %v13372_v31 = vld [vmem:[#allocation65_spill] sm:$0xff] }
 0x6ad   : > { %v11453_v24 = vadd.f32 %v4121_v35, %v4002_v1  ;;  %v13373_v1 = vpack.c.b16 %v13371_v26, %v13372_v31  ;;  %v2911_v35 = vpack.c.bf16 %v11093_v33, %v11093_v33 }
 0x6b2   : > { %v11455_v19 = vpop.f32.mrf.mxu3  ;;  %v4122_v62 = vpop.f32.mrf.mxu2 }
 0x6b3   : > { %v4123_v29 = vadd.f32 %v4122_v62, %v11267_v42  ;;  %v2799_v62 = vpack.c.bf16 %v11145_v59, %v11145_v59 }
 0x6b5   : > { %v11460_v15 = vadd.f32 %v4123_v29, %v4004_v40  ;;  %v3823_v29 = vunpack.c.l.b16 %v2911_v35  ;;  %v4418_v60 = vunpack.c.l.b16 %v2799_v62  ;;  %v13383_v35 = vld [vmem:[#allocation135_spill] sm:$0xff] }
 0x6b6   : > { %v2803_v62 = vpack.c.bf16 %v13383_v35, %v13383_v35 }
 0x6b7   : > { %8371 = vmatmul.msk.bf16.gmra.mxu3 %vm652_vm0, %v13369_v32  ;;  %8431 = vmatmul.msk.bf16.gmra.mxu2 %vm652_vm0, %v13370_v14  ;;  %v4429_v32 = vpack.c.b16 %v4418_v60, %v4417_v6 }
 0x6b8   : > { %v4422_v60 = vunpack.c.l.b16 %v2803_v62 }
 0x6ba   : > { %v11470_v23 = vpop.f32.mrf.mxu3  ;;  %v4125_v28 = vpop.f32.mrf.mxu2 }
 0x6bb   : > { %v4126_v45 = vadd.f32 %v4125_v28, %v11275_v46  ;;  %v4017_v28 = vadd.f32 %v11201_v10, %v10963_v16 }
 0x6bd   : > { %v11475_v42 = vadd.f32 %v4126_v45, %v4007_v21 }
 0x6c2   : > { %v11477_v12 = vpop.f32.mrf.mxu3  ;;  %v4127_v22 = vpop.f32.mrf.mxu2 }
 0x6c3   : > { %v4128_v11 = vadd.f32 %v4127_v22, %v11290_v34  ;;  %v2910_v34 = vpack.c.bf16 %v11082_v9, %v11082_v9  ;;  %v4014_v9 = vadd.f32 %v11190_v48, %v10950_v17  ;;  %v2912_v17 = vpack.c.bf16 %v11113_v50, %v11113_v50  ;;  %v9460_v50 = vld [vmem:[%s13119_s29 + $0x280] sm:$0xff] }
 0x6c4   : > { %v2913_v48 = vpack.c.bf16 %v11138_v43, %v11138_v43  ;;  %v2800_v22 = vpack.c.bf16 %v11164_v49, %v11164_v49  ;;  %v4019_v43 = vadd.f32 %v11232_v8, %v10969_v4  ;;  %8203 = vmatmul.msk.bf16.gmra.mxu1 %vm1622_vm2, %v9460_v50  ;;  %v13381_v8 = vld [vmem:[#allocation128_spill] sm:$0xff] }
 0x6c5   : > { %v11482_v37 = vadd.f32 %v4128_v11, %v4009_v38  ;;  %v3822_v40 = vunpack.c.l.b16 %v2910_v34  ;;  %v3824_v38 = vunpack.c.l.b16 %v2912_v17  ;;  %v9522_v17 = vld [vmem:[%s13132_s4 + $0x70] sm:$0xff] }
 0x6c6   : > { %v3825_v11 = vunpack.c.l.b16 %v2913_v48  ;;  %v4419_v10 = vunpack.c.l.b16 %v2800_v22  ;;  %4827 = vmatpush.bf16.msrb.mxu2 %v9522_v17  ;;  %v13404_v17 = vld [vmem:[#allocation116_spill] sm:$0xff] }
 0x6c7   : > { %8372 = vmatmul.msk.bf16.gmra.mxu3 %vm652_vm0, %v13373_v1  ;;  %8432 = vmatmul.msk.bf16.gmra.mxu2 %vm652_vm0, %v13374_v61  ;;  %v3834_v3 = vpack.c.b16 %v3823_v29, %v3822_v40  ;;  %v9512_v40 = vld [vmem:[%s13132_s4 + $0x20] sm:$0xff]  ;;  %v13384_v29 = vld [vmem:[#allocation133_spill] sm:$0xff] }
 0x6c8   : > { %v3835_v31 = vpack.c.b16 %v3825_v11, %v3824_v38  ;;  %4232 = vmatpush.bf16.msra.mxu3 %v9512_v40 }
 0x6ca   : > { %v11492_v56 = vpop.f32.mrf.mxu3  ;;  %v4130_v46 = vpop.f32.mrf.mxu2 }
 0x6cb   : > { %13375 = vst [vmem:[#allocation23_spill] sm:$0xff] %v11492_v56  ;;  %v4131_v57 = vadd.f32 %v4130_v46, %v11296_v25  ;;  %v13506_v56 = vld [vmem:[#allocation89_spill] sm:$0xff] }
 0x6cd   : > { %v11503_v58 = vadd.f32 %v4131_v57, %v4012_v47  ;;  %v4022_v47 = vadd.f32 %v11240_v41, %v10982_v51  ;;  %v13382_v57 = vld [vmem:[#allocation130_spill] sm:$0xff]  ;;  %v2802_v51 = vpack.c.bf16 %v13384_v29, %v13384_v29 }
 0x6ce   : > { %v2915_v34 = vpack.c.bf16 %v13382_v57, %v13382_v57 }
 0x6d2   : > { %v11507_v2 = vpop.f32.mrf.mxu3  ;;  %v4132_v25 = vpop.f32.mrf.mxu2 }
 0x6d3   : > { %13376 = vst [vmem:[#allocation22_spill] sm:$0xff] %v11507_v2  ;;  %v4133_v33 = vadd.f32 %v4132_v25, %v11311_v5  ;;  %v2801_v5 = vpack.c.bf16 %v11173_v20, %v11173_v20 }
 0x6d5   : > { %v11512_v59 = vadd.f32 %v4133_v33, %v4014_v9  ;;  %v4420_v26 = vunpack.c.l.b16 %v2801_v5  ;;  %v9461_v9 = vld [vmem:[%s13119_s29 + $0x288] sm:$0xff]  ;;  %v4421_v33 = vunpack.c.l.b16 %v2802_v51  ;;  %v9462_v51 = vld [vmem:[%s13119_s29 + $0x290] sm:$0xff] }
 0x6d6   : > { %8204 = vmatmul.msk.bf16.gmra.mxu1 %vm1622_vm2, %v9461_v9  ;;  %v13401_v9 = vld [vmem:[#allocation51_spill] sm:$0xff] }
 0x6d7   : > { %8373 = vmatmul.msk.bf16.gmra.mxu3 %vm652_vm0, %v3834_v3  ;;  %8433 = vmatmul.msk.bf16.gmra.mxu2 %vm652_vm0, %v4429_v32  ;;  %v4430_v49 = vpack.c.b16 %v4420_v26, %v4419_v10  ;;  %v13386_v3 = vld [vmem:[#allocation110_spill] sm:$0xff]  ;;  %v13387_v32 = vld [vmem:[#allocation143_spill] sm:$0xff]  ;;  %v4431_v5 = vpack.c.b16 %v4422_v60, %v4421_v33  ;;  %v13391_v26 = vld [vmem:[#allocation112_spill] sm:$0xff] }
 0x6d8   : > { %v13393_v10 = vld [vmem:[#allocation19_spill] sm:$0xff]  ;;  %v13400_v60 = vld [vmem:[#allocation145_spill] sm:$0xff] }
 0x6da   : > { %v11516_v30 = vpop.f32.mrf.mxu3  ;;  %v4135_v14 = vpop.f32.mrf.mxu2 }
 0x6db   : > { %13377 = vst [vmem:[#allocation60_spill] sm:$0xff] %v11516_v30  ;;  %v4136_v21 = vadd.f32 %v4135_v14, %v11328_v0  ;;  %v4024_v14 = vadd.f32 %v13387_v32, %v13386_v3 }
 0x6dd   : > { %v11527_v45 = vadd.f32 %v4136_v21, %v4017_v28  ;;  %v13388_v28 = vld [vmem:[#allocation17_spill] sm:$0xff] }
 0x6e2   : > { %v11531_v16 = vpop.f32.mrf.mxu3  ;;  %v4137_v0 = vpop.f32.mrf.mxu2 }
 0x6e3   : > { %13378 = vst [vmem:[#allocation59_spill] sm:$0xff] %v11531_v16  ;;  %v4138_v20 = vadd.f32 %v4137_v0, %v11334_v52  ;;  %v2914_v52 = vpack.c.bf16 %v13381_v8, %v13381_v8  ;;  %v13392_v0 = vld [vmem:[#allocation28_spill] sm:$0xff] }
 0x6e4   : > { %v4027_v50 = vadd.f32 %v13392_v0, %v13391_v26 }
 0x6e5   : > { %v11540_v1 = vadd.f32 %v4138_v20, %v4019_v43  ;;  %v3826_v41 = vunpack.c.l.b16 %v2914_v52  ;;  %v13394_v20 = vld [vmem:[#allocation132_spill] sm:$0xff]  ;;  %v13397_v52 = vld [vmem:[#allocation138_spill] sm:$0xff] }
 0x6e6   : > { %v2804_v57 = vpack.c.bf16 %v13397_v52, %v13397_v52  ;;  %8205 = vmatmul.msk.bf16.gmra.mxu1 %vm1622_vm2, %v9462_v51  ;;  %v13413_v52 = vld [vmem:[#allocation30_spill] sm:$0xff]  ;;  %v9464_v51 = vld [vmem:[%s13119_s29 + $0x2a0] sm:$0xff] }
 0x6e7   : > { %13379 = vst [vmem:[#allocation62_spill] sm:$0xff] %v11540_v1  ;;  %8374 = vmatmul.msk.bf16.gmra.mxu3 %vm652_vm0, %v3835_v31  ;;  %8434 = vmatmul.msk.bf16.gmra.mxu2 %vm652_vm0, %v4430_v49  ;;  %v2916_v31 = vpack.c.bf16 %v13394_v20, %v13394_v20  ;;  %v13395_v49 = vld [vmem:[#allocation136_spill] sm:$0xff]  ;;  %v13408_v20 = vld [vmem:[#allocation10_spill] sm:$0xff] }
 0x6e8   : > { %v13463_v1 = vld [vmem:[#allocation54_spill] sm:$0xff] }
 0x6ea   : > { %v11544_v61 = vpop.f32.mrf.mxu3  ;;  %v4140_v46 = vpop.f32.mrf.mxu2 }
 0x6eb   : > { %13380 = vst [vmem:[#allocation61_spill] sm:$0xff] %v11544_v61  ;;  %v4141_v4 = vadd.f32 %v4140_v46, %v11349_v39  ;;  %v3827_v39 = vunpack.c.l.b16 %v2915_v34  ;;  %v2917_v46 = vpack.c.bf16 %v13395_v49, %v13395_v49  ;;  %v3828_v34 = vunpack.c.l.b16 %v2916_v31  ;;  %v13482_v61 = vld [vmem:[#allocation35_spill] sm:$0xff] }
 0x6ed   : > { %v11555_v55 = vadd.f32 %v4141_v4, %v4022_v47  ;;  %v3836_v48 = vpack.c.b16 %v3827_v39, %v3826_v41  ;;  %v13396_v47 = vld [vmem:[#allocation140_spill] sm:$0xff]  ;;  %v3829_v35 = vunpack.c.l.b16 %v2917_v46  ;;  %v4423_v41 = vunpack.c.l.b16 %v2804_v57  ;;  %v13399_v39 = vld [vmem:[#allocation114_spill] sm:$0xff]  ;;  %v13414_v57 = vld [vmem:[#allocation29_spill] sm:$0xff] }
 0x6ee   : > { %v2805_v4 = vpack.c.bf16 %v13396_v47, %v13396_v47  ;;  %v13410_v47 = vld [vmem:[#allocation68_spill] sm:$0xff] }
 0x6ef   : > { %v3837_v3 = vpack.c.b16 %v3829_v35, %v3828_v34  ;;  %v13415_v34 = vpack.c.b16 %v13413_v52, %v13414_v57  ;;  %v13429_v57 = vld [vmem:[#allocation74_spill] sm:$0xff] }
 0x6f0   : > { %v4424_v62 = vunpack.c.l.b16 %v2805_v4 }
 0x6f2   : > { %v11562_v25 = vpop.f32.mrf.mxu3  ;;  %v4142_v6 = vpop.f32.mrf.mxu2  ;;  %v4432_v32 = vpack.c.b16 %v4424_v62, %v4423_v41  ;;  %v13416_v41 = vld [vmem:[#allocation70_spill] sm:$0xff] }
 0x6f3   : > { %13385 = vst [vmem:[#allocation64_spill] sm:$0xff] %v11562_v25  ;;  %v4143_v21 = vadd.f32 %v4142_v6, %v13388_v28  ;;  %v4029_v6 = vadd.f32 %v13400_v60, %v13399_v39  ;;  %v13417_v39 = vld [vmem:[#allocation69_spill] sm:$0xff] }
 0x6f4   : > { %v13418_v60 = vpack.c.b16 %v13416_v41, %v13417_v39  ;;  %v13432_v41 = vld [vmem:[#allocation42_spill] sm:$0xff]  ;;  %v13433_v39 = vld [vmem:[#allocation41_spill] sm:$0xff] }
 0x6f5   : > { %v11574_v22 = vadd.f32 %v4143_v21, %v4024_v14 }
 0x6f7   : > { %13389 = vst [vmem:[#allocation63_spill] sm:$0xff] %v11574_v22  ;;  %8375 = vmatmul.msk.bf16.gmra.mxu3 %vm652_vm0, %v3836_v48  ;;  %8435 = vmatmul.msk.bf16.gmra.mxu2 %vm652_vm0, %v4431_v5  ;;  %v13405_v48 = vld [vmem:[#allocation31_spill] sm:$0xff] }
 0x6f8   : > { %v4032_v5 = vadd.f32 %v13405_v48, %v13404_v17  ;;  %v9465_v48 = vld [vmem:[%s13119_s29 + $0x2a8] sm:$0xff] }
 0x6fa   : > { %v11578_v38 = vpop.f32.mrf.mxu3  ;;  %v4145_v11 = vpop.f32.mrf.mxu2 }
 0x6fb   : > { %13390 = vst [vmem:[#allocation66_spill] sm:$0xff] %v11578_v38  ;;  %v4146_v43 = vadd.f32 %v4145_v11, %v13393_v10  ;;  %v9463_v10 = vld [vmem:[%s13119_s29 + $0x298] sm:$0xff] }
 0x6fc   : > { %8206 = vmatmul.msk.bf16.gmra.mxu1 %vm1622_vm2, %v9463_v10  ;;  %v13425_v10 = vld [vmem:[#allocation38_spill] sm:$0xff] }
 0x6fd   : > { %v11589_v8 = vadd.f32 %v4146_v43, %v4027_v50  ;;  %v13407_v43 = vld [vmem:[#allocation118_spill] sm:$0xff] }
 0x6fe   : > { %v4034_v31 = vadd.f32 %v13408_v20, %v13407_v43  ;;  %v13426_v43 = vld [vmem:[#allocation37_spill] sm:$0xff]  ;;  %v13471_v38 = vld [vmem:[#allocation82_spill] sm:$0xff] }
 0x6ff   : > { %v13427_v20 = vpack.c.b16 %v13425_v10, %v13426_v43  ;;  %v13441_v43 = vld [vmem:[#allocation46_spill] sm:$0xff] }
 0x702   : > { %v11593_v40 = vpop.f32.mrf.mxu3  ;;  %v4147_v29 = vpop.f32.mrf.mxu2 }
 0x703   : > { %13398 = vst [vmem:[#allocation65_spill] sm:$0xff] %v11593_v40  ;;  %v4148_v33 = vadd.f32 %v4147_v29, %v13401_v9  ;;  %v13420_v9 = vld [vmem:[#allocation33_spill] sm:$0xff] }
 0x704   : > { %v13464_v40 = vld [vmem:[#allocation53_spill] sm:$0xff] }
 0x705   : > { %v11602_v14 = vadd.f32 %v4148_v33, %v4029_v6  ;;  %v13419_v6 = vld [vmem:[#allocation34_spill] sm:$0xff]  ;;  %v13465_v36 = vpack.c.b16 %v13463_v1, %v13464_v40  ;;  %v13475_v1 = vld [vmem:[#allocation57_spill] sm:$0xff] }
 0x706   : > { %v13421_v33 = vpack.c.b16 %v13419_v6, %v13420_v9 }
 0x707   : > { %13402 = vst [vmem:[#allocation128_spill] sm:$0xff] %v11602_v14  ;;  %8376 = vmatmul.msk.bf16.gmra.mxu3 %vm652_vm0, %v3837_v3  ;;  %8436 = vmatmul.msk.bf16.gmra.mxu2 %vm652_vm0, %v4432_v32 }
 0x70a   : > { %v11606_v28 = vpop.f32.mrf.mxu3  ;;  %v4150_v21 = vpop.f32.mrf.mxu2 }
 0x70b   : > { %13403 = vst [vmem:[#allocation130_spill] sm:$0xff] %v11606_v28  ;;  %v4151_v11 = vadd.f32 %v4150_v21, %v11404_v44  ;;  %v13411_v44 = vld [vmem:[#allocation67_spill] sm:$0xff]  ;;  %v9518_v28 = vld [vmem:[%s13132_s4 + $0x50] sm:$0xff] }
 0x70c   : > { %v13412_v4 = vpack.c.b16 %v13410_v47, %v13411_v44  ;;  %8207 = vmatmul.msk.bf16.gmra.mxu1 %vm1622_vm2, %v9464_v51  ;;  %v11676_v47 = vpop.f32.mrf.mxu0  ;;  %4589 = vmatpush.bf16.msrb.mxu3 %v9518_v28 }
 0x70d   : > { %v11611_v26 = vadd.f32 %v4151_v11, %v4032_v5  ;;  %v13422_v5 = vld [vmem:[#allocation72_spill] sm:$0xff]  ;;  %v13423_v11 = vld [vmem:[#allocation71_spill] sm:$0xff] }
 0x712   : > { %v11613_v0 = vpop.f32.mrf.mxu3  ;;  %v4152_v50 = vpop.f32.mrf.mxu2 }
 0x713   : > { %13406 = vst [vmem:[#allocation135_spill] sm:$0xff] %v11613_v0  ;;  %v4153_v49 = vadd.f32 %v4152_v50, %v11414_v7  ;;  %v13424_v50 = vpack.c.b16 %v13422_v5, %v13423_v11  ;;  %v13438_v11 = vld [vmem:[#allocation76_spill] sm:$0xff] }
 0x714   : > { %v11682_v52 = vpop.f32.mrf.mxu0 }
 0x715   : > { %v11622_v46 = vadd.f32 %v4153_v49, %v4034_v31  ;;  %13428 = vst [vmem:[#allocation110_spill] sm:$0xff] %v11682_v52 }
 0x717   : > { %13409 = vst [vmem:[#allocation133_spill] sm:$0xff] %v11622_v46  ;;  %8405 = vmatmul.msk.bf16.vlgmr.msra.gmra.mxu3 %vm652_vm0, %v13412_v4  ;;  %8465 = vmatmul.msk.bf16.vlgmr.msrb.gmra.mxu2 %vm652_vm0, %v13415_v34  ;;  %v13430_v34 = vld [vmem:[#allocation73_spill] sm:$0xff] }
 0x718   : > { %v13431_v51 = vpack.c.b16 %v13429_v57, %v13430_v34 }
 0x71a   : > { %v11632_v35 = vpop.f32.mrf.mxu3  ;;  %v11634_v62 = vpop.f32.mrf.mxu2 }
 0x71c   : > { %8208 = vmatmul.msk.bf16.gmra.mxu1 %vm1622_vm2, %v9465_v48 }
 0x722   : > { %v11636_v29 = vpop.f32.mrf.mxu3  ;;  %v11638_v7 = vpop.f32.mrf.mxu2 }
 0x727   : > { %8406 = vmatmul.msk.bf16.gmra.mxu3 %vm652_vm0, %v13418_v60  ;;  %8466 = vmatmul.msk.bf16.gmra.mxu2 %vm652_vm0, %v13421_v33  ;;  %v13434_v60 = vpack.c.b16 %v13432_v41, %v13433_v39  ;;  %v11696_v33 = vpop.f32.mrf.mxu0 }
 0x72a   : > { %v11652_v3 = vpop.f32.mrf.mxu3  ;;  %v11654_v32 = vpop.f32.mrf.mxu2 }
 0x72f   : > { %v11710_v34 = vpop.f32.mrf.mxu0 }
 0x730   : > { %13444 = vst [vmem:[#allocation28_spill] sm:$0xff] %v11710_v34 }
 0x732   : > { %v11656_v21 = vpop.f32.mrf.mxu3  ;;  %v11658_v17 = vpop.f32.mrf.mxu2 }
 0x737   : > { %8407 = vmatmul.msk.bf16.gmra.mxu3 %vm652_vm0, %v13424_v50  ;;  %8467 = vmatmul.msk.bf16.gmra.mxu2 %vm652_vm0, %v13427_v20  ;;  %v13439_v50 = vld [vmem:[#allocation75_spill] sm:$0xff]  ;;  %v13442_v20 = vld [vmem:[#allocation45_spill] sm:$0xff]  ;;  %v11720_v46 = vpop.f32.mrf.mxu0 }
 0x738   : > { %v13440_v10 = vpack.c.b16 %v13438_v11, %v13439_v50  ;;  %v13443_v57 = vpack.c.b16 %v13441_v43, %v13442_v20  ;;  %v13449_v11 = vld [vmem:[#allocation78_spill] sm:$0xff]  ;;  %v13450_v50 = vld [vmem:[#allocation77_spill] sm:$0xff] }
 0x739   : > { %v13452_v43 = vld [vmem:[#allocation50_spill] sm:$0xff]  ;;  %v13453_v20 = vld [vmem:[#allocation49_spill] sm:$0xff] }
 0x73a   : > { %v11672_v31 = vpop.f32.mrf.mxu3  ;;  %v11674_v49 = vpop.f32.mrf.mxu2 }
 0x73f   : > { %v11737_v25 = vpop.f32.mrf.mxu0 }
 0x740   : > { %13457 = vst [vmem:[#allocation145_spill] sm:$0xff] %v11737_v25 }
 0x741   : > { %v2422_v34 = vpop.f32.mrf.mxu1 }
 0x742   : > { %v11678_v44 = vpop.f32.mrf.mxu3  ;;  %v11680_v4 = vpop.f32.mrf.mxu2  ;;  %v2822_v16 = vpack.c.bf16 %v2422_v34, %v2422_v34 }
 0x747   : > { %8408 = vmatmul.msk.bf16.gmra.mxu3 %vm652_vm0, %v13431_v51  ;;  %8468 = vmatmul.msk.bf16.gmra.mxu2 %vm652_vm0, %v13434_v60 }
 0x74a   : > { %v11692_v6 = vpop.f32.mrf.mxu3  ;;  %v11694_v9 = vpop.f32.mrf.mxu2 }
 0x74b   : > { %13435 = vst [vmem:[#allocation143_spill] sm:$0xff] %v11694_v9 }
 0x752   : > { %v11698_v48 = vpop.f32.mrf.mxu3  ;;  %v11700_v5 = vpop.f32.mrf.mxu2 }
 0x753   : > { %13436 = vst [vmem:[#allocation17_spill] sm:$0xff] %v11698_v48 }
 0x754   : > { %13437 = vst [vmem:[#allocation112_spill] sm:$0xff] %v11700_v5 }
 0x757   : > { %8409 = vmatmul.msk.bf16.gmra.mxu3 %vm652_vm0, %v13440_v10  ;;  %8469 = vmatmul.msk.bf16.gmra.mxu2 %vm652_vm0, %v13443_v57  ;;  %v13451_v10 = vpack.c.b16 %v13449_v11, %v13450_v50  ;;  %v13454_v57 = vpack.c.b16 %v13452_v43, %v13453_v20  ;;  %v11743_v43 = vpop.f32.mrf.mxu0  ;;  %v13460_v20 = vld [vmem:[#allocation80_spill] sm:$0xff] }
 0x75a   : > { %v11712_v51 = vpop.f32.mrf.mxu3  ;;  %v11714_v41 = vpop.f32.mrf.mxu2 }
 0x75b   : > { %13445 = vst [vmem:[#allocation19_spill] sm:$0xff] %v11712_v51 }
 0x75c   : > { %13446 = vst [vmem:[#allocation132_spill] sm:$0xff] %v11714_v41 }
 0x75f   : > { %v11757_v25 = vpop.f32.mrf.mxu0 }
 0x760   : > { %13468 = vst [vmem:[#allocation10_spill] sm:$0xff] %v11757_v25 }
 0x762   : > { %v11716_v39 = vpop.f32.mrf.mxu3  ;;  %v11718_v60 = vpop.f32.mrf.mxu2 }
 0x763   : > { %13447 = vst [vmem:[#allocation136_spill] sm:$0xff] %v11716_v39 }
 0x764   : > { %13448 = vst [vmem:[#allocation140_spill] sm:$0xff] %v11718_v60 }
 0x767   : > { %8410 = vmatmul.msk.bf16.gmra.mxu3 %vm652_vm0, %v13451_v10  ;;  %8470 = vmatmul.msk.bf16.gmra.mxu2 %vm652_vm0, %v13454_v57  ;;  %v2424_v10 = vpop.f32.mrf.mxu1  ;;  %v13461_v57 = vld [vmem:[#allocation79_spill] sm:$0xff]  ;;  %v4710_v25 = vpop.f32.mrf.mxu0 }
 0x768   : > { %v13462_v14 = vpack.c.b16 %v13460_v20, %v13461_v57  ;;  %v13472_v20 = vld [vmem:[#allocation81_spill] sm:$0xff] }
 0x769   : > { %v13473_v57 = vpack.c.b16 %v13471_v38, %v13472_v20 }
 0x76a   : > { %v11730_v22 = vpop.f32.mrf.mxu3  ;;  %v11732_v0 = vpop.f32.mrf.mxu2 }
 0x76b   : > { %13455 = vst [vmem:[#allocation138_spill] sm:$0xff] %v11730_v22  ;;  %v13483_v22 = vld [vmem:[#allocation9_spill] sm:$0xff] }
 0x76c   : > { %13456 = vst [vmem:[#allocation114_spill] sm:$0xff] %v11732_v0  ;;  %v4711_v34 = vadd.f32 %v4710_v25, %v13483_v22  ;;  %v13485_v25 = vld [vmem:[#allocation121_spill] sm:$0xff]  ;;  %v13486_v22 = vld [vmem:[#allocation40_spill] sm:$0xff] }
 0x772   : > { %v11739_v11 = vpop.f32.mrf.mxu3  ;;  %v11741_v50 = vpop.f32.mrf.mxu2 }
 0x773   : > { %13458 = vst [vmem:[#allocation51_spill] sm:$0xff] %v11739_v11  ;;  %v2427_v11 = vpop.f32.mrf.mxu1 }
 0x774   : > { %13459 = vst [vmem:[#allocation116_spill] sm:$0xff] %v11741_v50 }
 0x777   : > { %8411 = vmatmul.msk.bf16.gmra.mxu3 %vm652_vm0, %v13462_v14  ;;  %8471 = vmatmul.msk.bf16.gmra.mxu2 %vm652_vm0, %v13465_v36  ;;  %v13474_v14 = vld [vmem:[#allocation58_spill] sm:$0xff] }
 0x778   : > { %v13476_v40 = vpack.c.b16 %v13474_v14, %v13475_v1 }
 0x77a   : > { %v11753_v52 = vpop.f32.mrf.mxu3  ;;  %v11755_v28 = vpop.f32.mrf.mxu2 }
 0x77b   : > { %13466 = vst [vmem:[#allocation31_spill] sm:$0xff] %v11753_v52  ;;  %v2429_v36 = vpop.f32.mrf.mxu1  ;;  %v4528_v52 = vunpack.c.l.b16 %v2822_v16 }
 0x77c   : > { %13467 = vst [vmem:[#allocation118_spill] sm:$0xff] %v11755_v28  ;;  %v2825_v41 = vpack.c.bf16 %v2429_v36, %v2429_v36 }
 0x77e   : > { %v4531_v5 = vunpack.c.l.b16 %v2825_v41 }
 0x782   : > { %v11759_v50 = vpop.f32.mrf.mxu3  ;;  %v11761_v39 = vpop.f32.mrf.mxu2 }
 0x783   : > { %13469 = vst [vmem:[#allocation68_spill] sm:$0xff] %v11759_v50  ;;  %v2823_v50 = vpack.c.bf16 %v2424_v10, %v2424_v10  ;;  %v2432_v20 = vpop.f32.mrf.mxu1  ;;  %v13484_v10 = vld [vmem:[#allocation83_spill] sm:$0xff] }
 0x784   : > { %13470 = vst [vmem:[#allocation67_spill] sm:$0xff] %v11761_v39 }
 0x785   : > { %v4529_v39 = vunpack.c.l.b16 %v2823_v50 }
 0x787   : > { %8412 = vmatmul.msk.bf16.gmra.mxu3 %vm652_vm0, %v13473_v57  ;;  %8472 = vmatmul.msk.bf16.gmra.mxu2 %vm652_vm0, %v13476_v40  ;;  %v11779_v57 = vpop.f32.mrf.mxu0  ;;  %v4544_v14 = vpack.c.b16 %v4529_v39, %v4528_v52 }
 0x78a   : > { %v11771_v60 = vpop.f32.mrf.mxu3  ;;  %v11773_v28 = vpop.f32.mrf.mxu2 }
 0x78b   : > { %13477 = vst [vmem:[#allocation30_spill] sm:$0xff] %v11771_v60  ;;  %v13481_v60 = vld [vmem:[#allocation120_spill] sm:$0xff]  ;;  %v2434_v51 = vpop.f32.mrf.mxu1 }
 0x78c   : > { %13478 = vst [vmem:[#allocation29_spill] sm:$0xff] %v11773_v28  ;;  %v4354_v28 = vadd.f32 %v13482_v61, %v13481_v60  ;;  %v4356_v60 = vadd.f32 %v13486_v22, %v13485_v25  ;;  %v13491_v25 = vld [vmem:[#allocation85_spill] sm:$0xff] }
 0x78f   : > { %v4715_v52 = vpop.f32.mrf.mxu0 }
 0x792   : > { %v11775_v0 = vpop.f32.mrf.mxu3  ;;  %v11777_v38 = vpop.f32.mrf.mxu2 }
 0x793   : > { %13479 = vst [vmem:[#allocation70_spill] sm:$0xff] %v11775_v0  ;;  %v2824_v0 = vpack.c.bf16 %v2427_v11, %v2427_v11 }
 0x794   : > { %13480 = vst [vmem:[#allocation69_spill] sm:$0xff] %v11777_v38 }
 0x797   : > { %8441 = vmatmul.msk.bf16.vlgmr.msrb.gmra.mxu3 %vm652_vm0, %v4544_v14  ;;  %v4530_v14 = vunpack.c.l.b16 %v2824_v0 }
 0x799   : > { %v4545_v11 = vpack.c.b16 %v4531_v5, %v4530_v14  ;;  %v2826_v5 = vpack.c.bf16 %v2432_v20, %v2432_v20  ;;  %v2827_v14 = vpack.c.bf16 %v2434_v51, %v2434_v51 }
 0x79a   : > { %v4234_v1 = vpop.f32.mrf.mxu3  ;;  %v4829_v40 = vpop.f32.mrf.mxu2 }
 0x79b   : > { %v4235_v16 = vadd.f32 %v4234_v1, %v13484_v10  ;;  %v4830_v50 = vadd.f32 %v4829_v40, %v11632_v35  ;;  %v13487_v1 = vld [vmem:[#allocation84_spill] sm:$0xff]  ;;  %v2437_v40 = vpop.f32.mrf.mxu1 }
 0x79d   : > { %v4885_v38 = vadd.f32 %v4354_v28, %v4235_v16  ;;  %v11787_v30 = vadd.f32 %v4830_v50, %v4711_v34  ;;  %v13489_v34 = vld [vmem:[#allocation15_spill] sm:$0xff]  ;;  %v13490_v16 = vld [vmem:[#allocation32_spill] sm:$0xff] }
 0x79e   : > { %v4716_v50 = vadd.f32 %v4715_v52, %v13490_v16  ;;  %v13493_v52 = vld [vmem:[#allocation44_spill] sm:$0xff] }
 0x79f   : > { %v11790_v39 = vadd.f32 %v4885_v38, %v11431_v18  ;;  %v11801_v18 = vpop.f32.mrf.mxu0  ;;  %v13488_v38 = vld [vmem:[#allocation122_spill] sm:$0xff] }
 0x7a0   : > { %v4359_v10 = vadd.f32 %v13489_v34, %v13488_v38  ;;  %v13492_v38 = vld [vmem:[#allocation123_spill] sm:$0xff] }
 0x7a1   : > { %v4361_v34 = vadd.f32 %v13493_v52, %v13492_v38  ;;  %v2828_v52 = vpack.c.bf16 %v2437_v40, %v2437_v40 }
 0x7a2   : > { %v4236_v2 = vpop.f32.mrf.mxu3  ;;  %v11792_v61 = vpop.f32.mrf.mxu2 }
 0x7a3   : > { %v4237_v35 = vadd.f32 %v4236_v2, %v13487_v1 }
 0x7a5   : > { %v4886_v36 = vadd.f32 %v4356_v60, %v4237_v35  ;;  %v4532_v35 = vunpack.c.l.b16 %v2826_v5 }
 0x7a7   : > { %v11798_v28 = vadd.f32 %v4886_v36, %v11438_v54  ;;  %8442 = vmatmul.msk.bf16.gmra.mxu3 %vm652_vm0, %v4545_v11  ;;  %v4533_v11 = vunpack.c.l.b16 %v2827_v14  ;;  %v2439_v36 = vpop.f32.mrf.mxu1  ;;  %v13498_v14 = vld [vmem:[#allocation87_spill] sm:$0xff] }
 0x7a9   : > { %v4546_v20 = vpack.c.b16 %v4533_v11, %v4532_v35  ;;  %v2829_v35 = vpack.c.bf16 %v2439_v36, %v2439_v36 }
 0x7aa   : > { %v4239_v0 = vpop.f32.mrf.mxu3  ;;  %v4834_v41 = vpop.f32.mrf.mxu2 }
 0x7ab   : > { %v4240_v22 = vadd.f32 %v4239_v0, %v13491_v25  ;;  %v4835_v2 = vadd.f32 %v4834_v41, %v11652_v3  ;;  %v13494_v0 = vld [vmem:[#allocation86_spill] sm:$0xff]  ;;  %v4720_v3 = vpop.f32.mrf.mxu0  ;;  %v13496_v25 = vld [vmem:[#allocation16_spill] sm:$0xff] }
 0x7ad   : > { %v4887_v54 = vadd.f32 %v4359_v10, %v4240_v22  ;;  %v11808_v60 = vadd.f32 %v4835_v2, %v4716_v50  ;;  %v13495_v50 = vld [vmem:[#allocation124_spill] sm:$0xff] }
 0x7ae   : > { %v4364_v22 = vadd.f32 %v13496_v25, %v13495_v50  ;;  %v13497_v2 = vld [vmem:[#allocation36_spill] sm:$0xff] }
 0x7af   : > { %v11811_v1 = vadd.f32 %v4887_v54, %v11453_v24  ;;  %v4721_v5 = vadd.f32 %v4720_v3, %v13497_v2  ;;  %v13499_v3 = vld [vmem:[#allocation125_spill] sm:$0xff] }
 0x7b2   : > { %v4241_v48 = vpop.f32.mrf.mxu3  ;;  %v11813_v9 = vpop.f32.mrf.mxu2 }
 0x7b3   : > { %v4242_v16 = vadd.f32 %v4241_v48, %v13494_v0  ;;  %v2442_v48 = vpop.f32.mrf.mxu1 }
 0x7b5   : > { %v4888_v51 = vadd.f32 %v4361_v34, %v4242_v16  ;;  %v4534_v16 = vunpack.c.l.b16 %v2828_v52 }
 0x7b7   : > { %v11819_v41 = vadd.f32 %v4888_v51, %v11460_v15  ;;  %8443 = vmatmul.msk.bf16.gmra.mxu3 %vm652_vm0, %v4546_v20  ;;  %v11829_v15 = vpop.f32.mrf.mxu0  ;;  %v4535_v20 = vunpack.c.l.b16 %v2829_v35  ;;  %v13505_v35 = vld [vmem:[#allocation12_spill] sm:$0xff] }
 0x7b9   : > { %v4547_v40 = vpack.c.b16 %v4535_v20, %v4534_v16  ;;  %v2830_v16 = vpack.c.bf16 %v2442_v48, %v2442_v48 }
 0x7ba   : > { %v4244_v24 = vpop.f32.mrf.mxu3  ;;  %v4839_v10 = vpop.f32.mrf.mxu2 }
 0x7bb   : > { %v4245_v54 = vadd.f32 %v4244_v24, %v13498_v14  ;;  %v4840_v38 = vadd.f32 %v4839_v10, %v11672_v31  ;;  %v13500_v24 = vld [vmem:[#allocation18_spill] sm:$0xff]  ;;  %v13501_v31 = vld [vmem:[#allocation88_spill] sm:$0xff] }
 0x7bc   : > { %v4366_v25 = vadd.f32 %v13500_v24, %v13499_v3 }
 0x7bd   : > { %v4889_v11 = vadd.f32 %v4364_v22, %v4245_v54  ;;  %v11827_v34 = vadd.f32 %v4840_v38, %v4721_v5  ;;  %v2444_v22 = vpop.f32.mrf.mxu1  ;;  %v13503_v54 = vld [vmem:[#allocation126_spill] sm:$0xff]  ;;  %v13504_v38 = vld [vmem:[#allocation21_spill] sm:$0xff] }
 0x7be   : > { %v4369_v52 = vadd.f32 %v13504_v38, %v13503_v54  ;;  %v2831_v20 = vpack.c.bf16 %v2444_v22, %v2444_v22 }
 0x7bf   : > { %v11832_v0 = vadd.f32 %v4889_v11, %v11475_v42  ;;  %v4725_v42 = vpop.f32.mrf.mxu0 }
 0x7c0   : > { %v4726_v11 = vadd.f32 %v4725_v42, %v13505_v35  ;;  %v13508_v42 = vld [vmem:[#allocation90_spill] sm:$0xff] }
 0x7c2   : > { %v4246_v51 = vpop.f32.mrf.mxu3  ;;  %v11834_v50 = vpop.f32.mrf.mxu2 }
 0x7c3   : > { %v4247_v10 = vadd.f32 %v4246_v51, %v13501_v31 }
 0x7c5   : > { %v4890_v36 = vadd.f32 %v4366_v25, %v4247_v10  ;;  %v2447_v31 = vpop.f32.mrf.mxu1  ;;  %v4536_v10 = vunpack.c.l.b16 %v2830_v16 }
 0x7c7   : > { %v11840_v2 = vadd.f32 %v4890_v36, %v11482_v37  ;;  %8444 = vmatmul.msk.bf16.gmra.mxu3 %vm652_vm0, %v4547_v40  ;;  %v4537_v40 = vunpack.c.l.b16 %v2831_v20 }
 0x7c9   : > { %13502 = vst [vmem:[#allocation34_spill] sm:$0xff] %v11840_v2  ;;  %v13507_v2 = vld [vmem:[#allocation127_spill] sm:$0xff] }
 0x7ca   : > { %v4249_v5 = vpop.f32.mrf.mxu3  ;;  %v4844_v14 = vpop.f32.mrf.mxu2  ;;  %v4371_v54 = vadd.f32 %v11406_v53, %v13507_v2 }
 0x7cb   : > { %v4250_v3 = vadd.f32 %v4249_v5, %v13506_v56  ;;  %v4845_v51 = vadd.f32 %v4844_v14, %v11692_v6  ;;  %v4548_v56 = vpack.c.b16 %v4537_v40, %v4536_v10  ;;  %v13511_v10 = vld [vmem:[#allocation134_spill] sm:$0xff] }
 0x7cc   : > { %v4379_v40 = vadd.f32 %v11696_v33, %v13511_v10 }
 0x7cd   : > { %v4891_v24 = vadd.f32 %v4369_v52, %v4250_v3  ;;  %v11848_v25 = vadd.f32 %v4845_v51, %v4726_v11  ;;  %v2449_v48 = vpop.f32.mrf.mxu1  ;;  %v13510_v52 = vld [vmem:[#allocation91_spill] sm:$0xff]  ;;  %v2832_v11 = vpack.c.bf16 %v2447_v31, %v2447_v31 }
 0x7ce   : > { %v2833_v3 = vpack.c.bf16 %v2449_v48, %v2449_v48 }
 0x7cf   : > { %v11851_v37 = vadd.f32 %v4891_v24, %v11503_v58  ;;  %v13509_v58 = vld [vmem:[#allocation129_spill] sm:$0xff]  ;;  %v4538_v2 = vunpack.c.l.b16 %v2832_v11 }
 0x7d0   : > { %v4374_v14 = vadd.f32 %v11676_v47, %v13509_v58  ;;  %v4539_v16 = vunpack.c.l.b16 %v2833_v3  ;;  %v13512_v47 = vld [vmem:[#allocation93_spill] sm:$0xff]  ;;  %v13517_v3 = vld [vmem:[#allocation26_spill] sm:$0xff] }
 0x7d2   : > { %v4251_v36 = vpop.f32.mrf.mxu3 }
 0x7d3   : > { %v4252_v38 = vadd.f32 %v4251_v36, %v13508_v42  ;;  %v13514_v42 = vld [vmem:[#allocation25_spill] sm:$0xff] }
 0x7d5   : > { %v4892_v5 = vadd.f32 %v4371_v54, %v4252_v38  ;;  %v13513_v54 = vld [vmem:[#allocation24_spill] sm:$0xff] }
 0x7d6   : > { %v2834_v31 = vpack.c.bf16 %v13513_v54, %v13513_v54 }
 0x7d7   : > { %v11857_v6 = vadd.f32 %v4892_v5, %v11512_v59  ;;  %8445 = vmatmul.msk.bf16.gmra.mxu3 %vm652_vm0, %v4548_v56  ;;  %v4549_v59 = vpack.c.b16 %v4539_v16, %v4538_v2  ;;  %v13518_v2 = vld [vmem:[#allocation27_spill] sm:$0xff] }
 0x7d8   : > { %v4540_v5 = vunpack.c.l.b16 %v2834_v31  ;;  %v13520_v31 = vld [vmem:[#allocation97_spill] sm:$0xff] }
 0x7da   : > { %v4254_v22 = vpop.f32.mrf.mxu3 }
 0x7db   : > { %v4255_v35 = vadd.f32 %v4254_v22, %v13510_v52 }
 0x7dd   : > { %v4893_v51 = vadd.f32 %v4374_v14, %v4255_v35  ;;  %v13515_v14 = vld [vmem:[#allocation139_spill] sm:$0xff] }
 0x7de   : > { %v4384_v52 = vadd.f32 %v11720_v46, %v13515_v14  ;;  %v13516_v35 = vld [vmem:[#allocation95_spill] sm:$0xff] }
 0x7df   : > { %v11864_v53 = vadd.f32 %v4893_v51, %v11527_v45  ;;  %v2835_v45 = vpack.c.bf16 %v13514_v42, %v13514_v42  ;;  %v2836_v51 = vpack.c.bf16 %v13517_v3, %v13517_v3  ;;  %v13522_v3 = vld [vmem:[#allocation8_spill] sm:$0xff] }
 0x7e1   : > { %v4541_v48 = vunpack.c.l.b16 %v2835_v45 }
 0x7e2   : > { %v11866_v20 = vpop.f32.mrf.mxu3 }
 0x7e3   : > { %v4550_v58 = vpack.c.b16 %v4541_v48, %v4540_v5  ;;  %v4473_v48 = vadd.f32 %v11634_v62, %v11426_v63 }
 0x7e7   : > { %8446 = vmatmul.msk.bf16.gmra.mxu3 %vm652_vm0, %v4549_v59 }
 0x7ea   : > { %v4259_v24 = vpop.f32.mrf.mxu3 }
 0x7eb   : > { %v4260_v36 = vadd.f32 %v4259_v24, %v13512_v47  ;;  %v4542_v24 = vunpack.c.l.b16 %v2836_v51  ;;  %v4475_v51 = vadd.f32 %v11638_v7, %v11433_v27 }
 0x7ed   : > { %v4895_v38 = vadd.f32 %v4379_v40, %v4260_v36  ;;  %v13519_v36 = vld [vmem:[#allocation142_spill] sm:$0xff] }
 0x7ee   : > { %v4389_v54 = vadd.f32 %v11743_v43, %v13519_v36  ;;  %v4832_v43 = vadd.f32 %v11792_v61, %v11636_v29  ;;  %v4478_v29 = vadd.f32 %v11654_v32, %v11448_v13  ;;  %v13524_v61 = vld [vmem:[#allocation101_spill] sm:$0xff] }
 0x7ef   : > { %v11877_v56 = vadd.f32 %v4895_v38, %v11555_v55  ;;  %v2837_v55 = vpack.c.bf16 %v13518_v2, %v13518_v2  ;;  %v13523_v2 = vld [vmem:[#allocation100_spill] sm:$0xff] }
 0x7f1   : > { %v4543_v10 = vunpack.c.l.b16 %v2837_v55 }
 0x7f2   : > { %v11879_v22 = vpop.f32.mrf.mxu3 }
 0x7f3   : > { %v4551_v47 = vpack.c.b16 %v4543_v10, %v4542_v24 }
 0x7f7   : > { %8447 = vmatmul.msk.bf16.gmra.mxu3 %vm652_vm0, %v4550_v58  ;;  %v13521_v58 = vld [vmem:[#allocation99_spill] sm:$0xff] }
 0x7fa   : > { %v4264_v33 = vpop.f32.mrf.mxu3 }
 0x7fb   : > { %v4265_v11 = vadd.f32 %v4264_v33, %v13516_v35 }
 0x7fd   : > { %v4897_v16 = vadd.f32 %v4384_v52, %v4265_v11 }
 0x7ff   : > { %v11890_v59 = vadd.f32 %v4897_v16, %v11589_v8 }
 0x802   : > { %v11892_v40 = vpop.f32.mrf.mxu3 }
 0x807   : > { %8448 = vmatmul.msk.bf16.gmra.mxu3 %vm652_vm0, %v4551_v47 }
 0x80a   : > { %v4269_v46 = vpop.f32.mrf.mxu3 }
 0x80b   : > { %v4270_v42 = vadd.f32 %v4269_v46, %v13520_v31  ;;  %v13525_v46 = vld [vmem:[#allocation11_spill] sm:$0xff] }
 0x80c   : > { %v4718_v36 = vadd.f32 %v11801_v18, %v13525_v46  ;;  %v11935_v18 = vld [vmem:[%s13528_s5] ss:$0 sm:$0xff]  ;;  %v13535_v46 = vld [vmem:[#allocation17_spill] sm:$0xff]  ;;  %s593_s5 = sand.u32 1, %s9811_s30  }
 0x80d   : > { %v4899_v45 = vadd.f32 %v4389_v54, %v4270_v42  ;;  %v13526_v54 = vld [vmem:[#allocation102_spill] sm:$0xff]  ;;  %s594_s22 = scalar_lea.vmem [#allocation2], %s593_s5  ;;  %s7509_s24 = scalar_lea.sflag [#allocation3], %s593_s5 }
 0x80e   : > { %s7519_s4 = sshll.u32 %s594_s22, 4  ;;  %s7520_s4 = int_to_ptr.vmem [resolvable:$true] %s7519_s4 }
 0x80f   : > { %v11899_v38 = vadd.f32 %v4899_v45, %v11611_v26  ;;  %v4713_v26 = vadd.f32 %v11779_v57, %v13522_v3  ;;  %v4837_v57 = vadd.f32 %v11813_v9, %v11656_v21  ;;  %v4483_v21 = vadd.f32 %v11674_v49, %v11470_v23  ;;  %v13527_v9 = vld [vmem:[#allocation103_spill] sm:$0xff]  ;;  %v13529_v49 = vld [vmem:[#allocation13_spill] sm:$0xff] }
 0x811   : > { %v4918_v63 = vadd.f32 %v4832_v43, %v4713_v26  ;;  %v4920_v13 = vadd.f32 %v4837_v57, %v4718_v36 }
 0x812   : > { %v11901_v5 = vpop.f32.mrf.mxu3 }
 0x81a   : > { %v4591_v8 = vpop.f32.mrf.mxu3 }
 0x81b   : > { %v4592_v33 = vadd.f32 %v4591_v8, %v13521_v58  ;;  %v4846_v8 = vpop.f32.mrf.mxu2  ;;  %v4842_v58 = vadd.f32 %v11834_v50, %v11678_v44 }
 0x81c   : > { %v4847_v36 = vadd.f32 %v4846_v8, %v13535_v46 }
 0x81d   : > { %v4901_v14 = vadd.f32 %v4592_v33, %v4473_v48 }
 0x81f   : > { %v4949_v52 = vadd.f32 %v11787_v30, %v4901_v14  ;;  %v4723_v14 = vadd.f32 %v11829_v15, %v13529_v49 }
 0x821   : > { %v4965_v35 = vadd.f32 %v4949_v52, %v11790_v39  ;;  %v4485_v52 = vadd.f32 %v11680_v4, %v11477_v12  ;;  %v4922_v26 = vadd.f32 %v4842_v58, %v4723_v14  ;;  %v13533_v12 = vld [vmem:[#allocation143_spill] sm:$0xff] }
 0x822   : > { %v4593_v11 = vpop.f32.mrf.mxu3 }
 0x823   : > { %v4594_v55 = vadd.f32 %v4593_v11, %v13523_v2  ;;  %v13530_v11 = vld [vmem:[#allocation104_spill] sm:$0xff]  ;;  %v4849_v44 = vpop.f32.mrf.mxu2 }
 0x825   : > { %v4902_v62 = vadd.f32 %v4594_v55, %v4475_v51 }
 0x827   : > { %v4950_v16 = vadd.f32 %v4918_v63, %v4902_v62  ;;  %v13531_v63 = vld [vmem:[#allocation34_spill] sm:$0xff] }
 0x829   : > { %v4966_v24 = vadd.f32 %v4950_v16, %v11798_v28  ;;  %v4480_v28 = vadd.f32 %v11658_v17, %v11455_v19  ;;  %v4727_v17 = vpop.f32.mrf.mxu0  ;;  %v13532_v16 = vld [vmem:[#allocation23_spill] sm:$0xff] }
 0x82a   : > { %v4596_v30 = vpop.f32.mrf.mxu3  ;;  %v4488_v4 = vadd.f32 %v13533_v12, %v13532_v16 }
 0x82b   : > { %v4597_v39 = vadd.f32 %v4596_v30, %v13524_v61  ;;  %v4986_v55 = vadd.f32 %v11935_v18, %v4966_v24  ;;  %v4851_v24 = vpop.f32.mrf.mxu2 }
 0x82d   : > { %v4903_v10 = vadd.f32 %v4597_v39, %v4478_v29  ;;  %v13534_v29 = vld [vmem:[#allocation105_spill] sm:$0xff] }
 0x82f   : > { %v4951_v47 = vadd.f32 %v11808_v60, %v4903_v10  ;;  %v5002_v10 = vmax.f32 %v4986_v55, 0.0 }
 0x831   : > { %v4967_v27 = vadd.f32 %v4951_v47, %v11811_v1 }
 0x832   : > { %v4598_v7 = vpop.f32.mrf.mxu3 }
 0x833   : > { %v4599_v31 = vadd.f32 %v4598_v7, %v13526_v54 }
 0x835   : > { %v4904_v32 = vadd.f32 %v4599_v31, %v4480_v28  ;;  %v4987_v28 = vadd.f32 %v11935_v18, %v4967_v27 }
 0x837   : > { %v4952_v42 = vadd.f32 %v4920_v13, %v4904_v32  ;;  %v13536_v13 = vld [vmem:[#allocation39_spill] sm:$0xff]  ;;  %v5003_v58 = vmax.f32 %v4987_v28, 0.0 }
 0x838   : > { %v4728_v32 = vadd.f32 %v4727_v17, %v13536_v13 }
 0x839   : > { %v4968_v45 = vadd.f32 %v4952_v42, %v11819_v41  ;;  %v4985_v41 = vadd.f32 %v11935_v18, %v4965_v35 }
 0x83a   : > { %v4601_v60 = vpop.f32.mrf.mxu3 }
 0x83b   : > { %v4602_v1 = vadd.f32 %v4601_v60, %v13527_v9  ;;  %v13537_v60 = vld [vmem:[#allocation22_spill] sm:$0xff]  ;;  %v4988_v49 = vadd.f32 %v11935_v18, %v4968_v45 }
 0x83d   : > { %v4905_v19 = vadd.f32 %v4602_v1, %v4483_v21  ;;  %v13538_v21 = vld [vmem:[#allocation112_spill] sm:$0xff] }
 0x83e   : > { %v4490_v9 = vadd.f32 %v13538_v21, %v13537_v60 }
 0x83f   : > { %v4953_v48 = vadd.f32 %v11827_v34, %v4905_v19  ;;  %v5001_v34 = vmax.f32 %v4985_v41, 0.0  ;;  %v13539_v19 = vld [vmem:[#allocation106_spill] sm:$0xff] }
 0x841   : > { %v4969_v33 = vadd.f32 %v4953_v48, %v11832_v0  ;;  %v4730_v0 = vpop.f32.mrf.mxu0  ;;  %v4924_v48 = vadd.f32 %v4847_v36, %v4728_v32  ;;  %v13549_v36 = vld [vmem:[#allocation109_spill] sm:$0xff] }
 0x842   : > { %v4603_v23 = vpop.f32.mrf.mxu3 }
 0x843   : > { %v4989_v43 = vadd.f32 %v11935_v18, %v4969_v33  ;;  %v4604_v3 = vadd.f32 %v4603_v23, %v13530_v11  ;;  %v13540_v23 = vld [vmem:[#allocation19_spill] sm:$0xff]  ;;  %v13542_v11 = vld [vmem:[#allocation60_spill] sm:$0xff] }
 0x845   : > { %v5005_v51 = vmax.f32 %v4989_v43, 0.0  ;;  %v4906_v2 = vadd.f32 %v4604_v3, %v4485_v52  ;;  %v13541_v52 = vld [vmem:[#allocation14_spill] sm:$0xff]  ;;  %v13543_v3 = vld [vmem:[#allocation132_spill] sm:$0xff] }
 0x846   : > { %v4731_v43 = vadd.f32 %v4730_v0, %v13541_v52 }
 0x847   : > { %v4954_v50 = vadd.f32 %v4922_v26, %v4906_v2  ;;  %v11948_v35 = vmax.f32 %v5001_v34, %v5005_v51  ;;  %v4493_v26 = vadd.f32 %v13543_v3, %v13542_v11  ;;  %v4854_v34 = vpop.f32.mrf.mxu2  ;;  %v13544_v2 = vld [vmem:[#allocation107_spill] sm:$0xff]  ;;  %v13558_v11 = vld [vmem:[#allocation136_spill] sm:$0xff] }
 0x848   : > { %v4852_v3 = vadd.f32 %v4851_v24, %v13558_v11  ;;  %v13566_v24 = vld [vmem:[#allocation145_spill] sm:$0xff] }
 0x849   : > { %v4970_v15 = vadd.f32 %v4954_v50, %v13531_v63  ;;  %v4732_v42 = vpop.f32.mrf.mxu0 }
 0x84a   : > { %v4606_v62 = vpop.f32.mrf.mxu3 }
 0x84b   : > { %v4990_v30 = vadd.f32 %v11935_v18, %v4970_v15  ;;  %v4607_v61 = vadd.f32 %v4606_v62, %v13534_v29  ;;  %v5004_v15 = vmax.f32 %v4988_v49, 0.0 }
 0x84d   : > { %v4907_v39 = vadd.f32 %v4607_v61, %v4488_v4  ;;  %v5006_v47 = vmax.f32 %v4990_v30, 0.0  ;;  %v13545_v30 = vld [vmem:[#allocation138_spill] sm:$0xff] }
 0x84e   : > { %v4855_v29 = vadd.f32 %v4854_v34, %v13545_v30  ;;  %v13563_v30 = vld [vmem:[#allocation96_spill] sm:$0xff] }
 0x84f   : > { %v4955_v57 = vadd.f32 %v11848_v25, %v4907_v39  ;;  %v11957_v7 = vmax.f32 %v5002_v10, %v5006_v47  ;;  %v11980_v0 = vpop.f32.mrf.mxu2  ;;  %v13546_v39 = vld [vmem:[#allocation48_spill] sm:$0xff]  ;;  %v13547_v47 = vld [vmem:[#allocation61_spill] sm:$0xff] }
 0x851   : > { %v4971_v54 = vadd.f32 %v4955_v57, %v11851_v37  ;;  %v4850_v37 = vadd.f32 %v4849_v44, %v13540_v23  ;;  %v4735_v55 = vpop.f32.mrf.mxu0  ;;  %v13548_v57 = vld [vmem:[#allocation114_spill] sm:$0xff] }
 0x852   : > { %v4608_v31 = vpop.f32.mrf.mxu3  ;;  %v4736_v10 = vadd.f32 %v4735_v55, %v13546_v39  ;;  %v4498_v46 = vadd.f32 %v13548_v57, %v13547_v47  ;;  %v13562_v55 = vld [vmem:[#allocation43_spill] sm:$0xff]  ;;  %v13564_v39 = vld [vmem:[#allocation68_spill] sm:$0xff] }
 0x853   : > { %v4991_v1 = vadd.f32 %v11935_v18, %v4971_v54  ;;  %v4609_v25 = vadd.f32 %v4608_v31, %v13539_v19  ;;  %v4925_v63 = vadd.f32 %v4850_v37, %v4731_v43  ;;  %v13557_v43 = vld [vmem:[#allocation92_spill] sm:$0xff] }
 0x854   : > { %v4927_v54 = vadd.f32 %v4855_v29, %v4736_v10  ;;  %v4267_v29 = vadd.f32 %v11892_v40, %v13563_v30  ;;  %v13565_v10 = vld [vmem:[#allocation141_spill] sm:$0xff]  ;;  %v13581_v30 = vld [vmem:[#allocation51_spill] sm:$0xff] }
 0x855   : > { %v5007_v41 = vmax.f32 %v4991_v1, 0.0  ;;  %v4908_v8 = vadd.f32 %v4609_v25, %v4490_v9  ;;  %v13550_v9 = vld [vmem:[#allocation31_spill] sm:$0xff]  ;;  %v13551_v25 = vld [vmem:[#allocation108_spill] sm:$0xff]  ;;  %v4386_v47 = vadd.f32 %v13566_v24, %v13565_v10 }
 0x856   : > { %v13585_v24 = vld [vmem:[#allocation47_spill] sm:$0xff] }
 0x857   : > { %v11967_v33 = vmax.f32 %v5003_v58, %v5007_v41  ;;  %v4956_v27 = vadd.f32 %v4924_v48, %v4908_v8  ;;  %v4859_v13 = vpop.f32.mrf.mxu2  ;;  %v13552_v58 = vld [vmem:[#allocation52_spill] sm:$0xff]  ;;  %v13553_v8 = vld [vmem:[#allocation59_spill] sm:$0xff]  ;;  %v4898_v40 = vadd.f32 %v4386_v47, %v4267_v29  ;;  %v4857_v29 = vadd.f32 %v11980_v0, %v13581_v30  ;;  %v13586_v0 = vld [vmem:[#allocation98_spill] sm:$0xff] }
 0x858   : > { %v4860_v1 = vadd.f32 %v4859_v13, %v13550_v9 }
 0x859   : > { %v4972_v17 = vadd.f32 %v4956_v27, %v11857_v6  ;;  %v11982_v4 = vpop.f32.mrf.mxu0  ;;  %v13554_v27 = vld [vmem:[#allocation140_spill] sm:$0xff] }
 0x85a   : > { %v4611_v14 = vpop.f32.mrf.mxu3  ;;  %v4495_v23 = vadd.f32 %v13554_v27, %v13553_v8  ;;  %v4738_v47 = vadd.f32 %v11982_v4, %v13585_v24  ;;  %v9532_v24 = vld [vmem:[%s13596_s6 + $0x40] sm:$0xff] }
 0x85b   : > { %v4992_v51 = vadd.f32 %v11935_v18, %v4972_v17  ;;  %v4612_v50 = vadd.f32 %v4611_v14, %v13544_v2  ;;  %v13555_v17 = vld [vmem:[#allocation66_spill] sm:$0xff] }
 0x85c   : > { %v13556_v14 = vld [vmem:[#allocation118_spill] sm:$0xff] }
 0x85d   : > { %v5008_v62 = vmax.f32 %v4992_v51, 0.0  ;;  %v4909_v44 = vadd.f32 %v4612_v50, %v4493_v26  ;;  %v4503_v52 = vadd.f32 %v13556_v14, %v13555_v17  ;;  %v13559_v26 = vld [vmem:[#allocation113_spill] sm:$0xff]  ;;  %v13560_v51 = vld [vmem:[#allocation131_spill] sm:$0xff]  ;;  %v13561_v2 = vld [vmem:[#allocation110_spill] sm:$0xff] }
 0x85e   : > { %v4376_v50 = vadd.f32 %v13561_v2, %v13560_v51  ;;  %v13573_v14 = vld [vmem:[#allocation30_spill] sm:$0xff]  ;;  %v13576_v2 = vld [vmem:[#allocation64_spill] sm:$0xff] }
 0x85f   : > { %v4957_v16 = vadd.f32 %v4925_v63, %v4909_v44  ;;  %v11977_v45 = vmax.f32 %v5004_v15, %v5008_v62  ;;  %v4861_v19 = vpop.f32.mrf.mxu2  ;;  %v4733_v63 = vadd.f32 %v4732_v42, %v13562_v55  ;;  %v13567_v42 = vld [vmem:[#allocation20_spill] sm:$0xff] }
 0x861   : > { %v4973_v6 = vadd.f32 %v4957_v16, %v11864_v53  ;;  %v4740_v53 = vpop.f32.mrf.mxu0 }
 0x862   : > { %v4613_v12 = vpop.f32.mrf.mxu3  ;;  %v4741_v41 = vadd.f32 %v4740_v53, %v13552_v58  ;;  %v13570_v53 = vld [vmem:[#allocation62_spill] sm:$0xff] }
 0x863   : > { %v4614_v48 = vadd.f32 %v4613_v12, %v13551_v25  ;;  %v4926_v12 = vadd.f32 %v4852_v3, %v4733_v63  ;;  %v4993_v57 = vadd.f32 %v11935_v18, %v4973_v6  ;;  %v13571_v25 = vld [vmem:[#allocation115_spill] sm:$0xff]  ;;  %v13578_v63 = vld [vmem:[#allocation94_spill] sm:$0xff] }
 0x864   : > { %v4929_v15 = vadd.f32 %v4860_v1, %v4741_v41 }
 0x865   : > { %v4910_v62 = vadd.f32 %v4614_v48, %v4495_v23  ;;  %v5009_v6 = vmax.f32 %v4993_v57, 0.0  ;;  %v13572_v23 = vld [vmem:[#allocation128_spill] sm:$0xff] }
 0x867   : > { %v4864_v1 = vpop.f32.mrf.mxu2 }
 0x869   : > { %v4742_v49 = vpop.f32.mrf.mxu0 }
 0x86a   : > { %v4616_v61 = vpop.f32.mrf.mxu3 }
 0x86b   : > { %v4617_v28 = vadd.f32 %v4616_v61, %v13549_v36 }
 0x86d   : > { %v4911_v31 = vadd.f32 %v4617_v28, %v4498_v46  ;;  %v4958_v46 = vadd.f32 %v4926_v12, %v4910_v62  ;;  %v4743_v28 = vadd.f32 %v4742_v49, %v13567_v42 }
 0x86f   : > { %v4959_v32 = vadd.f32 %v4927_v54, %v4911_v31  ;;  %v13568_v54 = vld [vmem:[#allocation65_spill] sm:$0xff]  ;;  %v13569_v31 = vld [vmem:[#allocation67_spill] sm:$0xff] }
 0x870   : > { %v4505_v13 = vadd.f32 %v13569_v31, %v13568_v54 }
 0x871   : > { %v11990_v60 = vadd.f32 %v4959_v32, %v11877_v56  ;;  %v4257_v56 = vadd.f32 %v11866_v20, %v13557_v43  ;;  %v4862_v20 = vadd.f32 %v4861_v19, %v13564_v39  ;;  %v4745_v41 = vpop.f32.mrf.mxu0 }
 0x872   : > { %v4618_v21 = vpop.f32.mrf.mxu3 }
 0x873   : > { %v4894_v16 = vadd.f32 %v4376_v50, %v4257_v56  ;;  %v4930_v58 = vadd.f32 %v4862_v20, %v4743_v28  ;;  %v13574_v56 = vld [vmem:[#allocation111_spill] sm:$0xff]  ;;  %v13577_v50 = vld [vmem:[#allocation116_spill] sm:$0xff]  ;;  %v4995_v4 = vadd.f32 %v11935_v18, %v11990_v60 }
 0x874   : > { %v4619_v11 = vadd.f32 %v4618_v21, %v13574_v56  ;;  %v4500_v55 = vadd.f32 %v13577_v50, %v13576_v2  ;;  %v13584_v20 = vld [vmem:[#allocation28_spill] sm:$0xff] }
 0x875   : > { %v4942_v9 = vadd.f32 %v4894_v16, %v13570_v53  ;;  %v13580_v16 = vld [vmem:[#allocation29_spill] sm:$0xff] }
 0x877   : > { %v4974_v8 = vadd.f32 %v4958_v46, %v4942_v9  ;;  %v4866_v46 = vpop.f32.mrf.mxu2 }
 0x879   : > { %v4994_v43 = vadd.f32 %v11935_v18, %v4974_v8  ;;  %v4747_v31 = vpop.f32.mrf.mxu0  ;;  %v13590_v8 = vld [vmem:[#allocation55_spill] sm:$0xff] }
 0x87a   : > { %v4621_v37 = vpop.f32.mrf.mxu3 }
 0x87b   : > { %v4622_v34 = vadd.f32 %v4621_v37, %v13559_v26  ;;  %v4946_v37 = vadd.f32 %v4898_v40, %v13572_v23  ;;  %v5010_v42 = vmax.f32 %v4994_v43, 0.0  ;;  %v13587_v40 = vld [vmem:[#allocation144_spill] sm:$0xff]  ;;  %v13592_v23 = vld [vmem:[#allocation69_spill] sm:$0xff]  ;;  %v13594_v43 = vld [vmem:[#allocation119_spill] sm:$0xff] }
 0x87d   : > { %v4913_v44 = vadd.f32 %v4622_v34, %v4503_v52  ;;  %v4865_v52 = vadd.f32 %v4864_v1, %v13573_v14  ;;  %v13575_v34 = vld [vmem:[#allocation56_spill] sm:$0xff]  ;;  %v13588_v1 = vld [vmem:[#allocation10_spill] sm:$0xff] }
 0x87e   : > { %v4746_v51 = vadd.f32 %v4745_v41, %v13575_v34 }
 0x87f   : > { %v4961_v61 = vadd.f32 %v4929_v15, %v4913_v44  ;;  %v4262_v15 = vadd.f32 %v11879_v22, %v13578_v63  ;;  %v13579_v44 = vld [vmem:[#allocation130_spill] sm:$0xff]  ;;  %v4912_v22 = vadd.f32 %v4619_v11, %v4500_v55 }
 0x880   : > { %v4508_v12 = vadd.f32 %v13580_v16, %v13579_v44  ;;  %v4931_v57 = vadd.f32 %v4865_v52, %v4746_v51 }
 0x881   : > { %v4977_v36 = vadd.f32 %v4961_v61, %v11890_v59  ;;  %v13582_v61 = vld [vmem:[#allocation117_spill] sm:$0xff] }
 0x882   : > { %v4623_v32 = vpop.f32.mrf.mxu3 }
 0x883   : > { %v4997_v19 = vadd.f32 %v11935_v18, %v4977_v36  ;;  %v4624_v48 = vadd.f32 %v4623_v32, %v13571_v25  ;;  %v4272_v32 = vadd.f32 %v11901_v5, %v13586_v0  ;;  %v13589_v25 = vld [vmem:[#allocation70_spill] sm:$0xff] }
 0x885   : > { %v5013_v27 = vmax.f32 %v4997_v19, 0.0  ;;  %v4914_v59 = vadd.f32 %v4624_v48, %v4505_v13  ;;  %v4928_v13 = vadd.f32 %v4857_v29, %v4738_v47  ;;  %v4391_v19 = vadd.f32 %v13588_v1, %v13587_v40  ;;  %v9535_v47 = vld [vmem:[%s13597_s7 + $0x10] sm:$0xff] }
 0x886   : > { %v4867_v48 = vadd.f32 %v4866_v46, %v13589_v25  ;;  %v9538_v46 = vld [vmem:[%s13597_s7 + $0x28] sm:$0xff] }
 0x887   : > { %v4962_v49 = vadd.f32 %v4930_v58, %v4914_v59  ;;  %v5021_v17 = vmax.f32 %v5009_v6, %v5013_v27  ;;  %v4960_v58 = vadd.f32 %v4928_v13, %v4912_v22  ;;  %v4748_v27 = vadd.f32 %v4747_v31, %v13590_v8  ;;  %v13591_v59 = vld [vmem:[#allocation135_spill] sm:$0xff] }
 0x888   : > { %v4510_v5 = vadd.f32 %v13592_v23, %v13591_v59  ;;  %v4900_v14 = vadd.f32 %v4391_v19, %v4272_v32  ;;  %v9544_v8 = vld [vmem:[%s13597_s7 + $0x58] sm:$0xff] }
 0x889   : > { %v4978_v3 = vadd.f32 %v4962_v49, %v4946_v37  ;;  %v5025_v26 = vmax.f32 %v11948_v35, %v5021_v17  ;;  %v13583_v35 = vld [vmem:[#allocation137_spill] sm:$0xff]  ;;  %v13593_v37 = vld [vmem:[#allocation63_spill] sm:$0xff]  ;;  %v4932_v60 = vadd.f32 %v4867_v48, %v4748_v27 }
 0x88a   : > { %v4626_v62 = vpop.f32.mrf.mxu3  ;;  %v4381_v10 = vadd.f32 %v13584_v20, %v13583_v35  ;;  %v9530_v35 = vld [vmem:[%s13596_s6 + $0x30] sm:$0xff]  ;;  %v9531_v20 = vld [vmem:[%s13596_s6 + $0x38] sm:$0xff] }
 0x88b   : > { %v4998_v21 = vadd.f32 %v11935_v18, %v4978_v3  ;;  %v4627_v39 = vadd.f32 %v4626_v62, %v13582_v61  ;;  %v5011_v3 = vmax.f32 %v4995_v4, 0.0  ;;  %v9528_v61 = vld [vmem:[%s13596_s6 + $0x20] sm:$0xff] }
 0x88c   : > { %v4896_v54 = vadd.f32 %v4381_v10, %v4262_v15  ;;  %v9536_v10 = vld [vmem:[%s13597_s7 + $0x18] sm:$0xff] }
 0x88d   : > { %v4915_v36 = vadd.f32 %v4627_v39, %v4508_v12  ;;  %v5014_v28 = vmax.f32 %v4998_v21, 0.0  ;;  %v9524_v21 = vld [vmem:[%s13596_s6] sm:$0xff]  ;;  %v9529_v39 = vld [vmem:[%s13596_s6 + $0x28] sm:$0xff]  ;;  %5229 = vmatpush.bf16.msra.mxu0 %v9536_v10 }
 0x88e   : > { %v4944_v49 = vadd.f32 %v4896_v54, %v13593_v37  ;;  %v9540_v54 = vld [vmem:[%s13597_s7 + $0x38] sm:$0xff]  ;;  %v9543_v37 = vld [vmem:[%s13597_s7 + $0x50] sm:$0xff] }
 0x88f   : > { %v4963_v53 = vadd.f32 %v4931_v57, %v4915_v36  ;;  %v5022_v9 = vmax.f32 %v5010_v42, %v5014_v28  ;;  %v9537_v36 = vld [vmem:[%s13597_s7 + $0x20] sm:$0xff] }
 0x890   : > { %v4976_v34 = vadd.f32 %v4960_v58, %v4944_v49 }
 0x891   : > { %v4979_v41 = vadd.f32 %v4963_v53, %v11899_v38  ;;  %v5026_v6 = vmax.f32 %v11957_v7, %v5022_v9  ;;  %v13595_v7 = vld [vmem:[#allocation133_spill] sm:$0xff]  ;;  %5230 = vmatpush.bf16.msra.mxu0 %v9535_v47 }
 0x892   : > { %v4628_v17 = vpop.f32.mrf.mxu3  ;;  %v4948_v2 = vadd.f32 %v4900_v14, %v13595_v7  ;;  %v4996_v63 = vadd.f32 %v11935_v18, %v4976_v34  ;;  %v9539_v53 = vld [vmem:[%s13597_s7 + $0x30] sm:$0xff] }
 0x893   : > { %v4999_v52 = vadd.f32 %v11935_v18, %v4979_v41  ;;  %v4629_v56 = vadd.f32 %v4628_v17, %v13594_v43  ;;  %v5029_v11 = vpack.c.bf16 %v5026_v6, %v5025_v26 }
 0x894   : > { %v5012_v16 = vmax.f32 %v4996_v63, 0.0 }
 0x895   : > { %v5015_v38 = vmax.f32 %v4999_v52, 0.0  ;;  %v4916_v51 = vadd.f32 %v4629_v56, %v4510_v5  ;;  %5273 = vmatpush.bf16.msrb.mxu0 %v9540_v54 }
 0x897   : > { %v5023_v50 = vmax.f32 %v5011_v3, %v5015_v38  ;;  %v4964_v55 = vadd.f32 %v4932_v60, %v4916_v51  ;;  %v9548_v38 = vld [vmem:[%s13597_s7 + $0x78] sm:$0xff] }
 0x898   : > { %5361 = vmatpush.bf16.msra.mxu2 %v9548_v38 }
 0x899   : > { %v4980_v15 = vadd.f32 %v4964_v55, %v4948_v2  ;;  %v5027_v62 = vmax.f32 %v11967_v33, %v5023_v50  ;;  %v9525_v33 = vld [vmem:[%s13596_s6 + $0x8] sm:$0xff]  ;;  %5274 = vmatpush.bf16.msrb.mxu0 %v9539_v53  ;;  %v9547_v55 = vld [vmem:[%s13597_s7 + $0x70] sm:$0xff] }
 0x89b   : > { %v5000_v44 = vadd.f32 %v11935_v18, %v4980_v15  ;;  %v9526_v18 = vld [vmem:[%s13596_s6 + $0x10] sm:$0xff] }
 0x89c   : > { %5362 = vmatpush.bf16.msra.mxu2 %v9547_v55 }
 0x89d   : > { %v5016_v12 = vmax.f32 %v5000_v44, 0.0  ;;  %v9534_v44 = vld [vmem:[%s13597_s7 + $0x8] sm:$0xff] }
 0x89f   : > { %v5024_v30 = vmax.f32 %v5012_v16, %v5016_v12  ;;  %v9549_v12 = vld [vmem:[%s13597_s7 + $0x80] sm:$0xff] }
 0x8a0   : > { %5434 = vmatpush.bf16.msrb.mxu2 %v9534_v44 }
 0x8a1   : > { %v5028_v26 = vmax.f32 %v11977_v45, %v5024_v30  ;;  %v9527_v45 = vld [vmem:[%s13596_s6 + $0x18] sm:$0xff]  ;;  %v9533_v30 = vld [vmem:[%s13597_s7] sm:$0xff]  ;;  %s9771_s6 = sshra.s32 %s7522_s23, 4  ;;  %s9772_s6 = int_to_ptr.hbm [resolvable:$true] %s9771_s6 }
 0x8a2   : > { %p9778_p0 = scmp.lt.s32.totalorder %s9772_s6, %s13027_s19 }
 0x8a3   : > { %v5030_v29 = vpack.c.bf16 %v5028_v26, %v5027_v62  ;;  %v9550_v62 = vld [vmem:[%s13597_s7 + $0x88] sm:$0xff] }
 0x8a4   : > { %5435 = vmatpush.bf16.msrb.mxu2 %v9533_v30  ;;  %v9542_v26 = vld [vmem:[%s13597_s7 + $0x48] sm:$0xff] }
 0x8a5   : > { %5128 = vmatpush.bf16.msra.mxu3 %v5030_v29 }
 0x8a9   : > { %5129 = vmatpush.bf16.msra.mxu3 %v5029_v11 }
 0x8ac   : > { %8509 = vmatmul.msk.bf16.vlgmr.msra.gmra.mxu3 %vm5094_vm3, %v9524_v21  ;;  %v9541_v21 = vld [vmem:[%s13597_s7 + $0x40] sm:$0xff] }
 0x8ad   : > { %5468 = vmatpush.bf16.msrb.mxu3 %v9538_v46 }
 0x8b1   : > { %5469 = vmatpush.bf16.msrb.mxu3 %v9537_v36 }
 0x8bc   : > { %8510 = vmatmul.msk.bf16.gmra.mxu3 %vm5094_vm3, %v9525_v33 }
 0x8cc   : > { %8511 = vmatmul.msk.bf16.gmra.mxu3 %vm5094_vm3, %v9526_v18 }
 0x8dc   : > { %8512 = vmatmul.msk.bf16.gmra.mxu3 %vm5094_vm3, %v9527_v45 }
 0x8ec   : > { %8513 = vmatmul.msk.bf16.gmra.mxu3 %vm5094_vm3, %v9528_v61 }
 0x8fc   : > { %8514 = vmatmul.msk.bf16.gmra.mxu3 %vm5094_vm3, %v9529_v39 }
 0x90c   : > { %8515 = vmatmul.msk.bf16.gmra.mxu3 %vm5094_vm3, %v9530_v35  ;;  %v9546_v35 = vld [vmem:[%s13597_s7 + $0x68] sm:$0xff] }
 0x91c   : > { %8516 = vmatmul.msk.bf16.gmra.mxu3 %vm5094_vm3, %v9531_v20 }
 0x92c   : > { %8517 = vmatmul.msk.bf16.gmra.mxu3 %vm5094_vm3, %v9532_v24  ;;  %v9545_v24 = vld [vmem:[%s13597_s7 + $0x60] sm:$0xff]  ;;  %s9773_s7 = scalar_lea.hbm %s9772_s6, 1 }
 0x92d   : > { %p9774_p11 = scmp.ne.s32.totalorder %s9772_s6, %s9773_s7  ;;  %p9779_p1 = scmp.lt.s32.totalorder %s9777_s25, %s9773_s7 }
 0x92f   : > { %v12101_v57 = vpop.f32.mrf.mxu3  ;;  %p9775_p12 = pnand %p9774_p11, %p9960_p5  ;;  %p9780_p2 = por %p9779_p1, %p9778_p0 }
 0x930   : > { %v5176_v46 = vpack.c.bf16 %v12101_v57, %v12101_v57 }
 0x931   : > { %p9776_p13 = pneg %p9775_p12 }
 0x933   : > { %p9781_p3 = pnand %p9780_p2, %p9776_p13 }
 0x937   : > { %v12106_v22 = vpop.f32.mrf.mxu3 }
 0x938   : > { %v5177_v47 = vpack.c.bf16 %v12106_v22, %v12106_v22 }
 0x93f   : > { %v5136_v42 = vpop.f32.mrf.mxu3 }
 0x940   : > { %v5178_v28 = vpack.c.bf16 %v5136_v42, %v5136_v42 }
 0x942   : > { %v5205_v0 = vunpack.c.l.b16 %v5178_v28  ;;  %v5411_v28 = vunpack.c.l.b16 %v5177_v47  ;;  %v9559_v47 = vld [vmem:[%s13017_s9 + $0x40] sm:$0xff] }
 0x947   : > { %v5138_v31 = vpop.f32.mrf.mxu3 }
 0x948   : > { %v5179_v13 = vpack.c.bf16 %v5138_v31, %v5138_v31  ;;  %v5410_v31 = vunpack.c.l.b16 %v5176_v46 }
 0x94a   : > { %v5206_v32 = vunpack.c.l.b16 %v5179_v13 }
 0x94c   : > { %v5207_v9 = vpack.c.b16 %v5206_v32, %v5205_v0  ;;  %v5412_v32 = vpack.c.b16 %v5411_v28, %v5410_v31 }
 0x94e   : > { %8530 = vmatmul.msk.bf16.vlgmr.msra.gmra.mxu0 %vm5094_vm3, %v5207_v9 }
 0x94f   : > { %v5141_v40 = vpop.f32.mrf.mxu3  ;;  %5317 = vmatpush.bf16.msra.mxu0 %v9544_v8 }
 0x950   : > { %v5180_v1 = vpack.c.bf16 %v5141_v40, %v5141_v40 }
 0x952   : > { %v5444_v48 = vunpack.c.l.b16 %v5180_v1 }
 0x953   : > { %5318 = vmatpush.bf16.msra.mxu0 %v9543_v37 }
 0x957   : > { %v5143_v19 = vpop.f32.mrf.mxu3 }
 0x958   : > { %v5181_v25 = vpack.c.bf16 %v5143_v19, %v5143_v19 }
 0x95a   : > { %v5445_v4 = vunpack.c.l.b16 %v5181_v25 }
 0x95c   : > { %v5446_v58 = vpack.c.b16 %v5445_v4, %v5444_v48 }
 0x95e   : > { %8612 = vmatmul.msk.bf16.vlgmr.msrb.gmra.mxu3 %vm5094_vm3, %v5446_v58 }
 0x95f   : > { %v5146_v41 = vpop.f32.mrf.mxu3 }
 0x960   : > { %v5182_v6 = vpack.c.bf16 %v5146_v41, %v5146_v41 }
 0x962   : > { %v5249_v23 = vunpack.c.l.b16 %v5182_v6 }
 0x967   : > { %v5148_v27 = vpop.f32.mrf.mxu3 }
 0x968   : > { %v5183_v59 = vpack.c.bf16 %v5148_v27, %v5148_v27 }
 0x96a   : > { %v5250_v5 = vunpack.c.l.b16 %v5183_v59 }
 0x96c   : > { %v5251_v49 = vpack.c.b16 %v5250_v5, %v5249_v23 }
 0x96e   : > { %8547 = vmatmul.msk.bf16.vlgmr.msrb.gmra.mxu0 %vm5094_vm3, %v5251_v49 }
 0x96f   : > { %v5151_v17 = vpop.f32.mrf.mxu3  ;;  %5400 = vmatpush.bf16.msrb.mxu0 %v9550_v62  ;;  %v9753_v62 = vld [vmem:[%s13016_s8] ss:$0 sm:$0xff] }
 0x970   : > { %v5184_v14 = vpack.c.bf16 %v5151_v17, %v5151_v17 }
 0x972   : > { %v5478_v56 = vunpack.c.l.b16 %v5184_v14 }
 0x973   : > { %5401 = vmatpush.bf16.msrb.mxu0 %v9549_v12 }
 0x977   : > { %v5153_v52 = vpop.f32.mrf.mxu3 }
 0x978   : > { %v5185_v43 = vpack.c.bf16 %v5153_v52, %v5153_v52 }
 0x97a   : > { %v5479_v11 = vunpack.c.l.b16 %v5185_v43 }
 0x97c   : > { %v5480_v60 = vpack.c.b16 %v5479_v11, %v5478_v56 }
 0x97f   : > { %v5156_v3 = vpop.f32.mrf.mxu3 }
 0x980   : > { %v5186_v34 = vpack.c.bf16 %v5156_v3, %v5156_v3 }
 0x982   : > { %v5293_v2 = vunpack.c.l.b16 %v5186_v34 }
 0x987   : > { %v5158_v51 = vpop.f32.mrf.mxu3 }
 0x988   : > { %v5187_v7 = vpack.c.bf16 %v5158_v51, %v5158_v51 }
 0x98a   : > { %v5294_v50 = vunpack.c.l.b16 %v5187_v7 }
 0x98c   : > { %v5295_v63 = vpack.c.b16 %v5294_v50, %v5293_v2 }
 0x98e   : > { %8564 = vmatmul.msk.bf16.vlgmr.msra.gmra.mxu0 %vm5094_vm3, %v5295_v63 }
 0x98f   : > { %v5161_v15 = vpop.f32.mrf.mxu3  ;;  %5502 = vmatpush.bf16.msra.mxu0 %v9542_v26 }
 0x990   : > { %v5188_v40 = vpack.c.bf16 %v5161_v15, %v5161_v15 }
 0x992   : > { %v5512_v22 = vunpack.c.l.b16 %v5188_v40 }
 0x993   : > { %5503 = vmatpush.bf16.msra.mxu0 %v9541_v21 }
 0x997   : > { %v5163_v16 = vpop.f32.mrf.mxu3 }
 0x998   : > { %v5189_v9 = vpack.c.bf16 %v5163_v16, %v5163_v16 }
 0x99a   : > { %v5513_v1 = vunpack.c.l.b16 %v5189_v9 }
 0x99c   : > { %v5514_v19 = vpack.c.b16 %v5513_v1, %v5512_v22 }
 0x99f   : > { %v5166_v29 = vpop.f32.mrf.mxu3 }
 0x9a0   : > { %v5190_v33 = vpack.c.bf16 %v5166_v29, %v5166_v29 }
 0x9a2   : > { %v5337_v61 = vunpack.c.l.b16 %v5190_v33 }
 0x9a7   : > { %v5168_v18 = vpop.f32.mrf.mxu3 }
 0x9a8   : > { %v5191_v45 = vpack.c.bf16 %v5168_v18, %v5168_v18  ;;  %v9551_v18 = vld [vmem:[%s13017_s9] sm:$0xff] }
 0x9aa   : > { %v5338_v39 = vunpack.c.l.b16 %v5191_v45  ;;  %v9552_v45 = vld [vmem:[%s13017_s9 + $0x8] sm:$0xff] }
 0x9ac   : > { %v5339_v20 = vpack.c.b16 %v5338_v39, %v5337_v61  ;;  %v9553_v61 = vld [vmem:[%s13017_s9 + $0x10] sm:$0xff]  ;;  %v9554_v39 = vld [vmem:[%s13017_s9 + $0x18] sm:$0xff] }
 0x9ae   : > { %8581 = vmatmul.msk.bf16.vlgmr.msra.gmra.mxu2 %vm5094_vm3, %v5339_v20  ;;  %v9556_v20 = vld [vmem:[%s13017_s9 + $0x28] sm:$0xff] }
 0x9af   : > { %v5171_v10 = vpop.f32.mrf.mxu3  ;;  %5536 = vmatpush.bf16.msra.mxu2 %v9546_v35  ;;  %v9555_v35 = vld [vmem:[%s13017_s9 + $0x20] sm:$0xff] }
 0x9b0   : > { %v5192_v36 = vpack.c.bf16 %v5171_v10, %v5171_v10  ;;  %v9557_v10 = vld [vmem:[%s13017_s9 + $0x30] sm:$0xff] }
 0x9b2   : > { %v5376_v13 = vunpack.c.l.b16 %v5192_v36 }
 0x9b3   : > { %5537 = vmatpush.bf16.msra.mxu2 %v9545_v24  ;;  %v9558_v24 = vld [vmem:[%s13017_s9 + $0x38] sm:$0xff] }
 0x9b7   : > { %v5173_v42 = vpop.f32.mrf.mxu3 }
 0x9b8   : > { %v5193_v54 = vpack.c.bf16 %v5173_v42, %v5173_v42 }
 0x9ba   : > { %v5377_v0 = vunpack.c.l.b16 %v5193_v54 }
 0x9bc   : > { %v5378_v53 = vpack.c.b16 %v5377_v0, %v5376_v13  ;;  %v9576_v0 = vld [vmem:[%s13018_s10 + $0x38] sm:$0xff] }
 0x9be   : > { %8594 = vmatmul.msk.bf16.vlgmr.msrb.gmra.mxu0 %vm5094_vm3, %v5378_v53  ;;  %8603 = vmatmul.msk.bf16.vlgmr.msrb.gmra.mxu2 %vm5094_vm3, %v5412_v32  ;;  %v9560_v32 = vld [vmem:[%s13017_s9 + $0x48] sm:$0xff] }
 0x9cb   : > { %v5232_v57 = vpop.f32.mrf.mxu0 }
 0x9ce   : > { %8621 = vmatmul.msk.bf16.vlgmr.msra.gmra.mxu0 %vm5094_vm3, %v5480_v60  ;;  %8630 = vmatmul.msk.bf16.vlgmr.msra.gmra.mxu2 %vm5094_vm3, %v5514_v19 }
 0x9d3   : > { %v5234_v25 = vpop.f32.mrf.mxu0 }
 0x9e1   : > { %v5471_v49 = vpop.f32.mrf.mxu3 }
 0x9e9   : > { %v5473_v51 = vpop.f32.mrf.mxu3 }
 0x9eb   : > { %v5276_v48 = vpop.f32.mrf.mxu0 }
 0x9ec   : > { %v5472_v56 = vadd.f32 %v5471_v49, %v5276_v48 }
 0x9f3   : > { %v5278_v4 = vpop.f32.mrf.mxu0 }
 0x9f4   : > { %v5474_v2 = vadd.f32 %v5473_v51, %v5278_v4 }
 0xa0b   : > { %v5320_v58 = vpop.f32.mrf.mxu0 }
 0xa13   : > { %v5322_v6 = vpop.f32.mrf.mxu0 }
 0xa31   : > { %v5364_v41 = vpop.f32.mrf.mxu2 }
 0xa39   : > { %v5366_v8 = vpop.f32.mrf.mxu2 }
 0xa3b   : > { %v5403_v27 = vpop.f32.mrf.mxu0 }
 0xa41   : > { %v5437_v59 = vpop.f32.mrf.mxu2 }
 0xa42   : > { %v5438_v14 = vadd.f32 %v5437_v59, %v5232_v57  ;;  %v9562_v59 = vld [vmem:[%s13017_s9 + $0x58] sm:$0xff] }
 0xa43   : > { %v5405_v23 = vpop.f32.mrf.mxu0 }
 0xa44   : > { %v5544_v60 = vadd.f32 %v5472_v56, %v5438_v14  ;;  %v9584_v56 = vld [vmem:[%s13018_s10 + $0x78] sm:$0xff] }
 0xa45   : > { %6015 = vmatpush.bf16.msrb.mxu2 %v9584_v56 }
 0xa49   : > { %v5439_v5 = vpop.f32.mrf.mxu2 }
 0xa4a   : > { %v5440_v34 = vadd.f32 %v5439_v5, %v5234_v25  ;;  %v9561_v25 = vld [vmem:[%s13017_s9 + $0x50] sm:$0xff] }
 0xa4b   : > { %v5505_v37 = vpop.f32.mrf.mxu0 }
 0xa4c   : > { %v5506_v52 = vadd.f32 %v5505_v37, %v5320_v58  ;;  %v5545_v63 = vadd.f32 %v5474_v2, %v5440_v34  ;;  %v9582_v34 = vld [vmem:[%s13018_s10 + $0x68] sm:$0xff] }
 0xa51   : > { %v5539_v17 = vpop.f32.mrf.mxu2 }
 0xa52   : > { %v5540_v43 = vadd.f32 %v5539_v17, %v5364_v41 }
 0xa53   : > { %v5507_v3 = vpop.f32.mrf.mxu0 }
 0xa54   : > { %v5546_v11 = vadd.f32 %v5540_v43, %v5506_v52  ;;  %v5508_v50 = vadd.f32 %v5507_v3, %v5322_v6  ;;  %v9563_v43 = vld [vmem:[%s13017_s9 + $0x60] sm:$0xff] }
 0xa56   : > { %v5548_v38 = vadd.f32 %v5546_v11, %v5544_v60  ;;  %v9583_v60 = vld [vmem:[%s13018_s10 + $0x70] sm:$0xff] }
 0xa57   : > { %6016 = vmatpush.bf16.msrb.mxu2 %v9583_v60 }
 0xa58   : > { %v5550_v15 = vadd.f32 %v5548_v38, %v5403_v27 }
 0xa59   : > { %v5541_v7 = vpop.f32.mrf.mxu2 }
 0xa5a   : > { %v5542_v55 = vadd.f32 %v5541_v7, %v5366_v8  ;;  %v5556_v12 = vadd.f32 %v9753_v62, %v5550_v15 }
 0xa5b   : > { %6017 = vmatpush.bf16.msrb.mxu2 %v9582_v34 }
 0xa5c   : > { %v5547_v44 = vadd.f32 %v5542_v55, %v5508_v50  ;;  %v5558_v29 = vmax.f32 %v5556_v12, 0.0  ;;  %v9581_v50 = vld [vmem:[%s13018_s10 + $0x60] sm:$0xff] }
 0xa5e   : > { %v5549_v16 = vadd.f32 %v5547_v44, %v5545_v63  ;;  %v9564_v63 = vld [vmem:[%s13017_s9 + $0x68] sm:$0xff] }
 0xa5f   : > { %6018 = vmatpush.bf16.msrb.mxu2 %v9581_v50 }
 0xa60   : > { %v5551_v30 = vadd.f32 %v5549_v16, %v5405_v23 }
 0xa62   : > { %v5557_v26 = vadd.f32 %v9753_v62, %v5551_v30  ;;  %v9575_v62 = vld [vmem:[%s13018_s10 + $0x30] sm:$0xff] }
 0xa64   : > { %v5559_v21 = vmax.f32 %v5557_v26, 0.0 }
 0xa66   : > { %v5560_v33 = vpack.c.bf16 %v5559_v21, %v5558_v29  ;;  %v9565_v21 = vld [vmem:[%s13017_s9 + $0x70] sm:$0xff] }
 0xa68   : > { %5748 = vmatpush.bf16.msrb.mxu0 %v5560_v33 }
 0xa6b   : > { %8703 = vmatmul.msk.bf16.vlgmr.msrb.gmra.mxu0 %vm652_vm0, %v9551_v18 }
 0xa6c   : > { %5938 = vmatpush.bf16.msra.mxu0 %v9576_v0  ;;  %v9574_v0 = vld [vmem:[%s13018_s10 + $0x28] sm:$0xff] }
 0xa70   : > { %5939 = vmatpush.bf16.msra.mxu0 %v9575_v62 }
 0xa74   : > { %5940 = vmatpush.bf16.msra.mxu0 %v9574_v0  ;;  %v9570_v0 = vld [vmem:[%s13018_s10 + $0x8] sm:$0xff] }
 0xa7b   : > { %8704 = vmatmul.msk.bf16.gmra.mxu0 %vm652_vm0, %v9552_v45 }
 0xa8b   : > { %8705 = vmatmul.msk.bf16.gmra.mxu0 %vm652_vm0, %v9553_v61 }
 0xa9b   : > { %8706 = vmatmul.msk.bf16.gmra.mxu0 %vm652_vm0, %v9554_v39 }
 0xaab   : > { %8707 = vmatmul.msk.bf16.gmra.mxu0 %vm652_vm0, %v9555_v35 }
 0xabb   : > { %8708 = vmatmul.msk.bf16.gmra.mxu0 %vm652_vm0, %v9556_v20 }
 0xacb   : > { %8709 = vmatmul.msk.bf16.gmra.mxu0 %vm652_vm0, %v9557_v10  ;;  %v9566_v10 = vld [vmem:[%s13017_s9 + $0x78] sm:$0xff] }
 0xadb   : > { %8710 = vmatmul.msk.bf16.gmra.mxu0 %vm652_vm0, %v9558_v24 }
 0xae8   : > { %v5750_v46 = vpop.f32.mrf.mxu0 }
 0xae9   : > { %v5840_v36 = vpack.c.bf16 %v5750_v46, %v5750_v46 }
 0xaeb   : > { %8711 = vmatmul.msk.bf16.gmra.mxu0 %vm652_vm0, %v9559_v47  ;;  %v12205_v54 = vunpack.c.l.b16 %v5840_v36 }
 0xaf0   : > { %v5752_v42 = vpop.f32.mrf.mxu0 }
 0xaf1   : > { %v5841_v28 = vpack.c.bf16 %v5752_v42, %v5752_v42 }
 0xaf3   : > { %v12207_v31 = vunpack.c.l.b16 %v5841_v28 }
 0xaf5   : > { %v6260_v13 = vpack.c.b16 %v12207_v31, %v12205_v54  ;;  %v9596_v54 = vld [vmem:[%s13018_s10 + $0xd8] sm:$0xff]  ;;  %v9595_v31 = vld [vmem:[%s13018_s10 + $0xd0] sm:$0xff] }
 0xaf8   : > { %v5755_v53 = vpop.f32.mrf.mxu0 }
 0xaf9   : > { %v5842_v9 = vpack.c.bf16 %v5755_v53, %v5755_v53  ;;  %v9567_v53 = vld [vmem:[%s13017_s9 + $0x80] sm:$0xff] }
 0xafb   : > { %8712 = vmatmul.msk.bf16.gmra.mxu0 %vm652_vm0, %v9560_v32  ;;  %v12218_v22 = vunpack.c.l.b16 %v5842_v9  ;;  %v9573_v9 = vld [vmem:[%s13018_s10 + $0x20] sm:$0xff] }
 0xafc   : > { %5941 = vmatpush.bf16.msra.mxu0 %v9573_v9 }
 0xb00   : > { %v5757_v40 = vpop.f32.mrf.mxu0 }
 0xb01   : > { %v5843_v1 = vpack.c.bf16 %v5757_v40, %v5757_v40 }
 0xb03   : > { %v12220_v19 = vunpack.c.l.b16 %v5843_v1 }
 0xb05   : > { %v6261_v57 = vpack.c.b16 %v12220_v19, %v12218_v22  ;;  %v9593_v22 = vld [vmem:[%s13018_s10 + $0xc0] sm:$0xff] }
 0xb08   : > { %v5760_v48 = vpop.f32.mrf.mxu0 }
 0xb09   : > { %v5844_v4 = vpack.c.bf16 %v5760_v48, %v5760_v48 }
 0xb0b   : > { %8713 = vmatmul.msk.bf16.gmra.mxu0 %vm652_vm0, %v9561_v25  ;;  %v12228_v6 = vunpack.c.l.b16 %v5844_v4 }
 0xb10   : > { %v5762_v58 = vpop.f32.mrf.mxu0 }
 0xb11   : > { %v5845_v41 = vpack.c.bf16 %v5762_v58, %v5762_v58 }
 0xb13   : > { %v12230_v8 = vunpack.c.l.b16 %v5845_v41 }
 0xb15   : > { %v5901_v27 = vpack.c.b16 %v12230_v8, %v12228_v6  ;;  %v9599_v8 = vld [vmem:[%s13018_s10 + $0xf0] sm:$0xff] }
 0xb18   : > { %v5765_v23 = vpop.f32.mrf.mxu0 }
 0xb19   : > { %v5846_v5 = vpack.c.bf16 %v5765_v23, %v5765_v23 }
 0xb1b   : > { %8714 = vmatmul.msk.bf16.gmra.mxu0 %vm652_vm0, %v9562_v59  ;;  %v12238_v17 = vunpack.c.l.b16 %v5846_v5  ;;  %v9568_v59 = vld [vmem:[%s13017_s9 + $0x88] sm:$0xff]  ;;  %v9592_v5 = vld [vmem:[%s13018_s10 + $0xb8] sm:$0xff] }
 0xb1c   : > { %6092 = vmatpush.bf16.msrb.mxu0 %v9592_v5 }
 0xb20   : > { %v5767_v37 = vpop.f32.mrf.mxu0 }
 0xb21   : > { %v5847_v49 = vpack.c.bf16 %v5767_v37, %v5767_v37 }
 0xb23   : > { %v12240_v14 = vunpack.c.l.b16 %v5847_v49  ;;  %v9591_v49 = vld [vmem:[%s13018_s10 + $0xb0] sm:$0xff] }
 0xb24   : > { %6093 = vmatpush.bf16.msrb.mxu0 %v9591_v49 }
 0xb25   : > { %v5902_v52 = vpack.c.b16 %v12240_v14, %v12238_v17 }
 0xb28   : > { %v5770_v11 = vpop.f32.mrf.mxu0 }
 0xb29   : > { %v5848_v3 = vpack.c.bf16 %v5770_v11, %v5770_v11 }
 0xb2b   : > { %8715 = vmatmul.msk.bf16.gmra.mxu0 %vm652_vm0, %v9563_v43  ;;  %v12257_v7 = vunpack.c.l.b16 %v5848_v3  ;;  %v9590_v3 = vld [vmem:[%s13018_s10 + $0xa8] sm:$0xff] }
 0xb2c   : > { %6094 = vmatpush.bf16.msrb.mxu0 %v9590_v3  ;;  %v9580_v3 = vld [vmem:[%s13018_s10 + $0x58] sm:$0xff] }
 0xb30   : > { %v5772_v38 = vpop.f32.mrf.mxu0 }
 0xb31   : > { %v5849_v51 = vpack.c.bf16 %v5772_v38, %v5772_v38  ;;  %v9589_v38 = vld [vmem:[%s13018_s10 + $0xa0] sm:$0xff] }
 0xb32   : > { %6095 = vmatpush.bf16.msrb.mxu0 %v9589_v38  ;;  %v9588_v38 = vld [vmem:[%s13018_s10 + $0x98] sm:$0xff] }
 0xb33   : > { %v12259_v2 = vunpack.c.l.b16 %v5849_v51 }
 0xb35   : > { %v6319_v55 = vpack.c.b16 %v12259_v2, %v12257_v7 }
 0xb38   : > { %v5775_v15 = vpop.f32.mrf.mxu0 }
 0xb39   : > { %v5850_v44 = vpack.c.bf16 %v5775_v15, %v5775_v15 }
 0xb3b   : > { %8716 = vmatmul.msk.bf16.gmra.mxu0 %vm652_vm0, %v9564_v63  ;;  %v12273_v30 = vunpack.c.l.b16 %v5850_v44 }
 0xb40   : > { %v5777_v16 = vpop.f32.mrf.mxu0 }
 0xb41   : > { %v5851_v12 = vpack.c.bf16 %v5777_v16, %v5777_v16 }
 0xb43   : > { %v12275_v26 = vunpack.c.l.b16 %v5851_v12 }
 0xb45   : > { %v6320_v29 = vpack.c.b16 %v12275_v26, %v12273_v30 }
 0xb48   : > { %v5780_v33 = vpop.f32.mrf.mxu0 }
 0xb49   : > { %v5852_v18 = vpack.c.bf16 %v5780_v33, %v5780_v33 }
 0xb4b   : > { %8717 = vmatmul.msk.bf16.gmra.mxu0 %vm652_vm0, %v9565_v21  ;;  %v5975_v39 = vunpack.c.l.b16 %v5852_v18  ;;  %v9600_v21 = vld [vmem:[%s13018_s10 + $0xf8] sm:$0xff]  ;;  %v9597_v18 = vld [vmem:[%s13018_s10 + $0xe0] sm:$0xff] }
 0xb4c   : > { %6169 = vmatpush.bf16.msra.mxu2 %v9600_v21  ;;  %v9577_v21 = vld [vmem:[%s13018_s10 + $0x40] sm:$0xff] }
 0xb50   : > { %v5782_v45 = vpop.f32.mrf.mxu0  ;;  %6170 = vmatpush.bf16.msra.mxu2 %v9599_v8 }
 0xb51   : > { %v5853_v61 = vpack.c.bf16 %v5782_v45, %v5782_v45 }
 0xb53   : > { %v5976_v35 = vunpack.c.l.b16 %v5853_v61 }
 0xb55   : > { %v5979_v20 = vpack.c.b16 %v5976_v35, %v5975_v39 }
 0xb57   : > { %8779 = vmatmul.msk.bf16.vlgmr.msrb.gmra.mxu2 %vm5927_vm4, %v5979_v20 }
 0xb58   : > { %v5785_v24 = vpop.f32.mrf.mxu0 }
 0xb59   : > { %v5854_v47 = vpack.c.bf16 %v5785_v24, %v5785_v24  ;;  %v9572_v24 = vld [vmem:[%s13018_s10 + $0x18] sm:$0xff] }
 0xb5b   : > { %8718 = vmatmul.msk.bf16.gmra.mxu0 %vm652_vm0, %v9566_v10  ;;  %v5977_v42 = vunpack.c.l.b16 %v5854_v47  ;;  %v9604_v10 = vld [vmem:[%s13018_s10 + $0x118] sm:$0xff] }
 0xb60   : > { %v5787_v46 = vpop.f32.mrf.mxu0 }
 0xb61   : > { %v5855_v36 = vpack.c.bf16 %v5787_v46, %v5787_v46  ;;  %v9603_v46 = vld [vmem:[%s13018_s10 + $0x110] sm:$0xff] }
 0xb63   : > { %v5978_v28 = vunpack.c.l.b16 %v5855_v36  ;;  %v9571_v36 = vld [vmem:[%s13018_s10 + $0x10] sm:$0xff] }
 0xb65   : > { %v5980_v32 = vpack.c.b16 %v5978_v28, %v5977_v42  ;;  %v9602_v28 = vld [vmem:[%s13018_s10 + $0x108] sm:$0xff] }
 0xb67   : > { %8780 = vmatmul.msk.bf16.gmra.mxu2 %vm5927_vm4, %v5980_v32 }
 0xb68   : > { %v5790_v40 = vpop.f32.mrf.mxu0 }
 0xb69   : > { %v5856_v1 = vpack.c.bf16 %v5790_v40, %v5790_v40 }
 0xb6b   : > { %8719 = vmatmul.msk.bf16.gmra.mxu0 %vm652_vm0, %v9567_v53  ;;  %v12299_v4 = vunpack.c.l.b16 %v5856_v1  ;;  %v9601_v1 = vld [vmem:[%s13018_s10 + $0x100] sm:$0xff] }
 0xb70   : > { %v5792_v25 = vpop.f32.mrf.mxu0 }
 0xb71   : > { %v5857_v48 = vpack.c.bf16 %v5792_v25, %v5792_v25  ;;  %v9569_v25 = vld [vmem:[%s13018_s10] sm:$0xff] }
 0xb73   : > { %v12301_v58 = vunpack.c.l.b16 %v5857_v48 }
 0xb75   : > { %v6378_v41 = vpack.c.b16 %v12301_v58, %v12299_v4 }
 0xb78   : > { %v5795_v23 = vpop.f32.mrf.mxu0 }
 0xb79   : > { %v5858_v37 = vpack.c.bf16 %v5795_v23, %v5795_v23 }
 0xb7b   : > { %8720 = vmatmul.msk.bf16.gmra.mxu0 %vm652_vm0, %v9568_v59  ;;  %v12315_v11 = vunpack.c.l.b16 %v5858_v37 }
 0xb80   : > { %v5797_v43 = vpop.f32.mrf.mxu0 }
 0xb81   : > { %v5859_v56 = vpack.c.bf16 %v5797_v43, %v5797_v43 }
 0xb83   : > { %v12317_v60 = vunpack.c.l.b16 %v5859_v56 }
 0xb85   : > { %v6379_v34 = vpack.c.b16 %v12317_v60, %v12315_v11 }
 0xb88   : > { %v5800_v51 = vpop.f32.mrf.mxu0 }
 0xb89   : > { %v5860_v44 = vpack.c.bf16 %v5800_v51, %v5800_v51 }
 0xb8b   : > { %8745 = vmatmul.msk.bf16.vlgmr.msra.gmra.mxu0 %vm5927_vm4, %v5901_v27  ;;  %v6052_v12 = vunpack.c.l.b16 %v5860_v44  ;;  %v9598_v27 = vld [vmem:[%s13018_s10 + $0xe8] sm:$0xff] }
 0xb8c   : > { %6171 = vmatpush.bf16.msra.mxu2 %v9598_v27  ;;  %6237 = vmatpush.bf16.msra.mxu0 %v9604_v10  ;;  %v9586_v44 = vld [vmem:[%s13018_s10 + $0x88] sm:$0xff] }
 0xb90   : > { %v5802_v50 = vpop.f32.mrf.mxu0  ;;  %6172 = vmatpush.bf16.msra.mxu2 %v9597_v18  ;;  %6238 = vmatpush.bf16.msra.mxu0 %v9603_v46 }
 0xb91   : > { %v5861_v62 = vpack.c.bf16 %v5802_v50, %v5802_v50  ;;  %v9579_v50 = vld [vmem:[%s13018_s10 + $0x50] sm:$0xff] }
 0xb93   : > { %v6053_v16 = vunpack.c.l.b16 %v5861_v62  ;;  %v9578_v62 = vld [vmem:[%s13018_s10 + $0x48] sm:$0xff] }
 0xb94   : > { %6296 = vmatpush.bf16.msrb.mxu2 %v9572_v24  ;;  %6239 = vmatpush.bf16.msra.mxu0 %v9602_v28 }
 0xb95   : > { %v6056_v6 = vpack.c.b16 %v6053_v16, %v6052_v12 }
 0xb98   : > { %v5805_v63 = vpop.f32.mrf.mxu0  ;;  %6297 = vmatpush.bf16.msrb.mxu2 %v9571_v36  ;;  %6240 = vmatpush.bf16.msra.mxu0 %v9601_v1 }
 0xb9b   : > { %8746 = vmatmul.msk.bf16.gmra.mxu0 %vm5927_vm4, %v5902_v52  ;;  %v5862_v52 = vpack.c.bf16 %v5805_v63, %v5805_v63  ;;  %v9587_v63 = vld [vmem:[%s13018_s10 + $0x90] sm:$0xff] }
 0xb9c   : > { %6298 = vmatpush.bf16.msrb.mxu2 %v9570_v0 }
 0xb9d   : > { %v6054_v61 = vunpack.c.l.b16 %v5862_v52 }
 0xba0   : > { %v5807_v15 = vpop.f32.mrf.mxu0  ;;  %6299 = vmatpush.bf16.msrb.mxu2 %v9569_v25 }
 0xba1   : > { %v5863_v14 = vpack.c.bf16 %v5807_v15, %v5807_v15 }
 0xba3   : > { %v6055_v45 = vunpack.c.l.b16 %v5863_v14 }
 0xba5   : > { %v6057_v35 = vpack.c.b16 %v6055_v45, %v6054_v61 }
 0xba8   : > { %v12338_v33 = vpop.f32.mrf.mxu0 }
 0xba9   : > { %v5864_v7 = vpack.c.bf16 %v12338_v33, %v12338_v33 }
 0xbab   : > { %8813 = vmatmul.msk.bf16.vlgmr.msrb.gmra.mxu0 %vm5927_vm4, %v6056_v6  ;;  %v9585_v6 = vld [vmem:[%s13018_s10 + $0x80] sm:$0xff]  ;;  %v6433_v4 = vunpack.c.l.b16 %v5864_v7 }
 0xbac   : > { %6355 = vmatpush.bf16.msrb.mxu0 %v9580_v3 }
 0xbb0   : > { %v12347_v17 = vpop.f32.mrf.mxu0  ;;  %6356 = vmatpush.bf16.msrb.mxu0 %v9579_v50 }
 0xbb4   : > { %6357 = vmatpush.bf16.msrb.mxu0 %v9578_v62 }
 0xbb8   : > { %v12352_v39 = vpop.f32.mrf.mxu0  ;;  %6358 = vmatpush.bf16.msrb.mxu0 %v9577_v21 }
 0xbbb   : > { %8814 = vmatmul.msk.bf16.gmra.mxu0 %vm5927_vm4, %v6057_v35 }
 0xbc0   : > { %v12355_v20 = vpop.f32.mrf.mxu0 }
 0xbc1   : > { %v5867_v26 = vpack.c.bf16 %v12355_v20, %v12355_v20 }
 0xbc3   : > { %v6436_v60 = vunpack.c.l.b16 %v5867_v26 }
 0xbc8   : > { %v5820_v47 = vpop.f32.mrf.mxu0 }
 0xbc9   : > { %v5868_v42 = vpack.c.bf16 %v5820_v47, %v5820_v47 }
 0xbcb   : > { %v6129_v9 = vunpack.c.l.b16 %v5868_v42 }
 0xbd0   : > { %v5822_v32 = vpop.f32.mrf.mxu0 }
 0xbd1   : > { %v5869_v53 = vpack.c.bf16 %v5822_v32, %v5822_v32 }
 0xbd3   : > { %v6130_v40 = vunpack.c.l.b16 %v5869_v53 }
 0xbd5   : > { %v6133_v48 = vpack.c.b16 %v6130_v40, %v6129_v9 }
 0xbd7   : > { %8847 = vmatmul.msk.bf16.vlgmr.msra.gmra.mxu2 %vm5927_vm4, %v6133_v48 }
 0xbd8   : > { %v5825_v59 = vpop.f32.mrf.mxu0  ;;  %6414 = vmatpush.bf16.msra.mxu2 %v9588_v38 }
 0xbd9   : > { %v5870_v23 = vpack.c.bf16 %v5825_v59, %v5825_v59 }
 0xbdb   : > { %v6131_v49 = vunpack.c.l.b16 %v5870_v23 }
 0xbdc   : > { %6415 = vmatpush.bf16.msra.mxu2 %v9587_v63 }
 0xbe0   : > { %v5827_v5 = vpop.f32.mrf.mxu0  ;;  %6416 = vmatpush.bf16.msra.mxu2 %v9586_v44 }
 0xbe1   : > { %v5871_v37 = vpack.c.bf16 %v5827_v5, %v5827_v5 }
 0xbe3   : > { %v6132_v43 = vunpack.c.l.b16 %v5871_v37 }
 0xbe4   : > { %6417 = vmatpush.bf16.msra.mxu2 %v9585_v6 }
 0xbe5   : > { %v6134_v56 = vpack.c.b16 %v6132_v43, %v6131_v49 }
 0xbe7   : > { %8848 = vmatmul.msk.bf16.gmra.mxu2 %vm5927_vm4, %v6134_v56 }
 0xbe8   : > { %v5830_v51 = vpop.f32.mrf.mxu0 }
 0xbe9   : > { %v5872_v15 = vpack.c.bf16 %v5830_v51, %v5830_v51 }
 0xbeb   : > { %v6197_v8 = vunpack.c.l.b16 %v5872_v15 }
 0xbf0   : > { %v5832_v16 = vpop.f32.mrf.mxu0 }
 0xbf1   : > { %v5873_v12 = vpack.c.bf16 %v5832_v16, %v5832_v16 }
 0xbf3   : > { %v6198_v27 = vunpack.c.l.b16 %v5873_v12 }
 0xbf5   : > { %v6201_v14 = vpack.c.b16 %v6198_v27, %v6197_v8 }
 0xbf7   : > { %8873 = vmatmul.msk.bf16.vlgmr.msra.gmra.mxu0 %vm5927_vm4, %v6201_v14  ;;  %8891 = vmatmul.msk.bf16.vlgmr.msrb.gmra.mxu2 %vm5927_vm4, %v6260_v13  ;;  %v9594_v13 = vld [vmem:[%s13018_s10 + $0xc8] sm:$0xff] }
 0xbf8   : > { %v5835_v52 = vpop.f32.mrf.mxu0  ;;  %6473 = vmatpush.bf16.msra.mxu0 %v9596_v54 }
 0xbf9   : > { %v5874_v18 = vpack.c.bf16 %v5835_v52, %v5835_v52 }
 0xbfb   : > { %v6199_v35 = vunpack.c.l.b16 %v5874_v18 }
 0xbfc   : > { %6474 = vmatpush.bf16.msra.mxu0 %v9595_v31 }
 0xc00   : > { %v5837_v45 = vpop.f32.mrf.mxu0  ;;  %6475 = vmatpush.bf16.msra.mxu0 %v9594_v13 }
 0xc01   : > { %v5875_v61 = vpack.c.bf16 %v5837_v45, %v5837_v45 }
 0xc03   : > { %v6200_v10 = vunpack.c.l.b16 %v5875_v61 }
 0xc04   : > { %6476 = vmatpush.bf16.msra.mxu0 %v9593_v22 }
 0xc05   : > { %v6202_v24 = vpack.c.b16 %v6200_v10, %v6199_v35 }
 0xc07   : > { %8874 = vmatmul.msk.bf16.gmra.mxu0 %vm5927_vm4, %v6202_v24  ;;  %8892 = vmatmul.msk.bf16.gmra.mxu2 %vm5927_vm4, %v6261_v57  ;;  %v5865_v57 = vpack.c.bf16 %v12347_v17, %v12347_v17 }
 0xc08   : > { %v5943_v19 = vpop.f32.mrf.mxu0 }
 0xc10   : > { %v5945_v2 = vpop.f32.mrf.mxu0 }
 0xc17   : > { %8909 = vmatmul.msk.bf16.vlgmr.msrb.gmra.mxu0 %vm5927_vm4, %v6319_v55  ;;  %8927 = vmatmul.msk.bf16.vlgmr.msra.gmra.mxu2 %vm5927_vm4, %v6378_v41  ;;  %v6434_v55 = vunpack.c.l.b16 %v5865_v57  ;;  %v6020_v41 = vpop.f32.mrf.mxu2 }
 0xc18   : > { %v5948_v30 = vpop.f32.mrf.mxu0 }
 0xc19   : > { %v6437_v58 = vpack.c.b16 %v6434_v55, %v6433_v4 }
 0xc1f   : > { %v6022_v11 = vpop.f32.mrf.mxu2 }
 0xc20   : > { %v5950_v17 = vpop.f32.mrf.mxu0 }
 0xc27   : > { %8910 = vmatmul.msk.bf16.gmra.mxu0 %vm5927_vm4, %v6320_v29  ;;  %8928 = vmatmul.msk.bf16.gmra.mxu2 %vm5927_vm4, %v6379_v34  ;;  %v5866_v29 = vpack.c.bf16 %v12352_v39, %v12352_v39  ;;  %v6025_v33 = vpop.f32.mrf.mxu2 }
 0xc28   : > { %v6097_v46 = vpop.f32.mrf.mxu0 }
 0xc29   : > { %v6435_v34 = vunpack.c.l.b16 %v5866_v29 }
 0xc2b   : > { %v6438_v47 = vpack.c.b16 %v6436_v60, %v6435_v34 }
 0xc2f   : > { %v6027_v36 = vpop.f32.mrf.mxu2 }
 0xc30   : > { %v6099_v42 = vpop.f32.mrf.mxu0 }
 0xc37   : > { %8945 = vmatmul.msk.bf16.vlgmr.msra.gmra.mxu0 %vm5927_vm4, %v6437_v58 }
 0xc38   : > { %v6102_v0 = vpop.f32.mrf.mxu0 }
 0xc40   : > { %v6104_v53 = vpop.f32.mrf.mxu0 }
 0xc47   : > { %8946 = vmatmul.msk.bf16.gmra.mxu0 %vm5927_vm4, %v6438_v47 }
 0xc5a   : > { %v6174_v28 = vpop.f32.mrf.mxu2 }
 0xc62   : > { %v6176_v32 = vpop.f32.mrf.mxu2 }
 0xc6a   : > { %v6179_v9 = vpop.f32.mrf.mxu2 }
 0xc72   : > { %v6181_v40 = vpop.f32.mrf.mxu2 }
 0xc74   : > { %v6242_v20 = vpop.f32.mrf.mxu0 }
 0xc7a   : > { %v6301_v39 = vpop.f32.mrf.mxu2 }
 0xc7b   : > { %v6302_v45 = vadd.f32 %v6301_v39, %v5943_v19  ;;  %v9754_v19 = vld [vmem:[%s13019_s11] ss:$0 sm:$0xff] }
 0xc7c   : > { %v6244_v1 = vpop.f32.mrf.mxu0  ;;  %v9605_v39 = vld [vmem:[%s13020_s12] sm:$0xff] }
 0xc82   : > { %v6303_v59 = vpop.f32.mrf.mxu2 }
 0xc83   : > { %v6304_v12 = vadd.f32 %v6303_v59, %v5945_v2  ;;  %v9608_v59 = vld [vmem:[%s13020_s12 + $0x18] sm:$0xff] }
 0xc84   : > { %v6247_v25 = vpop.f32.mrf.mxu0 }
 0xc8a   : > { %v6306_v5 = vpop.f32.mrf.mxu2 }
 0xc8b   : > { %v6307_v61 = vadd.f32 %v6306_v5, %v5948_v30  ;;  %v9610_v5 = vld [vmem:[%s13020_s12 + $0x28] sm:$0xff] }
 0xc8c   : > { %v6249_v48 = vpop.f32.mrf.mxu0 }
 0xc92   : > { %v6308_v49 = vpop.f32.mrf.mxu2 }
 0xc93   : > { %v6309_v4 = vadd.f32 %v6308_v49, %v5950_v17  ;;  %v9628_v49 = vld [vmem:[%s13021_s13 + $0x74] sm:$0xf0] }
 0xc94   : > { %v6360_v23 = vpop.f32.mrf.mxu0 }
 0xc95   : > { %v6361_v21 = vadd.f32 %v6360_v23, %v6020_v41  ;;  %v9609_v23 = vld [vmem:[%s13020_s12 + $0x20] sm:$0xff] }
 0xc97   : > { %v6488_v54 = vadd.f32 %v6361_v21, %v6302_v45  ;;  %v9623_v21 = vld [vmem:[%s13021_s13 + $0x54] sm:$0xf]  ;;  %v9621_v45 = vld [vmem:[%s13021_s13 + $0x44] sm:$0xf] }
 0xc9a   : > { %v6419_v56 = vpop.f32.mrf.mxu2 }
 0xc9b   : > { %v6420_v6 = vadd.f32 %v6419_v56, %v6097_v46 }
 0xc9c   : > { %v6362_v37 = vpop.f32.mrf.mxu0 }
 0xc9d   : > { %v6363_v62 = vadd.f32 %v6362_v37, %v6022_v11  ;;  %v9221_v37 = vld [vmem:[%s13021_s13 + $0x70] sm:$0xf] }
 0xc9e   : > { %v9222_v56 = vor.u32 %v9628_v49, %v9221_v37 }
 0xc9f   : > { %v6489_v35 = vadd.f32 %v6363_v62, %v6304_v12  ;;  %v9215_v62 = vld [vmem:[%s13021_s13 + $0x68] sm:$0xf0]  ;;  %v9624_v12 = vld [vmem:[%s13021_s13 + $0x54] sm:$0xf0] }
 0xca2   : > { %v6421_v51 = vpop.f32.mrf.mxu2 }
 0xca3   : > { %v6422_v44 = vadd.f32 %v6421_v51, %v6099_v42  ;;  %v9213_v51 = vld [vmem:[%s13021_s13 + $0x60] sm:$0xf] }
 0xca4   : > { %v6365_v43 = vpop.f32.mrf.mxu0 }
 0xca5   : > { %v6366_v27 = vadd.f32 %v6365_v43, %v6025_v33  ;;  %v9627_v43 = vld [vmem:[%s13021_s13 + $0x74] sm:$0xf] }
 0xca7   : > { %v6490_v31 = vadd.f32 %v6366_v27, %v6307_v61 }
 0xcaa   : > { %v6424_v63 = vpop.f32.mrf.mxu2 }
 0xcab   : > { %v6425_v14 = vadd.f32 %v6424_v63, %v6102_v0  ;;  %v9625_v63 = vld [vmem:[%s13021_s13 + $0x64] sm:$0xf] }
 0xcac   : > { %v6367_v3 = vpop.f32.mrf.mxu0 }
 0xcad   : > { %v6368_v57 = vadd.f32 %v6367_v3, %v6027_v36  ;;  %v9223_v3 = vld [vmem:[%s13021_s13 + $0x78] sm:$0xf0] }
 0xcaf   : > { %v6491_v29 = vadd.f32 %v6368_v57, %v6309_v4 }
 0xcb2   : > { %v6426_v22 = vpop.f32.mrf.mxu2 }
 0xcb3   : > { %v6427_v58 = vadd.f32 %v6426_v22, %v6104_v53  ;;  %v9191_v22 = vld [vmem:[%s13021_s13 + $0x38] sm:$0xf0] }
 0xcb4   : > { %v6478_v38 = vpop.f32.mrf.mxu0 }
 0xcb5   : > { %v6479_v16 = vadd.f32 %v6478_v38, %v6174_v28  ;;  %v9226_v38 = vor.u32 %v9627_v43, %v9223_v3  ;;  %v9021_v43 = vld [vmem:[%s13021_s13 + $0xa0] sm:$0xf] }
 0xcb7   : > { %v6492_v10 = vadd.f32 %v6479_v16, %v6420_v6  ;;  %7108 = vmatpush.bf16.msra.mxu3 %v9226_v38  ;;  %v9205_v16 = vld [vmem:[%s13021_s13 + $0x50] sm:$0xf] }
 0xcb8   : > { %v9206_v6 = vor.u32 %v9624_v12, %v9205_v16  ;;  %v9013_v38 = vld [vmem:[%s13021_s13 + $0x90] sm:$0xf]  ;;  %v9630_v16 = vld [vmem:[%s13021_s13 + $0x84] sm:$0xf0] }
 0xcb9   : > { %v6496_v7 = vadd.f32 %v6492_v10, %v6488_v54  ;;  %v9620_v54 = vld [vmem:[%s13021_s13 + $0x34] sm:$0xf0] }
 0xcbb   : > { %v6500_v11 = vadd.f32 %v6496_v7, %v6242_v20  ;;  %v9181_v7 = vld [vmem:[%s13021_s13 + $0x20] sm:$0xf] }
 0xcbc   : > { %v6480_v50 = vpop.f32.mrf.mxu0 }
 0xcbd   : > { %v6481_v15 = vadd.f32 %v6480_v50, %v6176_v32  ;;  %v6508_v33 = vadd.f32 %v9754_v19, %v6500_v11  ;;  %v9626_v50 = vld [vmem:[%s13021_s13 + $0x64] sm:$0xf0]  ;;  %v9615_v11 = vld [vmem:[%s13021_s13 + $0x14] sm:$0xf] }
 0xcbf   : > { %v6493_v52 = vadd.f32 %v6481_v15, %v6422_v44  ;;  %v6512_v0 = vmax.f32 %v6508_v33, 0.0  ;;  %v9214_v15 = vor.u32 %v9626_v50, %v9213_v51  ;;  %v9218_v44 = vor.u32 %v9625_v63, %v9215_v62  ;;  %v9614_v33 = vld [vmem:[%s13021_s13 + $0x4] sm:$0xf0]  ;;  %v9632_v51 = vld [vmem:[%s13021_s13 + $0x94] sm:$0xf0] }
 0xcc0   : > { %v9014_v63 = vor.u32 %v9632_v51, %v9013_v38  ;;  %v9629_v51 = vld [vmem:[%s13021_s13 + $0x84] sm:$0xf] }
 0xcc1   : > { %v6497_v13 = vadd.f32 %v6493_v52, %v6489_v35  ;;  %7109 = vmatpush.bf16.msra.mxu3 %v9218_v44  ;;  %v9197_v52 = vld [vmem:[%s13021_s13 + $0x40] sm:$0xf]  ;;  %v9199_v35 = vld [vmem:[%s13021_s13 + $0x48] sm:$0xf0] }
 0xcc2   : > { %v9202_v10 = vor.u32 %v9621_v45, %v9199_v35  ;;  %v9005_v44 = vld [vmem:[%s13021_s13 + $0x80] sm:$0xf]  ;;  %v9287_v45 = vld [vmem:[%s13021_s13 + $0x178] sm:$0xf0] }
 0xcc3   : > { %v6501_v41 = vadd.f32 %v6497_v13, %v6244_v1 }
 0xcc4   : > { %v6483_v8 = vpop.f32.mrf.mxu0 }
 0xcc5   : > { %v6484_v18 = vadd.f32 %v6483_v8, %v6179_v9  ;;  %v6509_v34 = vadd.f32 %v9754_v19, %v6501_v41  ;;  %v9207_v8 = vld [vmem:[%s13021_s13 + $0x58] sm:$0xf0] }
 0xcc6   : > { %v9210_v27 = vor.u32 %v9623_v21, %v9207_v8 }
 0xcc7   : > { %v6494_v24 = vadd.f32 %v6484_v18, %v6425_v14  ;;  %v6513_v28 = vmax.f32 %v6509_v34, 0.0  ;;  %v9611_v14 = vld [vmem:[%s13020_s12 + $0x30] sm:$0xff]  ;;  %v9622_v18 = vld [vmem:[%s13021_s13 + $0x44] sm:$0xf0]  ;;  %v9612_v34 = vld [vmem:[%s13020_s12 + $0x38] sm:$0xff] }
 0xcc8   : > { %7110 = vmatpush.bf16.msra.mxu3 %v9210_v27  ;;  %v9198_v61 = vor.u32 %v9622_v18, %v9197_v52  ;;  %v9643_v27 = vld [vmem:[%s13021_s13 + $0xf4] sm:$0xf] }
 0xcc9   : > { %v6498_v55 = vadd.f32 %v6494_v24, %v6490_v31  ;;  %v6516_v53 = vmax.f32 %v6512_v0, %v6513_v28  ;;  %v9189_v24 = vld [vmem:[%s13021_s13 + $0x30] sm:$0xf]  ;;  %v9619_v31 = vld [vmem:[%s13021_s13 + $0x34] sm:$0xf] }
 0xcca   : > { %v9190_v13 = vor.u32 %v9620_v54, %v9189_v24  ;;  %v9194_v57 = vor.u32 %v9619_v31, %v9191_v22  ;;  %v9061_v0 = vld [vmem:[%s13021_s13 + $0xf0] sm:$0xf]  ;;  %v9659_v52 = vld [vmem:[%s13021_s13 + $0x174] sm:$0xf]  ;;  %v9055_v24 = vld [vmem:[%s13021_s13 + $0xe8] sm:$0xf0] }
 0xccb   : > { %v6502_v30 = vadd.f32 %v6498_v55, %v6247_v25  ;;  %v9606_v25 = vld [vmem:[%s13020_s12 + $0x8] sm:$0xff]  ;;  %v9290_v35 = vor.u32 %v9659_v52, %v9287_v45  ;;  %v9657_v54 = vld [vmem:[%s13021_s13 + $0x164] sm:$0xf]  ;;  %v9149_v52 = vld [vmem:[%s13021_s13 + $0x1e0] sm:$0xf] }
 0xccc   : > { %v6485_v2 = vpop.f32.mrf.mxu0  ;;  %7111 = vmatpush.bf16.msra.mxu3 %v9202_v10  ;;  %v9618_v55 = vld [vmem:[%s13021_s13 + $0x24] sm:$0xf0]  ;;  %v9641_v10 = vld [vmem:[%s13021_s13 + $0xe4] sm:$0xf] }
 0xccd   : > { %v6486_v26 = vadd.f32 %v6485_v2, %v6181_v40  ;;  %v6510_v46 = vadd.f32 %v9754_v19, %v6502_v30  ;;  %v9617_v2 = vld [vmem:[%s13021_s13 + $0x24] sm:$0xf]  ;;  %v9182_v4 = vor.u32 %v9618_v55, %v9181_v7  ;;  %v9175_v30 = vld [vmem:[%s13021_s13 + $0x18] sm:$0xf0]  ;;  %v9058_v31 = vor.u32 %v9641_v10, %v9055_v24  ;;  %v9655_v55 = vld [vmem:[%s13021_s13 + $0x154] sm:$0xf] }
 0xcce   : > { %v9047_v7 = vld [vmem:[%s13021_s13 + $0xd8] sm:$0xf0] }
 0xccf   : > { %v6495_v60 = vadd.f32 %v6486_v26, %v6427_v58  ;;  %v6514_v17 = vmax.f32 %v6510_v46, 0.0  ;;  %v9183_v58 = vld [vmem:[%s13021_s13 + $0x28] sm:$0xf0]  ;;  %v9173_v26 = vld [vmem:[%s13021_s13 + $0x10] sm:$0xf] }
 0xcd0   : > { %7112 = vmatpush.bf16.msra.mxu3 %v9194_v57  ;;  %v9186_v41 = vor.u32 %v9617_v2, %v9183_v58  ;;  %v9613_v46 = vld [vmem:[%s13021_s13 + $0x4] sm:$0xf]  ;;  %v9639_v57 = vld [vmem:[%s13021_s13 + $0xd4] sm:$0xf]  ;;  %v9271_v58 = vld [vmem:[%s13021_s13 + $0x158] sm:$0xf0] }
 0xcd1   : > { %v6499_v47 = vadd.f32 %v6495_v60, %v6491_v29  ;;  %v9616_v29 = vld [vmem:[%s13021_s13 + $0x14] sm:$0xf0]  ;;  %v9178_v60 = vor.u32 %v9615_v11, %v9175_v30  ;;  %v9637_v11 = vld [vmem:[%s13021_s13 + $0xc4] sm:$0xf] }
 0xcd2   : > { %v9653_v30 = vld [vmem:[%s13021_s13 + $0x144] sm:$0xf] }
 0xcd3   : > { %v6503_v36 = vadd.f32 %v6499_v47, %v6249_v48  ;;  %v9607_v48 = vld [vmem:[%s13020_s12 + $0x10] sm:$0xff]  ;;  %v9165_v47 = vld [vmem:[%s13021_s13] sm:$0xf] }
 0xcd4   : > { %7113 = vmatpush.bf16.msra.mxu3 %v9186_v41 }
 0xcd5   : > { %v6511_v42 = vadd.f32 %v9754_v19, %v6503_v36  ;;  %v9174_v19 = vor.u32 %v9616_v29, %v9173_v26  ;;  %v9166_v36 = vor.u32 %v9614_v33, %v9165_v47  ;;  %v9274_v26 = vor.u32 %v9655_v55, %v9271_v58  ;;  %v9263_v33 = vld [vmem:[%s13021_s13 + $0x148] sm:$0xf0]  ;;  %v9668_v58 = vld [vmem:[%s13021_s13 + $0x1b4] sm:$0xf0] }
 0xcd7   : > { %v6515_v32 = vmax.f32 %v6511_v42, 0.0  ;;  %v9167_v42 = vld [vmem:[%s13021_s13 + $0x8] sm:$0xf0] }
 0xcd8   : > { %7114 = vmatpush.bf16.msra.mxu3 %v9178_v60  ;;  %v9170_v28 = vor.u32 %v9613_v46, %v9167_v42  ;;  %v9266_v46 = vor.u32 %v9653_v30, %v9263_v33  ;;  %v9635_v42 = vld [vmem:[%s13021_s13 + $0xb4] sm:$0xf]  ;;  %v9109_v30 = vld [vmem:[%s13021_s13 + $0x190] sm:$0xf] }
 0xcd9   : > { %v6517_v9 = vmax.f32 %v6514_v17, %v6515_v32  ;;  %v9644_v17 = vld [vmem:[%s13021_s13 + $0xf4] sm:$0xf0] }
 0xcda   : > { %v9062_v32 = vor.u32 %v9644_v17, %v9061_v0  ;;  %v9651_v0 = vld [vmem:[%s13021_s13 + $0x134] sm:$0xf] }
 0xcdb   : > { %v6518_v40 = vmax.f32 %v6516_v53, %v6517_v9  ;;  %v9053_v53 = vld [vmem:[%s13021_s13 + $0xe0] sm:$0xf]  ;;  %v9642_v9 = vld [vmem:[%s13021_s13 + $0xe4] sm:$0xf0] }
 0xcdc   : > { %7115 = vmatpush.bf16.msra.mxu3 %v9170_v28  ;;  %6795 = vmatpush.bf16.msrb.mxu0 %v9062_v32  ;;  %v9031_v28 = vld [vmem:[%s13021_s13 + $0xb8] sm:$0xf0] }
 0xcdd   : > { %v6519_v20 = vpack.c.bf16 %v6518_v40, %v6518_v40  ;;  %v9054_v40 = vor.u32 %v9642_v9, %v9053_v53  ;;  %v9034_v17 = vor.u32 %v9635_v42, %v9031_v28  ;;  %v9255_v32 = vld [vmem:[%s13021_s13 + $0x138] sm:$0xf0]  ;;  %v9662_v42 = vld [vmem:[%s13021_s13 + $0x184] sm:$0xf0] }
 0xcde   : > { %v9258_v9 = vor.u32 %v9651_v0, %v9255_v32 }
 0xcdf   : > { %v6603_v1 = vsel %vm6601_vm5, %v6519_v20, 0  ;;  %v9045_v20 = vld [vmem:[%s13021_s13 + $0xd0] sm:$0xf] }
 0xce0   : > { %6612 = vmatpush.bf16.msrb.mxu2 %v6603_v1  ;;  %6796 = vmatpush.bf16.msrb.mxu0 %v9054_v40  ;;  %v9640_v1 = vld [vmem:[%s13021_s13 + $0xd4] sm:$0xf0]  ;;  %v9633_v40 = vld [vmem:[%s13021_s13 + $0xa4] sm:$0xf] }
 0xce3   : > { %8979 = vmatmul.msk.bf16.vlgmr.msrb.gmra.mxu2 %vm6576_vm6, %v9605_v39  ;;  %v9046_v39 = vor.u32 %v9640_v1, %v9045_v20  ;;  %v9023_v20 = vld [vmem:[%s13021_s13 + $0xa8] sm:$0xf0]  ;;  %v9649_v1 = vld [vmem:[%s13021_s13 + $0x124] sm:$0xf] }
 0xce4   : > { %7089 = vmatpush.bf16.msra.mxu2 %v9222_v56  ;;  %v9634_v56 = vld [vmem:[%s13021_s13 + $0xa4] sm:$0xf0] }
 0xce5   : > { %6797 = vmatpush.bf16.msrb.mxu0 %v9046_v39  ;;  %v9022_v3 = vor.u32 %v9634_v56, %v9021_v43  ;;  %v9026_v39 = vor.u32 %v9633_v40, %v9023_v20  ;;  %v9239_v43 = vld [vmem:[%s13021_s13 + $0x118] sm:$0xf0] }
 0xce8   : > { %7090 = vmatpush.bf16.msra.mxu2 %v9214_v15 }
 0xcec   : > { %7091 = vmatpush.bf16.msra.mxu2 %v9206_v6  ;;  %v9006_v6 = vor.u32 %v9630_v16, %v9005_v44  ;;  %v9231_v16 = vld [vmem:[%s13021_s13 + $0x108] sm:$0xf0] }
 0xcf0   : > { %7092 = vmatpush.bf16.msra.mxu2 %v9198_v61 }
 0xcf3   : > { %8980 = vmatmul.msk.bf16.gmra.mxu2 %vm6576_vm6, %v9606_v25  ;;  %v9037_v25 = vld [vmem:[%s13021_s13 + $0xc0] sm:$0xf] }
 0xcf4   : > { %7093 = vmatpush.bf16.msra.mxu2 %v9190_v13  ;;  %v9279_v13 = vld [vmem:[%s13021_s13 + $0x168] sm:$0xf0] }
 0xcf5   : > { %v9282_v22 = vor.u32 %v9657_v54, %v9279_v13  ;;  %v9133_v13 = vld [vmem:[%s13021_s13 + $0x1c0] sm:$0xf] }
 0xcf8   : > { %7094 = vmatpush.bf16.msra.mxu2 %v9182_v4  ;;  %v9050_v4 = vor.u32 %v9639_v57, %v9047_v7 }
 0xcfc   : > { %7095 = vmatpush.bf16.msra.mxu2 %v9174_v19  ;;  %v9039_v19 = vld [vmem:[%s13021_s13 + $0xc8] sm:$0xf0] }
 0xcfd   : > { %v9042_v47 = vor.u32 %v9637_v11, %v9039_v19  ;;  %v9666_v11 = vld [vmem:[%s13021_s13 + $0x1a4] sm:$0xf0] }
 0xd00   : > { %7096 = vmatpush.bf16.msra.mxu2 %v9166_v36 }
 0xd03   : > { %8981 = vmatmul.msk.bf16.gmra.mxu2 %vm6576_vm6, %v9607_v48  ;;  %v9638_v48 = vld [vmem:[%s13021_s13 + $0xc4] sm:$0xf0] }
 0xd04   : > { %7238 = vmatpush.bf16.msrb.mxu2 %v9290_v35  ;;  %v9672_v35 = vld [vmem:[%s13021_s13 + $0x1d4] sm:$0xf0] }
 0xd08   : > { %7239 = vmatpush.bf16.msrb.mxu2 %v9282_v22  ;;  %v9670_v22 = vld [vmem:[%s13021_s13 + $0x1c4] sm:$0xf0] }
 0xd09   : > { %v9134_v55 = vor.u32 %v9670_v22, %v9133_v13  ;;  %v9660_v13 = vld [vmem:[%s13021_s13 + $0x174] sm:$0xf0] }
 0xd0c   : > { %7240 = vmatpush.bf16.msrb.mxu2 %v9274_v26 }
 0xd10   : > { %7241 = vmatpush.bf16.msrb.mxu2 %v9266_v46 }
 0xd13   : > { %8982 = vmatmul.msk.bf16.gmra.mxu2 %vm6576_vm6, %v9608_v59  ;;  %v9038_v59 = vor.u32 %v9638_v48, %v9037_v25  ;;  %v9247_v25 = vld [vmem:[%s13021_s13 + $0x128] sm:$0xf0] }
 0xd14   : > { %7242 = vmatpush.bf16.msrb.mxu2 %v9258_v9  ;;  %v9250_v48 = vor.u32 %v9649_v1, %v9247_v25  ;;  %v9159_v9 = vld [vmem:[%s13021_s13 + $0x1f8] sm:$0xf0]  ;;  %v9673_v1 = vld [vmem:[%s13021_s13 + $0x1e4] sm:$0xf] }
 0xd15   : > { %6798 = vmatpush.bf16.msrb.mxu0 %v9038_v59  ;;  %v9631_v59 = vld [vmem:[%s13021_s13 + $0x94] sm:$0xf] }
 0xd18   : > { %7243 = vmatpush.bf16.msrb.mxu2 %v9250_v48  ;;  %v9671_v48 = vld [vmem:[%s13021_s13 + $0x1d4] sm:$0xf] }
 0xd23   : > { %8983 = vmatmul.msk.bf16.gmra.mxu2 %vm6576_vm6, %v9609_v23  ;;  %v9029_v23 = vld [vmem:[%s13021_s13 + $0xb0] sm:$0xf] }
 0xd33   : > { %8984 = vmatmul.msk.bf16.gmra.mxu2 %vm6576_vm6, %v9610_v5  ;;  %v9636_v5 = vld [vmem:[%s13021_s13 + $0xb4] sm:$0xf0] }
 0xd34   : > { %v9030_v37 = vor.u32 %v9636_v5, %v9029_v23  ;;  %v9015_v23 = vld [vmem:[%s13021_s13 + $0x98] sm:$0xf0]  ;;  %v9647_v5 = vld [vmem:[%s13021_s13 + $0x114] sm:$0xf] }
 0xd36   : > { %6799 = vmatpush.bf16.msrb.mxu0 %v9030_v37 }
 0xd3a   : > { %6800 = vmatpush.bf16.msrb.mxu0 %v9022_v3  ;;  %v9242_v3 = vor.u32 %v9647_v5, %v9239_v43  ;;  %v9669_v43 = vld [vmem:[%s13021_s13 + $0x1c4] sm:$0xf] }
 0xd3c   : > { %7244 = vmatpush.bf16.msrb.mxu2 %v9242_v3 }
 0xd3e   : > { %6801 = vmatpush.bf16.msrb.mxu0 %v9014_v63  ;;  %v9645_v63 = vld [vmem:[%s13021_s13 + $0x104] sm:$0xf] }
 0xd42   : > { %6802 = vmatpush.bf16.msrb.mxu0 %v9006_v6  ;;  %v9157_v6 = vld [vmem:[%s13021_s13 + $0x1f0] sm:$0xf] }
 0xd43   : > { %8985 = vmatmul.msk.bf16.gmra.mxu2 %vm6576_vm6, %v9611_v14  ;;  %v9063_v14 = vld [vmem:[%s13021_s13 + $0xf8] sm:$0xf0] }
 0xd44   : > { %v9066_v18 = vor.u32 %v9643_v27, %v9063_v14 }
 0xd46   : > { %6814 = vmatpush.bf16.msra.mxu0 %v9066_v18  ;;  %v9674_v18 = vld [vmem:[%s13021_s13 + $0x1e4] sm:$0xf0] }
 0xd47   : > { %v9150_v45 = vor.u32 %v9674_v18, %v9149_v52  ;;  %v9103_v52 = vld [vmem:[%s13021_s13 + $0x188] sm:$0xf0] }
 0xd4a   : > { %6815 = vmatpush.bf16.msra.mxu0 %v9058_v31 }
 0xd4e   : > { %6816 = vmatpush.bf16.msra.mxu0 %v9050_v4  ;;  %v9125_v4 = vld [vmem:[%s13021_s13 + $0x1b0] sm:$0xf] }
 0xd52   : > { %6817 = vmatpush.bf16.msra.mxu0 %v9042_v47 }
 0xd53   : > { %8986 = vmatmul.msk.bf16.gmra.mxu2 %vm6576_vm6, %v9612_v34 }
 0xd56   : > { %6818 = vmatpush.bf16.msra.mxu0 %v9034_v17 }
 0xd5a   : > { %6819 = vmatpush.bf16.msra.mxu0 %v9026_v39  ;;  %v9151_v39 = vld [vmem:[%s13021_s13 + $0x1e8] sm:$0xf0] }
 0xd5b   : > { %v9154_v25 = vor.u32 %v9673_v1, %v9151_v39  ;;  %v9646_v1 = vld [vmem:[%s13021_s13 + $0x104] sm:$0xf0] }
 0xd66   : > { %v6614_v49 = vpop.f32.mrf.mxu2 }
 0xd67   : > { %v6654_v50 = vpack.c.bf16 %v6614_v49, %v6614_v49  ;;  %v9018_v49 = vor.u32 %v9631_v59, %v9015_v23  ;;  %v9143_v59 = vld [vmem:[%s13021_s13 + $0x1d8] sm:$0xf0] }
 0xd68   : > { %v9146_v5 = vor.u32 %v9671_v48, %v9143_v59 }
 0xd69   : > { %v7001_v12 = vunpack.c.l.b16 %v6654_v50  ;;  %6820 = vmatpush.bf16.msra.mxu0 %v9018_v49  ;;  %v9007_v50 = vld [vmem:[%s13021_s13 + $0x88] sm:$0xf0] }
 0xd6a   : > { %v9010_v44 = vor.u32 %v9629_v51, %v9007_v50 }
 0xd6d   : > { %6821 = vmatpush.bf16.msra.mxu0 %v9010_v44  ;;  %v9665_v44 = vld [vmem:[%s13021_s13 + $0x1a4] sm:$0xf] }
 0xd6e   : > { %v6616_v15 = vpop.f32.mrf.mxu2 }
 0xd6f   : > { %v6655_v62 = vpack.c.bf16 %v6616_v15, %v6616_v15 }
 0xd71   : > { %v7002_v21 = vunpack.c.l.b16 %v6655_v62 }
 0xd73   : > { %v7005_v8 = vpack.c.b16 %v7002_v21, %v7001_v12  ;;  %v9234_v12 = vor.u32 %v9645_v63, %v9231_v16  ;;  %v9667_v63 = vld [vmem:[%s13021_s13 + $0x1b4] sm:$0xf]  ;;  %v9119_v16 = vld [vmem:[%s13021_s13 + $0x1a8] sm:$0xf0] }
 0xd75   : > { %7097 = vmatmul.bf16.vlgmr.msra.gmra.mxu2 %v7005_v8  ;;  %7116 = vmatmul.bf16.vlgmr.msra.gmra.mxu3 %v7005_v8  ;;  %v9676_v8 = vld [vmem:[%s13021_s13 + $0x1f4] sm:$0xf0] }
 0xd76   : > { %v6619_v61 = vpop.f32.mrf.mxu2  ;;  %7245 = vmatpush.bf16.msrb.mxu2 %v9234_v12  ;;  %v9158_v27 = vor.u32 %v9676_v8, %v9157_v6  ;;  %v9663_v6 = vld [vmem:[%s13021_s13 + $0x194] sm:$0xf]  ;;  %v9111_v8 = vld [vmem:[%s13021_s13 + $0x198] sm:$0xf0] }
 0xd77   : > { %v6656_v2 = vpack.c.bf16 %v6619_v61, %v6619_v61  ;;  %v9141_v61 = vld [vmem:[%s13021_s13 + $0x1d0] sm:$0xf] }
 0xd78   : > { %v9142_v24 = vor.u32 %v9672_v35, %v9141_v61 }
 0xd79   : > { %v7003_v60 = vunpack.c.l.b16 %v6656_v2 }
 0xd7e   : > { %v6621_v41 = vpop.f32.mrf.mxu2 }
 0xd7f   : > { %v6657_v29 = vpack.c.bf16 %v6621_v41, %v6621_v41  ;;  %v9126_v41 = vor.u32 %v9668_v58, %v9125_v4  ;;  %v9269_v4 = vld [vmem:[%s13021_s13 + $0x150] sm:$0xf]  ;;  %v9656_v58 = vld [vmem:[%s13021_s13 + $0x154] sm:$0xf0] }
 0xd81   : > { %v7004_v34 = vunpack.c.l.b16 %v6657_v29  ;;  %v9117_v29 = vld [vmem:[%s13021_s13 + $0x1a0] sm:$0xf] }
 0xd82   : > { %v9118_v19 = vor.u32 %v9666_v11, %v9117_v29  ;;  %v9654_v29 = vld [vmem:[%s13021_s13 + $0x144] sm:$0xf0] }
 0xd83   : > { %v7006_v36 = vpack.c.b16 %v7004_v34, %v7003_v60  ;;  %v9664_v60 = vld [vmem:[%s13021_s13 + $0x194] sm:$0xf0] }
 0xd84   : > { %v9110_v47 = vor.u32 %v9664_v60, %v9109_v30 }
 0xd85   : > { %7102 = vmatmul.bf16.gmra.mxu2 %v7006_v36  ;;  %7121 = vmatmul.bf16.gmra.mxu3 %v7006_v36  ;;  %v9101_v36 = vld [vmem:[%s13021_s13 + $0x180] sm:$0xf] }
 0xd86   : > { %v6624_v53 = vpop.f32.mrf.mxu2  ;;  %v9102_v17 = vor.u32 %v9662_v42, %v9101_v36  ;;  %v9652_v36 = vld [vmem:[%s13021_s13 + $0x134] sm:$0xf0] }
 0xd87   : > { %v6658_v37 = vpack.c.bf16 %v6624_v53, %v6624_v53  ;;  %v9675_v53 = vld [vmem:[%s13021_s13 + $0x1f4] sm:$0xf] }
 0xd88   : > { %v9162_v40 = vor.u32 %v9675_v53, %v9159_v9  ;;  %v9237_v53 = vld [vmem:[%s13021_s13 + $0x110] sm:$0xf]  ;;  %v9648_v9 = vld [vmem:[%s13021_s13 + $0x114] sm:$0xf0] }
 0xd89   : > { %v6707_v15 = vunpack.c.l.b16 %v6658_v37 }
 0xd8e   : > { %v6626_v56 = vpop.f32.mrf.mxu2 }
 0xd8f   : > { %v6659_v38 = vpack.c.bf16 %v6626_v56, %v6626_v56  ;;  %v9135_v56 = vld [vmem:[%s13021_s13 + $0x1c8] sm:$0xf0] }
 0xd90   : > { %v9138_v51 = vor.u32 %v9669_v43, %v9135_v56 }
 0xd91   : > { %v6708_v62 = vunpack.c.l.b16 %v6659_v38 }
 0xd93   : > { %v6711_v21 = vpack.c.b16 %v6708_v62, %v6707_v15  ;;  %v9127_v15 = vld [vmem:[%s13021_s13 + $0x1b8] sm:$0xf0] }
 0xd94   : > { %v9130_v62 = vor.u32 %v9667_v63, %v9127_v15 }
 0xd95   : > { %6803 = vmatmul.bf16.vlgmr.msrb.gmra.mxu0 %v6711_v21 }
 0xd96   : > { %v6629_v14 = vpop.f32.mrf.mxu2  ;;  %6959 = vmatpush.bf16.msrb.mxu0 %v9158_v27  ;;  %v9114_v27 = vor.u32 %v9663_v6, %v9111_v8  ;;  %v9689_v8 = vld [vmem:[%s13023_s15 + $0x60] sm:$0xff] }
 0xd97   : > { %v6660_v10 = vpack.c.bf16 %v6629_v14, %v6629_v14  ;;  %v9661_v14 = vld [vmem:[%s13021_s13 + $0x184] sm:$0xf] }
 0xd98   : > { %v9106_v35 = vor.u32 %v9661_v14, %v9103_v52 }
 0xd99   : > { %v6709_v57 = vunpack.c.l.b16 %v6660_v10 }
 0xd9a   : > { %6960 = vmatpush.bf16.msrb.mxu0 %v9150_v45 }
 0xd9e   : > { %v6631_v54 = vpop.f32.mrf.mxu2  ;;  %6961 = vmatpush.bf16.msrb.mxu0 %v9142_v24 }
 0xd9f   : > { %v6661_v31 = vpack.c.bf16 %v6631_v54, %v6631_v54 }
 0xda1   : > { %v6710_v7 = vunpack.c.l.b16 %v6661_v31  ;;  %v9285_v31 = vld [vmem:[%s13021_s13 + $0x170] sm:$0xf] }
 0xda2   : > { %6962 = vmatpush.bf16.msrb.mxu0 %v9134_v55  ;;  %v9286_v22 = vor.u32 %v9660_v13, %v9285_v31  ;;  %v7265_v31 = vld [vmem:[%s13022_s14] sm:$0x3] }
 0xda3   : > { %v6712_v2 = vpack.c.b16 %v6710_v7, %v6709_v57  ;;  %v9277_v57 = vld [vmem:[%s13021_s13 + $0x160] sm:$0xf]  ;;  %v9658_v7 = vld [vmem:[%s13021_s13 + $0x164] sm:$0xf0] }
 0xda5   : > { %6808 = vmatmul.bf16.gmra.mxu0 %v6712_v2 }
 0xda6   : > { %v6634_v26 = vpop.f32.mrf.mxu2  ;;  %6963 = vmatpush.bf16.msrb.mxu0 %v9126_v41  ;;  %v9270_v41 = vor.u32 %v9656_v58, %v9269_v4 }
 0xda7   : > { %v6662_v34 = vpack.c.bf16 %v6634_v26, %v6634_v26  ;;  %v9261_v26 = vld [vmem:[%s13021_s13 + $0x140] sm:$0xf] }
 0xda8   : > { %v9262_v60 = vor.u32 %v9654_v29, %v9261_v26  ;;  %v9683_v29 = vld [vmem:[%s13023_s15 + $0x30] sm:$0xff] }
 0xda9   : > { %v7131_v28 = vunpack.c.l.b16 %v6662_v34 }
 0xdaa   : > { %6964 = vmatpush.bf16.msrb.mxu0 %v9118_v19 }
 0xdae   : > { %v6636_v33 = vpop.f32.mrf.mxu2  ;;  %6965 = vmatpush.bf16.msrb.mxu0 %v9110_v47 }
 0xdaf   : > { %v6663_v46 = vpack.c.bf16 %v6636_v33, %v6636_v33 }
 0xdb1   : > { %v7132_v0 = vunpack.c.l.b16 %v6663_v46  ;;  %v9253_v46 = vld [vmem:[%s13021_s13 + $0x130] sm:$0xf] }
 0xdb2   : > { %6966 = vmatpush.bf16.msrb.mxu0 %v9102_v17  ;;  %v9254_v42 = vor.u32 %v9652_v36, %v9253_v46 }
 0xdb3   : > { %v12778_v32 = vpack.c.b16 %v7132_v0, %v7131_v28  ;;  %v9245_v28 = vld [vmem:[%s13021_s13 + $0x120] sm:$0xf]  ;;  %v9650_v0 = vld [vmem:[%s13021_s13 + $0x124] sm:$0xf0] }
 0xdb4   : > { %v9246_v17 = vor.u32 %v9650_v0, %v9245_v28 }
 0xdb5   : > { %6822 = vmatmul.bf16.vlgmr.msra.gmra.mxu0 %v6711_v21  ;;  %7246 = vmatmul.bf16.vlgmr.msrb.gmra.mxu2 %v12778_v32  ;;  %v9122_v21 = vor.u32 %v9665_v44, %v9119_v16 }
 0xdb6   : > { %v6639_v20 = vpop.f32.mrf.mxu2  ;;  %6978 = vmatpush.bf16.msra.mxu0 %v9162_v40  ;;  %v9238_v40 = vor.u32 %v9648_v9, %v9237_v53  ;;  %v9680_v53 = vld [vmem:[%s13023_s15 + $0x18] sm:$0xff] }
 0xdb7   : > { %v6664_v23 = vpack.c.bf16 %v6639_v20, %v6639_v20  ;;  %v9229_v20 = vld [vmem:[%s13021_s13 + $0x100] sm:$0xf] }
 0xdb8   : > { %v9230_v39 = vor.u32 %v9646_v1, %v9229_v20 }
 0xdb9   : > { %v7133_v3 = vunpack.c.l.b16 %v6664_v23 }
 0xdba   : > { %6979 = vmatpush.bf16.msra.mxu0 %v9154_v25 }
 0xdbe   : > { %v6641_v37 = vpop.f32.mrf.mxu2  ;;  %6980 = vmatpush.bf16.msra.mxu0 %v9146_v5 }
 0xdbf   : > { %v6665_v49 = vpack.c.bf16 %v6641_v37, %v6641_v37 }
 0xdc1   : > { %v7134_v38 = vunpack.c.l.b16 %v6665_v49 }
 0xdc2   : > { %6981 = vmatpush.bf16.msra.mxu0 %v9138_v51 }
 0xdc3   : > { %v12805_v50 = vpack.c.b16 %v7134_v38, %v7133_v3 }
 0xdc5   : > { %6827 = vmatmul.bf16.gmra.mxu0 %v6712_v2  ;;  %7251 = vmatmul.bf16.gmra.mxu2 %v12805_v50  ;;  %v9278_v2 = vor.u32 %v9658_v7, %v9277_v57  ;;  %v7268_v7 = vperm.slane %v7265_v31, 1 }
 0xdc6   : > { %v6644_v12 = vpop.f32.mrf.mxu2  ;;  %6982 = vmatpush.bf16.msra.mxu0 %v9130_v62 }
 0xdc7   : > { %v6666_v18 = vpack.c.bf16 %v6644_v12, %v6644_v12 }
 0xdc9   : > { %v6871_v10 = vunpack.c.l.b16 %v6666_v18 }
 0xdca   : > { %6983 = vmatpush.bf16.msra.mxu0 %v9122_v21  ;;  %v9690_v21 = vld [vmem:[%s13023_s15 + $0x68] sm:$0xff] }
 0xdce   : > { %v6646_v45 = vpop.f32.mrf.mxu2  ;;  %6984 = vmatpush.bf16.msra.mxu0 %v9114_v27  ;;  %v9688_v27 = vld [vmem:[%s13023_s15 + $0x58] sm:$0xff] }
 0xdcf   : > { %v6667_v61 = vpack.c.bf16 %v6646_v45, %v6646_v45  ;;  %v9687_v45 = vld [vmem:[%s13023_s15 + $0x50] sm:$0xff] }
 0xdd1   : > { %v6872_v24 = vunpack.c.l.b16 %v6667_v61  ;;  %v9686_v61 = vld [vmem:[%s13023_s15 + $0x48] sm:$0xff] }
 0xdd2   : > { %6985 = vmatpush.bf16.msra.mxu0 %v9106_v35 }
 0xdd3   : > { %v6875_v54 = vpack.c.b16 %v6872_v24, %v6871_v10 }
 0xdd5   : > { %6967 = vmatmul.bf16.vlgmr.msrb.gmra.mxu0 %v6875_v54 }
 0xdd6   : > { %v6649_v55 = vpop.f32.mrf.mxu2  ;;  %7219 = vmatpush.bf16.msrb.mxu0 %v9286_v22 }
 0xdd7   : > { %v6668_v11 = vpack.c.bf16 %v6649_v55, %v6649_v55  ;;  %v9684_v55 = vld [vmem:[%s13023_s15 + $0x38] sm:$0xff] }
 0xdd8   : > { %7427 = vmatpush.bf16.msrb.mxu3 %v9684_v55 }
 0xdd9   : > { %v6873_v34 = vunpack.c.l.b16 %v6668_v11 }
 0xdda   : > { %7220 = vmatpush.bf16.msrb.mxu0 %v9278_v2 }
 0xddc   : > { %7428 = vmatpush.bf16.msrb.mxu3 %v9683_v29 }
 0xdde   : > { %v6651_v19 = vpop.f32.mrf.mxu2  ;;  %7221 = vmatpush.bf16.msrb.mxu0 %v9270_v41 }
 0xddf   : > { %v6669_v30 = vpack.c.bf16 %v6651_v19, %v6651_v19 }
 0xde1   : > { %v6874_v47 = vunpack.c.l.b16 %v6669_v30 }
 0xde2   : > { %7222 = vmatpush.bf16.msrb.mxu0 %v9262_v60 }
 0xde3   : > { %v6876_v33 = vpack.c.b16 %v6874_v47, %v6873_v34  ;;  %v9682_v47 = vld [vmem:[%s13023_s15 + $0x28] sm:$0xff] }
 0xde4   : > { %7429 = vmatpush.bf16.msrb.mxu3 %v9682_v47 }
 0xde5   : > { %6972 = vmatmul.bf16.gmra.mxu0 %v6876_v33 }
 0xde6   : > { %7223 = vmatpush.bf16.msrb.mxu0 %v9254_v42  ;;  %v9681_v42 = vld [vmem:[%s13023_s15 + $0x20] sm:$0xff] }
 0xde8   : > { %7430 = vmatpush.bf16.msrb.mxu3 %v9681_v42 }
 0xdea   : > { %7224 = vmatpush.bf16.msrb.mxu0 %v9246_v17 }
 0xdec   : > { %7431 = vmatpush.bf16.msrb.mxu3 %v9680_v53 }
 0xdee   : > { %7225 = vmatpush.bf16.msrb.mxu0 %v9238_v40 }
 0xdf2   : > { %7226 = vmatpush.bf16.msrb.mxu0 %v9230_v39 }
 0xdf5   : > { %6986 = vmatmul.bf16.vlgmr.msra.gmra.mxu0 %v6875_v54  ;;  %v9685_v54 = vld [vmem:[%s13023_s15 + $0x40] sm:$0xff] }
 0xdf8   : > { %v7098_v25 = vpop.f32.mrf.mxu2  ;;  %v7117_v52 = vpop.f32.mrf.mxu3 }
 0xe00   : > { %v7100_v23 = vpop.f32.mrf.mxu2  ;;  %v7119_v10 = vpop.f32.mrf.mxu3 }
 0xe05   : > { %6991 = vmatmul.bf16.gmra.mxu0 %v6876_v33 }
 0xe08   : > { %v7103_v49 = vpop.f32.mrf.mxu2  ;;  %v7122_v11 = vpop.f32.mrf.mxu3 }
 0xe10   : > { %v7105_v38 = vpop.f32.mrf.mxu2  ;;  %v7124_v0 = vpop.f32.mrf.mxu3 }
 0xe12   : > { %v6804_v48 = vpop.f32.mrf.mxu0 }
 0xe13   : > { %v12880_v59 = vadd.f32 %v7098_v25, %v6804_v48  ;;  %v9679_v48 = vld [vmem:[%s13023_s15 + $0x10] sm:$0xff] }
 0xe14   : > { %7432 = vmatpush.bf16.msrb.mxu3 %v9679_v48 }
 0xe15   : > { %7227 = vmatmul.bf16.vlgmr.msrb.gmra.mxu0 %v12778_v32  ;;  %v9692_v32 = vld [vmem:[%s13023_s15 + $0x78] sm:$0xff] }
 0xe16   : > { %7440 = vmatpush.bf16.msra.mxu0 %v9692_v32 }
 0xe1a   : > { %v6806_v5 = vpop.f32.mrf.mxu0 }
 0xe1b   : > { %v12883_v37 = vadd.f32 %v7100_v23, %v6806_v5 }
 0xe22   : > { %v6809_v43 = vpop.f32.mrf.mxu0 }
 0xe23   : > { %v12885_v56 = vadd.f32 %v7103_v49, %v6809_v43  ;;  %v9678_v43 = vld [vmem:[%s13023_s15 + $0x8] sm:$0xff] }
 0xe24   : > { %7433 = vmatpush.bf16.msrb.mxu3 %v9678_v43 }
 0xe25   : > { %7232 = vmatmul.bf16.gmra.mxu0 %v12805_v50  ;;  %v9691_v50 = vld [vmem:[%s13023_s15 + $0x70] sm:$0xff] }
 0xe26   : > { %7441 = vmatpush.bf16.msra.mxu0 %v9691_v50  ;;  %v7267_v50 = vperm.slane %v7265_v31, 0 }
 0xe2a   : > { %v6811_v3 = vpop.f32.mrf.mxu0  ;;  %7442 = vmatpush.bf16.msra.mxu0 %v9690_v21 }
 0xe2b   : > { %v12888_v51 = vadd.f32 %v7105_v38, %v6811_v3 }
 0xe2e   : > { %7443 = vmatpush.bf16.msra.mxu0 %v9689_v8 }
 0xe32   : > { %v6823_v63 = vpop.f32.mrf.mxu0  ;;  %7444 = vmatpush.bf16.msra.mxu0 %v9688_v27 }
 0xe33   : > { %v7118_v22 = vadd.f32 %v7117_v52, %v6823_v63 }
 0xe36   : > { %7445 = vmatpush.bf16.msra.mxu0 %v9687_v45 }
 0xe38   : > { %v7247_v18 = vpop.f32.mrf.mxu2 }
 0xe3a   : > { %v6825_v15 = vpop.f32.mrf.mxu0  ;;  %7446 = vmatpush.bf16.msra.mxu0 %v9686_v61 }
 0xe3b   : > { %v7120_v4 = vadd.f32 %v7119_v10, %v6825_v15 }
 0xe3e   : > { %7447 = vmatpush.bf16.msra.mxu0 %v9685_v54 }
 0xe40   : > { %v7249_v13 = vpop.f32.mrf.mxu2 }
 0xe42   : > { %v6828_v62 = vpop.f32.mrf.mxu0 }
 0xe43   : > { %v7123_v28 = vadd.f32 %v7122_v11, %v6828_v62 }
 0xe48   : > { %v7252_v30 = vpop.f32.mrf.mxu2 }
 0xe4a   : > { %v6830_v44 = vpop.f32.mrf.mxu0 }
 0xe4b   : > { %v7125_v20 = vadd.f32 %v7124_v0, %v6830_v44  ;;  %v9677_v44 = vld [vmem:[%s13023_s15] sm:$0xff] }
 0xe4c   : > { %7434 = vmatpush.bf16.msrb.mxu3 %v9677_v44 }
 0xe50   : > { %v7254_v40 = vpop.f32.mrf.mxu2 }
 0xe52   : > { %v12890_v16 = vpop.f32.mrf.mxu0 }
 0xe5a   : > { %v12895_v12 = vpop.f32.mrf.mxu0 }
 0xe62   : > { %v12903_v6 = vpop.f32.mrf.mxu0 }
 0xe6a   : > { %v12911_v14 = vpop.f32.mrf.mxu0 }
 0xe72   : > { %v6987_v35 = vpop.f32.mrf.mxu0 }
 0xe73   : > { %v7248_v24 = vadd.f32 %v7247_v18, %v6987_v35 }
 0xe75   : > { %v7258_v57 = vadd.f32 %v7248_v24, %v7118_v22 }
 0xe77   : > { %v7272_v41 = vadd.f32 %v7268_v7, %v7258_v57 }
 0xe79   : > { %v7280_v60 = vmax.f32 %v7272_v41, 0.0 }
 0xe7a   : > { %v6989_v2 = vpop.f32.mrf.mxu0 }
 0xe7b   : > { %v7250_v58 = vadd.f32 %v7249_v13, %v6989_v2  ;;  %v9696_v2 = vld [vmem:[%s13025_s17 + $0x18] sm:$0xff] }
 0xe7c   : > { %7498 = vmatpush.bf16.msra.mxu2 %v9696_v2 }
 0xe7d   : > { %v7260_v26 = vadd.f32 %v7250_v58, %v7120_v4  ;;  %v9693_v4 = vld [vmem:[%s13025_s17] sm:$0xff] }
 0xe7e   : > { %v9755_v58 = vld [vmem:[%s13024_s16] ss:$0 sm:$0xff] }
 0xe7f   : > { %v7274_v19 = vadd.f32 %v7268_v7, %v7260_v26 }
 0xe81   : > { %v7282_v34 = vmax.f32 %v7274_v19, 0.0 }
 0xe82   : > { %v6992_v33 = vpop.f32.mrf.mxu0 }
 0xe83   : > { %v7288_v46 = vmax.f32 %v7280_v60, %v7282_v34  ;;  %v7253_v36 = vadd.f32 %v7252_v30, %v6992_v33  ;;  %v9756_v60 = vld [vmem:[%s13026_s18] ss:$0 sm:$0xff] }
 0xe85   : > { %v7262_v17 = vadd.f32 %v7253_v36, %v7123_v28 }
 0xe87   : > { %v7276_v39 = vadd.f32 %v7268_v7, %v7262_v17 }
 0xe89   : > { %v7284_v5 = vmax.f32 %v7276_v39, 0.0 }
 0xe8a   : > { %v6994_v9 = vpop.f32.mrf.mxu0 }
 0xe8b   : > { %v7255_v1 = vadd.f32 %v7254_v40, %v6994_v9 }
 0xe8d   : > { %v7264_v25 = vadd.f32 %v7255_v1, %v7125_v20 }
 0xe8f   : > { %v7278_v23 = vadd.f32 %v7268_v7, %v7264_v25 }
 0xe91   : > { %v7286_v49 = vmax.f32 %v7278_v23, 0.0 }
 0xe92   : > { %v7228_v3 = vpop.f32.mrf.mxu0 }
 0xe93   : > { %v7290_v38 = vmax.f32 %v7284_v5, %v7286_v49  ;;  %v7229_v63 = vadd.f32 %v7228_v3, %v12890_v16 }
 0xe95   : > { %v7292_v15 = vmax.f32 %v7288_v46, %v7290_v38  ;;  %v7257_v62 = vadd.f32 %v7229_v63, %v12880_v59 }
 0xe97   : > { %v7294_v32 = vpack.c.bf16 %v7292_v15, %v7292_v15  ;;  %v7271_v27 = vadd.f32 %v7267_v50, %v7257_v62 }
 0xe99   : > { %7448 = vmatmul.bf16.vlgmr.msra.gmra.mxu0 %v7294_v32  ;;  %v7279_v16 = vmax.f32 %v7271_v27, 0.0 }
 0xe9a   : > { %v7230_v21 = vpop.f32.mrf.mxu0 }
 0xe9b   : > { %v7231_v8 = vadd.f32 %v7230_v21, %v12895_v12 }
 0xe9d   : > { %v7259_v52 = vadd.f32 %v7231_v8, %v12883_v37 }
 0xe9f   : > { %v7273_v18 = vadd.f32 %v7267_v50, %v7259_v52 }
 0xea1   : > { %v7281_v45 = vmax.f32 %v7273_v18, 0.0 }
 0xea2   : > { %v7233_v61 = vpop.f32.mrf.mxu0 }
 0xea3   : > { %v7287_v35 = vmax.f32 %v7279_v16, %v7281_v45  ;;  %v7234_v59 = vadd.f32 %v7233_v61, %v12903_v6  ;;  %v9694_v6 = vld [vmem:[%s13025_s17 + $0x8] sm:$0xff] }
 0xea5   : > { %v7261_v10 = vadd.f32 %v7234_v59, %v12885_v56  ;;  %v9695_v56 = vld [vmem:[%s13025_s17 + $0x10] sm:$0xff] }
 0xea6   : > { %7499 = vmatpush.bf16.msra.mxu2 %v9695_v56 }
 0xea7   : > { %v7275_v31 = vadd.f32 %v7267_v50, %v7261_v10 }
 0xea9   : > { %v7283_v12 = vmax.f32 %v7275_v31, 0.0 }
 0xeaa   : > { %v7235_v24 = vpop.f32.mrf.mxu0  ;;  %7500 = vmatpush.bf16.msra.mxu2 %v9694_v6 }
 0xeab   : > { %v7236_v54 = vadd.f32 %v7235_v24, %v12911_v14 }
 0xead   : > { %v7263_v13 = vadd.f32 %v7236_v54, %v12888_v51 }
 0xeae   : > { %7501 = vmatpush.bf16.msra.mxu2 %v9693_v4 }
 0xeaf   : > { %v7277_v22 = vadd.f32 %v7267_v50, %v7263_v13 }
 0xeb1   : > { %v7285_v57 = vmax.f32 %v7277_v22, 0.0 }
 0xeb3   : > { %v7289_v7 = vmax.f32 %v7283_v12, %v7285_v57 }
 0xeb5   : > { %v7291_v37 = vmax.f32 %v7287_v35, %v7289_v7 }
 0xeb7   : > { %v7293_v55 = vpack.c.bf16 %v7291_v37, %v7291_v37 }
 0xeb9   : > { %7435 = vmatmul.bf16.vlgmr.msrb.gmra.mxu3 %v7293_v55 }
 0xf16   : > { %v7449_v51 = vpop.f32.mrf.mxu0 }
 0xf1e   : > { %v7451_v14 = vpop.f32.mrf.mxu0 }
 0xf3c   : > { %v7436_v41 = vpop.f32.mrf.mxu3 }
 0xf3d   : > { %v7437_v26 = vadd.f32 %v9755_v58, %v7436_v41 }
 0xf3f   : > { %v7450_v29 = vadd.f32 %v7449_v51, %v7437_v26 }
 0xf41   : > { %v7453_v11 = vmax.f32 %v7450_v29, 0.0 }
 0xf43   : > { %v7454_v19 = vpack.c.bf16 %v7453_v11, %v7453_v11 }
 0xf44   : > { %v7438_v30 = vpop.f32.mrf.mxu3 }
 0xf45   : > { %9371 = vmatmul.msk.bf16.vlgmr.msra.gmra.mxu2 %vm5927_vm4, %v7454_v19 }
 0xfc8   : > { %v7503_v34 = vpop.f32.mrf.mxu2 }
 0xfc9   : > { %v7504_v47 = vadd.f32 %v9756_v60, %v7503_v34 }
 0xfcb   : > { %7507 = vst [vmem:[%s594_s22] sm:$0x1] %v7504_v47 }
 0xfcc   : > { %9784 = shalt.err (!%p9781_p3)
}
 0xfcd   : > { %9711 = dma.vmem_to_hbm [thread:$0]  (%p9960_p5), %s7520_s4, 16, %s7522_s23, %s7509_s24  }
 0xfd0   : > { %v7505_v33 = vpop.f32.mrf.mxu2 }
 0xfd1 PF: > { %p9717_p4 = scmp.ge.s32.totalorder %s9819_s21, 2  ;;  %s7533_s5 = sand.u32 1, %s9807_s0  }
 0xfd2   : > { %s7534_s27 = scalar_lea.sflag [#allocation3], %s7533_s5 }
 0xfd3   : > { %p9714_p7 = pnand %p9717_p4, %p9964_p6 }
 0xfd5   : > { %p9715_p8 = pneg %p9714_p7 }
 0xfd7   : > { %9802 = dma.done.wait (%p9715_p8), %s7534_s27, 16  }
 0xfd8   : > { %9804 = vsyncadd (%p9715_p8), %s7534_s27, 4294967280  ;;  %s13598_s21 = sld [smem:[#allocation6_spill]]  ;;  %s13601_s0 = smov %s9811_s30 }
 0xfd9   : > { %s13599_s6 = sld [smem:[#allocation5_spill]] }
 0xfda   : > { %s13600_s20 = sld [smem:[#allocation7_spill]] }
 0xfde   : > { %p29_p9 = scmp.ge.s32.totalorder %s13598_s21, 4  }
 0xfdf   : > { %s13602_s30 = smov %s13599_s6 }
 0xfe0   :  { %31 = sbr.rel (!%p29_p9) target bundleno = 12 (0xc), region = 165 }
 0xfe5   :  { %7539 = vsyncpa [#allocation3], 1 }
 0xfe6   :  { %7541 = vsyncpa [#allocation3 + $0x1], 1 }

</bundles_post_ra>
